<compile_context>
chip_gen: v6e
topology: v6e:2x2x1
jax: 0.10.0
libtpu: 0.0.40
codegen_flags: <defaults>
</compile_context>

<pallas_src>
import jax
import jax.numpy as jnp
from jax import lax
from jax.experimental import pallas as pl
from jax.experimental.pallas import tpu as pltpu

# ---- problem sizes (small, consistent with the module's forward) -----------
B = 2           # batch
H = W = 16      # square images (module asserts H == W)
CHAN_IN = 3     # rgb channels / point coordinate dim
CIN_PAD = 8     # channel dim padded for aligned MXU contraction
FEAT = 32       # cfg.feat_dim
FEAT_PAD = 128  # lane-dense padded feature dim (zero padding)
N = 64          # padded points per cloud
NUM_CORRES = 16
HW = H * W


# =============================================================================
# Fused kernel: (per batch element) encoders + projection/grid_sample +
#               similarity + mlp_project
#   TODO(synk): ResNetEncoder / MinkUNet34C (and voxelization / Rt augmentation)
#               are external modules; replaced by per-element linear stubs.
# =============================================================================
def byoc_fused_kernel(rgb_ref, pts_ref, kt_ref,
                      img_w_ref, img_b_ref, pt_w_ref, pt_b_ref,
                      w1_ref, b1_ref, gam_ref, beta_ref, w2_ref, b2_ref,
                      vis_ref, geo_ref, proj_ref, sim_ref,
                      imf_s):
    f32 = jnp.float32
    bf16 = jnp.bfloat16

    # ---------------------------------------------------------------- stage A
    # Image encoder, hoisted across BOTH frames of this batch: one MXU matmul
    # (2*HW, 8) @ (8, 128), normalize, park as bf16 in VMEM scratch.
    imf = jnp.dot(rgb_ref[...].astype(bf16), img_w_ref[...],
                  preferred_element_type=f32) + img_b_ref[...]
    imf = imf * lax.rsqrt(jnp.maximum(jnp.sum(imf * imf, -1, keepdims=True), 1e-24))
    imf_s[...] = imf.astype(bf16)          # nothing large stays live past here

    # ---------------------------------------------------------------- stage B
    # Geometric encoder: per-point linear (3->F) + L2 normalize, both frames.
    pts = pts_ref[...]                                            # (2N, 8) f32
    g = jnp.dot(pts.astype(bf16), pt_w_ref[...],
                preferred_element_type=f32) + pt_b_ref[...]       # (2N, 128)
    g = g * lax.rsqrt(jnp.maximum(jnp.sum(g * g, -1, keepdims=True), 1e-24))
    geo_ref[...] = g

    gb = g.astype(bf16)
    # geo cosine similarity (features already unit-norm) -> lane half [N:2N].
    geo_sim = lax.dot_general(gb[:N, :], gb[N:, :], (((1,), (1,)), ((), ())),
                              preferred_element_type=f32)         # (N, N)
    sim_ref[:, N:] = geo_sim               # direct column store, no concatenate

    # mlp_project: Linear -> LayerNorm -> ReLU -> Linear (masked two-pass LN;
    # padded lanes excluded explicitly so statistics are exact over FEAT lanes).
    lane = lax.broadcasted_iota(jnp.int32, (2 * N, FEAT_PAD), 1)
    fmask = lane < FEAT
    h = jnp.dot(gb, w1_ref[...], preferred_element_type=f32) + b1_ref[...]
    hm = jnp.where(fmask, h, 0.0)
    mu = jnp.sum(hm, -1, keepdims=True) * (1.0 / FEAT)
    hc = jnp.where(fmask, h - mu, 0.0)
    var = jnp.sum(hc * hc, -1, keepdims=True) * (1.0 / FEAT)
    hn = hc * lax.rsqrt(var + 1e-5)                               # LN eps = 1e-5
    hn = hn * gam_ref[...] + beta_ref[...]    # zero-padded gamma/beta keep pads 0
    hn = jnp.maximum(hn, 0.0)                                     # ReLU
    proj_ref[...] = jnp.dot(hn.astype(bf16), w2_ref[...],
                            preferred_element_type=f32) + b2_ref[...]

    # ---------------------------------------------------------------- stage C
    # Pinhole projection + bilinear weights, batched over both frames (they
    # share the per-batch K).  All columns are (2N, 1) — tiny.
    kt = kt_ref[0]                                                # (8, 8) f32
    uvd = jnp.dot(pts, kt, preferred_element_type=f32)            # (2N, 8) f32
    d = jnp.maximum(uvd[:, 2:3], 1e-9)                            # clamp(min=1e-9)
    un = 2.0 * (uvd[:, 0:1] / d) / H - 1.0
    vn = 2.0 * (uvd[:, 1:2] / d) / H - 1.0   # module divides by H for both (H == W)
    # grid_sample align_corners=False: pixel coord = (g + 1) * S/2 - 0.5
    ix = (un + 1.0) * (W * 0.5) - 0.5
    iy = (vn + 1.0) * (H * 0.5) - 0.5
    # clip keeps int math bounded; exact — every clipped corner is invalid anyway
    ix = jnp.clip(ix, -2.0, W + 1.0)
    iy = jnp.clip(iy, -2.0, H + 1.0)
    x0f = jnp.floor(ix)
    y0f = jnp.floor(iy)
    fx = ix - x0f
    fy = iy - y0f
    wx0 = 1.0 - fx
    wy0 = 1.0 - fy
    vx0 = (x0f >= 0.0) & (x0f <= W - 1.0)
    vx1 = (x0f >= -1.0) & (x0f <= W - 2.0)      # x1 = x0 + 1 in [0, W-1]
    vy0 = (y0f >= 0.0) & (y0f <= H - 1.0)
    vy1 = (y0f >= -1.0) & (y0f <= H - 2.0)
    w00 = jnp.where(vx0 & vy0, wx0 * wy0, 0.0)  # zero-padding mode of grid_sample
    w10 = jnp.where(vx1 & vy0, fx * wy0, 0.0)
    w01 = jnp.where(vx0 & vy1, wx0 * fy, 0.0)
    w11 = jnp.where(vx1 & vy1, fx * fy, 0.0)
    x0i = x0f.astype(jnp.int32)
    y0i = y0f.astype(jnp.int32)
    idx_lin = y0i * W + x0i
    # wrap base index mod HW (range is small; two selects instead of a remainder)
    idx_lin = jnp.where(idx_lin < 0, idx_lin + HW, idx_lin)
    idxw = jnp.where(idx_lin >= HW, idx_lin - HW, idx_lin)        # (2N, 1) int32

    # ---------------------------------------------------------------- stage D
    # Bilinear grid_sample as a sparse (N, HW) matrix times the image features.
    cols = lax.broadcasted_iota(jnp.int32, (N, HW), 1)
    v_frames = []
    for p in range(2):                                            # frame loop
        r0 = p * N
        idx_p = idxw[r0:r0 + N, :]
        # base one-hot (x0, y0): single compare + select on the (N, HW) tile.
        base = jnp.where(cols == idx_p, jnp.float32(1.0), jnp.float32(0.0))
        # remaining corners derived on the XLU via lane rolls (+1, +W, +W+1);
        # wrap-around columns carry zero weight (invalid corners masked above).
        wmat = base * w00[r0:r0 + N, :]
        wmat = wmat + pltpu.roll(base, shift=1, axis=1) * w10[r0:r0 + N, :]
        wmat = wmat + pltpu.roll(base, shift=W, axis=1) * w01[r0:r0 + N, :]
        wmat = wmat + pltpu.roll(base, shift=W + 1, axis=1) * w11[r0:r0 + N, :]

        pf = jnp.dot(wmat.astype(bf16), imf_s[p * HW:(p + 1) * HW, :],
                     preferred_element_type=f32)                  # (N, 128)
        vis_ref[r0:r0 + N, :] = pf
        vnrm = pf * lax.rsqrt(jnp.maximum(jnp.sum(pf * pf, -1, keepdims=True),
                                          1e-24))
        v_frames.append(vnrm.astype(bf16))

    vis_sim = lax.dot_general(v_frames[0], v_frames[1], (((1,), (1,)), ((), ())),
                              preferred_element_type=f32)         # (N, N)
    sim_ref[:, :N] = vis_sim


def byoc_fused(rgb_flat, pts_flat, kt, pp):
    out_shapes = (
        jax.ShapeDtypeStruct((B * 2 * N, FEAT_PAD), jnp.float32),   # vis features
        jax.ShapeDtypeStruct((B * 2 * N, FEAT_PAD), jnp.float32),   # geo features
        jax.ShapeDtypeStruct((B * 2 * N, FEAT_PAD), jnp.float32),   # mlp-projected geo
        jax.ShapeDtypeStruct((B * N, 2 * N), jnp.float32),          # [vis_sim | geo_sim]
    )
    full = lambda shape: pl.BlockSpec(shape, lambda i: tuple(0 for _ in shape))
    return pl.pallas_call(
        byoc_fused_kernel,
        out_shape=out_shapes,
        grid=(B,),
        in_specs=[
            pl.BlockSpec((2 * HW, CIN_PAD), lambda i: (i, 0)),          # rgb (per batch)
            pl.BlockSpec((2 * N, CIN_PAD), lambda i: (i, 0)),           # pts (per batch)
            pl.BlockSpec((1, CIN_PAD, CIN_PAD), lambda i: (i, 0, 0)),   # K^T (per batch)
            full((CIN_PAD, FEAT_PAD)),                                  # img_w (bf16)
            full((1, FEAT_PAD)),                                        # img_b
            full((CIN_PAD, FEAT_PAD)),                                  # pt_w (bf16)
            full((1, FEAT_PAD)),                                        # pt_b
            full((FEAT_PAD, FEAT_PAD)),                                 # mlp_w1 (bf16)
            full((1, FEAT_PAD)),                                        # mlp_b1
            full((1, FEAT_PAD)),                                        # gamma
            full((1, FEAT_PAD)),                                        # beta
            full((FEAT_PAD, FEAT_PAD)),                                 # mlp_w2 (bf16)
            full((1, FEAT_PAD)),                                        # mlp_b2
        ],
        out_specs=(
            pl.BlockSpec((2 * N, FEAT_PAD), lambda i: (i, 0)),
            pl.BlockSpec((2 * N, FEAT_PAD), lambda i: (i, 0)),
            pl.BlockSpec((2 * N, FEAT_PAD), lambda i: (i, 0)),
            pl.BlockSpec((N, 2 * N), lambda i: (i, 0)),
        ),
        scratch_shapes=[pltpu.VMEM((2 * HW, FEAT_PAD), jnp.bfloat16)],  # imf scratch
        compiler_params=pltpu.CompilerParams(
            dimension_semantics=("parallel",)),     # uses both TCs on v7x
    )(rgb_flat, pts_flat, kt,
      pp["img_w"], pp["img_b"], pp["pt_w"], pp["pt_b"],
      pp["mlp_w1"], pp["mlp_b1"], pp["mlp_g"], pp["mlp_beta"],
      pp["mlp_w2"], pp["mlp_b2"])


# =============================================================================
# Plain-JAX glue (small, not the hot path)
# =============================================================================
def pad_params(p):
    bf16 = jnp.bfloat16

    def pw(w):   # (CHAN_IN, FEAT) -> (CIN_PAD, FEAT_PAD), bf16 MXU operand
        return jnp.pad(w, ((0, CIN_PAD - w.shape[0]),
                           (0, FEAT_PAD - w.shape[1]))).astype(bf16)

    def pm(w):   # (FEAT, FEAT) -> (FEAT_PAD, FEAT_PAD), bf16 MXU operand
        return jnp.pad(w, ((0, FEAT_PAD - w.shape[0]),
                           (0, FEAT_PAD - w.shape[1]))).astype(bf16)

    def pv(v):   # (1, FEAT) -> (1, FEAT_PAD), f32 (VPU side)
        return jnp.pad(v, ((0, 0), (0, FEAT_PAD - v.shape[1])))

    return {"img_w": pw(p["img_w"]), "img_b": pv(p["img_b"]),
            "pt_w": pw(p["pt_w"]), "pt_b": pv(p["pt_b"]),
            "mlp_w1": pm(p["mlp_w1"]), "mlp_b1": pv(p["mlp_b1"]),
            "mlp_g": pv(p["mlp_g"]), "mlp_beta": pv(p["mlp_beta"]),
            "mlp_w2": pm(p["mlp_w2"]), "mlp_b2": pv(p["mlp_b2"])}


def nn_gather(x, idx):
    # x: (B, N, C), idx: (B, K) -> (B, K, C)
    return jax.vmap(lambda p, i: p[i])(x, idx)


def corres_from_sim(sim, num_corres):
    # TODO(synk): exact external get_correspondences (ratio-test weighting) is
    #             not in-source; NN cosine similarity + top-k by score.
    nn_sim = jnp.max(sim, axis=-1)                  # (B, N)
    nn_idx = jnp.argmax(sim, axis=-1)               # (B, N)
    w, idx0 = jax.lax.top_k(nn_sim, num_corres)     # (B, K)
    idx1 = jnp.take_along_axis(nn_idx, idx0, axis=-1)
    return idx0, idx1, w


def align(corr, xyz0, xyz1, weighted=True):
    # TODO(synk): external `align` (weighted Procrustes + loss cfg) is not
    #             in-source; standard weighted Kabsch implemented here.
    idx0, idx1, w = corr
    p0 = nn_gather(xyz0, idx0)
    p1 = nn_gather(xyz1, idx1)
    ww = w if weighted else jnp.ones_like(w)
    ww = jnp.maximum(ww, 0.0) + 1e-6
    wn = ww / jnp.sum(ww, axis=-1, keepdims=True)
    c0 = jnp.sum(wn[..., None] * p0, axis=1)
    c1 = jnp.sum(wn[..., None] * p1, axis=1)
    q0 = p0 - c0[:, None]
    q1 = p1 - c1[:, None]
    cov = jnp.einsum("bni,bn,bnj->bij", q0, wn, q1)
    U, _, Vt = jnp.linalg.svd(cov)
    V = jnp.swapaxes(Vt, -1, -2)
    det = jnp.linalg.det(jnp.einsum("bij,bkj->bik", V, U))
    D = jnp.stack([jnp.ones_like(det), jnp.ones_like(det), det], axis=-1)
    R = jnp.einsum("bij,bj,bkj->bik", V, D, U)
    t = c1 - jnp.einsum("bij,bj->bi", R, c0)
    p0_t = jnp.einsum("bij,bnj->bni", R, p0) + t[:, None]
    residual = jnp.linalg.norm(p0_t - p1, axis=-1)
    loss = jnp.mean(jnp.sum(wn * residual, axis=-1))
    Rt = jnp.concatenate([R, t[..., None]], axis=-1)        # (B, 3, 4)
    return Rt, loss, residual


def feat_std(f):
    # matches [pc.std(dim=0).mean() for pc in features_list()] (unbiased std)
    return jnp.mean(jnp.std(f, axis=1, ddof=1), axis=-1)    # (B,)


def transfer_correspondances(vis_corr, proj0, proj1, vis_residual):
    # TODO(synk): external transfer_correspondances loss definition is not
    #             in-source; mlp_project done in the fused Pallas kernel,
    #             simplified consistency loss here.
    idx0, idx1, _ = vis_corr
    g0 = nn_gather(proj0, idx0)
    g1 = nn_gather(proj1, idx1)
    g0 = g0 / jnp.maximum(jnp.linalg.norm(g0, axis=-1, keepdims=True), 1e-12)
    g1 = g1 / jnp.maximum(jnp.linalg.norm(g1, axis=-1, keepdims=True), 1e-12)
    v2g_weight = jax.nn.sigmoid(jnp.sum(g0 * g1, axis=-1))  # (B, K)
    target = jnp.exp(-vis_residual)
    v2g_loss = jnp.mean((v2g_weight - target) ** 2)
    return v2g_loss, v2g_weight


# =============================================================================
# BYOC forward
# =============================================================================
@jax.jit
def byoc_forward(rgbs, pcs, K, params):
    # ---- pack inputs batch-major for the per-batch grid ----
    # images: 2 x (B,C,H,W) -> (B, 2, H, W, C) -> (B*2*HW, 3), pad channel to 8
    rgb_flat = jnp.stack(rgbs, 0).transpose(1, 0, 3, 4, 2).reshape(
        B * 2 * HW, CHAN_IN)
    rgb_flat = jnp.pad(rgb_flat, ((0, 0), (0, CIN_PAD - CHAN_IN)))
    # point clouds: 2 x (B,N,3) -> (B, 2, N, 3) -> (B*2*N, 3), pad channel to 8
    pts_flat = jnp.stack(pcs, 0).transpose(1, 0, 2, 3).reshape(B * 2 * N, CHAN_IN)
    pts_flat = jnp.pad(pts_flat, ((0, 0), (0, CIN_PAD - CHAN_IN)))
    # per-batch K^T, zero-padded to (B, 8, 8) (shared by both frames of a batch)
    Kt = jnp.pad(jnp.transpose(K, (0, 2, 1)),
                 ((0, 0), (0, CIN_PAD - 3), (0, CIN_PAD - 3)))

    pp = pad_params(params)
    vis_out, geo_out, proj_out, sim_out = byoc_fused(rgb_flat, pts_flat, Kt, pp)

    # unpack lane-padded kernel outputs (cheap XLA slices/reshapes)
    vis_f = vis_out[:, :FEAT].reshape(B, 2, N, FEAT)
    geo_f = geo_out[:, :FEAT].reshape(B, 2, N, FEAT)
    proj_f = proj_out[:, :FEAT].reshape(B, 2, N, FEAT)
    sim = sim_out.reshape(B, N, 2 * N)
    vis_sim = sim[:, :, :N]
    geo_sim = sim[:, :, N:]

    vis_f0, vis_f1 = vis_f[:, 0], vis_f[:, 1]
    geo_f0, geo_f1 = geo_f[:, 0], geo_f[:, 1]
    proj_f0, proj_f1 = proj_f[:, 0], proj_f[:, 1]
    xyz_0, xyz_1 = pcs[0], pcs[1]

    output = {}
    # ---- visual registration
    vis_corr = corres_from_sim(vis_sim, NUM_CORRES)
    Rt_vis, vis_loss, vis_residual = align(vis_corr, xyz_0, xyz_1, weighted=True)
    vis_corr_output = [nn_gather(xyz_0, vis_corr[0]),
                       nn_gather(xyz_1, vis_corr[1]), vis_corr[2]]
    output["vis_corr_loss"] = vis_loss
    output["vis_corr"] = vis_corr_output
    output["Rt_vis"] = Rt_vis
    output["vis_pc_0"] = vis_f0
    output["vis_pc_1"] = vis_f1
    output["feat_std_vis"] = feat_std(vis_f0)

    # ---- geometric registration (overwrite_weighting='none' -> unweighted)
    geo_corr = corres_from_sim(geo_sim, NUM_CORRES)
    Rt_geo, geo_loss, _ = align(geo_corr, xyz_0, xyz_1, weighted=False)
    geo_corr_output = [nn_gather(xyz_0, geo_corr[0]),
                       nn_gather(xyz_1, geo_corr[1]), geo_corr[2]]
    output["geo_corr_loss"] = geo_loss
    output["geo_corr"] = geo_corr_output
    output["Rt_geo"] = Rt_geo
    output["geo_pc_0"] = geo_f0
    output["geo_pc_1"] = geo_f1
    output["feat_std_geo"] = feat_std(geo_f0)

    # ---- visual -> geometric transfer
    v2g_loss, v2g_weight = transfer_correspondances(
        vis_corr, proj_f0, proj_f1, vis_residual)
    output["v2g_corr_loss"] = v2g_loss
    output["v2g_corr"] = [vis_corr_output[0], vis_corr_output[1], v2g_weight]
    output["Rt_v2g"] = Rt_vis
    return output


# =============================================================================
# Deterministic parameter init
# =============================================================================
def init_params(key):
    ks = jax.random.split(key, 6)

    def nrm(k, shape, scale):
        return (scale * jax.random.normal(k, shape)).astype(jnp.float32)

    return {
        "img_w": nrm(ks[0], (CHAN_IN, FEAT), 0.5),
        "img_b": nrm(ks[1], (1, FEAT), 0.1),
        "pt_w": nrm(ks[2], (CHAN_IN, FEAT), 0.5),
        "pt_b": nrm(ks[3], (1, FEAT), 0.1),
        "mlp_w1": nrm(ks[4], (FEAT, FEAT), 1.0 / FEAT ** 0.5),
        "mlp_b1": jnp.zeros((1, FEAT), jnp.float32),
        "mlp_g": jnp.ones((1, FEAT), jnp.float32),
        "mlp_beta": jnp.zeros((1, FEAT), jnp.float32),
        "mlp_w2": nrm(ks[5], (FEAT, FEAT), 1.0 / FEAT ** 0.5),
        "mlp_b2": jnp.zeros((1, FEAT), jnp.float32),
    }


if __name__ == "__main__":
    root = jax.random.PRNGKey(0)
    kp, k_rgb0, k_rgb1, k_pc0, k_pc1 = jax.random.split(root, 5)
    params = init_params(kp)

    rgbs = [jax.random.uniform(k_rgb0, (B, CHAN_IN, H, W), jnp.float32),
            jax.random.uniform(k_rgb1, (B, CHAN_IN, H, W), jnp.float32)]

    def make_pc(k):
        k1, k2 = jax.random.split(k)
        xy = jax.random.uniform(k1, (B, N, 2), minval=-0.6, maxval=0.6)
        z = jax.random.uniform(k2, (B, N, 1), minval=1.0, maxval=2.0)
        return jnp.concatenate([xy * z, z], axis=-1).astype(jnp.float32)

    pcs = [make_pc(k_pc0), make_pc(k_pc1)]

    K_intr = jnp.broadcast_to(
        jnp.array([[H / 2.0, 0.0, H / 2.0],
                   [0.0, H / 2.0, H / 2.0],
                   [0.0, 0.0, 1.0]], jnp.float32), (B, 3, 3))

    out = byoc_forward(rgbs, pcs, K_intr, params)
    out = jax.block_until_ready(out)
    print("KERNEL_OK")
</pallas_src>

<mosaic_0001>
module attributes {stable_mosaic.version = 11 : i64} {
  func.func @byoc_fused_kernel(%arg0: i32, %arg1: memref<512x8xf32, #tpu.memory_space<vmem>>, %arg2: memref<128x8xf32, #tpu.memory_space<vmem>>, %arg3: memref<1x8x8xf32, #tpu.memory_space<vmem>>, %arg4: memref<8x128xbf16, #tpu.memory_space<vmem>>, %arg5: memref<1x128xf32, #tpu.memory_space<vmem>>, %arg6: memref<8x128xbf16, #tpu.memory_space<vmem>>, %arg7: memref<1x128xf32, #tpu.memory_space<vmem>>, %arg8: memref<128x128xbf16, #tpu.memory_space<vmem>>, %arg9: memref<1x128xf32, #tpu.memory_space<vmem>>, %arg10: memref<1x128xf32, #tpu.memory_space<vmem>>, %arg11: memref<1x128xf32, #tpu.memory_space<vmem>>, %arg12: memref<128x128xbf16, #tpu.memory_space<vmem>>, %arg13: memref<1x128xf32, #tpu.memory_space<vmem>>, %arg14: memref<128x128xf32, #tpu.memory_space<vmem>>, %arg15: memref<128x128xf32, #tpu.memory_space<vmem>>, %arg16: memref<128x128xf32, #tpu.memory_space<vmem>>, %arg17: memref<64x128xf32, #tpu.memory_space<vmem>>, %arg18: memref<512x128xbf16, #tpu.memory_space<vmem>>) attributes {dimension_semantics = [#tpu.dimension_semantics<parallel>], iteration_bounds = array<i64: 2>, scalar_prefetch = 0 : i64, scratch_operands = 1 : i64, tpu.core_type = #tpu.core_type<tc>, window_params = [{transform_indices = @transform_0, window_bounds = array<i64: 512, 8>}, {transform_indices = @transform_1, window_bounds = array<i64: 128, 8>}, {transform_indices = @transform_2, window_bounds = array<i64: 1, 8, 8>}, {pipeline_mode = #tpu.pipeline_mode<synchronous>, transform_indices = @transform_3, window_bounds = array<i64: 8, 128>}, {pipeline_mode = #tpu.pipeline_mode<synchronous>, transform_indices = @transform_4, window_bounds = array<i64: 1, 128>}, {pipeline_mode = #tpu.pipeline_mode<synchronous>, transform_indices = @transform_5, window_bounds = array<i64: 8, 128>}, {pipeline_mode = #tpu.pipeline_mode<synchronous>, transform_indices = @transform_6, window_bounds = array<i64: 1, 128>}, {pipeline_mode = #tpu.pipeline_mode<synchronous>, transform_indices = @transform_7, window_bounds = array<i64: 128, 128>}, {pipeline_mode = #tpu.pipeline_mode<synchronous>, transform_indices = @transform_8, window_bounds = array<i64: 1, 128>}, {pipeline_mode = #tpu.pipeline_mode<synchronous>, transform_indices = @transform_9, window_bounds = array<i64: 1, 128>}, {pipeline_mode = #tpu.pipeline_mode<synchronous>, transform_indices = @transform_10, window_bounds = array<i64: 1, 128>}, {pipeline_mode = #tpu.pipeline_mode<synchronous>, transform_indices = @transform_11, window_bounds = array<i64: 128, 128>}, {pipeline_mode = #tpu.pipeline_mode<synchronous>, transform_indices = @transform_12, window_bounds = array<i64: 1, 128>}, {transform_indices = @transform_13, window_bounds = array<i64: 128, 128>}, {transform_indices = @transform_14, window_bounds = array<i64: 128, 128>}, {transform_indices = @transform_15, window_bounds = array<i64: 128, 128>}, {transform_indices = @transform_16, window_bounds = array<i64: 64, 128>}]} {
    %c0 = arith.constant 0 : index
    %c0_0 = arith.constant 0 : index
    %0 = vector.load %arg1[%c0, %c0_0] : memref<512x8xf32, #tpu.memory_space<vmem>>, vector<512x8xf32>
    %1 = arith.truncf %0 : vector<512x8xf32> to vector<512x8xbf16>
    %c0_1 = arith.constant 0 : index
    %c0_2 = arith.constant 0 : index
    %2 = vector.load %arg4[%c0_1, %c0_2] : memref<8x128xbf16, #tpu.memory_space<vmem>>, vector<8x128xbf16>
    %cst = arith.constant dense<0.000000e+00> : vector<512x128xf32>
    %3 = tpu.matmul %1, %2, %cst {dimension_numbers = #tpu.dot_dimension_numbers<[1], [0], [0], [1], [0, 0, 1, 1], [], []>} : vector<512x8xbf16>, vector<8x128xbf16>, vector<512x128xf32> -> vector<512x128xf32>
    %c0_3 = arith.constant 0 : index
    %c0_4 = arith.constant 0 : index
    %4 = vector.load %arg5[%c0_3, %c0_4] : memref<1x128xf32, #tpu.memory_space<vmem>>, vector<1x128xf32>
    %5 = vector.broadcast %4 : vector<1x128xf32> to vector<512x128xf32>
    %6 = arith.addf %3, %5 : vector<512x128xf32>
    %7 = arith.mulf %6, %6 : vector<512x128xf32>
    %cst_5 = arith.constant dense<0.000000e+00> : vector<512xf32>
    %8 = vector.multi_reduction <add>, %7, %cst_5 [1] : vector<512x128xf32> to vector<512xf32>
    %9 = vector.shape_cast %8 : vector<512xf32> to vector<512x1xf32>
    %cst_6 = arith.constant 1.000000e-24 : f32
    %10 = vector.broadcast %cst_6 : f32 to vector<512x1xf32>
    %11 = arith.maximumf %9, %10 : vector<512x1xf32>
    %12 = math.rsqrt %11 : vector<512x1xf32>
    %13 = vector.broadcast %12 : vector<512x1xf32> to vector<512x128xf32>
    %14 = arith.mulf %6, %13 : vector<512x128xf32>
    %15 = arith.truncf %14 : vector<512x128xf32> to vector<512x128xbf16>
    %c0_7 = arith.constant 0 : index
    %c0_8 = arith.constant 0 : index
    %16 = vector.load %arg18[%c0_7, %c0_8] : memref<512x128xbf16, #tpu.memory_space<vmem>>, vector<512x128xbf16>
    tpu.vector_store %arg18[%c0_7, %c0_8], %15 {strides = array<i32>} : memref<512x128xbf16, #tpu.memory_space<vmem>>, vector<512x128xbf16>,
    %c0_9 = arith.constant 0 : index
    %c0_10 = arith.constant 0 : index
    %17 = vector.load %arg2[%c0_9, %c0_10] : memref<128x8xf32, #tpu.memory_space<vmem>>, vector<128x8xf32>
    %18 = arith.truncf %17 : vector<128x8xf32> to vector<128x8xbf16>
    %c0_11 = arith.constant 0 : index
    %c0_12 = arith.constant 0 : index
    %19 = vector.load %arg6[%c0_11, %c0_12] : memref<8x128xbf16, #tpu.memory_space<vmem>>, vector<8x128xbf16>
    %cst_13 = arith.constant dense<0.000000e+00> : vector<128x128xf32>
    %20 = tpu.matmul %18, %19, %cst_13 {dimension_numbers = #tpu.dot_dimension_numbers<[1], [0], [0], [1], [0, 0, 1, 1], [], []>} : vector<128x8xbf16>, vector<8x128xbf16>, vector<128x128xf32> -> vector<128x128xf32>
    %c0_14 = arith.constant 0 : index
    %c0_15 = arith.constant 0 : index
    %21 = vector.load %arg7[%c0_14, %c0_15] : memref<1x128xf32, #tpu.memory_space<vmem>>, vector<1x128xf32>
    %22 = vector.broadcast %21 : vector<1x128xf32> to vector<128x128xf32>
    %23 = arith.addf %20, %22 : vector<128x128xf32>
    %24 = arith.mulf %23, %23 : vector<128x128xf32>
    %cst_16 = arith.constant dense<0.000000e+00> : vector<128xf32>
    %25 = vector.multi_reduction <add>, %24, %cst_16 [1] : vector<128x128xf32> to vector<128xf32>
    %26 = vector.shape_cast %25 : vector<128xf32> to vector<128x1xf32>
    %cst_17 = arith.constant 1.000000e-24 : f32
    %27 = vector.broadcast %cst_17 : f32 to vector<128x1xf32>
    %28 = arith.maximumf %26, %27 : vector<128x1xf32>
    %29 = math.rsqrt %28 : vector<128x1xf32>
    %30 = vector.broadcast %29 : vector<128x1xf32> to vector<128x128xf32>
    %31 = arith.mulf %23, %30 : vector<128x128xf32>
    %c0_18 = arith.constant 0 : index
    %c0_19 = arith.constant 0 : index
    %32 = vector.load %arg15[%c0_18, %c0_19] : memref<128x128xf32, #tpu.memory_space<vmem>>, vector<128x128xf32>
    tpu.vector_store %arg15[%c0_18, %c0_19], %31 {strides = array<i32>} : memref<128x128xf32, #tpu.memory_space<vmem>>, vector<128x128xf32>,
    %33 = arith.truncf %31 : vector<128x128xf32> to vector<128x128xbf16>
    %34 = vector.extract_strided_slice %33 {offsets = [0, 0], sizes = [64, 128], strides = [1, 1]} : vector<128x128xbf16> to vector<64x128xbf16>
    %35 = vector.extract_strided_slice %33 {offsets = [64, 0], sizes = [64, 128], strides = [1, 1]} : vector<128x128xbf16> to vector<64x128xbf16>
    %cst_20 = arith.constant dense<0.000000e+00> : vector<64x64xf32>
    %36 = tpu.matmul %34, %35, %cst_20 {dimension_numbers = #tpu.dot_dimension_numbers<[1], [1], [0], [0], [0, 0, 1, 0], [], []>} : vector<64x128xbf16>, vector<64x128xbf16>, vector<64x64xf32> -> vector<64x64xf32>
    %c0_21 = arith.constant 0 : index
    %c64 = arith.constant 64 : index
    %37 = vector.load %arg17[%c0_21, %c64] : memref<64x128xf32, #tpu.memory_space<vmem>>, vector<64x64xf32>
    tpu.vector_store %arg17[%c0_21, %c64], %36 {strides = array<i32>} : memref<64x128xf32, #tpu.memory_space<vmem>>, vector<64x64xf32>,
    %38 = tpu.iota {dimensions = array<i32: 1>} : vector<128x128xi32>
    %c32_i32 = arith.constant 32 : i32
    %39 = vector.broadcast %c32_i32 : i32 to vector<128x128xi32>
    %40 = arith.cmpi slt, %38, %39 : vector<128x128xi32>
    %c0_22 = arith.constant 0 : index
    %c0_23 = arith.constant 0 : index
    %41 = vector.load %arg8[%c0_22, %c0_23] : memref<128x128xbf16, #tpu.memory_space<vmem>>, vector<128x128xbf16>
    %cst_24 = arith.constant dense<0.000000e+00> : vector<128x128xf32>
    %42 = tpu.matmul %33, %41, %cst_24 {dimension_numbers = #tpu.dot_dimension_numbers<[1], [0], [0], [1], [0, 0, 1, 1], [], []>} : vector<128x128xbf16>, vector<128x128xbf16>, vector<128x128xf32> -> vector<128x128xf32>
    %c0_25 = arith.constant 0 : index
    %c0_26 = arith.constant 0 : index
    %43 = vector.load %arg9[%c0_25, %c0_26] : memref<1x128xf32, #tpu.memory_space<vmem>>, vector<1x128xf32>
    %44 = vector.broadcast %43 : vector<1x128xf32> to vector<128x128xf32>
    %45 = arith.addf %42, %44 : vector<128x128xf32>
    %cst_27 = arith.constant 0.000000e+00 : f32
    %46 = vector.broadcast %cst_27 : f32 to vector<128x128xf32>
    %47 = arith.select %40, %45, %46 : vector<128x128xi1>, vector<128x128xf32>
    %cst_28 = arith.constant dense<0.000000e+00> : vector<128xf32>
    %48 = vector.multi_reduction <add>, %47, %cst_28 [1] : vector<128x128xf32> to vector<128xf32>
    %49 = vector.shape_cast %48 : vector<128xf32> to vector<128x1xf32>
    %cst_29 = arith.constant 3.125000e-02 : f32
    %50 = vector.broadcast %cst_29 : f32 to vector<128x1xf32>
    %51 = arith.mulf %49, %50 : vector<128x1xf32>
    %52 = vector.broadcast %51 : vector<128x1xf32> to vector<128x128xf32>
    %53 = arith.subf %45, %52 : vector<128x128xf32>
    %cst_30 = arith.constant 0.000000e+00 : f32
    %54 = vector.broadcast %cst_30 : f32 to vector<128x128xf32>
    %55 = arith.select %40, %53, %54 : vector<128x128xi1>, vector<128x128xf32>
    %56 = arith.mulf %55, %55 : vector<128x128xf32>
    %cst_31 = arith.constant dense<0.000000e+00> : vector<128xf32>
    %57 = vector.multi_reduction <add>, %56, %cst_31 [1] : vector<128x128xf32> to vector<128xf32>
    %58 = vector.shape_cast %57 : vector<128xf32> to vector<128x1xf32>
    %cst_32 = arith.constant 3.125000e-02 : f32
    %59 = vector.broadcast %cst_32 : f32 to vector<128x1xf32>
    %60 = arith.mulf %58, %59 : vector<128x1xf32>
    %cst_33 = arith.constant 9.99999974E-6 : f32
    %61 = vector.broadcast %cst_33 : f32 to vector<128x1xf32>
    %62 = arith.addf %60, %61 : vector<128x1xf32>
    %63 = math.rsqrt %62 : vector<128x1xf32>
    %64 = vector.broadcast %63 : vector<128x1xf32> to vector<128x128xf32>
    %65 = arith.mulf %55, %64 : vector<128x128xf32>
    %c0_34 = arith.constant 0 : index
    %c0_35 = arith.constant 0 : index
    %66 = vector.load %arg10[%c0_34, %c0_35] : memref<1x128xf32, #tpu.memory_space<vmem>>, vector<1x128xf32>
    %67 = vector.broadcast %66 : vector<1x128xf32> to vector<128x128xf32>
    %68 = arith.mulf %65, %67 : vector<128x128xf32>
    %c0_36 = arith.constant 0 : index
    %c0_37 = arith.constant 0 : index
    %69 = vector.load %arg11[%c0_36, %c0_37] : memref<1x128xf32, #tpu.memory_space<vmem>>, vector<1x128xf32>
    %70 = vector.broadcast %69 : vector<1x128xf32> to vector<128x128xf32>
    %71 = arith.addf %68, %70 : vector<128x128xf32>
    %cst_38 = arith.constant 0.000000e+00 : f32
    %72 = vector.broadcast %cst_38 : f32 to vector<128x128xf32>
    %73 = arith.maximumf %71, %72 : vector<128x128xf32>
    %74 = arith.truncf %73 : vector<128x128xf32> to vector<128x128xbf16>
    %c0_39 = arith.constant 0 : index
    %c0_40 = arith.constant 0 : index
    %75 = vector.load %arg12[%c0_39, %c0_40] : memref<128x128xbf16, #tpu.memory_space<vmem>>, vector<128x128xbf16>
    %cst_41 = arith.constant dense<0.000000e+00> : vector<128x128xf32>
    %76 = tpu.matmul %74, %75, %cst_41 {dimension_numbers = #tpu.dot_dimension_numbers<[1], [0], [0], [1], [0, 0, 1, 1], [], []>} : vector<128x128xbf16>, vector<128x128xbf16>, vector<128x128xf32> -> vector<128x128xf32>
    %c0_42 = arith.constant 0 : index
    %c0_43 = arith.constant 0 : index
    %77 = vector.load %arg13[%c0_42, %c0_43] : memref<1x128xf32, #tpu.memory_space<vmem>>, vector<1x128xf32>
    %78 = vector.broadcast %77 : vector<1x128xf32> to vector<128x128xf32>
    %79 = arith.addf %76, %78 : vector<128x128xf32>
    %c0_44 = arith.constant 0 : index
    %c0_45 = arith.constant 0 : index
    %80 = vector.load %arg16[%c0_44, %c0_45] : memref<128x128xf32, #tpu.memory_space<vmem>>, vector<128x128xf32>
    tpu.vector_store %arg16[%c0_44, %c0_45], %79 {strides = array<i32>} : memref<128x128xf32, #tpu.memory_space<vmem>>, vector<128x128xf32>,
    %c0_46 = arith.constant 0 : index
    %c0_47 = arith.constant 0 : index
    %c0_48 = arith.constant 0 : index
    %81 = vector.load %arg3[%c0_46, %c0_47, %c0_48] : memref<1x8x8xf32, #tpu.memory_space<vmem>>, vector<1x8x8xf32>
    %82 = vector.shape_cast %81 : vector<1x8x8xf32> to vector<8x8xf32>
    %cst_49 = arith.constant dense<0.000000e+00> : vector<128x8xf32>
    %83 = tpu.matmul %17, %82, %cst_49 {dimension_numbers = #tpu.dot_dimension_numbers<[1], [0], [0], [1], [0, 0, 1, 1], [], []>} : vector<128x8xf32>, vector<8x8xf32>, vector<128x8xf32> -> vector<128x8xf32>
    %84 = vector.extract_strided_slice %83 {offsets = [0, 2], sizes = [128, 1], strides = [1, 1]} : vector<128x8xf32> to vector<128x1xf32>
    %cst_50 = arith.constant 9.99999971E-10 : f32
    %85 = vector.broadcast %cst_50 : f32 to vector<128x1xf32>
    %86 = arith.maximumf %84, %85 : vector<128x1xf32>
    %87 = vector.extract_strided_slice %83 {offsets = [0, 0], sizes = [128, 1], strides = [1, 1]} : vector<128x8xf32> to vector<128x1xf32>
    %88 = arith.divf %87, %86 : vector<128x1xf32>
    %cst_51 = arith.constant 2.000000e+00 : f32
    %89 = vector.broadcast %cst_51 : f32 to vector<128x1xf32>
    %90 = arith.mulf %89, %88 : vector<128x1xf32>
    %cst_52 = arith.constant 1.600000e+01 : f32
    %91 = vector.broadcast %cst_52 : f32 to vector<128x1xf32>
    %92 = arith.divf %90, %91 : vector<128x1xf32>
    %cst_53 = arith.constant 1.000000e+00 : f32
    %93 = vector.broadcast %cst_53 : f32 to vector<128x1xf32>
    %94 = arith.subf %92, %93 : vector<128x1xf32>
    %95 = vector.extract_strided_slice %83 {offsets = [0, 1], sizes = [128, 1], strides = [1, 1]} : vector<128x8xf32> to vector<128x1xf32>
    %96 = arith.divf %95, %86 : vector<128x1xf32>
    %cst_54 = arith.constant 2.000000e+00 : f32
    %97 = vector.broadcast %cst_54 : f32 to vector<128x1xf32>
    %98 = arith.mulf %97, %96 : vector<128x1xf32>
    %cst_55 = arith.constant 1.600000e+01 : f32
    %99 = vector.broadcast %cst_55 : f32 to vector<128x1xf32>
    %100 = arith.divf %98, %99 : vector<128x1xf32>
    %cst_56 = arith.constant 1.000000e+00 : f32
    %101 = vector.broadcast %cst_56 : f32 to vector<128x1xf32>
    %102 = arith.subf %100, %101 : vector<128x1xf32>
    %cst_57 = arith.constant 1.000000e+00 : f32
    %103 = vector.broadcast %cst_57 : f32 to vector<128x1xf32>
    %104 = arith.addf %94, %103 : vector<128x1xf32>
    %cst_58 = arith.constant 8.000000e+00 : f32
    %105 = vector.broadcast %cst_58 : f32 to vector<128x1xf32>
    %106 = arith.mulf %104, %105 : vector<128x1xf32>
    %cst_59 = arith.constant 5.000000e-01 : f32
    %107 = vector.broadcast %cst_59 : f32 to vector<128x1xf32>
    %108 = arith.subf %106, %107 : vector<128x1xf32>
    %cst_60 = arith.constant 1.000000e+00 : f32
    %109 = vector.broadcast %cst_60 : f32 to vector<128x1xf32>
    %110 = arith.addf %102, %109 : vector<128x1xf32>
    %cst_61 = arith.constant 8.000000e+00 : f32
    %111 = vector.broadcast %cst_61 : f32 to vector<128x1xf32>
    %112 = arith.mulf %110, %111 : vector<128x1xf32>
    %cst_62 = arith.constant 5.000000e-01 : f32
    %113 = vector.broadcast %cst_62 : f32 to vector<128x1xf32>
    %114 = arith.subf %112, %113 : vector<128x1xf32>
    %cst_63 = arith.constant -2.000000e+00 : f32
    %cst_64 = arith.constant 1.700000e+01 : f32
    %115 = vector.broadcast %cst_63 : f32 to vector<128x1xf32>
    %116 = arith.maximumf %115, %108 : vector<128x1xf32>
    %117 = vector.broadcast %cst_64 : f32 to vector<128x1xf32>
    %118 = arith.minimumf %117, %116 : vector<128x1xf32>
    %cst_65 = arith.constant -2.000000e+00 : f32
    %cst_66 = arith.constant 1.700000e+01 : f32
    %119 = vector.broadcast %cst_65 : f32 to vector<128x1xf32>
    %120 = arith.maximumf %119, %114 : vector<128x1xf32>
    %121 = vector.broadcast %cst_66 : f32 to vector<128x1xf32>
    %122 = arith.minimumf %121, %120 : vector<128x1xf32>
    %123 = math.floor %118 : vector<128x1xf32>
    %124 = math.floor %122 : vector<128x1xf32>
    %125 = arith.subf %118, %123 : vector<128x1xf32>
    %126 = arith.subf %122, %124 : vector<128x1xf32>
    %cst_67 = arith.constant 1.000000e+00 : f32
    %127 = vector.broadcast %cst_67 : f32 to vector<128x1xf32>
    %128 = arith.subf %127, %125 : vector<128x1xf32>
    %cst_68 = arith.constant 1.000000e+00 : f32
    %129 = vector.broadcast %cst_68 : f32 to vector<128x1xf32>
    %130 = arith.subf %129, %126 : vector<128x1xf32>
    %cst_69 = arith.constant 0.000000e+00 : f32
    %131 = vector.broadcast %cst_69 : f32 to vector<128x1xf32>
    %132 = arith.cmpf oge, %123, %131 : vector<128x1xf32>
    %cst_70 = arith.constant 1.500000e+01 : f32
    %133 = vector.broadcast %cst_70 : f32 to vector<128x1xf32>
    %134 = arith.cmpf ole, %123, %133 : vector<128x1xf32>
    %135 = arith.andi %132, %134 : vector<128x1xi1>
    %cst_71 = arith.constant -1.000000e+00 : f32
    %136 = vector.broadcast %cst_71 : f32 to vector<128x1xf32>
    %137 = arith.cmpf oge, %123, %136 : vector<128x1xf32>
    %cst_72 = arith.constant 1.400000e+01 : f32
    %138 = vector.broadcast %cst_72 : f32 to vector<128x1xf32>
    %139 = arith.cmpf ole, %123, %138 : vector<128x1xf32>
    %140 = arith.andi %137, %139 : vector<128x1xi1>
    %cst_73 = arith.constant 0.000000e+00 : f32
    %141 = vector.broadcast %cst_73 : f32 to vector<128x1xf32>
    %142 = arith.cmpf oge, %124, %141 : vector<128x1xf32>
    %cst_74 = arith.constant 1.500000e+01 : f32
    %143 = vector.broadcast %cst_74 : f32 to vector<128x1xf32>
    %144 = arith.cmpf ole, %124, %143 : vector<128x1xf32>
    %145 = arith.andi %142, %144 : vector<128x1xi1>
    %cst_75 = arith.constant -1.000000e+00 : f32
    %146 = vector.broadcast %cst_75 : f32 to vector<128x1xf32>
    %147 = arith.cmpf oge, %124, %146 : vector<128x1xf32>
    %cst_76 = arith.constant 1.400000e+01 : f32
    %148 = vector.broadcast %cst_76 : f32 to vector<128x1xf32>
    %149 = arith.cmpf ole, %124, %148 : vector<128x1xf32>
    %150 = arith.andi %147, %149 : vector<128x1xi1>
    %151 = arith.andi %135, %145 : vector<128x1xi1>
    %152 = arith.mulf %128, %130 : vector<128x1xf32>
    %cst_77 = arith.constant 0.000000e+00 : f32
    %153 = vector.broadcast %cst_77 : f32 to vector<128x1xf32>
    %154 = arith.select %151, %152, %153 : vector<128x1xi1>, vector<128x1xf32>
    %155 = arith.andi %140, %145 : vector<128x1xi1>
    %156 = arith.mulf %125, %130 : vector<128x1xf32>
    %cst_78 = arith.constant 0.000000e+00 : f32
    %157 = vector.broadcast %cst_78 : f32 to vector<128x1xf32>
    %158 = arith.select %155, %156, %157 : vector<128x1xi1>, vector<128x1xf32>
    %159 = arith.andi %135, %150 : vector<128x1xi1>
    %160 = arith.mulf %128, %126 : vector<128x1xf32>
    %cst_79 = arith.constant 0.000000e+00 : f32
    %161 = vector.broadcast %cst_79 : f32 to vector<128x1xf32>
    %162 = arith.select %159, %160, %161 : vector<128x1xi1>, vector<128x1xf32>
    %163 = arith.andi %140, %150 : vector<128x1xi1>
    %164 = arith.mulf %125, %126 : vector<128x1xf32>
    %cst_80 = arith.constant 0.000000e+00 : f32
    %165 = vector.broadcast %cst_80 : f32 to vector<128x1xf32>
    %166 = arith.select %163, %164, %165 : vector<128x1xi1>, vector<128x1xf32>
    %167 = arith.fptosi %123 : vector<128x1xf32> to vector<128x1xi32>
    %168 = arith.fptosi %124 : vector<128x1xf32> to vector<128x1xi32>
    %c16_i32 = arith.constant 16 : i32
    %169 = vector.broadcast %c16_i32 : i32 to vector<128x1xi32>
    %170 = arith.muli %168, %169 : vector<128x1xi32>
    %171 = arith.addi %170, %167 : vector<128x1xi32>
    %c0_i32 = arith.constant 0 : i32
    %172 = vector.broadcast %c0_i32 : i32 to vector<128x1xi32>
    %173 = arith.cmpi slt, %171, %172 : vector<128x1xi32>
    %c256_i32 = arith.constant 256 : i32
    %174 = vector.broadcast %c256_i32 : i32 to vector<128x1xi32>
    %175 = arith.addi %171, %174 : vector<128x1xi32>
    %176 = arith.select %173, %175, %171 : vector<128x1xi1>, vector<128x1xi32>
    %c256_i32_81 = arith.constant 256 : i32
    %177 = vector.broadcast %c256_i32_81 : i32 to vector<128x1xi32>
    %178 = arith.cmpi sge, %176, %177 : vector<128x1xi32>
    %c256_i32_82 = arith.constant 256 : i32
    %179 = vector.broadcast %c256_i32_82 : i32 to vector<128x1xi32>
    %180 = arith.subi %176, %179 : vector<128x1xi32>
    %181 = arith.select %178, %180, %176 : vector<128x1xi1>, vector<128x1xi32>
    %182 = tpu.iota {dimensions = array<i32: 1>} : vector<64x256xi32>
    %183 = vector.extract_strided_slice %181 {offsets = [0, 0], sizes = [64, 1], strides = [1, 1]} : vector<128x1xi32> to vector<64x1xi32>
    %184 = vector.broadcast %183 : vector<64x1xi32> to vector<64x256xi32>
    %185 = arith.cmpi eq, %182, %184 : vector<64x256xi32>
    %cst_83 = arith.constant 1.000000e+00 : f32
    %cst_84 = arith.constant 0.000000e+00 : f32
    %186 = vector.broadcast %cst_83 : f32 to vector<64x256xf32>
    %187 = vector.broadcast %cst_84 : f32 to vector<64x256xf32>
    %188 = arith.select %185, %186, %187 : vector<64x256xi1>, vector<64x256xf32>
    %189 = vector.extract_strided_slice %154 {offsets = [0, 0], sizes = [64, 1], strides = [1, 1]} : vector<128x1xf32> to vector<64x1xf32>
    %190 = vector.broadcast %189 : vector<64x1xf32> to vector<64x256xf32>
    %191 = arith.mulf %188, %190 : vector<64x256xf32>
    %c1_i32 = arith.constant 1 : i32
    %192 = tpu.dynamic_rotate %188 by %c1_i32 dim 1 : vector<64x256xf32>, i32 -> vector<64x256xf32>
    %193 = vector.extract_strided_slice %158 {offsets = [0, 0], sizes = [64, 1], strides = [1, 1]} : vector<128x1xf32> to vector<64x1xf32>
    %194 = vector.broadcast %193 : vector<64x1xf32> to vector<64x256xf32>
    %195 = arith.mulf %192, %194 : vector<64x256xf32>
    %196 = arith.addf %191, %195 : vector<64x256xf32>
    %c16_i32_85 = arith.constant 16 : i32
    %197 = tpu.dynamic_rotate %188 by %c16_i32_85 dim 1 : vector<64x256xf32>, i32 -> vector<64x256xf32>
    %198 = vector.extract_strided_slice %162 {offsets = [0, 0], sizes = [64, 1], strides = [1, 1]} : vector<128x1xf32> to vector<64x1xf32>
    %199 = vector.broadcast %198 : vector<64x1xf32> to vector<64x256xf32>
    %200 = arith.mulf %197, %199 : vector<64x256xf32>
    %201 = arith.addf %196, %200 : vector<64x256xf32>
    %c17_i32 = arith.constant 17 : i32
    %202 = tpu.dynamic_rotate %188 by %c17_i32 dim 1 : vector<64x256xf32>, i32 -> vector<64x256xf32>
    %203 = vector.extract_strided_slice %166 {offsets = [0, 0], sizes = [64, 1], strides = [1, 1]} : vector<128x1xf32> to vector<64x1xf32>
    %204 = vector.broadcast %203 : vector<64x1xf32> to vector<64x256xf32>
    %205 = arith.mulf %202, %204 : vector<64x256xf32>
    %206 = arith.addf %201, %205 : vector<64x256xf32>
    %207 = arith.truncf %206 : vector<64x256xf32> to vector<64x256xbf16>
    %c0_86 = arith.constant 0 : index
    %c0_87 = arith.constant 0 : index
    %208 = vector.load %arg18[%c0_86, %c0_87] : memref<512x128xbf16, #tpu.memory_space<vmem>>, vector<256x128xbf16>
    %cst_88 = arith.constant dense<0.000000e+00> : vector<64x128xf32>
    %209 = tpu.matmul %207, %208, %cst_88 {dimension_numbers = #tpu.dot_dimension_numbers<[1], [0], [0], [1], [0, 0, 1, 1], [], []>} : vector<64x256xbf16>, vector<256x128xbf16>, vector<64x128xf32> -> vector<64x128xf32>
    %c0_89 = arith.constant 0 : index
    %c0_90 = arith.constant 0 : index
    %210 = vector.load %arg14[%c0_89, %c0_90] : memref<128x128xf32, #tpu.memory_space<vmem>>, vector<64x128xf32>
    tpu.vector_store %arg14[%c0_89, %c0_90], %209 {strides = array<i32>} : memref<128x128xf32, #tpu.memory_space<vmem>>, vector<64x128xf32>,
    %211 = arith.mulf %209, %209 : vector<64x128xf32>
    %cst_91 = arith.constant dense<0.000000e+00> : vector<64xf32>
    %212 = vector.multi_reduction <add>, %211, %cst_91 [1] : vector<64x128xf32> to vector<64xf32>
    %213 = vector.shape_cast %212 : vector<64xf32> to vector<64x1xf32>
    %cst_92 = arith.constant 1.000000e-24 : f32
    %214 = vector.broadcast %cst_92 : f32 to vector<64x1xf32>
    %215 = arith.maximumf %213, %214 : vector<64x1xf32>
    %216 = math.rsqrt %215 : vector<64x1xf32>
    %217 = vector.broadcast %216 : vector<64x1xf32> to vector<64x128xf32>
    %218 = arith.mulf %209, %217 : vector<64x128xf32>
    %219 = arith.truncf %218 : vector<64x128xf32> to vector<64x128xbf16>
    %220 = vector.extract_strided_slice %181 {offsets = [64, 0], sizes = [64, 1], strides = [1, 1]} : vector<128x1xi32> to vector<64x1xi32>
    %221 = vector.broadcast %220 : vector<64x1xi32> to vector<64x256xi32>
    %222 = arith.cmpi eq, %182, %221 : vector<64x256xi32>
    %cst_93 = arith.constant 1.000000e+00 : f32
    %cst_94 = arith.constant 0.000000e+00 : f32
    %223 = vector.broadcast %cst_93 : f32 to vector<64x256xf32>
    %224 = vector.broadcast %cst_94 : f32 to vector<64x256xf32>
    %225 = arith.select %222, %223, %224 : vector<64x256xi1>, vector<64x256xf32>
    %226 = vector.extract_strided_slice %154 {offsets = [64, 0], sizes = [64, 1], strides = [1, 1]} : vector<128x1xf32> to vector<64x1xf32>
    %227 = vector.broadcast %226 : vector<64x1xf32> to vector<64x256xf32>
    %228 = arith.mulf %225, %227 : vector<64x256xf32>
    %c1_i32_95 = arith.constant 1 : i32
    %229 = tpu.dynamic_rotate %225 by %c1_i32_95 dim 1 : vector<64x256xf32>, i32 -> vector<64x256xf32>
    %230 = vector.extract_strided_slice %158 {offsets = [64, 0], sizes = [64, 1], strides = [1, 1]} : vector<128x1xf32> to vector<64x1xf32>
    %231 = vector.broadcast %230 : vector<64x1xf32> to vector<64x256xf32>
    %232 = arith.mulf %229, %231 : vector<64x256xf32>
    %233 = arith.addf %228, %232 : vector<64x256xf32>
    %c16_i32_96 = arith.constant 16 : i32
    %234 = tpu.dynamic_rotate %225 by %c16_i32_96 dim 1 : vector<64x256xf32>, i32 -> vector<64x256xf32>
    %235 = vector.extract_strided_slice %162 {offsets = [64, 0], sizes = [64, 1], strides = [1, 1]} : vector<128x1xf32> to vector<64x1xf32>
    %236 = vector.broadcast %235 : vector<64x1xf32> to vector<64x256xf32>
    %237 = arith.mulf %234, %236 : vector<64x256xf32>
    %238 = arith.addf %233, %237 : vector<64x256xf32>
    %c17_i32_97 = arith.constant 17 : i32
    %239 = tpu.dynamic_rotate %225 by %c17_i32_97 dim 1 : vector<64x256xf32>, i32 -> vector<64x256xf32>
    %240 = vector.extract_strided_slice %166 {offsets = [64, 0], sizes = [64, 1], strides = [1, 1]} : vector<128x1xf32> to vector<64x1xf32>
    %241 = vector.broadcast %240 : vector<64x1xf32> to vector<64x256xf32>
    %242 = arith.mulf %239, %241 : vector<64x256xf32>
    %243 = arith.addf %238, %242 : vector<64x256xf32>
    %244 = arith.truncf %243 : vector<64x256xf32> to vector<64x256xbf16>
    %c256 = arith.constant 256 : index
    %c0_98 = arith.constant 0 : index
    %245 = vector.load %arg18[%c256, %c0_98] : memref<512x128xbf16, #tpu.memory_space<vmem>>, vector<256x128xbf16>
    %cst_99 = arith.constant dense<0.000000e+00> : vector<64x128xf32>
    %246 = tpu.matmul %244, %245, %cst_99 {dimension_numbers = #tpu.dot_dimension_numbers<[1], [0], [0], [1], [0, 0, 1, 1], [], []>} : vector<64x256xbf16>, vector<256x128xbf16>, vector<64x128xf32> -> vector<64x128xf32>
    %c64_100 = arith.constant 64 : index
    %c0_101 = arith.constant 0 : index
    %247 = vector.load %arg14[%c64_100, %c0_101] : memref<128x128xf32, #tpu.memory_space<vmem>>, vector<64x128xf32>
    tpu.vector_store %arg14[%c64_100, %c0_101], %246 {strides = array<i32>} : memref<128x128xf32, #tpu.memory_space<vmem>>, vector<64x128xf32>,
    %248 = arith.mulf %246, %246 : vector<64x128xf32>
    %cst_102 = arith.constant dense<0.000000e+00> : vector<64xf32>
    %249 = vector.multi_reduction <add>, %248, %cst_102 [1] : vector<64x128xf32> to vector<64xf32>
    %250 = vector.shape_cast %249 : vector<64xf32> to vector<64x1xf32>
    %cst_103 = arith.constant 1.000000e-24 : f32
    %251 = vector.broadcast %cst_103 : f32 to vector<64x1xf32>
    %252 = arith.maximumf %250, %251 : vector<64x1xf32>
    %253 = math.rsqrt %252 : vector<64x1xf32>
    %254 = vector.broadcast %253 : vector<64x1xf32> to vector<64x128xf32>
    %255 = arith.mulf %246, %254 : vector<64x128xf32>
    %256 = arith.truncf %255 : vector<64x128xf32> to vector<64x128xbf16>
    %cst_104 = arith.constant dense<0.000000e+00> : vector<64x64xf32>
    %257 = tpu.matmul %219, %256, %cst_104 {dimension_numbers = #tpu.dot_dimension_numbers<[1], [1], [0], [0], [0, 0, 1, 0], [], []>} : vector<64x128xbf16>, vector<64x128xbf16>, vector<64x64xf32> -> vector<64x64xf32>
    %c0_105 = arith.constant 0 : index
    %c0_106 = arith.constant 0 : index
    %258 = vector.load %arg17[%c0_105, %c0_106] : memref<64x128xf32, #tpu.memory_space<vmem>>, vector<64x64xf32>
    tpu.vector_store %arg17[%c0_105, %c0_106], %257 {strides = array<i32>} : memref<64x128xf32, #tpu.memory_space<vmem>>, vector<64x64xf32>,
    return
  }
  func.func @transform_0(%arg0: i32) -> (i32, i32) {
    %c0_i32 = arith.constant 0 : i32
    %c0_i32_0 = arith.constant 0 : i32
    return %arg0, %c0_i32 : i32, i32
  }
  func.func @transform_1(%arg0: i32) -> (i32, i32) {
    %c0_i32 = arith.constant 0 : i32
    %c0_i32_0 = arith.constant 0 : i32
    return %arg0, %c0_i32 : i32, i32
  }
  func.func @transform_2(%arg0: i32) -> (i32, i32, i32) {
    %c0_i32 = arith.constant 0 : i32
    %c0_i32_0 = arith.constant 0 : i32
    %c0_i32_1 = arith.constant 0 : i32
    return %arg0, %c0_i32, %c0_i32_0 : i32, i32, i32
  }
  func.func @transform_3(%arg0: i32) -> (i32, i32) {
    %c0_i32 = arith.constant 0 : i32
    %c0_i32_0 = arith.constant 0 : i32
    %c0_i32_1 = arith.constant 0 : i32
    return %c0_i32, %c0_i32_0 : i32, i32
  }
  func.func @transform_4(%arg0: i32) -> (i32, i32) {
    %c0_i32 = arith.constant 0 : i32
    %c0_i32_0 = arith.constant 0 : i32
    %c0_i32_1 = arith.constant 0 : i32
    return %c0_i32, %c0_i32_0 : i32, i32
  }
  func.func @transform_5(%arg0: i32) -> (i32, i32) {
    %c0_i32 = arith.constant 0 : i32
    %c0_i32_0 = arith.constant 0 : i32
    %c0_i32_1 = arith.constant 0 : i32
    return %c0_i32, %c0_i32_0 : i32, i32
  }
  func.func @transform_6(%arg0: i32) -> (i32, i32) {
    %c0_i32 = arith.constant 0 : i32
    %c0_i32_0 = arith.constant 0 : i32
    %c0_i32_1 = arith.constant 0 : i32
    return %c0_i32, %c0_i32_0 : i32, i32
  }
  func.func @transform_7(%arg0: i32) -> (i32, i32) {
    %c0_i32 = arith.constant 0 : i32
    %c0_i32_0 = arith.constant 0 : i32
    %c0_i32_1 = arith.constant 0 : i32
    return %c0_i32, %c0_i32_0 : i32, i32
  }
  func.func @transform_8(%arg0: i32) -> (i32, i32) {
    %c0_i32 = arith.constant 0 : i32
    %c0_i32_0 = arith.constant 0 : i32
    %c0_i32_1 = arith.constant 0 : i32
    return %c0_i32, %c0_i32_0 : i32, i32
  }
  func.func @transform_9(%arg0: i32) -> (i32, i32) {
    %c0_i32 = arith.constant 0 : i32
    %c0_i32_0 = arith.constant 0 : i32
    %c0_i32_1 = arith.constant 0 : i32
    return %c0_i32, %c0_i32_0 : i32, i32
  }
  func.func @transform_10(%arg0: i32) -> (i32, i32) {
    %c0_i32 = arith.constant 0 : i32
    %c0_i32_0 = arith.constant 0 : i32
    %c0_i32_1 = arith.constant 0 : i32
    return %c0_i32, %c0_i32_0 : i32, i32
  }
  func.func @transform_11(%arg0: i32) -> (i32, i32) {
    %c0_i32 = arith.constant 0 : i32
    %c0_i32_0 = arith.constant 0 : i32
    %c0_i32_1 = arith.constant 0 : i32
    return %c0_i32, %c0_i32_0 : i32, i32
  }
  func.func @transform_12(%arg0: i32) -> (i32, i32) {
    %c0_i32 = arith.constant 0 : i32
    %c0_i32_0 = arith.constant 0 : i32
    %c0_i32_1 = arith.constant 0 : i32
    return %c0_i32, %c0_i32_0 : i32, i32
  }
  func.func @transform_13(%arg0: i32) -> (i32, i32) {
    %c0_i32 = arith.constant 0 : i32
    %c0_i32_0 = arith.constant 0 : i32
    return %arg0, %c0_i32 : i32, i32
  }
  func.func @transform_14(%arg0: i32) -> (i32, i32) {
    %c0_i32 = arith.constant 0 : i32
    %c0_i32_0 = arith.constant 0 : i32
    return %arg0, %c0_i32 : i32, i32
  }
  func.func @transform_15(%arg0: i32) -> (i32, i32) {
    %c0_i32 = arith.constant 0 : i32
    %c0_i32_0 = arith.constant 0 : i32
    return %arg0, %c0_i32 : i32, i32
  }
  func.func @transform_16(%arg0: i32) -> (i32, i32) {
    %c0_i32 = arith.constant 0 : i32
    %c0_i32_0 = arith.constant 0 : i32
    return %arg0, %c0_i32 : i32, i32
  }
}

</mosaic_0001>

<bundles_post_ra>
// kernel: custom-call.108
= control target key start
LH: loop header
LB: loop body
LE: loop exit
PB: predicated region body
PF: predicated region fallthrough
CT: control target
= control target key end

     0   :  { %s651_s9 = smov 0   ;;  %s653_s10 = smov 0   ;;  %s801_s0 = inlined_call_operand.vmem [shape: f32[2,6,3], index: 0, kind: input, shape index: {}]   ;;  %s802_s1 = inlined_call_operand.vmem [shape: f32[2,6,3], index: 1, kind: output, shape index: {0}]   ;;  %s803_s2 = inlined_call_operand.vmem [shape: f32[2,3], index: 2, kind: output, shape index: {1}]  }
   0x1   :  { %s655_s11 = smov 0   ;;  %s657_s12 = smov 0  }
   0x2   :  { %s659_s13 = smov 0  }
   0x3 LB: > { %s28_s14 = sadd.s32 1, %s624_s12  ;;  %s506_s15 = sadd.s32 4294967295, %s628_s13   ;;  %s628_s13 = sphi %s659_s13, %s9_s13   ;;  %s624_s12 = sphi %s657_s12, %s810_s12   ;;  %s620_s11 = sphi %s655_s11, %s809_s11   ;;  %s616_s10 = sphi %s653_s10, %s808_s10   ;;  %s612_s9 = sphi %s651_s9, %s807_s9  }
   0x4   : > { %p30_p0 = scmp.ge.s32.totalorder %s28_s14, 2  ;;  %s33_s16 = ssub.s32 0, %s624_s12 }
   0x5   : > { %s508_s17 = smin.u32 %s624_s12, %s33_s16  ;;  %p57_p1 = scmp.ne.s32.totalorder %s616_s10, %s612_s9 }
   0x6   : > { %s812_s14 = smov (%p30_p0, %s28_s14), 0  ;;  %s35_s18 = sshrl.u32 %s508_s17, 3 }
   0x7   : > { %s39_s19 = ssub.s32 0, %s812_s14  ;;  %p58_p2 = scmp.eq.s32.totalorder %s506_s15, 1 }
   0x8   : > { %s509_s20 = smin.u32 %s39_s19, %s812_s14  ;;  %s47_s24 = sadd.s32 1, %s616_s10 }
   0x9   : > { %s41_s21 = sshrl.u32 %s509_s20, 3  ;;  %p686_p3 = por %p58_p2, %p57_p1 }
   0xa   : > { %s44_s23 = ssub.s32 %s35_s18, %s41_s21  ;;  %p511_p5 = scmp.ge.s32.totalorder %s628_s13, 2 }
   0xb   : > { %p45_p4 = scmp.eq.s32.totalorder %s44_s23, 0  ;;  %s82_s26 = sand.u32 (!%p511_p5), 1, %s628_s13  }
   0xc   : > { %80 = sbr.rel (%p511_p5) target bundleno = 19 (0x13), region = 16  ;;  %s513_s27 = sshll.u32 (!%p511_p5), %s624_s12, 3 }
   0xd   : > { %s692_s25 = scalar_select %p45_p4, %s616_s10, %s47_s24  }
   0xe   : > { %s512_s28 = sshll.u32 (!%p511_p5), %s82_s26, 3  ;;  %s88_s3 = scalar_lea.vmem (!%p511_p5), %s801_s0, %s513_s27 }
   0xf   : > { %s84_s4 = scalar_lea.vmem (!%p511_p5), [#allocation0], %s512_s28 }
  0x11   : > { %v117_v0 = vld [vmem:[%s88_s3] sm:$0xff] }
  0x12   : > { %118 = vst [vmem:[%s84_s4] sm:$0xff] %v117_v0 }
  0x13 PF: > { %p514_p6 = scmp.ge.s32.totalorder %s628_s13, 1  ;;  %p123_p7 = scmp.lt.s32.totalorder %s628_s13, 3 }
  0x15   : > { %p124_p8 = pnand %p514_p6, %p123_p7 }
  0x17   : > { %127 = sbr.rel (%p124_p8) target bundleno = 336 (0x150), region = 54 }
  0x1c   : > { %s130_s5 = sand.u32 1, %s506_s15   ;;  %s144_s6 = sand.u32 1, %s612_s9   ;;  %v634_v2 = vmov 0.0  }
  0x1d   : > { %s515_s7 = sshll.u32 %s130_s5, 3  ;;  %s703_s8 = sshll.u32 %s144_s6, 1 }
  0x1e   : > { %s153_s16 = sand.u32 7, %s620_s11   ;;  %s132_s17 = scalar_lea.vmem [#allocation0], %s515_s7 }
  0x1f   : > { %v155_v1 = vld [vmem:[%s132_s17] sm:$0xff]  ;;  %s706_s18 = scalar_lea.vmem [#allocation1], %s515_s7  ;;  %s709_s19 = scalar_lea.vmem [#allocation2], %s153_s16 }
  0x20   : > { %156 = vst [vmem:[%s706_s18] sm:$0xff] %v155_v1  ;;  %157 = vst [vmem:[%s709_s19] sm:$0x1] %v634_v2  ;;  %s146_s15 = scalar_lea.vmem [#allocation3], %s703_s8  ;;  %s713_s20 = smov 0  }
  0x21 LB: >> { %v165_v3 = vlaneseq  ;;  %v722_v5 = vstv %s632_s20  ;;  %s192_s9 = scalar_lea.vmem %s706_s18, %s632_s20 [#allocation1]  ;;  %s250_s21 = scalar_lea.vmem [#allocation4], %s632_s20  ;;  %v635_v59 = vmov 1.0   ;;  %s632_s20 = sphi %s713_s20, %s163_s20  }
  0x22   : >> { %s267_s23 = smov [#allocation4] }
  0x23   : >> { %v719_v4 = vshrl.u32 %v165_v3, 7  ;;  %v244_v48 = vand.u32 127, %v165_v3 }
  0x25   : >> { %vm169_vm0 = vcmp.gt.s32.totalorder %v719_v4, %v722_v5  ;;  %vm170_vm1 = vcmp.lt.s32.totalorder %v719_v4, 6  ;;  %v231_v4 = vmov %v719_v4  ;;  %vm740_vm12 = vcmp.eq.s32.totalorder %v244_v48, %v722_v5 }
  0x26   : >> { %vm171_vm2 = vmand %vm169_vm0, %vm170_vm1  ;;  %vm235_vm9 = vcmp.gt.s32.totalorder %v231_v4, %v722_v5  ;;  %vm236_vm10 = vcmp.lt.s32.totalorder %v231_v4, 6  ;;  %v270_v4 = vmov %v719_v4  ;;  %vm296_vm15 = vcmp.gt.s32.totalorder %v244_v48, %v722_v5 }
  0x27   : >> { %v164_v6 = vld [vmem:[%s706_s18] sm:$0xff]  ;;  %v193_v15 = vld [vmem:[%s192_s9] ss:$0 sm:$0xff]  ;;  %s228_s18 = smov %s706_s18  ;;  %vm237_vm11 = vmand %vm235_vm9, %vm236_vm10  ;;  %vm275_vm13 = vcmp.lt.s32.totalorder %v270_v4, 6  ;;  %v287_v4 = vmov %v719_v4 }
  0x28   : >> { %v172_v7 = vsel %vm171_vm2, %v164_v6, 0.0  ;;  %v194_v16 = vand.u32 2147483647, %v193_v15  ;;  %vm219_vm8 = vcmp.lt.f32.partialorder %v193_v15, 0.0  ;;  %v232_v45 = vld [vmem:[%s228_s18] sm:$0xff]  ;;  %s266_s18 = smov %s706_s18  ;;  %vm304_vm14 = vcmp.ge.s32.totalorder %v287_v4, %v722_v5 }
  0x29   : >> { %v173_v8 = vmul.f32 %v172_v7, %v172_v7  ;;  %v238_v49 = vsel %vm237_vm11, %v232_v45, 0.0  ;;  %v263_v60 = vld [vmem:[%s709_s19] ss:$0 sm:$0xff]  ;;  %vm305_vm0 = vmand %vm740_vm12, %vm304_vm14 }
  0x2a   : >> { %v195_v21 = vmax.f32 %v194_v16, 0.0  ;;  %v273_v63 = vld [vmem:[%s266_s18] sm:$0xff]  ;;  %s283_s18 = smov %s266_s18 }
  0x2b   : >> { %v174_v9 = vrot.slane %v173_v8, 4  ;;  %s308_s24 = scalar_lea.vmem %s283_s18, %s632_s20  ;;  %s163_s20 = sadd.s32 1, %s632_s20  }
  0x2c   : >> { %p160_p9 = scmp.ge.s32.totalorder %s163_s20, 3  }
  0x2d   : >> { %v175_v10 = vadd.f32 %v174_v9, %v173_v8  ;;  %s521_s26 = sshll.u32 (%p160_p9), %s620_s11, 3 }
  0x2e   : > { %s335_s29 = scalar_lea.vmem (%p160_p9), %s802_s1, %s521_s26 }
  0x2f   : >> { %v176_v11 = vrot.slane %v175_v10, 2 }
  0x31   : >> { %v177_v12 = vadd.f32 %v176_v11, %v175_v10 }
  0x33   : >> { %v178_v13 = vrot.slane %v177_v12, 1 }
  0x35   : >> { %v179_v14 = vadd.f32 %v178_v13, %v177_v12  ;;  %v294_v13 = vld [vmem:[%s283_s18] sm:$0xff] }
  0x37   : >> { %576 = vrsqrt.f32 %v179_v14  ;;  %vm182_vm3 = vcmp.eq.f32.partialorder %v179_v14, inf  ;;  %v185_v18 = vand.u32 2147483648, %v179_v14  ;;  %vm184_vm4 = vcmp.eq.f32.partialorder %v179_v14, 0.0 }
  0x44   : >> { %v577_v17 = vpop.eup %576 }
  0x45   : >> { %v181_v19 = vmul.f32 %v577_v17, %v179_v14 }
  0x47   : >> { %v183_v20 = vsel %vm182_vm3, %v179_v14, %v181_v19 }
  0x48   : >> { %v186_v22 = vsel %vm184_vm4, %v185_v18, %v183_v20 }
  0x49   : >> { %v196_v23 = vand.u32 2147483647, %v186_v22 }
  0x4b   : >> { %v197_v24 = vmax.f32 %v195_v21, %v196_v23 }
  0x4d   : >> { %578 = vrcp.f32 %v197_v24  ;;  %vm209_vm7 = vcmp.eq.f32.partialorder %v197_v24, 0.0 }
  0x5a   : >> { %v579_v25 = vpop.eup %578 }
  0x5b   : >> { %v199_v26 = vmul.f32 %v579_v25, %v194_v16  ;;  %v202_v27 = vmul.f32 0.0, %v579_v25  ;;  %v206_v28 = vmul.f32 %v579_v25, %v196_v23 }
  0x5d   : >> { %v200_v29 = vmul.f32 %v199_v26, %v199_v26  ;;  %v203_v30 = vmul.f32 %v202_v27, %v202_v27  ;;  %v207_v31 = vmul.f32 %v206_v28, %v206_v28 }
  0x5f   : >> { %v204_v32 = vadd.f32 %v203_v30, %v200_v29 }
  0x61   : >> { %v208_v33 = vadd.f32 %v207_v31, %v204_v32 }
  0x63   : >> { %580 = vrsqrt.f32 %v208_v33  ;;  %vm212_vm5 = vcmp.eq.f32.partialorder %v208_v33, inf  ;;  %v215_v35 = vand.u32 2147483648, %v208_v33  ;;  %vm214_vm6 = vcmp.eq.f32.partialorder %v208_v33, 0.0 }
  0x70   : >> { %v581_v34 = vpop.eup %580 }
  0x71   : >> { %v211_v36 = vmul.f32 %v581_v34, %v208_v33 }
  0x73   : >> { %v213_v37 = vsel %vm212_vm5, %v208_v33, %v211_v36 }
  0x74   : >> { %v216_v38 = vsel %vm214_vm6, %v215_v35, %v213_v37 }
  0x75   : >> { %v217_v39 = vmul.f32 %v216_v38, %v197_v24 }
  0x77   : >> { %v218_v40 = vsel %vm209_vm7, 0.0, %v217_v39 }
  0x78   : >> { %v220_v41 = vxor.u32 2147483648, %v218_v40 }
  0x7a   : >> { %v221_v42 = vsel %vm219_vm8, %v218_v40, %v220_v41 }
  0x7b   : >> { %v732_v43 = vsel %vm184_vm4, %v193_v15, %v221_v42  ;;  %582 = vrcp.f32 %v221_v42  ;;  %v222_v46 = vsub.f32 %v221_v42, %v193_v15 }
  0x7c   : >> { %v227_v44 = vsub.f32 %v193_v15, %v732_v43 }
  0x7e   : >> { %584 = vrcp.f32 %v227_v44 }
  0x88   : >> { %v583_v47 = vpop.eup %582 }
  0x89   : >> { %v224_v50 = vmul.f32 %v583_v47, %v222_v46 }
  0x8b   : >> { %v585_v51 = vpop.eup %584  ;;  %v226_v55 = vsel %vm184_vm4, 0.0, %v224_v50 }
  0x8c   : >> { %v240_v52 = vmul.f32 %v585_v51, %v238_v49  ;;  %v256_v57 = vsel %vm740_vm12, %v226_v55, 0.0 }
  0x8e   : >> { %v241_v54 = vsel %vm184_vm4, 0.0, %v240_v52 }
  0x8f   : >> { %v246_v56 = vsel %vm740_vm12, %v241_v54, 0.0 }
  0x90   : >> { %247 = vadd.xlane.f32.xlu0 %v246_v56 }
  0x94   : >> { %257 = vadd.xlane.f32.xlu0 %v256_v57 }
 0x119   : >> { %v248_v58 = vpop.xlane.xlu0 %247 }
 0x11a   : >> { %249 = vst [vmem:[#allocation4] sm:$0xff] %v248_v58 }
 0x11b   : >> { %251 = vst [vmem:[%s250_s21] sm:$0x1] %v635_v59 }
 0x11d   : >> { %v258_v61 = vpop.xlane.xlu0 %257 }
 0x11e   : >> { %v264_v62 = vsel %vm740_vm12, %v258_v61, %v263_v60 }
 0x11f   : >> { %265 = vst [vmem:[%s709_s19] sm:$0x1] %v264_v62 }
 0x122   : >> { %v272_v0 = vld [vmem:[%s267_s23] sm:$0xff]  ;;  %s284_s23 = smov %s267_s23 }
 0x123   : >> { %v274_v1 = vmul.f32 %v273_v63, %v272_v0  ;;  %v292_v12 = vld [vmem:[%s284_s23] sm:$0xff] }
 0x125   : >> { %v276_v2 = vsel %vm275_vm13, %v274_v1, 0.0 }
 0x126   : >> { %v277_v3 = vrot.slane %v276_v2, 4  ;;  %v320_v4 = vld [vmem:[#allocation2] sm:$0x3] (%p160_p9) }
 0x127   : > { %323 = vst [vmem:[%s146_s15] sm:$0x3] (%p160_p9), %v320_v4 }
 0x128   : >> { %v278_v6 = vadd.f32 %v277_v3, %v276_v2 }
 0x12a   : >> { %v279_v7 = vrot.slane %v278_v6, 2 }
 0x12c   : >> { %v280_v8 = vadd.f32 %v279_v7, %v278_v6 }
 0x12e   : >> { %v281_v9 = vrot.slane %v280_v8, 1 }
 0x130   : >> { %v282_v10 = vadd.f32 %v281_v9, %v280_v8 }
 0x132   : >> { %v288_v11 = vmul.f32 %v282_v10, %v258_v61 }
 0x134   : >> { %v293_v14 = vmul.f32 %v292_v12, %v288_v11 }
 0x136   : >> { %v297_v15 = vsub.f32 %v294_v13, %v293_v14 }
 0x138   : >> { %v298_v16 = vsel %vm296_vm15, %v297_v15, %v294_v13 }
 0x139   : >> { %v306_v17 = vsel %vm305_vm0, %v292_v12, %v298_v16 }
 0x13a   : >> { %307 = vst [vmem:[%s283_s18] sm:$0xff] %v306_v17 }
 0x13f   : > { %162 = sbr.rel (!%p160_p9) target bundleno = 33 (0x21), region = 175 }
 0x141   : >> { %v309_v18 = vld [vmem:[%s308_s24] ss:$0 sm:$0xff] }
 0x142   : >> { %v314_v19 = vsel %vm740_vm12, %v732_v43, %v309_v18 }
 0x143   : >> { %315 = vst [vmem:[%s308_s24] sm:$0x1] %v314_v19 }
 0x144   : > { %p372_p10 = scmp.lt.s32.totalorder (%p686_p3), %s620_s11, 0  ;;  %s373_s30 = ssub.s32 (%p686_p3), 0, %s620_s11  ;;  %v396_v20 = vld [vmem:[%s146_s15] sm:$0x3] (%p686_p3) }
 0x145   : > { %s522_s3 = smin.u32 (%p686_p3), %s620_s11, %s373_s30 }
 0x146   : > { %s375_s4 = sshrl.u32 (%p686_p3), %s522_s3, 3 }
 0x147   : > { %371 = sbr.rel (!%p686_p3) target bundleno = 336 (0x150), region = 99  ;;  %s376_s5 = ssub.s32 (%p686_p3), 0, %s375_s4 }
 0x14a   : > { %v364_v5 = vld [vmem:[%s706_s18] sm:$0xff] }
 0x14b   : > { %365 = vst [vmem:[%s335_s29] sm:$0xff] %v364_v5 }
 0x14c   : > { %s814_s5 = smov (!%p372_p10, %s376_s5), %s375_s4 }
 0x14d   : > { %s523_s6 = sshll.u32 %s814_s5, 1 }
 0x14e   : > { %s379_s17 = scalar_lea.vmem %s803_s2, %s523_s6 }
 0x14f   : > { %397 = vst [vmem:[%s379_s17] sm:$0x3] %v396_v20 }
 0x150 PF: > { %s9_s13 = sadd.s32 1, %s628_s13   ;;  %s807_s9 = smov %s616_s10 }
 0x151   : > { %p6_p11 = scmp.ge.s32.totalorder %s9_s13, 4   ;;  %s808_s10 = smov %s692_s25 }
 0x152   : > { %s809_s11 = smov %s624_s12  ;;  %s810_s12 = smov %s812_s14 }
 0x153   :  { %8 = sbr.rel (!%p6_p11) target bundleno = 3 (0x3), region = 186 }

// kernel: custom-call.109
= control target key start
LH: loop header
LB: loop body
LE: loop exit
PB: predicated region body
PF: predicated region fallthrough
CT: control target
= control target key end

     0   :  { %s243_s6 = smov 0   ;;  %s270_s0 = inlined_call_operand.vmem [shape: f32[2,3,3], index: 0, kind: input, shape index: {}]   ;;  %s271_s1 = inlined_call_operand.vmem [shape: f32[2,3,3], index: 1, kind: output, shape index: {}]  }
   0x1 LB: > { %s205_s7 = sadd.s32 4294967295, %s231_s6   ;;  %p207_p0 = scmp.ge.s32.totalorder %s231_s6, 2  ;;  %s231_s6 = sphi %s243_s6, %s7_s6  }
   0x2   : > { %s23_s8 = sand.u32 (!%p207_p0), 1, %s231_s6   ;;  %s209_s9 = sshll.u32 (!%p207_p0), %s231_s6, 2 }
   0x3   : > { %21 = sbr.rel (%p207_p0) target bundleno = 10 (0xa), region = 16  ;;  %s208_s10 = sshll.u32 (!%p207_p0), %s23_s8, 2 }
   0x4   : > { %s27_s13 = scalar_lea.vmem (!%p207_p0), %s270_s0, %s209_s9  ;;  %s25_s14 = scalar_lea.vmem (!%p207_p0), [#allocation1], %s208_s10 }
   0x8   : > { %v44_v0 = vld [vmem:[%s27_s13] sm:$0xf] }
   0x9   : > { %45 = vst [vmem:[%s25_s14] sm:$0xf] %v44_v0 }
   0xa PF: > { %p210_p1 = scmp.ge.s32.totalorder %s231_s6, 1  ;;  %p62_p2 = scmp.lt.s32.totalorder %s231_s6, 3 }
   0xc   : > { %p63_p3 = pnand %p210_p1, %p62_p2 }
   0xd   : > { %s259_s15 = sand.u32 (!%p63_p3), 1, %s205_s7   ;;  %s214_s19 = sshll.u32 (!%p63_p3), %s205_s7, 2 }
   0xe   : > { %66 = sbr.rel (%p63_p3) target bundleno = 329 (0x149), region = 50  ;;  %s211_s16 = sshll.u32 (!%p63_p3), %s259_s15, 2 }
   0xf   : > { %s75_s17 = scalar_lea.vmem (!%p63_p3), [#allocation1], %s211_s16  ;;  %s79_s18 = scalar_lea.vmem (!%p63_p3), [#allocation3], %s211_s16 }
  0x10   : > { %s133_s22 = scalar_lea.vmem (!%p63_p3), %s271_s1, %s214_s19 }
  0x13   : > { %v85_v1 = vlaneseq  ;;  %v83_v2 = vld [vmem:[%s75_s17] sm:$0xf]  ;;  %vm99_vm1 = vcmask 23552  }
  0x14   : > { %84 = vst [vmem:[#allocation0] sm:$0xf] %v83_v2 }
  0x15   : > { %v86_v3 = vand.u32 127, %v85_v1  ;;  %v88_v4 = vshrl.u32 %v85_v1, 7 }
  0x17   : > { %vm94_vm0 = vcmp.eq.s32.totalorder %v86_v3, 0  ;;  %vm90_vm2 = vcmp.eq.s32.totalorder %v86_v3, %v88_v4  ;;  %vm103_vm3 = vcmp.eq.s32.totalorder %v86_v3, 1  ;;  %vm114_vm4 = vcmp.eq.s32.totalorder %v86_v3, 2 }
  0x1b   : > { %v91_v5 = vld [vmem:[#allocation0] sm:$0xff] }
  0x1c   : > { %v98_v6 = vld [vmem:[#allocation0 + $0x1] ss:$0 sm:$0xff]  ;;  %v95_v7 = vsel %vm94_vm0, %v91_v5, 1.0  ;;  %v109_v11 = vld [vmem:[#allocation0 + $0x2] ss:$0 sm:$0xff] }
  0x1d   : > { %v100_v8 = vsel %vm99_vm1, %v98_v6, 0.0  ;;  %v96_v9 = vsel %vm90_vm2, %v95_v7, 0.0  ;;  %v111_v12 = vsel %vm99_vm1, %v109_v11, 0.0 }
  0x1e   : > { %v104_v10 = vmul.f32 %v100_v8, %v96_v9 }
  0x20   : > { %105 = vadd.xlane.f32.xlu0 %v104_v10 }
  0xa9   : > { %v106_v13 = vpop.xlane.xlu0 %105 }
  0xaa   : > { %v107_v14 = vsel %vm103_vm3, %v106_v13, %v96_v9 }
  0xab   : > { %v115_v15 = vmul.f32 %v111_v12, %v107_v14 }
  0xad   : > { %116 = vadd.xlane.f32.xlu0 %v115_v15 }
 0x136   : > { %v117_v16 = vpop.xlane.xlu0 %116 }
 0x137   : > { %v118_v17 = vsel %vm114_vm4, %v117_v16, %v107_v14 }
 0x138   : > { %119 = vst [vmem:[#allocation2] sm:$0xff] %v118_v17 }
 0x13f   : > { %v124_v18 = vld [vmem:[#allocation2] sm:$0xf] }
 0x140   : > { %127 = vst [vmem:[%s79_s18] sm:$0xf] %v124_v18 }
 0x147   : > { %v150_v19 = vld [vmem:[%s79_s18] sm:$0xf] }
 0x148   : > { %151 = vst [vmem:[%s133_s22] sm:$0xf] %v150_v19 }
 0x149 PF: > { %s7_s6 = sadd.s32 1, %s231_s6  }
 0x14a   : > { %p4_p4 = scmp.ge.s32.totalorder %s7_s6, 4  }
 0x14c   :  { %6 = sbr.rel (!%p4_p4) target bundleno = 1 (0x1), region = 112 }

// kernel: custom-call.110
= control target key start
LH: loop header
LB: loop body
LE: loop exit
PB: predicated region body
PF: predicated region fallthrough
CT: control target
= control target key end

     0   :  { %s350_s6 = smov 0   ;;  %s352_s7 = smov 0   ;;  %s397_s0 = inlined_call_operand.vmem [shape: f32[2,3,3], index: 0, kind: input, shape index: {}]   ;;  %s398_s1 = inlined_call_operand.vmem [shape: f32[2,3,3], index: 1, kind: output, shape index: {}]  }
   0x1   :  { %s354_s8 = smov 0  }
   0x2 LB: > { %s272_s9 = sadd.s32 4294967295, %s337_s8   ;;  %s26_s10 = sadd.s32 1, %s333_s7  ;;  %s337_s8 = sphi %s354_s8, %s7_s8   ;;  %s333_s7 = sphi %s352_s7, %s400_s7   ;;  %s329_s6 = sphi %s350_s6, %s399_s6  }
   0x3   : > { %p28_p0 = scmp.ge.s32.totalorder %s26_s10, 2  ;;  %p274_p1 = scmp.ge.s32.totalorder %s337_s8, 2 }
   0x4   : > { %s42_s11 = sand.u32 (!%p274_p1), 1, %s337_s8   ;;  %s276_s12 = sshll.u32 (!%p274_p1), %s333_s7, 2 }
   0x5   : > { %s402_s10 = smov (%p28_p0, %s26_s10), 0  ;;  %40 = sbr.rel (%p274_p1) target bundleno = 12 (0xc), region = 16 }
   0x6   : > { %s275_s13 = sshll.u32 (!%p274_p1), %s42_s11, 2  ;;  %s48_s16 = scalar_lea.vmem (!%p274_p1), %s397_s0, %s276_s12 }
   0x7   : > { %s44_s17 = scalar_lea.vmem (!%p274_p1), [#allocation1], %s275_s13 }
   0xa   : > { %v65_v0 = vld [vmem:[%s48_s16] sm:$0xf] }
   0xb   : > { %66 = vst [vmem:[%s44_s17] sm:$0xf] %v65_v0 }
   0xc PF: > { %p277_p2 = scmp.ge.s32.totalorder %s337_s8, 1  ;;  %p83_p3 = scmp.lt.s32.totalorder %s337_s8, 3 }
   0xe   : > { %p84_p4 = pnand %p277_p2, %p83_p3 }
   0xf   : > { %s377_s18 = sand.u32 (!%p84_p4), 1, %s272_s9   ;;  %s281_s22 = sshll.u32 (!%p84_p4), %s329_s6, 2 }
  0x10   : > { %87 = sbr.rel (%p84_p4) target bundleno = 544 (0x220), region = 50  ;;  %s278_s19 = sshll.u32 (!%p84_p4), %s377_s18, 2 }
  0x11   : > { %s96_s20 = scalar_lea.vmem (!%p84_p4), [#allocation1], %s278_s19  ;;  %s100_s21 = scalar_lea.vmem (!%p84_p4), [#allocation3], %s278_s19 }
  0x12   : > { %s184_s25 = scalar_lea.vmem (!%p84_p4), %s398_s1, %s281_s22 }
  0x15   : > { %v339_v1 = vmov 0.0   ;;  %v104_v5 = vld [vmem:[%s96_s20] sm:$0xf]  ;;  %vm107_vm0 = vcmask 7168   ;;  %vm125_vm1 = vcmask 15368   ;;  %vm142_vm2 = vcmask 1047553  }
  0x16   : > { %106 = vst [vmem:[#allocation2] sm:$0xff] %v339_v1  ;;  %105 = vst [vmem:[#allocation0] sm:$0xf] %v104_v5  ;;  %vm147_vm4 = vcmask 23568   ;;  %vm164_vm5 = vcmask 1047554  }
  0x17   : > { %vm143_vm3 = vmand %vm125_vm1, %vm142_vm2 }
  0x18   : > { %vm165_vm6 = vmand %vm147_vm4, %vm164_vm5 }
  0x1d   : > { %v108_v2 = vld [vmem:[#allocation2] ss:$0 sm:$0xff]  ;;  %v109_v6 = vld [vmem:[#allocation0] ss:$0 sm:$0xff]  ;;  %v129_v18 = vld [vmem:[#allocation0 + $0x1] ss:$0 sm:$0xff] }
  0x1e   : > { %v110_v3 = vmul.f32 %v108_v2, %v108_v2  ;;  %v117_v4 = vmul.f32 0.0, %v108_v2  ;;  %v115_v10 = vld [vmem:[#allocation0] sm:$0xff] }
  0x1f   : > { %v151_v30 = vld [vmem:[#allocation0 + $0x2] ss:$0 sm:$0xff] }
  0x20   : > { %111 = vadd.xlane.f32.xlu0 %v110_v3 }
  0x24   : > { %118 = vadd.xlane.f32.xlu0 %v117_v4 }
  0xa9   : > { %v112_v7 = vpop.xlane.xlu0 %111 }
  0xaa   : > { %v113_v8 = vsub.f32 %v109_v6, %v112_v7 }
  0xac   : > { %309 = vrsqrt.f32 %v113_v8 }
  0xad   : > { %v119_v9 = vpop.xlane.xlu0 %118 }
  0xae   : > { %v120_v11 = vsub.f32 %v115_v10, %v119_v9 }
  0xb9   : > { %v310_v12 = vpop.eup %309 }
  0xba   : > { %v121_v13 = vmul.f32 %v310_v12, %v120_v11 }
  0xbc   : > { %v122_v14 = vsel %vm107_vm0, %v121_v13, 0.0 }
  0xbd   : > { %124 = vst [vmem:[#allocation2] sm:$0xff] %v122_v14 }
  0xc4   : > { %v127_v15 = vld [vmem:[#allocation2 + $0x1] ss:$0 sm:$0xff] }
  0xc5   : > { %v130_v16 = vmul.f32 %v127_v15, %v127_v15  ;;  %v137_v17 = vmul.f32 %v127_v15, %v122_v14 }
  0xc7   : > { %131 = vadd.xlane.f32.xlu1 %v130_v16 }
  0xcb   : > { %138 = vadd.xlane.f32.xlu1 %v137_v17 }
 0x150   : > { %v132_v19 = vpop.xlane.xlu1 %131 }
 0x151   : > { %v133_v20 = vsub.f32 %v129_v18, %v132_v19 }
 0x153   : > { %311 = vrsqrt.f32 %v133_v20 }
 0x154   : > { %v139_v21 = vpop.xlane.xlu1 %138 }
 0x155   : > { %v140_v22 = vsub.f32 %v115_v10, %v139_v21 }
 0x160   : > { %v312_v23 = vpop.eup %311 }
 0x161   : > { %v141_v24 = vmul.f32 %v312_v23, %v140_v22 }
 0x163   : > { %v144_v25 = vsel %vm143_vm3, %v141_v24, 0.0 }
 0x164   : > { %v145_v26 = vadd.f32 %v144_v25, %v122_v14 }
 0x166   : > { %146 = vst [vmem:[#allocation2] sm:$0xff] %v145_v26 }
 0x16d   : > { %v149_v27 = vld [vmem:[#allocation2 + $0x2] ss:$0 sm:$0xff] }
 0x16e   : > { %v159_v28 = vmul.f32 %v149_v27, %v145_v26  ;;  %v152_v29 = vmul.f32 %v149_v27, %v149_v27 }
 0x170   : > { %160 = vadd.xlane.f32.xlu1 %v159_v28  ;;  %153 = vadd.xlane.f32.xlu0 %v152_v29 }
 0x1f9   : > { %v154_v31 = vpop.xlane.xlu0 %153  ;;  %v161_v33 = vpop.xlane.xlu1 %160 }
 0x1fa   : > { %v155_v32 = vsub.f32 %v151_v30, %v154_v31  ;;  %v162_v34 = vsub.f32 %v115_v10, %v161_v33 }
 0x1fc   : > { %313 = vrsqrt.f32 %v155_v32 }
 0x209   : > { %v314_v35 = vpop.eup %313 }
 0x20a   : > { %v163_v36 = vmul.f32 %v314_v35, %v162_v34 }
 0x20c   : > { %v166_v37 = vsel %vm165_vm6, %v163_v36, 0.0 }
 0x20d   : > { %v167_v38 = vadd.f32 %v166_v37, %v145_v26 }
 0x20f   : > { %168 = vst [vmem:[#allocation2] sm:$0xff] %v167_v38 }
 0x216   : > { %v173_v39 = vld [vmem:[#allocation2] sm:$0xf] }
 0x217   : > { %176 = vst [vmem:[%s100_s21] sm:$0xf] %v173_v39 }
 0x21e   : > { %v201_v40 = vld [vmem:[%s100_s21] sm:$0xf] }
 0x21f   : > { %202 = vst [vmem:[%s184_s25] sm:$0xf] %v201_v40 }
 0x220 PF: > { %s7_s8 = sadd.s32 1, %s337_s8   ;;  %s399_s6 = smov %s333_s7 }
 0x221   : > { %p4_p5 = scmp.ge.s32.totalorder %s7_s8, 4   ;;  %s400_s7 = smov %s402_s10 }
 0x223   :  { %6 = sbr.rel (!%p4_p5) target bundleno = 2 (0x2), region = 114 }

// kernel: custom-call.111
= control target key start
LH: loop header
LB: loop body
LE: loop exit
PB: predicated region body
PF: predicated region fallthrough
CT: control target
= control target key end

     0   :  { %s350_s6 = smov 0   ;;  %s352_s7 = smov 0   ;;  %s397_s0 = inlined_call_operand.vmem [shape: f32[2,1,3,3], index: 0, kind: input, shape index: {}]   ;;  %s398_s1 = inlined_call_operand.vmem [shape: f32[2,1,3,3], index: 1, kind: output, shape index: {}]  }
   0x1   :  { %s354_s8 = smov 0  }
   0x2 LB: > { %s276_s9 = sadd.s32 4294967295, %s337_s8   ;;  %s33_s10 = sadd.s32 1, %s333_s7  ;;  %s337_s8 = sphi %s354_s8, %s7_s8   ;;  %s333_s7 = sphi %s352_s7, %s400_s7   ;;  %s329_s6 = sphi %s350_s6, %s399_s6  }
   0x3   : > { %p35_p0 = scmp.ge.s32.totalorder %s33_s10, 2  ;;  %p278_p1 = scmp.ge.s32.totalorder %s337_s8, 2 }
   0x4   : > { %s49_s11 = sand.u32 (!%p278_p1), 1, %s337_s8   ;;  %s280_s12 = sshll.u32 (!%p278_p1), %s333_s7, 2 }
   0x5   : > { %s402_s10 = smov (%p35_p0, %s33_s10), 0  ;;  %47 = sbr.rel (%p278_p1) target bundleno = 12 (0xc), region = 16 }
   0x6   : > { %s279_s13 = sshll.u32 (!%p278_p1), %s49_s11, 2  ;;  %s56_s16 = scalar_lea.vmem (!%p278_p1), %s397_s0, %s280_s12 }
   0x7   : > { %s51_s17 = scalar_lea.vmem (!%p278_p1), [#allocation1], %s279_s13 }
   0xa   : > { %v73_v0 = vld [vmem:[%s56_s16] sm:$0xf] }
   0xb   : > { %74 = vst [vmem:[%s51_s17] sm:$0xf] %v73_v0 }
   0xc PF: > { %p281_p2 = scmp.ge.s32.totalorder %s337_s8, 1  ;;  %p91_p3 = scmp.lt.s32.totalorder %s337_s8, 3 }
   0xe   : > { %p92_p4 = pnand %p281_p2, %p91_p3 }
  0x10   : > { %95 = sbr.rel (%p92_p4) target bundleno = 500 (0x1f4), region = 50 }
  0x15   : > { %s377_s18 = sand.u32 1, %s276_s9   ;;  %v114_v1 = vlaneseq  ;;  %v339_v11 = vmov -1.0   ;;  %s285_s22 = sshll.u32 %s329_s6, 2 }
  0x16   : > { %s282_s19 = sshll.u32 %s377_s18, 2  ;;  %s183_s25 = scalar_lea.vmem %s398_s1, %s285_s22 }
  0x17   : > { %s104_s20 = scalar_lea.vmem [#allocation1], %s282_s19  ;;  %v115_v3 = vand.u32 127, %v114_v1  ;;  %v118_v4 = vshrl.u32 %v114_v1, 7  ;;  %s108_s21 = scalar_lea.vmem [#allocation3], %s282_s19 }
  0x18   : > { %v112_v2 = vld [vmem:[%s104_s20] sm:$0xf] }
  0x19   : > { %113 = vst [vmem:[#allocation0] sm:$0xf] %v112_v2  ;;  %vm116_vm0 = vcmp.lt.s32.totalorder %v115_v3, 3  ;;  %vm125_vm1 = vcmp.ge.s32.totalorder %v118_v4, %v115_v3  ;;  %vm120_vm2 = vcmp.eq.s32.totalorder %v118_v4, %v115_v3  ;;  %vm139_vm4 = vcmp.eq.s32.totalorder %v115_v3, 0 }
  0x1a   : > { %vm126_vm3 = vmand %vm125_vm1, %vm116_vm0  ;;  %vm136_vm5 = vcmp.eq.s32.totalorder %v115_v3, %v118_v4  ;;  %v140_v12 = vsel %vm139_vm4, 1.0, %v339_v11  ;;  %vm147_vm6 = vcmp.eq.s32.totalorder %v115_v3, 1  ;;  %vm157_vm7 = vcmp.eq.s32.totalorder %v115_v3, 2 }
  0x1b   : > { %v141_v13 = vsel %vm136_vm5, %v140_v12, 0.0 }
  0x20   : > { %v121_v5 = vld [vmem:[#allocation0] sm:$0xff] }
  0x21   : > { %v122_v6 = vsel %vm120_vm2, %v121_v5, 0.0  ;;  %v127_v7 = vsel %vm126_vm3, %v121_v5, 0.0 }
  0x22   : > { %123 = vadd.xlane.f32.xlu0 %v122_v6 }
  0xab   : > { %v124_v8 = vpop.xlane.xlu0 %123 }
  0xac   : > { %313 = vrcp.f32 %v124_v8  ;;  %vm164_vm8 = vweird.f32 %v124_v8 }
  0xb9   : > { %v314_v9 = vpop.eup %313 }
  0xba   : > { %v129_v10 = vmul.f32 %v314_v9, %v127_v7 }
  0xbc   : > { %130 = vst [vmem:[#allocation4] sm:$0xff] %v129_v10 }
  0xc3   : > { %v143_v14 = vld [vmem:[#allocation4 + $0x1] ss:$0 sm:$0xff]  ;;  %v153_v17 = vld [vmem:[#allocation4 + $0x2] ss:$0 sm:$0xff] }
  0xc4   : > { %v144_v15 = vxor.u32 2147483648, %v143_v14  ;;  %v154_v19 = vxor.u32 2147483648, %v153_v17 }
  0xc6   : > { %v148_v16 = vmul.f32 %v144_v15, %v141_v13 }
  0xc8   : > { %149 = vadd.xlane.f32.xlu0 %v148_v16 }
 0x151   : > { %v150_v18 = vpop.xlane.xlu0 %149 }
 0x152   : > { %v151_v20 = vsel %vm147_vm6, %v150_v18, %v141_v13 }
 0x153   : > { %v158_v21 = vmul.f32 %v154_v19, %v151_v20 }
 0x155   : > { %159 = vadd.xlane.f32.xlu1 %v158_v21 }
 0x1de   : > { %v160_v22 = vpop.xlane.xlu1 %159 }
 0x1df   : > { %v161_v23 = vsel %vm157_vm7, %v160_v22, %v151_v20 }
 0x1e0   : > { %v163_v24 = vmul.f32 %v314_v9, %v161_v23 }
 0x1e2   : > { %v165_v25 = vsel %vm164_vm8, %v161_v23, %v163_v24 }
 0x1e3   : > { %166 = vst [vmem:[#allocation2] sm:$0xff] %v165_v25 }
 0x1ea   : > { %v171_v26 = vld [vmem:[#allocation2] sm:$0xf] }
 0x1eb   : > { %174 = vst [vmem:[%s108_s21] sm:$0xf] %v171_v26 }
 0x1f2   : > { %v200_v27 = vld [vmem:[%s108_s21] sm:$0xf] }
 0x1f3   : > { %201 = vst [vmem:[%s183_s25] sm:$0xf] %v200_v27 }
 0x1f4 PF: > { %s7_s8 = sadd.s32 1, %s337_s8   ;;  %s399_s6 = smov %s333_s7 }
 0x1f5   : > { %p4_p5 = scmp.ge.s32.totalorder %s7_s8, 4   ;;  %s400_s7 = smov %s402_s10 }
 0x1f7   :  { %6 = sbr.rel (!%p4_p5) target bundleno = 2 (0x2), region = 112 }

// kernel: custom-call.93
= control target key start
LH: loop header
LB: loop body
LE: loop exit
PB: predicated region body
PF: predicated region fallthrough
CT: control target
= control target key end

     0   :  { %s1740_s30 = smov 0   ;;  %s1742_s10 = smov 0   ;;  %s2066_s0 = inlined_call_operand.vmem [shape: f32[2,2,2], index: 0, kind: input, shape index: {}]   ;;  %s2067_s1 = inlined_call_operand.vmem [shape: f32[2,2,2], index: 1, kind: input, shape index: {}]   ;;  %s2068_s2 = inlined_call_operand.vmem [shape: f32[2,2,2], index: 2, kind: input, shape index: {}]   ;;  %s2069_s3 = inlined_call_operand.vmem [shape: f32[2,2,2], index: 3, kind: input, shape index: {}]   ;;  %s2070_s4 = inlined_call_operand.vmem [shape: f32[2,2], index: 4, kind: output, shape index: {0}]   ;;  %s2071_s5 = inlined_call_operand.vmem [shape: f32[2,2], index: 5, kind: output, shape index: {1}]   ;;  %s2072_s6 = inlined_call_operand.vmem [shape: f32[2,2,2], index: 6, kind: output, shape index: {2}]   ;;  %s2073_s7 = inlined_call_operand.vmem [shape: f32[2,2,2], index: 7, kind: output, shape index: {3}]   ;;  %s2074_s8 = inlined_call_operand.vmem [shape: f32[2,2,2], index: 8, kind: output, shape index: {4}]   ;;  %s2075_s9 = inlined_call_operand.vmem [shape: f32[2,2,2], index: 9, kind: output, shape index: {5}]  }
   0x1   :  { %s1744_s11 = smov 0  }
   0x2 LB: > { %s1756_s12 = sadd.s32 4294967295, %s1677_s11   ;;  %s1759_s13 = sadd.s32 1, %s1677_s11   ;;  %s1677_s11 = sphi %s1744_s11, %s2094_s11   ;;  %s1673_s10 = sphi %s1742_s10, %s2093_s10   ;;  %s1669_s30 = sphi %s1740_s30, %s2092_s30  }
   0x3   : > { %s20_s14 = sshrl.u32 %s1677_s11, 3  ;;  %s21_s15 = sshrl.u32 %s1759_s13, 3 }
   0x4   : > { %s22_s16 = ssub.s32 %s20_s14, %s21_s15  ;;  %s25_s17 = sadd.s32 1, %s1673_s10 }
   0x5   : > { %p23_p0 = scmp.eq.s32.totalorder %s22_s16, 0  ;;  %p35_p1 = scmp.ne.s32.totalorder %s1673_s10, %s1669_s30 }
   0x6   : > { %p36_p2 = scmp.eq.s32.totalorder %s1756_s12, 1  ;;  %p1538_p4 = scmp.ge.s32.totalorder %s1677_s11, 2 }
   0x7   : > { %s1768_s18 = scalar_select %p23_p0, %s1673_s10, %s25_s17  }
   0x8   : > { %p1770_p3 = por %p36_p2, %p35_p1  ;;  %86 = sbr.rel (%p1538_p4) target bundleno = 18 (0x12), region = 16 }
   0x9   : > { %2076 = sst [smem:[#allocation33_spill]] %s1768_s18  ;;  %s88_s20 = sand.u32 (!%p1538_p4), 1, %s1677_s11  }
   0xa   : > { %s1540_s21 = sshll.u32 (!%p1538_p4), %s1677_s11, 1  ;;  %s1539_s22 = sshll.u32 (!%p1538_p4), %s88_s20, 1 }
   0xb   : > { %s92_s25 = scalar_lea.vmem (!%p1538_p4), %s2066_s0, %s1540_s21  ;;  %s90_s26 = scalar_lea.vmem (!%p1538_p4), [#allocation1], %s1539_s22 }
   0xc   : > { %s131_s29 = scalar_lea.vmem (!%p1538_p4), %s2067_s1, %s1540_s21  ;;  %s170_s16 = scalar_lea.vmem (!%p1538_p4), %s2068_s2, %s1540_s21 }
   0xd   : > { %v109_v0 = vld [vmem:[%s92_s25] sm:$0x3]  ;;  %s129_s17 = scalar_lea.vmem [#allocation3], %s1539_s22  ;;  %s209_s23 = scalar_lea.vmem %s2069_s3, %s1540_s21 }
   0xe   : > { %110 = vst [vmem:[%s90_s26] sm:$0x3] %v109_v0  ;;  %v148_v1 = vld [vmem:[%s131_s29] sm:$0x3]  ;;  %s168_s24 = scalar_lea.vmem [#allocation5], %s1539_s22  ;;  %s207_s25 = scalar_lea.vmem [#allocation7], %s1539_s22 }
   0xf   : > { %149 = vst [vmem:[%s129_s17] sm:$0x3] %v148_v1  ;;  %v187_v2 = vld [vmem:[%s170_s16] sm:$0x3] }
  0x10   : > { %188 = vst [vmem:[%s168_s24] sm:$0x3] %v187_v2  ;;  %v226_v3 = vld [vmem:[%s209_s23] sm:$0x3] }
  0x11   : > { %227 = vst [vmem:[%s207_s25] sm:$0x3] %v226_v3 }
  0x12 PF: > { %p1547_p5 = scmp.ge.s32.totalorder %s1677_s11, 1  ;;  %p244_p6 = scmp.lt.s32.totalorder %s1677_s11, 3 }
  0x14   : > { %p245_p7 = pnand %p1547_p5, %p244_p6 }
  0x16   : > { %248 = sbr.rel (%p245_p7) target bundleno = 994 (0x3e2), region = 140 }
  0x1b   : > { %s267_s26 = sand.u32 1, %s1756_s12   ;;  %s285_s27 = sand.u32 1, %s1669_s30   ;;  %v349_v4 = vlaneseq  ;;  %v1687_v5 = vmov 0.0  }
  0x1c   : > { %s1793_s28 = sshll.u32 %s267_s26, 1  ;;  %s1795_s18 = sshll.u32 %s285_s27, 1  ;;  %344 = vst [vmem:[#allocation12] sm:$0xff] %v1687_v5  ;;  %345 = vst [vmem:[#allocation14] sm:$0xff] %v1687_v5 }
  0x1d   : > { %346 = vst [vmem:[#allocation16] sm:$0xff] %v1687_v5  ;;  %347 = vst [vmem:[#allocation18] sm:$0xff] %v1687_v5  ;;  %v1797_v6 = vand.u32 127, %v349_v4  ;;  %v1799_v7 = vshrl.u32 %v349_v4, 7  ;;  %s269_s11 = scalar_lea.vmem [#allocation1], %s1793_s28  ;;  %s273_s30 = scalar_lea.vmem [#allocation3], %s1793_s28 }
  0x1e   : > { %v313_v8 = vld [vmem:[%s269_s11] sm:$0x3]  ;;  %v318_v9 = vld [vmem:[%s273_s30] sm:$0x3]  ;;  %s277_s21 = scalar_lea.vmem [#allocation5], %s1793_s28  ;;  %s281_s22 = scalar_lea.vmem [#allocation7], %s1793_s28 }
  0x1f   : > { %314 = vst [vmem:[#allocation0] sm:$0x3] %v313_v8  ;;  %319 = vst [vmem:[#allocation2] sm:$0x3] %v318_v9  ;;  %v323_v10 = vld [vmem:[%s277_s21] sm:$0x3]  ;;  %v351_v6 = vmov %v1797_v6  ;;  %v354_v7 = vmov %v1799_v7 }
  0x20   : > { %v328_v11 = vld [vmem:[%s281_s22] sm:$0x3]  ;;  %324 = vst [vmem:[#allocation4] sm:$0x3] %v323_v10  ;;  %v364_v6 = vmov %v1797_v6  ;;  %v367_v7 = vmov %v1799_v7  ;;  %s332_s29 = smov [#allocation20]  ;;  %s335_s14 = smov [#allocation21]  ;;  %vm358_vm0 = vcmp.eq.s32.totalorder %v354_v7, %v351_v6 }
  0x21   : > { %329 = vst [vmem:[#allocation6] sm:$0x3] %v328_v11  ;;  %vm371_vm1 = vcmp.eq.s32.totalorder %v367_v7, %v364_v6  ;;  %s348_s15 = smov [#allocation12]  ;;  %s361_s16 = smov [#allocation18]  ;;  %vm1427_vm2 = vcmp.lt.s32.totalorder %v1797_v6, 2  ;;  %v1419_v6 = vmov %v1797_v6  ;;  %v1422_v7 = vmov %v1799_v7 }
  0x22   : > { %s338_s17 = smov [#allocation22]  ;;  %s341_s20 = smov [#allocation23]  ;;  %vm1432_vm3 = vcmp.eq.s32.totalorder %v1422_v7, %v1419_v6  ;;  %v1470_v6 = vmov %v1797_v6  ;;  %v1439_v7 = vmov %v1799_v7 }
  0x23   : > { %v355_v12 = vld [vmem:[%s348_s15] sm:$0x3]  ;;  %s1423_s30 = smov [#allocation20]  ;;  %s1440_s21 = smov [#allocation21]  ;;  %v1436_v6 = vmov %v1797_v6  ;;  %v1473_v7 = vmov %v1799_v7 }
  0x24   : > { %v368_v13 = vld [vmem:[%s361_s16] sm:$0x3]  ;;  %v359_v16 = vsel %vm358_vm0, 1.0, %v355_v12  ;;  %s1457_s22 = smov [#allocation22]  ;;  %v1453_v6 = vmov %v1797_v6  ;;  %v1456_v7 = vmov %v1799_v7  ;;  %vm1483_vm4 = vcmp.eq.s32.totalorder %v1473_v7, %v1470_v6 }
  0x25   : > { %v372_v17 = vsel %vm371_vm1, 1.0, %v368_v13  ;;  %360 = vst [vmem:[%s348_s15] sm:$0x3] %v359_v16 }
  0x26   : > { %v333_v14 = vld [vmem:[#allocation0] sm:$0xff]  ;;  %v336_v15 = vld [vmem:[#allocation2] sm:$0xff]  ;;  %373 = vst [vmem:[%s361_s16] sm:$0x3] %v372_v17 }
  0x27   : > { %334 = vst [vmem:[%s332_s29] sm:$0xff] %v333_v14  ;;  %337 = vst [vmem:[%s335_s14] sm:$0xff] %v336_v15  ;;  %v339_v18 = vld [vmem:[#allocation4] sm:$0xff]  ;;  %s1474_s29 = smov [#allocation23] }
  0x28   : > { %v342_v19 = vld [vmem:[#allocation6] sm:$0xff]  ;;  %340 = vst [vmem:[%s338_s17] sm:$0xff] %v339_v18 }
  0x29   : > { %343 = vst [vmem:[%s341_s20] sm:$0xff] %v342_v19 }
  0x2e   : > { %v1429_v20 = vld [vmem:[%s1423_s30] sm:$0x3] }
  0x2f   : > { %v1446_v21 = vld [vmem:[%s1440_s21] sm:$0x3]  ;;  %v1430_v22 = vsel %vm1427_vm2, %v1429_v20, 0.0 }
  0x30   : > { %v1447_v23 = vsel %vm1427_vm2, %v1446_v21, 0.0  ;;  %v1463_v24 = vld [vmem:[%s1457_s22] sm:$0x3]  ;;  %v1431_v26 = vmul.f32 %v1430_v22, %v1430_v22 }
  0x31   : > { %v1480_v25 = vld [vmem:[%s1474_s29] sm:$0x3]  ;;  %v1448_v27 = vmul.f32 %v1447_v23, %v1447_v23  ;;  %v1464_v28 = vsel %vm1427_vm2, %v1463_v24, 0.0 }
  0x32   : > { %v1481_v29 = vsel %vm1427_vm2, %v1480_v25, 0.0  ;;  %v1465_v30 = vmul.f32 %v1464_v28, %v1464_v28  ;;  %v1433_v33 = vsel %vm1432_vm3, 0.0, %v1431_v26 }
  0x33   : > { %v1450_v31 = vadd.f32 %v1448_v27, %v1431_v26  ;;  %v1482_v32 = vmul.f32 %v1481_v29, %v1481_v29  ;;  %v1449_v34 = vadd.f32 %v1448_v27, %v1433_v33 }
  0x35   : > { %v1467_v35 = vadd.f32 %v1465_v30, %v1450_v31  ;;  %v1466_v36 = vadd.f32 %v1465_v30, %v1449_v34  ;;  %v1484_v37 = vsel %vm1483_vm4, 0.0, %v1482_v32 }
  0x37   : > { %v1486_v38 = vadd.f32 %v1482_v32, %v1467_v35  ;;  %v1485_v39 = vadd.f32 %v1484_v37, %v1466_v36 }
  0x39   : > { %1487 = vadd.xlane.f32.xlu0 %v1486_v38 }
  0x3d   : > { %1495 = vadd.xlane.f32.xlu0 %v1485_v39 }
  0xc2   : > { %v1488_v40 = vpop.xlane.xlu0 %1487 }
  0xc3   : > { %v1489_v41 = vrot.slane %v1488_v40, 4 }
  0xc5   : > { %v1490_v42 = vadd.f32 %v1489_v41, %v1488_v40 }
  0xc6   : > { %v1496_v43 = vpop.xlane.xlu0 %1495 }
  0xc7   : > { %v1491_v44 = vrot.slane %v1490_v42, 2  ;;  %v1497_v45 = vrot.slane %v1496_v43, 4 }
  0xc9   : > { %v1498_v46 = vadd.f32 %v1497_v45, %v1496_v43  ;;  %v1492_v47 = vadd.f32 %v1491_v44, %v1490_v42 }
  0xcb   : > { %v1499_v48 = vrot.slane %v1498_v46, 2  ;;  %v1493_v50 = vrot.slane %v1492_v47, 1 }
  0xcd   : > { %v1500_v49 = vadd.f32 %v1499_v48, %v1498_v46  ;;  %v1494_v53 = vadd.f32 %v1493_v50, %v1492_v47 }
  0xcf   : > { %v1501_v51 = vrot.slane %v1500_v49, 1 }
  0xd1   : > { %v1502_v52 = vadd.f32 %v1501_v51, %v1500_v49 }
  0xd3   : > { %1588 = vpush %v1502_v52 }
  0xd4   : > { %1590 = vpush %v1494_v53 }
 0x104   : > { %s1589_s14 = spop %1588 }
 0x105   : > { %s1591_s15 = spop %1590 }
 0x106   : > { %s1505_s16 = smul.f32 1e-10, %s1591_s15 }
 0x108   : > { %p1506_p8 = scmp.le.f32.partialorder %s1589_s14, %s1505_s16 }
 0x109   : > { %s1833_s17 = smov (!%p1506_p8), 0  }
 0x10a   : > { %1509 = sbr.rel (%p1506_p8) target bundleno = 948 (0x3b4), region = 467 }
 0x10f LB: >> { %s1838_s20 = smov 0   ;;  %s1681_s17 = sphi %s1833_s17, %s2078_s17  }
 0x110 LB: >>> { %s478_s30 = smov [#allocation20]  ;;  %v482_v6 = vmov %v1797_v6  ;;  %v485_v7 = vmov %v1799_v7  ;;  %s498_s21 = smov [#allocation21]  ;;  %vm801_vm14 = vcmp.eq.s32.totalorder %v1799_v7, 0  ;;  %vm813_vm15 = vcmp.eq.s32.totalorder %v1799_v7, 1  ;;  %s1685_s20 = sphi %s1838_s20, %s477_s20  }
 0x111   : >>> { %v502_v6 = vmov %v1797_v6  ;;  %v505_v7 = vmov %v1799_v7  ;;  %v486_v54 = vld [vmem:[%s478_s30] sm:$0x3]  ;;  %vm489_vm5 = vcmp.eq.s32.totalorder %v485_v7, %v482_v6  ;;  %s518_s22 = smov [#allocation23]  ;;  %s479_s29 = smov [#allocation24] }
 0x112   : >>> { %vm509_vm6 = vcmp.eq.s32.totalorder %v505_v7, %v502_v6  ;;  %v522_v6 = vmov %v1797_v6  ;;  %v525_v7 = vmov %v1799_v7  ;;  %v490_v55 = vsel %vm489_vm5, %v486_v54, 0.0  ;;  %v506_v56 = vld [vmem:[%s498_s21] sm:$0x3]  ;;  %s499_s14 = smov [#allocation25]  ;;  %s519_s15 = smov [#allocation26] }
 0x113   : >>> { %vm529_vm7 = vcmp.eq.s32.totalorder %v525_v7, %v522_v6  ;;  %v491_v57 = vrot.slane %v490_v55, 4  ;;  %v510_v58 = vsel %vm509_vm6, %v506_v56, 0.0  ;;  %v526_v59 = vld [vmem:[%s518_s22] sm:$0x3]  ;;  %s542_s16 = smov [#allocation25]  ;;  %s540_s30 = smov [#allocation24]  ;;  %v591_v6 = vmov %v1797_v6 }
 0x114   : >>> { %v511_v60 = vrot.slane %v510_v58, 4  ;;  %v530_v61 = vsel %vm529_vm7, %v526_v59, 0.0  ;;  %s544_s21 = smov [#allocation26]  ;;  %s579_s22 = smov [#allocation27]  ;;  %v594_v7 = vmov %v1799_v7  ;;  %v606_v6 = vmov %v1797_v6 }
 0x115   : >>> { %v492_v62 = vadd.f32 %v491_v57, %v490_v55  ;;  %v531_v63 = vrot.slane %v530_v61, 4  ;;  %v609_v7 = vmov %v1799_v7  ;;  %vm596_vm12 = vcmp.eq.s32.totalorder %v594_v7, %v591_v6  ;;  %s1857_s24 = smov [#allocation22]  ;;  %s1863_s23 = smov [#allocation14] }
 0x116   : >>> { %v512_v0 = vadd.f32 %v511_v60, %v510_v58  ;;  %vm611_vm13 = vcmp.eq.s32.totalorder %v609_v7, %v606_v6  ;;  %s841_s11 = smov [#allocation31]  ;;  %s1869_s27 = smov [#allocation18]  ;;  %v627_v55 = vld [vmem:[%s1857_s24] sm:$0x3]  ;;  %v704_v6 = vmov %v1797_v6  ;;  %v707_v7 = vmov %v1799_v7 }
 0x117   : >>> { %v493_v1 = vrot.slane %v492_v62, 2  ;;  %v532_v2 = vadd.f32 %v531_v63, %v530_v61  ;;  %v850_v58 = vld [vmem:[%s1863_s23] sm:$0x3]  ;;  %s619_s26 = smov [#allocation32]  ;;  %s843_s25 = smov [#allocation32]  ;;  %v718_v6 = vmov %v1797_v6  ;;  %v721_v7 = vmov %v1799_v7 }
 0x118   : >>> { %v513_v3 = vrot.slane %v512_v0, 2  ;;  %v852_v61 = vld [vmem:[%s1869_s27] sm:$0x3]  ;;  %vm711_vm0 = vcmp.eq.s32.totalorder %v707_v7, %v704_v6  ;;  %v677_v6 = vmov %v1797_v6  ;;  %v680_v7 = vmov %v1799_v7  ;;  %s477_s20 = sadd.s32 1, %s1685_s20  }
 0x119   : >>> { %v494_v4 = vadd.f32 %v493_v1, %v492_v62  ;;  %v533_v5 = vrot.slane %v532_v2, 2  ;;  %v691_v6 = vmov %v1797_v6  ;;  %v694_v7 = vmov %v1799_v7  ;;  %p474_p9 = scmp.ge.s32.totalorder %s477_s20, 3  }
 0x11a   : >>> { %v514_v8 = vadd.f32 %v513_v3, %v512_v0  ;;  %vm726_vm1 = vcmp.eq.s32.totalorder %v721_v7, %v718_v6  ;;  %vm685_vm3 = vcmp.eq.s32.totalorder %v680_v7, %v677_v6  ;;  %vm698_vm4 = vcmp.eq.s32.totalorder %v694_v7, %v691_v6 }
 0x11b   : >>> { %v495_v9 = vrot.slane %v494_v4, 1  ;;  %v534_v10 = vadd.f32 %v533_v5, %v532_v2  ;;  %vm740_vm5 = vcmp.eq.s32.totalorder %v1797_v6, 0  ;;  %vm744_vm6 = vcmp.eq.s32.totalorder %v1797_v6, 1 }
 0x11c   : >>> { %v515_v11 = vrot.slane %v514_v8, 1  ;;  %v378_v6 = vmov (%p474_p9), %v1797_v6  ;;  %v381_v7 = vmov (%p474_p9), %v1799_v7 }
 0x11d   : >>> { %v496_v12 = vadd.f32 %v495_v9, %v494_v4  ;;  %v535_v13 = vrot.slane %v534_v10, 1  ;;  %v431_v6 = vmov (%p474_p9), %v1797_v6  ;;  %vm393_vm7 = vcmp.eq.s32.totalorder (%p474_p9), %v381_v7, %v378_v6 }
 0x11e   : >>> { %v516_v14 = vadd.f32 %v515_v11, %v514_v8  ;;  %v434_v7 = vmov (%p474_p9), %v1799_v7  ;;  %v397_v6 = vmov (%p474_p9), %v1797_v6 }
 0x11f   : >>> { %497 = vst [vmem:[%s479_s29] sm:$0x1] %v496_v12  ;;  %v536_v15 = vadd.f32 %v535_v13, %v534_v10  ;;  %s581_s29 = smov [#allocation28]  ;;  %v400_v7 = vmov (%p474_p9), %v1799_v7  ;;  %v414_v6 = vmov (%p474_p9), %v1797_v6 }
 0x120   : >>> { %517 = vst [vmem:[%s499_s14] sm:$0x1] %v516_v14  ;;  %s538_s14 = smov [#allocation29]  ;;  %v417_v7 = vmov (%p474_p9), %v1799_v7 }
 0x121   : >>> { %537 = vst [vmem:[%s519_s15] sm:$0x1] %v536_v15  ;;  %s539_s15 = smov [#allocation30]  ;;  %s583_s14 = smov %s538_s14 }
 0x122   : >>> { %s585_s15 = smov %s539_s15 }
 0x126   : >>> { %v541_v18 = vld [vmem:[%s540_s30] sm:$0xff]  ;;  %s602_s30 = smov [#allocation30] }
 0x127   : >>> { %v543_v16 = vld [vmem:[%s542_s16] sm:$0xff]  ;;  %v564_v33 = vand.u32 2147483647, %v541_v18  ;;  %s587_s16 = smov [#allocation29] }
 0x128   : >>> { %v547_v17 = vmul.f32 2.0, %v543_v16  ;;  %v545_v19 = vld [vmem:[%s544_s21] sm:$0xff]  ;;  %v565_v36 = vand.u32 2147483647, %v543_v16  ;;  %s600_s21 = smov [#allocation31] }
 0x129   : >>> { %v546_v20 = vsub.f32 %v545_v19, %v541_v18  ;;  %v566_v34 = vand.u32 2147483647, %v545_v19 }
 0x12a   : >>> { %1639 = vrcp.f32 %v547_v17 }
 0x12b   : >>> { %v567_v35 = vmin.f32 %v564_v33, %v566_v34 }
 0x12d   : >>> { %v568_v37 = vmul.f32 1.1920929e-08, %v567_v35 }
 0x12f   : >>> { %vm569_vm11 = vcmp.le.f32.partialorder %v565_v36, %v568_v37 }
 0x137   : >>> { %v1640_v21 = vpop.eup %1639 }
 0x138   : >>> { %v549_v22 = vmul.f32 %v1640_v21, %v546_v20 }
 0x13a   : >>> { %v551_v23 = vmul.f32 %v549_v22, %v549_v22  ;;  %vm550_vm10 = vcmp.ge.f32.partialorder %v549_v22, 0.0 }
 0x13c   : >>> { %v552_v24 = vadd.f32 1.0, %v551_v23 }
 0x13e   : >>> { %1641 = vrsqrt.f32 %v552_v24  ;;  %vm555_vm8 = vcmp.eq.f32.partialorder %v552_v24, inf  ;;  %v558_v26 = vand.u32 2147483648, %v552_v24  ;;  %vm557_vm9 = vcmp.eq.f32.partialorder %v552_v24, 0.0 }
 0x14b   : >>> { %v1642_v25 = vpop.eup %1641 }
 0x14c   : >>> { %v554_v27 = vmul.f32 %v1642_v25, %v552_v24 }
 0x14e   : >>> { %v556_v28 = vsel %vm555_vm8, %v552_v24, %v554_v27  ;;  %vm446_vm8 = vcmp.eq.s32.totalorder (%p474_p9), %v434_v7, %v431_v6 }
 0x14f   : >>> { %v559_v29 = vsel %vm557_vm9, %v558_v26, %v556_v28 }
 0x150   : >>> { %v560_v30 = vxor.u32 2147483648, %v559_v29 }
 0x152   : >>> { %v561_v31 = vsel %vm550_vm10, %v559_v29, %v560_v30 }
 0x153   : >>> { %v562_v32 = vadd.f32 %v561_v31, %v549_v22 }
 0x155   : >>> { %1643 = vrcp.f32 %v562_v32 }
 0x162   : >>> { %v1644_v38 = vpop.eup %1643 }
 0x163   : >>> { %v570_v39 = vsel %vm569_vm11, 0.0, %v1644_v38 }
 0x164   : >>> { %v571_v40 = vmul.f32 %v570_v39, %v570_v39  ;;  %v575_v41 = vmul.f32 %v570_v39, %v543_v16 }
 0x166   : >>> { %v572_v42 = vadd.f32 1.0, %v571_v40  ;;  %v576_v43 = vsub.f32 %v541_v18, %v575_v41  ;;  %v578_v44 = vadd.f32 %v575_v41, %v545_v19 }
 0x168   : >>> { %1645 = vrsqrt.f32 %v572_v42  ;;  %580 = vst [vmem:[%s579_s22] sm:$0xff] %v576_v43  ;;  %582 = vst [vmem:[%s581_s29] sm:$0xff] %v578_v44  ;;  %s617_s22 = smov [#allocation31]  ;;  %s1853_s29 = smov [#allocation20] }
 0x169   : >>> { %v625_v53 = vld [vmem:[%s1853_s29] sm:$0x3] }
 0x175   : >>> { %v1646_v45 = vpop.eup %1645 }
 0x176   : >>> { %584 = vst [vmem:[%s583_s14] sm:$0xff] %v1646_v45  ;;  %v574_v46 = vmul.f32 %v1646_v45, %v570_v39  ;;  %s615_s14 = smov [#allocation32] }
 0x178   : >>> { %586 = vst [vmem:[%s585_s15] sm:$0xff] %v574_v46  ;;  %s1855_s15 = smov [#allocation21] }
 0x179   : >>> { %v626_v54 = vld [vmem:[%s1855_s15] sm:$0x3] }
 0x17d   : >>> { %v588_v47 = vld [vmem:[%s587_s16] ss:$0 sm:$0xff]  ;;  %s1859_s16 = smov [#allocation23] }
 0x17e   : >>> { %v597_v48 = vsel %vm596_vm12, %v588_v47, 0.0  ;;  %v628_v56 = vld [vmem:[%s1859_s16] sm:$0x3] }
 0x17f   : >>> { %598 = vadd.xlane.f32.xlu0 %v597_v48  ;;  %v603_v49 = vld [vmem:[%s602_s30] ss:$0 sm:$0xff]  ;;  %s1861_s30 = smov [#allocation12] }
 0x180   : >>> { %v612_v50 = vsel %vm611_vm13, %v603_v49, 0.0  ;;  %v849_v57 = vld [vmem:[%s1861_s30] sm:$0x3] }
 0x183   : >>> { %613 = vadd.xlane.f32.xlu0 %v612_v50 }
 0x208   : >>> { %v599_v51 = vpop.xlane.xlu0 %598 }
 0x209   : >>> { %601 = vst [vmem:[%s600_s21] sm:$0xff] %v599_v51  ;;  %s1865_s21 = smov [#allocation16] }
 0x20a   : >>> { %v851_v59 = vld [vmem:[%s1865_s21] sm:$0x3] }
 0x20c   : >>> { %v614_v52 = vpop.xlane.xlu0 %613 }
 0x20d   : >>> { %616 = vst [vmem:[%s615_s14] sm:$0xff] %v614_v52  ;;  %s1889_s14 = smov [#allocation23] }
 0x210   : >>> { %v618_v60 = vld [vmem:[%s617_s22] sm:$0xff]  ;;  %s1887_s22 = smov [#allocation22] }
 0x211   : >>> { %v842_v62 = vld [vmem:[%s841_s11] sm:$0xff]  ;;  %v629_v63 = vmul.f32 %v625_v53, %v618_v60  ;;  %v632_v0 = vmul.f32 %v626_v54, %v618_v60  ;;  %v636_v1 = vmul.f32 %v627_v55, %v618_v60  ;;  %v639_v2 = vmul.f32 %v628_v56, %v618_v60  ;;  %s1885_s11 = smov [#allocation12] }
 0x212   : >>> { %v853_v3 = vmul.f32 %v849_v57, %v842_v62  ;;  %v856_v4 = vmul.f32 %v850_v58, %v842_v62  ;;  %v860_v5 = vmul.f32 %v851_v59, %v842_v62  ;;  %v863_v8 = vmul.f32 %v852_v61, %v842_v62 }
 0x214   : >>> { %v620_v9 = vld [vmem:[%s619_s26] sm:$0xff]  ;;  %s647_s26 = smov [#allocation30] }
 0x215   : >>> { %v844_v10 = vld [vmem:[%s843_s25] sm:$0xff]  ;;  %v630_v11 = vmul.f32 %v627_v55, %v620_v9  ;;  %v633_v12 = vmul.f32 %v628_v56, %v620_v9  ;;  %v635_v13 = vmul.f32 %v625_v53, %v620_v9  ;;  %v638_v14 = vmul.f32 %v626_v54, %v620_v9  ;;  %s645_s25 = smov [#allocation29] }
 0x216   : >>> { %v854_v15 = vmul.f32 %v851_v59, %v844_v10  ;;  %v857_v16 = vmul.f32 %v852_v61, %v844_v10  ;;  %v859_v17 = vmul.f32 %v849_v57, %v844_v10  ;;  %v862_v18 = vmul.f32 %v850_v58, %v844_v10  ;;  %v646_v27 = vld [vmem:[%s645_s25] ss:$0 sm:$0xff]  ;;  %s674_s25 = smov [#allocation27] }
 0x217   : >>> { %v631_v19 = vsub.f32 %v629_v63, %v630_v11  ;;  %v634_v20 = vsub.f32 %v632_v0, %v633_v12  ;;  %v637_v21 = vadd.f32 %v636_v1, %v635_v13  ;;  %v640_v22 = vadd.f32 %v639_v2, %v638_v14  ;;  %v648_v28 = vld [vmem:[%s647_s26] ss:$0 sm:$0xff]  ;;  %s673_s26 = smov [#allocation20] }
 0x218   : >>> { %v855_v23 = vsub.f32 %v853_v3, %v854_v15  ;;  %v858_v24 = vsub.f32 %v856_v4, %v857_v16  ;;  %v861_v25 = vadd.f32 %v860_v5, %v859_v17  ;;  %v864_v26 = vadd.f32 %v863_v8, %v862_v18  ;;  %v681_v63 = vld [vmem:[%s674_s25] ss:$0 sm:$0xff]  ;;  %s917_s25 = sadd.s32 (%p474_p9), 1, %s1681_s17  }
 0x219   : >>> { %642 = vst [vmem:[%s1855_s15] sm:$0x3] %v634_v20  ;;  %644 = vst [vmem:[%s1859_s16] sm:$0x3] %v640_v22  ;;  %s1891_s15 = smov [#allocation20]  ;;  %s715_s16 = smov [#allocation28] }
 0x21a   : >>> { %641 = vst [vmem:[%s1853_s29] sm:$0x3] %v631_v19  ;;  %643 = vst [vmem:[%s1857_s24] sm:$0x3] %v637_v21  ;;  %s1893_s24 = smov [#allocation16]  ;;  %s1901_s29 = smov [#allocation21]  ;;  %v722_v59 = vld [vmem:[%s715_s16] ss:$0 sm:$0xff] }
 0x21b   : >>> { %865 = vst [vmem:[%s1861_s30] sm:$0x3] %v855_v23  ;;  %866 = vst [vmem:[%s1863_s23] sm:$0x3] %v858_v24  ;;  %s1895_s23 = smov [#allocation14]  ;;  %s701_s30 = smov [#allocation22] }
 0x21c   : >>> { %867 = vst [vmem:[%s1865_s21] sm:$0x3] %v861_v25  ;;  %868 = vst [vmem:[%s1869_s27] sm:$0x3] %v864_v26  ;;  %s1899_s27 = smov [#allocation18]  ;;  %s714_s21 = smov [#allocation23] }
 0x21d   : >>> { %s817_s16 = smov [#allocation21]  ;;  %p470_p10 = scmp.ge.s32.totalorder (%p474_p9), %s917_s25, 15 }
 0x21e   : >> { %s2078_s17 = smov (%p474_p9), %s917_s25 }
 0x220   : >>> { %v656_v30 = vld [vmem:[%s1889_s14] sm:$0x3] }
 0x221   : >>> { %v655_v29 = vld [vmem:[%s1887_s22] sm:$0x3]  ;;  %v664_v36 = vmul.f32 %v656_v30, %v648_v28  ;;  %v667_v42 = vmul.f32 %v656_v30, %v646_v27 }
 0x222   : >>> { %v653_v31 = vld [vmem:[%s1891_s15] sm:$0x3]  ;;  %v663_v35 = vmul.f32 %v655_v29, %v646_v27  ;;  %v666_v37 = vmul.f32 %v655_v29, %v648_v28 }
 0x223   : >>> { %v871_v32 = vld [vmem:[%s1885_s11] ss:$0 sm:$0xff]  ;;  %v1567_v34 = vld [vmem:[%s1885_s11 + $0x1] ss:$0 sm:$0xff]  ;;  %v657_v48 = vmul.f32 %v653_v31, %v646_v27  ;;  %v660_v49 = vmul.f32 %v653_v31, %v648_v28 }
 0x224   : >>> { %v1566_v33 = vld [vmem:[%s1885_s11 - $0x1] sm:$0x2]  ;;  %v1569_v40 = vld [vmem:[%s1893_s24 + $0x1] sm:$0x1]  ;;  %v665_v47 = vsub.f32 %v663_v35, %v664_v36  ;;  %v668_v53 = vadd.f32 %v667_v42, %v666_v37 }
 0x225   : >>> { %v878_v38 = vsel %vm801_vm14, %v871_v32, %v1566_v33  ;;  %v882_v39 = vld [vmem:[%s1893_s24] ss:$0 sm:$0xff]  ;;  %v890_v43 = vsel %vm813_vm15, %v1567_v34, %v1569_v40  ;;  %v1571_v45 = vld [vmem:[%s1895_s23 + $0x1] ss:$0 sm:$0xff] }
 0x226   : >>> { %v895_v41 = vld [vmem:[%s1895_s23] ss:$0 sm:$0xff]  ;;  %881 = vst [vmem:[%s1885_s11] sm:$0x3] %v878_v38  ;;  %892 = vst [vmem:[%s1893_s24] sm:$0x3] %v890_v43  ;;  %v1573_v51 = vld [vmem:[%s1899_s27 + $0x1] sm:$0x1] }
 0x227   : >>> { %v1570_v44 = vld [vmem:[%s1895_s23 - $0x1] sm:$0x2]  ;;  %1568 = vst [vmem:[%s1885_s11 + $0x1] sm:$0x1] %v882_v39  ;;  %v914_v54 = vsel %vm813_vm15, %v1571_v45, %v1573_v51  ;;  %671 = vst [vmem:[%s1887_s22] sm:$0x3] %v665_v47  ;;  %s688_s11 = smov [#allocation21] }
 0x228   : >>> { %v906_v46 = vld [vmem:[%s1899_s27] ss:$0 sm:$0xff]  ;;  %v902_v50 = vsel %vm801_vm14, %v895_v41, %v1570_v44  ;;  %672 = vst [vmem:[%s1889_s14] sm:$0x3] %v668_v53  ;;  %s1943_s22 = smov [#allocation22]  ;;  %s1688_s14 = smov 1  }
 0x229   : >>> { %v654_v52 = vld [vmem:[%s1901_s29] sm:$0x3]  ;;  %905 = vst [vmem:[%s1895_s23] sm:$0x3] %v902_v50  ;;  %916 = vst [vmem:[%s1899_s27] sm:$0x3] %v914_v54  ;;  %s730_s24 = smov [#allocation21]  ;;  %s1946_s27 = smov [#allocation23] }
 0x22a   : >>> { %v658_v55 = vmul.f32 %v654_v52, %v648_v28  ;;  %v661_v56 = vmul.f32 %v654_v52, %v646_v27  ;;  %1572 = vst [vmem:[%s1895_s23 + $0x1] sm:$0x1] %v906_v46  ;;  %s1689_s23 = smov 127  }
 0x22c   : >>> { %v659_v57 = vsub.f32 %v657_v48, %v658_v55  ;;  %v662_v58 = vadd.f32 %v661_v56, %v660_v49 }
 0x22e   : >>> { %669 = vst [vmem:[%s1891_s15] sm:$0x3] %v659_v57  ;;  %670 = vst [vmem:[%s1901_s29] sm:$0x3] %v662_v58  ;;  %v708_v60 = vld [vmem:[%s701_s30] sm:$0x3]  ;;  %s729_s15 = smov [#allocation20]  ;;  %s793_s29 = smov [#allocation20] }
 0x22f   : >>> { %v712_v61 = vsel %vm711_vm0, 0.0, %v708_v60  ;;  %v723_v62 = vld [vmem:[%s714_s21] sm:$0x3] }
 0x230   : >>> { %713 = vst [vmem:[%s701_s30] sm:$0x3] %v712_v61  ;;  %v727_v0 = vsel %vm726_vm1, %v722_v59, %v723_v62  ;;  %s794_s30 = smov [#allocation22] }
 0x231   : >>> { %728 = vst [vmem:[%s714_s21] sm:$0x3] %v727_v0  ;;  %s818_s21 = smov [#allocation23] }
 0x235   : >>> { %v682_v1 = vld [vmem:[%s673_s26] sm:$0x3] }
 0x236   : >>> { %v695_v2 = vld [vmem:[%s688_s11] sm:$0x3]  ;;  %v686_v3 = vsel %vm685_vm3, %v681_v63, %v682_v1 }
 0x237   : >>> { %v699_v4 = vsel %vm698_vm4, 0.0, %v695_v2  ;;  %687 = vst [vmem:[%s673_s26] sm:$0x3] %v686_v3  ;;  %v767_v5 = vld [vmem:[%s1943_s22] sm:$0x3]  ;;  %s382_s26 = smov (%p474_p9), [#allocation20] }
 0x238   : >>> { %700 = vst [vmem:[%s688_s11] sm:$0x3] %v699_v4  ;;  %768 = vrot.lane.b32.xlu0 %v767_v5, %s1688_s14  ;;  %v763_v11 = vld [vmem:[%s1946_s27] sm:$0x3]  ;;  %s401_s11 = smov (%p474_p9), [#allocation21] }
 0x239   : >>> { %v784_v12 = vld [vmem:[%s1946_s27] sm:$0x3] }
 0x23a   : >>> { %v766_v30 = vld [vmem:[%s1943_s22] sm:$0x3] }
 0x23e   : >>> { %v735_v8 = vld [vmem:[%s729_s15] sm:$0x3] }
 0x23f   : >>> { %736 = vrot.lane.b32.xlu1 %v735_v8, %s1688_s14  ;;  %v731_v9 = vld [vmem:[%s730_s24] sm:$0x3] }
 0x240   : >>> { %v752_v10 = vld [vmem:[%s730_s24] sm:$0x3] }
 0x241   : >>> { %v734_v18 = vld [vmem:[%s729_s15] sm:$0x3] }
 0x243   : >>> { %732 = vrot.lane.b32.xlu1 %v731_v9, %s1688_s14 }
 0x247   : >>> { %753 = vrot.lane.b32.xlu1 %v752_v10, %s1689_s23 }
 0x24b   : >>> { %764 = vrot.lane.b32.xlu1 %v763_v11, %s1688_s14  ;;  %s435_s14 = smov (%p474_p9), [#allocation23] }
 0x24f   : >>> { %785 = vrot.lane.b32.xlu1 %v784_v12, %s1689_s23 }
 0x2aa   : >>> { %v769_v20 = vpop.permute.xlu0 %768 }
 0x2ab   : >>> { %v773_v22 = vsel %vm740_vm5, %v767_v5, %v769_v20 }
 0x2b1   : >>> { %v737_v13 = vpop.permute.xlu1 %736 }
 0x2b2   : >>> { %v741_v14 = vsel %vm740_vm5, %v735_v8, %v737_v13 }
 0x2b5   : >>> { %v733_v15 = vpop.permute.xlu1 %732 }
 0x2b6   : >>> { %v745_v16 = vsel %vm744_vm6, %v733_v15, %v741_v14 }
 0x2b7   : >>> { %v751_v17 = vsel %vm1427_vm2, %v745_v16, 0.0 }
 0x2b8   : >>> { %759 = vst [vmem:[%s729_s15] sm:$0x3] %v751_v17 }
 0x2b9   : >>> { %v754_v19 = vpop.permute.xlu1 %753 }
 0x2ba   : >>> { %v758_v21 = vsel %vm744_vm6, %v734_v18, %v754_v19 }
 0x2bb   : >>> { %760 = vst [vmem:[%s730_s24] sm:$0x3] %v758_v21 }
 0x2bd   : >>> { %v765_v23 = vpop.permute.xlu1 %764 }
 0x2be   : >>> { %v777_v24 = vsel %vm744_vm6, %v765_v23, %v773_v22 }
 0x2bf   : >>> { %v795_v25 = vld [vmem:[%s793_s29] ss:$0 sm:$0xff]  ;;  %v1559_v27 = vld [vmem:[%s793_s29 + $0x1] ss:$0 sm:$0xff]  ;;  %v783_v29 = vsel %vm1427_vm2, %v777_v24, 0.0 }
 0x2c0   : >>> { %v1558_v26 = vld [vmem:[%s793_s29 - $0x1] sm:$0x2]  ;;  %791 = vst [vmem:[%s1943_s22] sm:$0x3] %v783_v29  ;;  %s418_s22 = smov (%p474_p9), [#allocation22] }
 0x2c1   : >>> { %v802_v28 = vsel %vm801_vm14, %v795_v25, %v1558_v26  ;;  %v786_v31 = vpop.permute.xlu1 %785 }
 0x2c2   : >>> { %805 = vst [vmem:[%s793_s29] sm:$0x3] %v802_v28  ;;  %v819_v32 = vld [vmem:[%s817_s16] ss:$0 sm:$0xff]  ;;  %v1563_v34 = vld [vmem:[%s817_s16 + $0x1] ss:$0 sm:$0xff]  ;;  %v790_v35 = vsel %vm744_vm6, %v766_v30, %v786_v31 }
 0x2c3   : >>> { %v1562_v33 = vld [vmem:[%s817_s16 - $0x1] sm:$0x2]  ;;  %792 = vst [vmem:[%s1946_s27] sm:$0x3] %v790_v35 }
 0x2c4   : >>> { %v826_v36 = vsel %vm801_vm14, %v819_v32, %v1562_v33 }
 0x2c5   : >>> { %829 = vst [vmem:[%s817_s16] sm:$0x3] %v826_v36 }
 0x2c7   : >>> { %v806_v37 = vld [vmem:[%s794_s30] ss:$0 sm:$0xff]  ;;  %v1561_v38 = vld [vmem:[%s794_s30 + $0x1] sm:$0x1] }
 0x2c8   : >>> { %1560 = vst [vmem:[%s793_s29 + $0x1] sm:$0x1] %v806_v37  ;;  %v814_v39 = vsel %vm813_vm15, %v1559_v27, %v1561_v38 }
 0x2c9   : >>> { %816 = vst [vmem:[%s794_s30] sm:$0x3] %v814_v39 }
 0x2ca   : >>> { %v830_v40 = vld [vmem:[%s818_s21] ss:$0 sm:$0xff]  ;;  %v1565_v41 = vld [vmem:[%s818_s21 + $0x1] sm:$0x1] }
 0x2cb   : >>> { %1564 = vst [vmem:[%s817_s16 + $0x1] sm:$0x1] %v830_v40  ;;  %v838_v42 = vsel %vm813_vm15, %v1563_v34, %v1565_v41 }
 0x2cc   : >>> { %840 = vst [vmem:[%s818_s21] sm:$0x3] %v838_v42  ;;  %476 = sbr.rel (!%p474_p9) target bundleno = 272 (0x110), region = 462 }
 0x2cf   : >> { %v388_v43 = vld [vmem:[%s382_s26] sm:$0x3] (%p474_p9) }
 0x2d0   : >> { %v389_v45 = vsel (%p474_p9), %vm1427_vm2, %v388_v43, 0.0  ;;  %v424_v47 = vld [vmem:[%s418_s22] sm:$0x3] (%p474_p9) }
 0x2d1   : >> { %v390_v49 = vmul.f32 %v389_v45, %v389_v45  ;;  %v425_v51 = vsel %vm1427_vm2, %v424_v47, 0.0 }
 0x2d2   : >> { %v407_v44 = vld [vmem:[%s401_s11] sm:$0x3]  ;;  %v426_v53 = vmul.f32 %v425_v51, %v425_v51 }
 0x2d3   : >> { %v408_v46 = vsel %vm1427_vm2, %v407_v44, 0.0  ;;  %v441_v48 = vld [vmem:[%s435_s14] sm:$0x3]  ;;  %v394_v56 = vsel %vm393_vm7, 0.0, %v390_v49 }
 0x2d4   : >> { %v409_v50 = vmul.f32 %v408_v46, %v408_v46  ;;  %v442_v52 = vsel %vm1427_vm2, %v441_v48, 0.0 }
 0x2d5   : >> { %v443_v55 = vmul.f32 %v442_v52, %v442_v52 }
 0x2d6   : >> { %v411_v54 = vadd.f32 %v409_v50, %v390_v49  ;;  %v410_v57 = vadd.f32 %v409_v50, %v394_v56 }
 0x2d7   : >> { %v447_v60 = vsel %vm446_vm8, 0.0, %v443_v55 }
 0x2d8   : >> { %v428_v58 = vadd.f32 %v426_v53, %v411_v54  ;;  %v427_v59 = vadd.f32 %v426_v53, %v410_v57 }
 0x2da   : >> { %v449_v61 = vadd.f32 %v443_v55, %v428_v58  ;;  %v448_v62 = vadd.f32 %v447_v60, %v427_v59 }
 0x2dc   : >> { %450 = vadd.xlane.f32.xlu0 %v449_v61 }
 0x2e0   : >> { %458 = vadd.xlane.f32.xlu0 %v448_v62 }
 0x365   : >> { %v451_v63 = vpop.xlane.xlu0 %450 }
 0x366   : >> { %v452_v0 = vrot.slane %v451_v63, 4 }
 0x368   : >> { %v453_v1 = vadd.f32 %v452_v0, %v451_v63 }
 0x369   : >> { %v459_v2 = vpop.xlane.xlu0 %458 }
 0x36a   : >> { %v454_v3 = vrot.slane %v453_v1, 2  ;;  %v460_v4 = vrot.slane %v459_v2, 4 }
 0x36c   : >> { %v461_v5 = vadd.f32 %v460_v4, %v459_v2  ;;  %v455_v8 = vadd.f32 %v454_v3, %v453_v1 }
 0x36e   : >> { %v462_v9 = vrot.slane %v461_v5, 2  ;;  %v456_v11 = vrot.slane %v455_v8, 1 }
 0x370   : >> { %v463_v10 = vadd.f32 %v462_v9, %v461_v5  ;;  %v457_v14 = vadd.f32 %v456_v11, %v455_v8 }
 0x372   : >> { %v464_v12 = vrot.slane %v463_v10, 1 }
 0x374   : >> { %v465_v13 = vadd.f32 %v464_v12, %v463_v10 }
 0x376   : >> { %1592 = vpush %v465_v13 }
 0x377   : >> { %1594 = vpush %v457_v14 }
 0x3a7   : >> { %s1593_s20 = spop %1592 }
 0x3a8   : >> { %s1595_s15 = spop %1594 }
 0x3a9   : >> { %s468_s24 = smul.f32 1e-10, %s1595_s15 }
 0x3ab   : >> { %p469_p11 = scmp.le.f32.partialorder %s1593_s20, %s468_s24 }
 0x3ad   : >> { %p471_p12 = por %p470_p10, %p469_p11 }
 0x3af   : > { %919 = sbr.rel (!%p471_p12) target bundleno = 271 (0x10f), region = 473 }
 0x3b4 PF: > { %s924_s23 = smov [#allocation20]  ;;  %v928_v6 = vmov %v1797_v6  ;;  %v931_v7 = vmov %v1799_v7  ;;  %v984_v15 = vld [vmem:[#allocation12] sm:$0x3]  ;;  %v992_v16 = vld [vmem:[#allocation14] sm:$0x3]  ;;  %s2079_s17 = scalar_lea.vmem [#allocation13], %s1793_s28 }
 0x3b5   : > { %v948_v6 = vmov %v1797_v6  ;;  %v951_v7 = vmov %v1799_v7  ;;  %v932_v17 = vld [vmem:[%s924_s23] sm:$0x3]  ;;  %vm935_vm9 = vcmp.eq.s32.totalorder %v931_v7, %v928_v6  ;;  %987 = vst [vmem:[%s2079_s17] sm:$0x3] %v984_v15  ;;  %s2080_s27 = scalar_lea.vmem [#allocation15], %s1793_s28  ;;  %s944_s29 = smov [#allocation23] }
 0x3b6   : > { %vm955_vm10 = vcmp.eq.s32.totalorder %v951_v7, %v948_v6  ;;  %995 = vst [vmem:[%s2080_s27] sm:$0x3] %v992_v16  ;;  %v1000_v18 = vld [vmem:[#allocation16] sm:$0x3]  ;;  %v936_v19 = vsel %vm935_vm9, %v932_v17, 0.0  ;;  %s2081_s16 = scalar_lea.vmem [#allocation17], %s1793_s28  ;;  %s2082_s30 = scalar_lea.vmem [#allocation19], %s1793_s28 }
 0x3b7   : > { %1003 = vst [vmem:[%s2081_s16] sm:$0x3] %v1000_v18  ;;  %v1008_v20 = vld [vmem:[#allocation18] sm:$0x3]  ;;  %v937_v21 = vrot.slane %v936_v19, 4  ;;  %v952_v22 = vld [vmem:[%s944_s29] sm:$0x3] }
 0x3b8   : > { %1011 = vst [vmem:[%s2082_s30] sm:$0x3] %v1008_v20  ;;  %v956_v23 = vsel %vm955_vm10, %v952_v22, 0.0  ;;  %s920_s21 = sand.u32 7, %s1756_s12   ;;  %s2083_s11 = scalar_lea.vmem [#allocation9], %s1795_s18 }
 0x3b9   : > { %v938_v24 = vadd.f32 %v937_v21, %v936_v19  ;;  %v957_v25 = vrot.slane %v956_v23, 4  ;;  %s921_s25 = scalar_lea.vmem [#allocation8], %s920_s21  ;;  %s923_s26 = scalar_lea.vmem [#allocation10], %s920_s21 }
 0x3ba   : > { %s925_s25 = smov %s921_s25  ;;  %s945_s26 = smov %s923_s26 }
 0x3bb   : > { %v939_v26 = vrot.slane %v938_v24, 2  ;;  %v958_v6 = vadd.f32 %v957_v25, %v956_v23  ;;  %s2084_s22 = scalar_lea.vmem [#allocation11], %s1795_s18  ;;  %s1039_s14 = sshrl.u32 (%p1770_p3), %s1756_s12, 3 }
 0x3bc   : > { %s2085_s20 = scalar_lea.vmem (%p1770_p3), [#allocation9], %s1795_s18  ;;  %s1580_s15 = sshll.u32 (%p1770_p3), %s1039_s14, 1 }
 0x3bd   : > { %v940_v7 = vadd.f32 %v939_v26, %v938_v24  ;;  %v959_v27 = vrot.slane %v958_v6, 2  ;;  %s1041_s17 = scalar_lea.vmem (%p1770_p3), %s2070_s4, %s1580_s15 }
 0x3bf   : > { %v941_v28 = vrot.slane %v940_v7, 1  ;;  %v960_v29 = vadd.f32 %v959_v27, %v958_v6 }
 0x3c1   : > { %v942_v30 = vadd.f32 %v941_v28, %v940_v7  ;;  %v961_v31 = vrot.slane %v960_v29, 1 }
 0x3c3   : > { %943 = vst [vmem:[%s925_s25] sm:$0x1] %v942_v30  ;;  %v962_v32 = vadd.f32 %v961_v31, %v960_v29 }
 0x3c5   : > { %963 = vst [vmem:[%s945_s26] sm:$0x1] %v962_v32 }
 0x3c9   : > { %1038 = sbr.rel (!%p1770_p3) target bundleno = 980 (0x3d4), region = 158 }
 0x3ca   : > { %v968_v33 = vld [vmem:[#allocation8] sm:$0x3] }
 0x3cb   : > { %971 = vst [vmem:[%s2083_s11] sm:$0x3] %v968_v33 }
 0x3cc   : > { %v976_v34 = vld [vmem:[#allocation10] sm:$0x3] }
 0x3cd   : > { %979 = vst [vmem:[%s2084_s22] sm:$0x3] %v976_v34 }
 0x3d2   : > { %v1058_v35 = vld [vmem:[%s2085_s20] sm:$0x3] }
 0x3d3   : > { %1059 = vst [vmem:[%s1041_s17] sm:$0x3] %v1058_v35 }
 0x3d4 PF: > { %1077 = sbr.rel (!%p1770_p3) target bundleno = 988 (0x3dc), region = 192  ;;  %s1078_s27 = sshrl.u32 (%p1770_p3), %s1756_s12, 3 }
 0x3d5   : > { %s2086_s29 = scalar_lea.vmem (%p1770_p3), [#allocation11], %s1795_s18  ;;  %s1581_s16 = sshll.u32 (%p1770_p3), %s1078_s27, 1 }
 0x3d6   : > { %s1080_s25 = scalar_lea.vmem (%p1770_p3), %s2071_s5, %s1581_s16 }
 0x3da   : > { %v1097_v36 = vld [vmem:[%s2086_s29] sm:$0x3] }
 0x3db   : > { %1098 = vst [vmem:[%s1080_s25] sm:$0x3] %v1097_v36 }
 0x3dc PF: > { %s1582_s26 = sshll.u32 %s1756_s12, 1  ;;  %s2087_s19 = scalar_lea.vmem [#allocation13], %s1793_s28 }
 0x3dd   : > { %v1132_v37 = vld [vmem:[%s2087_s19] sm:$0x3]  ;;  %s2088_s11 = scalar_lea.vmem [#allocation15], %s1793_s28  ;;  %s1115_s14 = scalar_lea.vmem %s2072_s6, %s1582_s26 }
 0x3de   : > { %v1167_v38 = vld [vmem:[%s2088_s11] sm:$0x3]  ;;  %s1150_s24 = scalar_lea.vmem %s2073_s7, %s1582_s26  ;;  %s2089_s23 = scalar_lea.vmem [#allocation17], %s1793_s28  ;;  %1133 = vst [vmem:[%s1115_s14] sm:$0x3] %v1132_v37 }
 0x3df   : > { %v1202_v39 = vld [vmem:[%s2089_s23] sm:$0x3]  ;;  %s2090_s17 = scalar_lea.vmem [#allocation19], %s1793_s28  ;;  %1168 = vst [vmem:[%s1150_s24] sm:$0x3] %v1167_v38  ;;  %s1185_s29 = scalar_lea.vmem %s2074_s8, %s1582_s26 }
 0x3e0   : > { %v1237_v40 = vld [vmem:[%s2090_s17] sm:$0x3]  ;;  %s1220_s21 = scalar_lea.vmem %s2075_s9, %s1582_s26  ;;  %1203 = vst [vmem:[%s1185_s29] sm:$0x3] %v1202_v39 }
 0x3e1   : > { %1238 = vst [vmem:[%s1220_s21] sm:$0x3] %v1237_v40 }
 0x3e2 PF: > { %s2091_s25 = sld [smem:[#allocation33_spill]]  ;;  %p13_p13 = scmp.ge.s32.totalorder %s1759_s13, 4  }
 0x3e3   : > { %s2092_s30 = smov %s1673_s10  ;;  %s2094_s11 = smov %s1759_s13 }
 0x3e4   :  { %15 = sbr.rel (!%p13_p13) target bundleno = 2 (0x2), region = 484 }
 0x3e8   : > { %s2093_s10 = smov %s2091_s25 }

// kernel: reverse.3
= control target key start
LH: loop header
LB: loop body
LE: loop exit
PB: predicated region body
PF: predicated region fallthrough
CT: control target
= control target key end

     0   :  { %v2_v0 = vlaneseq  ;;  %s112_s0 = inlined_call_operand.vmem [shape: f32[2,3], index: 0, kind: input, shape index: {}]   ;;  %s113_s1 = inlined_call_operand.vmem [shape: f32[2,3], index: 1, kind: output, shape index: {}]  }
   0x2   :  { %v3_v1 = vsub.s32 2, %v2_v0 }
   0x4   :  { %4 = vset.pattern.permute.xlu0 %v3_v1 }
   0x5   :  { %v21_v2 = vld [vmem:[%s112_s0] sm:$0x3] }
   0x6   :  { %22 = vst [vmem:[#allocation1] sm:$0x3] %v21_v2 }
   0xd   :  { %v41_v3 = vld [vmem:[#allocation1] sm:$0x3] }
   0xe   :  { %42 = vst [vmem:[#allocation0] sm:$0x3] %v41_v3 }
  0x15   :  { %v43_v4 = vld [vmem:[#allocation0] sm:$0xff] }
  0x16   :  { %44 = vperm.xlu0 %4, %v43_v4  }
  0x91   :  { %v45_v5 = vpop.permute.xlu0 %44 }
  0x92   :  { %46 = vst [vmem:[#allocation2] sm:$0xff] %v45_v5 }
  0x99   :  { %v51_v6 = vld [vmem:[#allocation2] sm:$0x3] }
  0x9a   :  { %54 = vst [vmem:[#allocation3] sm:$0x3] %v51_v6 }
  0xa1   :  { %v71_v7 = vld [vmem:[#allocation3] sm:$0x3] }
  0xa2   :  { %72 = vst [vmem:[%s113_s1] sm:$0x3] %v71_v7 }

// kernel: byoc_forward.1
= control target key start
LH: loop header
LB: loop body
LE: loop exit
PB: predicated region body
PF: predicated region fallthrough
CT: control target
= control target key end

     0   :  { %s7815_s21 = smov 0   ;;  %s11545_s0 = inlined_call_operand.vmem [shape: f32[1024,8], index: 0, kind: input, shape index: {}]   ;;  %s11546_s1 = inlined_call_operand.vmem [shape: f32[256,8], index: 1, kind: input, shape index: {}]   ;;  %s11547_s2 = inlined_call_operand.vmem [shape: f32[2,8,8], index: 2, kind: input, shape index: {}]   ;;  %s11548_s3 = inlined_call_operand.vmem [shape: bf16[8,128], index: 3, kind: input, shape index: {}]   ;;  %s11549_s4 = inlined_call_operand.vmem [shape: f32[1,128], index: 4, kind: input, shape index: {}]   ;;  %s11550_s5 = inlined_call_operand.vmem [shape: bf16[8,128], index: 5, kind: input, shape index: {}]   ;;  %s11551_s6 = inlined_call_operand.vmem [shape: f32[1,128], index: 6, kind: input, shape index: {}]   ;;  %s11552_s7 = inlined_call_operand.vmem [shape: bf16[128,128], index: 7, kind: input, shape index: {}]   ;;  %s11553_s8 = inlined_call_operand.vmem [shape: f32[1,128], index: 8, kind: input, shape index: {}]   ;;  %s11554_s9 = inlined_call_operand.vmem [shape: f32[1,128], index: 9, kind: input, shape index: {}]   ;;  %s11555_s10 = inlined_call_operand.vmem [shape: f32[1,128], index: 10, kind: input, shape index: {}]   ;;  %s11556_s11 = inlined_call_operand.vmem [shape: bf16[128,128], index: 11, kind: input, shape index: {}]   ;;  %s11557_s12 = inlined_call_operand.vmem [shape: f32[1,128], index: 12, kind: input, shape index: {}]   ;;  %s11558_s13 = inlined_call_operand.vmem [shape: f32[256,128], index: 13, kind: output, shape index: {0}]   ;;  %s11559_s14 = inlined_call_operand.vmem [shape: f32[256,128], index: 14, kind: output, shape index: {1}]   ;;  %s11560_s15 = inlined_call_operand.vmem [shape: f32[256,128], index: 15, kind: output, shape index: {2}]   ;;  %s11561_s16 = inlined_call_operand.vmem [shape: f32[128,128], index: 16, kind: output, shape index: {3}]  }
   0x1   :  { %11707 = sst [smem:[#allocation89_spill]] %s11545_s0 }
   0x2 LB: > { %s7821_s22 = sadd.s32 4294967295, %s7719_s21   ;;  %p6119_p0 = scmp.ge.s32.totalorder %s7719_s21, 1  ;;  %s7719_s21 = sphi %s7815_s21, %s27_s21  }
   0x3   : > { %p490_p1 = scmp.lt.s32.totalorder %s7719_s21, 3 }
   0x5   : > { %p491_p2 = pnand %p6119_p0, %p490_p1 }
   0x7   : > { %494 = sbr.rel (%p491_p2) target bundleno = 1935 (0x78f), region = 72 }
   0xc   : > { %v701_v0 = vld [vmem:[%s11548_s3] sm:$0xf]  ;;  %vm806_vm0 = vcmask 1043456   ;;  %s6120_s25 = sshll.u32 %s7821_s22, 6  ;;  %s6122_s26 = sshll.u32 %s7821_s22, 4  ;;  %vm709_vm1 = vcmask 64512  }
   0xd   : > { %7039 = vmatprep.subr.msk.bf16.mxu0 %vm806_vm0, %v701_v0  ;;  %7040 = vmatprep.subr.msk.bf16.mxu1 %vm806_vm0, %v701_v0  ;;  %v808_v1 = vsel %vm806_vm0, %v701_v0, 0  ;;  %p565_p3 = scmp.lt.s32.totalorder %s6120_s25, 127  ;;  %v1827_v2 = vld [vmem:[%s11550_s5] sm:$0xf]  ;;  %p571_p4 = scmp.lt.s32.totalorder %s6122_s26, 31 }
   0xe   : > { %6832 = vmatpush3.bf16.msra.mxu0 %v808_v1  ;;  %7038 = vmatpush3.bf16.msra.mxu1 %v808_v1  ;;  %p576_p5 = scmp.lt.s32.totalorder %s7821_s22, 1  ;;  %s11708_s17 = sld [smem:[#allocation89_spill]]  ;;  %v1860_v16 = vsel %vm806_vm0, %v1827_v2, 0 }
   0xf   : > { %s12145_s25 = smov (!%p565_p3, %s6120_s25), 127  ;;  %7041 = vmatprep.subr.msk.bf16.mxu1 %vm806_vm0, %v1827_v2  ;;  %s12147_s26 = smov (!%p571_p4, %s6122_s26), 31 }
  0x10   : > { %s6121_s29 = sshll.u32 %s12145_s25, 3  ;;  %s7843_s19 = sshll.u32 %s12147_s26, 3 }
  0x11   : > { %s7852_s24 = scalar_lea.vmem %s11546_s1, %s7843_s19  ;;  %s7729_s0 = smov 17  }
  0x12   : > { %v7860_v14 = vld [vmem:[%s7852_s24] sm:$0xff]  ;;  %v7865_v17 = vld [vmem:[%s7852_s24 + $0x8] sm:$0xff]  ;;  %s577_s25 = scalar_select %p576_p5, %s7821_s22, 1  ;;  %v7881_v24 = vld [vmem:[%s7852_s24 + $0x10] sm:$0xff] }
  0x13   : > { %v1819_v18 = vpack.c.bf16 %v7865_v17, %v7860_v14  ;;  %v7884_v25 = vld [vmem:[%s7852_s24 + $0x18] sm:$0xff]  ;;  %v7889_v27 = vld [vmem:[%s7852_s24 + $0x20] sm:$0xff]  ;;  %v7892_v28 = vld [vmem:[%s7852_s24 + $0x28] sm:$0xff] }
  0x14   : > { %s7841_s18 = scalar_lea.vmem %s11708_s17, %s6121_s29  ;;  %s6124_s26 = sshll.u32 %s577_s25, 3  ;;  %v1820_v31 = vpack.c.bf16 %v7884_v25, %v7881_v24  ;;  %v1821_v33 = vpack.c.bf16 %v7892_v28, %v7889_v27  ;;  %v7904_v34 = vld [vmem:[%s7852_s24 + $0x30] sm:$0xff]  ;;  %v7912_v38 = vld [vmem:[%s7852_s24 + $0x38] sm:$0xff]  ;;  %v7917_v41 = vld [vmem:[%s7852_s24 + $0x40] sm:$0xff] }
  0x15   : > { %v605_v3 = vld [vmem:[%s7841_s18] sm:$0xff]  ;;  %v606_v4 = vld [vmem:[%s7841_s18 + $0x8] sm:$0xff]  ;;  %v607_v8 = vld [vmem:[%s7841_s18 + $0x10] sm:$0xff]  ;;  %s579_s29 = scalar_lea.vmem %s11547_s2, %s6124_s26  ;;  %v1822_v44 = vpack.c.bf16 %v7912_v38, %v7904_v34  ;;  %s7721_s25 = smov 127  }
  0x16   : > { %v665_v5 = vld [vmem:[%s7841_s18 + $0x1e0] sm:$0xff]  ;;  %v669_v6 = vpack.c.bf16 %v606_v4, %v605_v3  ;;  %v666_v7 = vld [vmem:[%s7841_s18 + $0x1e8] sm:$0xff]  ;;  %v608_v9 = vld [vmem:[%s7841_s18 + $0x18] sm:$0xff]  ;;  %s7722_s26 = smov 126  }
  0x17   : > { %v699_v10 = vpack.c.bf16 %v666_v7, %v665_v5  ;;  %v670_v11 = vpack.c.bf16 %v608_v9, %v607_v8  ;;  %v667_v12 = vld [vmem:[%s7841_s18 + $0x1f0] sm:$0xff]  ;;  %v668_v13 = vld [vmem:[%s7841_s18 + $0x1f8] sm:$0xff]  ;;  %v609_v19 = vld [vmem:[%s7841_s18 + $0x20] sm:$0xff] }
  0x18   : > { %6833 = vmatprep.mubr.msk.bf16.mxu0 %vm709_vm1, %v669_v6  ;;  %v700_v15 = vpack.c.bf16 %v668_v13, %v667_v12  ;;  %v610_v20 = vld [vmem:[%s7841_s18 + $0x28] sm:$0xff]  ;;  %v611_v22 = vld [vmem:[%s7841_s18 + $0x30] sm:$0xff]  ;;  %v612_v23 = vld [vmem:[%s7841_s18 + $0x38] sm:$0xff] }
  0x19   : > { %6893 = vmatprep.mubr.msk.bf16.mxu1 %vm709_vm1, %v699_v10  ;;  %6834 = vmatmul.mubr.msk.bf16.vlgmr.msra.gmra.mxu0 %vm709_vm1, %v670_v11  ;;  %v671_v21 = vpack.c.bf16 %v610_v20, %v609_v19  ;;  %v613_v26 = vld [vmem:[%s7841_s18 + $0x40] sm:$0xff]  ;;  %v614_v29 = vld [vmem:[%s7841_s18 + $0x48] sm:$0xff]  ;;  %v672_v30 = vpack.c.bf16 %v612_v23, %v611_v22  ;;  %v615_v35 = vld [vmem:[%s7841_s18 + $0x50] sm:$0xff] }
  0x1a   : > { %6894 = vmatmul.mubr.msk.bf16.vlgmr.msra.gmra.mxu1 %vm709_vm1, %v700_v15  ;;  %v673_v32 = vpack.c.bf16 %v614_v29, %v613_v26  ;;  %v616_v36 = vld [vmem:[%s7841_s18 + $0x58] sm:$0xff]  ;;  %v2818_v37 = vld [vmem:[%s579_s29] sm:$0xff]  ;;  %v618_v40 = vld [vmem:[%s7841_s18 + $0x68] sm:$0xff]  ;;  %s6131_s29 = sshll.u32 %s7821_s22, 3  ;;  %s7728_s22 = smov 16  }
  0x1b   : > { %6898 = vmatpush3.bf16.msra.mxu1 %v1860_v16  ;;  %6899 = vmatprep.mubr.msk.bf16.mxu1 %vm709_vm1, %v1819_v18  ;;  %v617_v39 = vld [vmem:[%s7841_s18 + $0x60] sm:$0xff]  ;;  %v7920_v42 = vld [vmem:[%s7852_s24 + $0x48] sm:$0xff]  ;;  %v674_v43 = vpack.c.bf16 %v616_v36, %v615_v35  ;;  %v7929_v47 = vld [vmem:[%s7852_s24 + $0x50] sm:$0xff]  ;;  %p599_p6 = scmp.lt.s32.totalorder %s6131_s29, 15 }
  0x1c   : > { %6837 = vmatprep.mubr.msk.bf16.mxu0 %vm709_vm1, %v671_v21  ;;  %6995 = vmatprep.subr.mxu0 %v2818_v37  ;;  %v675_v45 = vpack.c.bf16 %v618_v40, %v617_v39  ;;  %v1823_v46 = vpack.c.bf16 %v7920_v42, %v7917_v41  ;;  %v619_v48 = vld [vmem:[%s7841_s18 + $0x70] sm:$0xff]  ;;  %v620_v49 = vld [vmem:[%s7841_s18 + $0x78] sm:$0xff]  ;;  %v621_v51 = vld [vmem:[%s7841_s18 + $0x80] sm:$0xff] }
  0x1d   : > { %6996 = vmatpush3.msra.mxu0 %v2818_v37  ;;  %v7936_v50 = vld [vmem:[%s7852_s24 + $0x58] sm:$0xff]  ;;  %v622_v52 = vld [vmem:[%s7841_s18 + $0x88] sm:$0xff]  ;;  %v7941_v53 = vld [vmem:[%s7852_s24 + $0x60] sm:$0xff]  ;;  %v676_v55 = vpack.c.bf16 %v620_v49, %v619_v48  ;;  %s12149_s29 = smov (!%p599_p6, %s6131_s29), 15 }
  0x1e   : > { %v7944_v54 = vld [vmem:[%s7852_s24 + $0x68] sm:$0xff]  ;;  %v1824_v56 = vpack.c.bf16 %v7936_v50, %v7929_v47  ;;  %v677_v57 = vpack.c.bf16 %v622_v52, %v621_v51  ;;  %v623_v59 = vld [vmem:[%s7841_s18 + $0x90] sm:$0xff]  ;;  %v624_v60 = vld [vmem:[%s7841_s18 + $0x98] sm:$0xff]  ;;  %s6132_s30 = sshll.u32 %s12149_s29, 3  ;;  %s11259_s29 = scalar_lea.vmem %s11558_s13, %s7843_s19 }
  0x1f   : > { %v1825_v58 = vpack.c.bf16 %v7944_v54, %v7941_v53  ;;  %v7954_v61 = vld [vmem:[%s7852_s24 + $0x70] sm:$0xff]  ;;  %v7957_v62 = vld [vmem:[%s7852_s24 + $0x78] sm:$0xff]  ;;  %v625_v63 = vld [vmem:[%s7841_s18 + $0xa0] sm:$0xff]  ;;  %v678_v1 = vpack.c.bf16 %v624_v60, %v623_v59  ;;  %s8560_s24 = scalar_lea.vmem %s11559_s14, %s7843_s19  ;;  %s9903_s20 = scalar_lea.vmem %s11561_s16, %s6132_s30 }
  0x20   : > { %v626_v0 = vld [vmem:[%s7841_s18 + $0xa8] sm:$0xff]  ;;  %v1826_v2 = vpack.c.bf16 %v7957_v62, %v7954_v61  ;;  %v627_v4 = vld [vmem:[%s7841_s18 + $0xb0] sm:$0xff]  ;;  %v628_v5 = vld [vmem:[%s7841_s18 + $0xb8] sm:$0xff] }
  0x21   : > { %6838 = vmatmul.mubr.msk.bf16.gmra.mxu0 %vm709_vm1, %v672_v30  ;;  %v679_v3 = vpack.c.bf16 %v626_v0, %v625_v63  ;;  %v629_v6 = vld [vmem:[%s7841_s18 + $0xc0] sm:$0xff]  ;;  %v630_v7 = vld [vmem:[%s7841_s18 + $0xc8] sm:$0xff]  ;;  %v680_v8 = vpack.c.bf16 %v628_v5, %v627_v4  ;;  %v631_v10 = vld [vmem:[%s7841_s18 + $0xd0] sm:$0xff] }
  0x22   : > { %6900 = vmatmul.mubr.msk.bf16.vlgmr.msra.gmra.mxu1 %vm709_vm1, %v1820_v31  ;;  %6841 = vmatprep.mubr.msk.bf16.mxu0 %vm709_vm1, %v673_v32  ;;  %v681_v9 = vpack.c.bf16 %v630_v7, %v629_v6  ;;  %v632_v11 = vld [vmem:[%s7841_s18 + $0xd8] sm:$0xff]  ;;  %v633_v12 = vld [vmem:[%s7841_s18 + $0xe0] sm:$0xff]  ;;  %v634_v13 = vld [vmem:[%s7841_s18 + $0xe8] sm:$0xff] }
  0x23   : > { %6903 = vmatprep.mubr.msk.bf16.mxu1 %vm709_vm1, %v1821_v33  ;;  %v682_v15 = vpack.c.bf16 %v632_v11, %v631_v10  ;;  %v683_v16 = vpack.c.bf16 %v634_v13, %v633_v12  ;;  %v635_v18 = vld [vmem:[%s7841_s18 + $0xf0] sm:$0xff]  ;;  %v636_v19 = vld [vmem:[%s7841_s18 + $0xf8] sm:$0xff]  ;;  %v637_v20 = vld [vmem:[%s7841_s18 + $0x100] sm:$0xff] }
  0x24   : > { %v638_v21 = vld [vmem:[%s7841_s18 + $0x108] sm:$0xff]  ;;  %v684_v22 = vpack.c.bf16 %v636_v19, %v635_v18  ;;  %v639_v26 = vld [vmem:[%s7841_s18 + $0x110] sm:$0xff]  ;;  %v640_v29 = vld [vmem:[%s7841_s18 + $0x118] sm:$0xff] }
  0x25   : > { %v685_v23 = vpack.c.bf16 %v638_v21, %v637_v20  ;;  %v641_v30 = vld [vmem:[%s7841_s18 + $0x120] sm:$0xff]  ;;  %v642_v31 = vld [vmem:[%s7841_s18 + $0x128] sm:$0xff]  ;;  %v686_v32 = vpack.c.bf16 %v640_v29, %v639_v26  ;;  %v643_v35 = vld [vmem:[%s7841_s18 + $0x130] sm:$0xff] }
  0x26   : > { %v687_v33 = vpack.c.bf16 %v642_v31, %v641_v30  ;;  %v644_v36 = vld [vmem:[%s7841_s18 + $0x138] sm:$0xff]  ;;  %v645_v37 = vld [vmem:[%s7841_s18 + $0x140] sm:$0xff]  ;;  %v646_v39 = vld [vmem:[%s7841_s18 + $0x148] sm:$0xff] }
  0x27   : > { %v688_v40 = vpack.c.bf16 %v644_v36, %v643_v35  ;;  %v650_v48 = vld [vmem:[%s7841_s18 + $0x168] sm:$0xff]  ;;  %v651_v52 = vld [vmem:[%s7841_s18 + $0x170] sm:$0xff]  ;;  %v656_v63 = vld [vmem:[%s7841_s18 + $0x198] sm:$0xff] }
  0x28   : > { %v655_v60 = vld [vmem:[%s7841_s18 + $0x190] sm:$0xff]  ;;  %v657_v0 = vld [vmem:[%s7841_s18 + $0x1a0] sm:$0xff]  ;;  %v660_v5 = vld [vmem:[%s7841_s18 + $0x1b8] sm:$0xff] }
  0x29   : > { %6842 = vmatmul.mubr.msk.bf16.gmra.mxu0 %vm709_vm1, %v674_v43  ;;  %v689_v43 = vpack.c.bf16 %v646_v39, %v645_v37  ;;  %v659_v4 = vld [vmem:[%s7841_s18 + $0x1b0] sm:$0xff]  ;;  %v661_v6 = vld [vmem:[%s7841_s18 + $0x1c0] sm:$0xff]  ;;  %v662_v7 = vld [vmem:[%s7841_s18 + $0x1c8] sm:$0xff] }
  0x2a   : > { %6904 = vmatmul.mubr.msk.bf16.gmra.mxu1 %vm709_vm1, %v1822_v44  ;;  %6845 = vmatprep.mubr.msk.bf16.mxu0 %vm709_vm1, %v675_v45  ;;  %v647_v44 = vld [vmem:[%s7841_s18 + $0x150] sm:$0xff]  ;;  %v648_v45 = vld [vmem:[%s7841_s18 + $0x158] sm:$0xff]  ;;  %v8092_v19 = vld [vmem:[%s11551_s6] ss:$0 sm:$0xff] }
  0x2b   : > { %6907 = vmatprep.mubr.msk.bf16.mxu1 %vm709_vm1, %v1823_v46  ;;  %v649_v46 = vld [vmem:[%s7841_s18 + $0x160] sm:$0xff]  ;;  %v690_v49 = vpack.c.bf16 %v648_v45, %v647_v44  ;;  %v663_v10 = vld [vmem:[%s7841_s18 + $0x1d0] sm:$0xff]  ;;  %v664_v11 = vld [vmem:[%s7841_s18 + $0x1d8] sm:$0xff] }
  0x2c   : > { %v691_v51 = vpack.c.bf16 %v650_v48, %v649_v46  ;;  %v698_v12 = vpack.c.bf16 %v664_v11, %v663_v10 }
  0x31   : > { %6846 = vmatmul.mubr.msk.bf16.gmra.mxu0 %vm709_vm1, %v676_v55  ;;  %v652_v55 = vld [vmem:[%s7841_s18 + $0x178] sm:$0xff] }
  0x32   : > { %6908 = vmatmul.mubr.msk.bf16.gmra.mxu1 %vm709_vm1, %v1824_v56  ;;  %6849 = vmatprep.mubr.msk.bf16.mxu0 %vm709_vm1, %v677_v57  ;;  %v653_v56 = vld [vmem:[%s7841_s18 + $0x180] sm:$0xff]  ;;  %v654_v57 = vld [vmem:[%s7841_s18 + $0x188] sm:$0xff] }
  0x33   : > { %6911 = vmatprep.mubr.msk.bf16.mxu1 %vm709_vm1, %v1825_v58  ;;  %v692_v58 = vpack.c.bf16 %v652_v55, %v651_v52  ;;  %v693_v59 = vpack.c.bf16 %v654_v57, %v653_v56 }
  0x39   : > { %6850 = vmatmul.mubr.msk.bf16.gmra.mxu0 %vm709_vm1, %v678_v1  ;;  %v658_v1 = vld [vmem:[%s7841_s18 + $0x1a8] sm:$0xff]  ;;  %s11412_s18 = scalar_lea.vmem %s11560_s15, %s7843_s19 }
  0x3a   : > { %6912 = vmatmul.mubr.msk.bf16.gmra.mxu1 %vm709_vm1, %v1826_v2  ;;  %6853 = vmatprep.mubr.msk.bf16.mxu0 %vm709_vm1, %v679_v3  ;;  %v694_v2 = vpack.c.bf16 %v656_v63, %v655_v60  ;;  %v695_v3 = vpack.c.bf16 %v658_v1, %v657_v0 }
  0x41   : > { %6854 = vmatmul.mubr.msk.bf16.gmra.mxu0 %vm709_vm1, %v680_v8  ;;  %v696_v8 = vpack.c.bf16 %v660_v5, %v659_v4 }
  0x42   : > { %6857 = vmatprep.mubr.msk.bf16.mxu0 %vm709_vm1, %v681_v9  ;;  %v697_v9 = vpack.c.bf16 %v662_v7, %v661_v6 }
  0x49   : > { %6858 = vmatmul.mubr.msk.bf16.gmra.mxu0 %vm709_vm1, %v682_v15 }
  0x4a   : > { %6861 = vmatprep.mubr.msk.bf16.mxu0 %vm709_vm1, %v683_v16 }
  0x51   : > { %6862 = vmatmul.mubr.msk.bf16.gmra.mxu0 %vm709_vm1, %v684_v22 }
  0x52   : > { %6865 = vmatprep.mubr.msk.bf16.mxu0 %vm709_vm1, %v685_v23 }
  0x59   : > { %6866 = vmatmul.mubr.msk.bf16.gmra.mxu0 %vm709_vm1, %v686_v32 }
  0x5a   : > { %6869 = vmatprep.mubr.msk.bf16.mxu0 %vm709_vm1, %v687_v33 }
  0x61   : > { %6870 = vmatmul.mubr.msk.bf16.gmra.mxu0 %vm709_vm1, %v688_v40 }
  0x62   : > { %6873 = vmatprep.mubr.msk.bf16.mxu0 %vm709_vm1, %v689_v43 }
  0x69   : > { %6874 = vmatmul.mubr.msk.bf16.gmra.mxu0 %vm709_vm1, %v690_v49 }
  0x6a   : > { %6877 = vmatprep.mubr.msk.bf16.mxu0 %vm709_vm1, %v691_v51 }
  0x71   : > { %6878 = vmatmul.mubr.msk.bf16.gmra.mxu0 %vm709_vm1, %v692_v58 }
  0x72   : > { %6881 = vmatprep.mubr.msk.bf16.mxu0 %vm709_vm1, %v693_v59 }
  0x79   : > { %6882 = vmatmul.mubr.msk.bf16.gmra.mxu0 %vm709_vm1, %v694_v2 }
  0x7a   : > { %6885 = vmatprep.mubr.msk.bf16.mxu0 %vm709_vm1, %v695_v3 }
  0x81   : > { %6886 = vmatmul.mubr.msk.bf16.gmra.mxu0 %vm709_vm1, %v696_v8 }
  0x82   : > { %6889 = vmatprep.mubr.msk.bf16.mxu0 %vm709_vm1, %v697_v9 }
  0x89   : > { %6890 = vmatmul.mubr.msk.bf16.gmra.mxu0 %vm709_vm1, %v698_v12 }
  0x8a   : > { %6997 = vmatprep.mubr.msk.f32.mxu0 %vm709_vm1, %v7860_v14  ;;  %v8061_v14 = vld [vmem:[%s11549_s4] ss:$0 sm:$0xff] }
  0x91   : > { %6998 = vmatmul.mubr.msk.f32.vlgmr.msra.gmra.mxu0 %vm709_vm1, %v7865_v17 }
  0x92   : > { %7000 = vmatprep.mubr.msk.f32.mxu0 %vm709_vm1, %v7881_v24 }
  0x95   : > { %7001 = vmatmul.mubr.msk.f32.gmra.mxu0 %vm709_vm1, %v7884_v25 }
  0x96   : > { %7003 = vmatprep.mubr.msk.f32.mxu0 %vm709_vm1, %v7889_v27 }
  0x99   : > { %7004 = vmatmul.mubr.msk.f32.gmra.mxu0 %vm709_vm1, %v7892_v28 }
  0x9a   : > { %7006 = vmatprep.mubr.msk.f32.mxu0 %vm709_vm1, %v7904_v34 }
  0x9d   : > { %7007 = vmatmul.mubr.msk.f32.gmra.mxu0 %vm709_vm1, %v7912_v38 }
  0x9e   : > { %7009 = vmatprep.mubr.msk.f32.mxu0 %vm709_vm1, %v7917_v41 }
  0xa1   : > { %7010 = vmatmul.mubr.msk.f32.gmra.mxu0 %vm709_vm1, %v7920_v42 }
  0xa2   : > { %7012 = vmatprep.mubr.msk.f32.mxu0 %vm709_vm1, %v7929_v47 }
  0xa5   : > { %7013 = vmatmul.mubr.msk.f32.gmra.mxu0 %vm709_vm1, %v7936_v50 }
  0xa6   : > { %7015 = vmatprep.mubr.msk.f32.mxu0 %vm709_vm1, %v7941_v53 }
  0xa9   : > { %7016 = vmatmul.mubr.msk.f32.gmra.mxu0 %vm709_vm1, %v7944_v54 }
  0xaa   : > { %7018 = vmatprep.mubr.msk.f32.mxu0 %vm709_vm1, %v7954_v61 }
  0xad   : > { %7019 = vmatmul.mubr.msk.f32.gmra.mxu0 %vm709_vm1, %v7957_v62 }
  0xd9   : > { %v6835_v17 = vpop.f32.mrf.mxu0 }
  0xda   : > { %v8064_v24 = vadd.f32 %v6835_v17, %v8061_v14  ;;  %v6895_v25 = vpop.f32.mrf.mxu1 }
  0xdb   : > { %v8067_v27 = vadd.f32 %v6895_v25, %v8061_v14  ;;  %v844_v28 = vpop.f32.mrf.mxu0 }
  0xdc   : > { %v1084_v34 = vpop.f32.mrf.mxu1  ;;  %v1101_v38 = vmul.f32 %v8064_v24, %v8064_v24  ;;  %v8072_v41 = vadd.f32 %v8061_v14, %v844_v28 }
  0xdd   : > { %v6836_v42 = vpop.f32.mrf.mxu0  ;;  %v1161_v47 = vmul.f32 %v8067_v27, %v8067_v27  ;;  %v8085_v13 = vadd.f32 %v8061_v14, %v1084_v34 }
  0xde   : > { %v8077_v50 = vadd.f32 %v6836_v42, %v8061_v14  ;;  %v6896_v53 = vpop.f32.mrf.mxu1  ;;  %1167 = vadd.xlane.f32.xlu1 %v1101_v38  ;;  %v1099_v16 = vmul.f32 %v8072_v41, %v8072_v41 }
  0xdf   : > { %1287 = vadd.xlane.f32.xlu0 %v1161_v47  ;;  %v847_v54 = vpop.f32.mrf.mxu0  ;;  %v8080_v61 = vadd.f32 %v6896_v53, %v8061_v14  ;;  %v1159_v29 = vmul.f32 %v8085_v13, %v8085_v13 }
  0xe0   : > { %v1102_v62 = vmul.f32 %v8077_v50, %v8077_v50  ;;  %v1087_v15 = vpop.f32.mrf.mxu1  ;;  %v8100_v23 = vadd.f32 %v8061_v14, %v847_v54 }
  0xe1   : > { %v6839_v18 = vpop.f32.mrf.mxu0  ;;  %v8095_v21 = vadd.f32 %v8061_v14, %v1087_v15  ;;  %v1162_v22 = vmul.f32 %v8080_v61, %v8080_v61 }
  0xe2   : > { %1169 = vadd.xlane.f32.xlu1 %v1102_v62  ;;  %v6901_v26 = vpop.f32.mrf.mxu1  ;;  %v8108_v32 = vadd.f32 %v6839_v18, %v8061_v14  ;;  %v1100_v36 = vmul.f32 %v8100_v23, %v8100_v23 }
  0xe3   : > { %1163 = vadd.xlane.f32.xlu0 %v1099_v16  ;;  %v860_v20 = vpop.f32.mrf.mxu0  ;;  %v8105_v31 = vadd.f32 %v6901_v26, %v8092_v19  ;;  %v1160_v35 = vmul.f32 %v8095_v21, %v8095_v21 }
  0xe4   : > { %v1896_v39 = vpop.f32.mrf.mxu1  ;;  %v8117_v43 = vadd.f32 %v8061_v14, %v860_v20  ;;  %v1105_v44 = vmul.f32 %v8108_v32, %v8108_v32 }
  0xe5   : > { %v6840_v30 = vpop.f32.mrf.mxu0  ;;  %v1961_v40 = vmul.f32 %v8105_v31, %v8105_v31  ;;  %v8122_v46 = vadd.f32 %v8092_v19, %v1896_v39 }
  0xe6   : > { %1289 = vadd.xlane.f32.xlu1 %v1162_v22  ;;  %v6902_v49 = vpop.f32.mrf.mxu1  ;;  %v1103_v51 = vmul.f32 %v8117_v43, %v8117_v43  ;;  %v8127_v55 = vadd.f32 %v6840_v30, %v8061_v14 }
  0xe7   : > { %1283 = vadd.xlane.f32.xlu0 %v1159_v29  ;;  %v863_v33 = vpop.f32.mrf.mxu0  ;;  %v1959_v56 = vmul.f32 %v8122_v46, %v8122_v46  ;;  %v8132_v57 = vadd.f32 %v6902_v49, %v8092_v19 }
  0xe8   : > { %v1899_v59 = vpop.f32.mrf.mxu1  ;;  %v8135_v63 = vadd.f32 %v8061_v14, %v863_v33  ;;  %v1106_v0 = vmul.f32 %v8127_v55, %v8127_v55 }
  0xe9   : > { %v6843_v37 = vpop.f32.mrf.mxu0  ;;  %v8140_v1 = vadd.f32 %v8092_v19, %v1899_v59  ;;  %v1962_v3 = vmul.f32 %v8132_v57, %v8132_v57 }
  0xea   : > { %1285 = vadd.xlane.f32.xlu1 %v1160_v35  ;;  %v6905_v2 = vpop.f32.mrf.mxu1  ;;  %v8148_v6 = vadd.f32 %v6843_v37, %v8061_v14  ;;  %v1104_v8 = vmul.f32 %v8135_v63, %v8135_v63 }
  0xeb   : > { %1165 = vadd.xlane.f32.xlu0 %v1100_v36  ;;  %v876_v45 = vpop.f32.mrf.mxu0  ;;  %v8145_v5 = vadd.f32 %v6905_v2, %v8092_v19  ;;  %v1960_v9 = vmul.f32 %v8140_v1, %v8140_v1 }
  0xec   : > { %v1912_v11 = vpop.f32.mrf.mxu1  ;;  %v8159_v17 = vadd.f32 %v8061_v14, %v876_v45  ;;  %v1109_v25 = vmul.f32 %v8148_v6, %v8148_v6 }
  0xed   : > { %v6844_v48 = vpop.f32.mrf.mxu0  ;;  %v1965_v12 = vmul.f32 %v8145_v5, %v8145_v5  ;;  %v8166_v34 = vadd.f32 %v8092_v19, %v1912_v11 }
  0xee   : > { %1979 = vadd.xlane.f32.xlu1 %v1961_v40  ;;  %v6906_v42 = vpop.f32.mrf.mxu1  ;;  %v1107_v47 = vmul.f32 %v8159_v17, %v8159_v17  ;;  %v8175_v54 = vadd.f32 %v6844_v48, %v8061_v14 }
  0xef   : > { %1175 = vadd.xlane.f32.xlu0 %v1105_v44  ;;  %v879_v52 = vpop.f32.mrf.mxu0  ;;  %v1963_v62 = vmul.f32 %v8166_v34, %v8166_v34  ;;  %v8180_v15 = vadd.f32 %v6906_v42, %v8092_v19 }
  0xf0   : > { %v1915_v18 = vpop.f32.mrf.mxu1  ;;  %v8187_v22 = vadd.f32 %v8061_v14, %v879_v52  ;;  %v1110_v26 = vmul.f32 %v8175_v54, %v8175_v54 }
  0xf1   : > { %v6847_v58 = vpop.f32.mrf.mxu0  ;;  %v8192_v29 = vadd.f32 %v8092_v19, %v1915_v18  ;;  %v1966_v33 = vmul.f32 %v8180_v15, %v8180_v15 }
  0xf2   : > { %1975 = vadd.xlane.f32.xlu1 %v1959_v56  ;;  %v6909_v30 = vpop.f32.mrf.mxu1  ;;  %v8202_v37 = vadd.f32 %v6847_v58, %v8061_v14  ;;  %v1108_v40 = vmul.f32 %v8187_v22, %v8187_v22 }
  0xf3   : > { %1171 = vadd.xlane.f32.xlu0 %v1103_v51  ;;  %v892_v60 = vpop.f32.mrf.mxu0  ;;  %v8199_v36 = vadd.f32 %v6909_v30, %v8092_v19  ;;  %v1964_v44 = vmul.f32 %v8192_v29, %v8192_v29 }
  0xf4   : > { %v1928_v48 = vpop.f32.mrf.mxu1  ;;  %v8215_v51 = vadd.f32 %v8061_v14, %v892_v60  ;;  %v1113_v52 = vmul.f32 %v8202_v37, %v8202_v37 }
  0xf5   : > { %v6848_v4 = vpop.f32.mrf.mxu0  ;;  %v1969_v49 = vmul.f32 %v8199_v36, %v8199_v36  ;;  %v8222_v58 = vadd.f32 %v8092_v19, %v1928_v48 }
  0xf6   : > { %1177 = vadd.xlane.f32.xlu1 %v1106_v0  ;;  %v6910_v0 = vpop.f32.mrf.mxu1  ;;  %v1111_v2 = vmul.f32 %v8215_v51, %v8215_v51  ;;  %v8231_v60 = vadd.f32 %v6848_v4, %v8061_v14 }
  0xf7   : > { %1981 = vadd.xlane.f32.xlu0 %v1962_v3  ;;  %v895_v7 = vpop.f32.mrf.mxu0 }
  0xf8   : > { %v8243_v42 = vadd.f32 %v8061_v14, %v895_v7  ;;  %v1114_v4 = vmul.f32 %v8231_v60, %v8231_v60 }
  0xf9   : > { %v8154_v10 = vpop.f32.mrf.mxu0 }
  0xfa   : > { %1173 = vadd.xlane.f32.xlu1 %v1104_v8  ;;  %v1967_v8 = vmul.f32 %v8222_v58, %v8222_v58  ;;  %v8259_v7 = vadd.f32 %v8154_v10, %v8061_v14 }
  0xfb   : > { %1977 = vadd.xlane.f32.xlu0 %v1960_v9  ;;  %v8163_v28 = vpop.f32.mrf.mxu0  ;;  %v8236_v9 = vadd.f32 %v6910_v0, %v8092_v19 }
  0xfc   : > { %11709 = vst [vmem:[#allocation3_spill] sm:$0xff] %v8259_v7  ;;  %v8273_v0 = vadd.f32 %v8061_v14, %v8163_v28  ;;  %v1117_v10 = vmul.f32 %v8259_v7, %v8259_v7 }
  0xfd   : > { %v8168_v38 = vpop.f32.mrf.mxu0  ;;  %v1970_v18 = vmul.f32 %v8236_v9, %v8236_v9 }
  0xfe   : > { %1987 = vadd.xlane.f32.xlu1 %v1965_v12  ;;  %v1931_v12 = vpop.f32.mrf.mxu1  ;;  %11710 = vst [vmem:[#allocation4_spill] sm:$0xff] %v8273_v0  ;;  %v8290_v28 = vadd.f32 %v8168_v38, %v8061_v14 }
  0xff   : > { %1183 = vadd.xlane.f32.xlu0 %v1109_v25  ;;  %v8172_v53 = vpop.f32.mrf.mxu0 }
 0x100   : > { %11712 = vst [vmem:[#allocation6_spill] sm:$0xff] %v8290_v28  ;;  %v1118_v38 = vmul.f32 %v8290_v28, %v8290_v28 }
 0x101   : > { %v8182_v16 = vpop.f32.mrf.mxu0 }
 0x102   : > { %1983 = vadd.xlane.f32.xlu1 %v1963_v62  ;;  %v6913_v62 = vpop.f32.mrf.mxu1  ;;  %v8322_v28 = vadd.f32 %v8182_v16, %v8061_v14 }
 0x103   : > { %1179 = vadd.xlane.f32.xlu0 %v1107_v47  ;;  %v8184_v20 = vpop.f32.mrf.mxu0  ;;  %v8248_v47 = vadd.f32 %v8092_v19, %v1931_v12  ;;  %v8255_v30 = vadd.f32 %v6913_v62, %v8092_v19  ;;  %v1115_v62 = vmul.f32 %v8273_v0, %v8273_v0 }
 0x104   : > { %v8338_v16 = vadd.f32 %v8061_v14, %v8184_v20 }
 0x105   : > { %v8196_v35 = vpop.f32.mrf.mxu0 }
 0x106   : > { %1185 = vadd.xlane.f32.xlu1 %v1110_v26  ;;  %v1119_v20 = vmul.f32 %v8338_v16, %v8338_v16 }
 0x107   : > { %1989 = vadd.xlane.f32.xlu0 %v1966_v33  ;;  %v8204_v39 = vpop.f32.mrf.mxu0 }
 0x109   : > { %v8210_v45 = vpop.f32.mrf.mxu0 }
 0x10a   : > { %1181 = vadd.xlane.f32.xlu1 %v1108_v40  ;;  %v1112_v40 = vmul.f32 %v8243_v42, %v8243_v42 }
 0x10b   : > { %1985 = vadd.xlane.f32.xlu0 %v1964_v44  ;;  %v8219_v56 = vpop.f32.mrf.mxu0  ;;  %v1968_v44 = vmul.f32 %v8248_v47, %v8248_v47 }
 0x10d   : > { %v8224_v59 = vpop.f32.mrf.mxu0 }
 0x10e   : > { %1995 = vadd.xlane.f32.xlu1 %v1969_v49  ;;  %v1944_v49 = vpop.f32.mrf.mxu1 }
 0x10f   : > { %1191 = vadd.xlane.f32.xlu0 %v1113_v52  ;;  %v8228_v3 = vpop.f32.mrf.mxu0  ;;  %v1973_v52 = vmul.f32 %v8255_v30, %v8255_v30 }
 0x111   : > { %v8238_v11 = vpop.f32.mrf.mxu0 }
 0x112   : > { %1991 = vadd.xlane.f32.xlu1 %v1967_v8  ;;  %v8280_v8 = vadd.f32 %v8092_v19, %v1944_v49 }
 0x113   : > { %1187 = vadd.xlane.f32.xlu0 %v1111_v2  ;;  %v8240_v25 = vpop.f32.mrf.mxu0 }
 0x114   : > { %11711 = vst [vmem:[#allocation5_spill] sm:$0xff] %v8280_v8 }
 0x115   : > { %v8252_v26 = vpop.f32.mrf.mxu0 }
 0x116   : > { %1193 = vadd.xlane.f32.xlu1 %v1114_v4  ;;  %v6914_v4 = vpop.f32.mrf.mxu1 }
 0x117   : > { %1997 = vadd.xlane.f32.xlu0 %v1970_v18  ;;  %v8261_v33 = vpop.f32.mrf.mxu0 }
 0x118   : > { %v1947_v7 = vpop.f32.mrf.mxu1 }
 0x119   : > { %v8267_v48 = vpop.f32.mrf.mxu0  ;;  %v8308_v0 = vadd.f32 %v8092_v19, %v1947_v7 }
 0x11a   : > { %1189 = vadd.xlane.f32.xlu1 %v1112_v40  ;;  %v1971_v40 = vmul.f32 %v8280_v8, %v8280_v8 }
 0x11b   : > { %1993 = vadd.xlane.f32.xlu0 %v1968_v44  ;;  %v8277_v2 = vpop.f32.mrf.mxu0  ;;  %v8295_v44 = vadd.f32 %v6914_v4, %v8092_v19  ;;  %11714 = vst [vmem:[#allocation8_spill] sm:$0xff] %v8308_v0  ;;  %v1972_v19 = vmul.f32 %v8308_v0, %v8308_v0  ;;  %v1121_v0 = vmul.f32 %v8322_v28, %v8322_v28 }
 0x11d   : > { %v8282_v12 = vpop.f32.mrf.mxu0  ;;  %v1974_v4 = vmul.f32 %v8295_v44, %v8295_v44 }
 0x11e   : > { %2003 = vadd.xlane.f32.xlu1 %v1973_v52 }
 0x11f   : > { %1199 = vadd.xlane.f32.xlu0 %v1117_v10  ;;  %v8286_v18 = vpop.f32.mrf.mxu0  ;;  %v8303_v10 = vadd.f32 %v8061_v14, %v8172_v53 }
 0x121   : > { %v8297_v49 = vpop.f32.mrf.mxu0  ;;  %11713 = vst [vmem:[#allocation7_spill] sm:$0xff] %v8303_v10  ;;  %v1116_v53 = vmul.f32 %v8303_v10, %v8303_v10 }
 0x122   : > { %1999 = vadd.xlane.f32.xlu1 %v1971_v40 }
 0x123   : > { %1195 = vadd.xlane.f32.xlu0 %v1115_v62  ;;  %v8299_v52 = vpop.f32.mrf.mxu0  ;;  %v8316_v62 = vadd.f32 %v8196_v35, %v8061_v14  ;;  %v8332_v35 = vadd.f32 %v8061_v14, %v8204_v39 }
 0x125   : > { %v6872_v8 = vpop.f32.mrf.mxu0  ;;  %11715 = vst [vmem:[#allocation9_spill] sm:$0xff] %v8316_v62  ;;  %11716 = vst [vmem:[#allocation10_spill] sm:$0xff] %v8332_v35  ;;  %v1120_v39 = vmul.f32 %v8332_v35, %v8332_v35 }
 0x126   : > { %1201 = vadd.xlane.f32.xlu1 %v1118_v38 }
 0x127   : > { %2005 = vadd.xlane.f32.xlu0 %v1974_v4  ;;  %v8312_v40 = vpop.f32.mrf.mxu0  ;;  %v1122_v4 = vmul.f32 %v8316_v62, %v8316_v62 }
 0x129   : > { %v8326_v7 = vpop.f32.mrf.mxu0 }
 0x12a   : > { %1197 = vadd.xlane.f32.xlu1 %v1116_v53  ;;  %v8344_v53 = vadd.f32 %v8224_v59, %v8061_v14 }
 0x12b   : > { %2001 = vadd.xlane.f32.xlu0 %v1972_v19  ;;  %v8328_v38 = vpop.f32.mrf.mxu0  ;;  %v8350_v19 = vadd.f32 %v8210_v45, %v8061_v14 }
 0x12c   : > { %11717 = vst [vmem:[#allocation11_spill] sm:$0xff] %v8344_v53  ;;  %v1126_v59 = vmul.f32 %v8344_v53, %v8344_v53 }
 0x12d   : > { %v6876_v10 = vpop.f32.mrf.mxu0  ;;  %v1125_v45 = vmul.f32 %v8350_v19, %v8350_v19 }
 0x12e   : > { %1209 = vadd.xlane.f32.xlu1 %v1122_v4  ;;  %v8362_v4 = vadd.f32 %v8061_v14, %v8219_v56 }
 0x12f   : > { %1207 = vadd.xlane.f32.xlu0 %v1121_v0  ;;  %v1007_v62 = vpop.f32.mrf.mxu0  ;;  %v8356_v0 = vadd.f32 %v8061_v14, %v8228_v3 }
 0x130   : > { %v1123_v56 = vmul.f32 %v8362_v4, %v8362_v4 }
 0x131   : > { %11718 = vst [vmem:[#allocation12_spill] sm:$0xff] %v8356_v0  ;;  %v6879_v35 = vpop.f32.mrf.mxu0  ;;  %v1124_v3 = vmul.f32 %v8356_v0, %v8356_v0 }
 0x132   : > { %1205 = vadd.xlane.f32.xlu1 %v1120_v39  ;;  %v8368_v39 = vadd.f32 %v8252_v26, %v8061_v14 }
 0x133   : > { %1203 = vadd.xlane.f32.xlu0 %v1119_v20  ;;  %v8374_v20 = vadd.f32 %v8238_v11, %v8061_v14  ;;  %v1020_v53 = vpop.f32.mrf.mxu0 }
 0x134   : > { %11719 = vst [vmem:[#allocation13_spill] sm:$0xff] %v8368_v39  ;;  %v1130_v26 = vmul.f32 %v8368_v39, %v8368_v39 }
 0x135   : > { %v1129_v11 = vmul.f32 %v8374_v20, %v8374_v20  ;;  %v6880_v0 = vpop.f32.mrf.mxu0 }
 0x136   : > { %1217 = vadd.xlane.f32.xlu1 %v1126_v59  ;;  %v8380_v59 = vadd.f32 %v8061_v14, %v8261_v33 }
 0x137   : > { %1215 = vadd.xlane.f32.xlu0 %v1125_v45  ;;  %v8386_v45 = vadd.f32 %v8061_v14, %v8240_v25  ;;  %v1023_v39 = vpop.f32.mrf.mxu0 }
 0x138   : > { %11720 = vst [vmem:[#allocation14_spill] sm:$0xff] %v8380_v59  ;;  %v1128_v33 = vmul.f32 %v8380_v59, %v8380_v59 }
 0x139   : > { %v1127_v25 = vmul.f32 %v8386_v45, %v8386_v45  ;;  %v6883_v59 = vpop.f32.mrf.mxu0 }
 0x13a   : > { %1213 = vadd.xlane.f32.xlu1 %v1124_v3  ;;  %v8392_v3 = vadd.f32 %v8282_v12, %v8061_v14 }
 0x13b   : > { %1211 = vadd.xlane.f32.xlu0 %v1123_v56  ;;  %v8398_v56 = vadd.f32 %v8267_v48, %v8061_v14 }
 0x13c   : > { %11721 = vst [vmem:[#allocation15_spill] sm:$0xff] %v8392_v3  ;;  %v1134_v12 = vmul.f32 %v8392_v3, %v8392_v3  ;;  %v1036_v3 = vpop.f32.mrf.mxu0 }
 0x13d   : > { %v1133_v48 = vmul.f32 %v8398_v56, %v8398_v56 }
 0x13e   : > { %1225 = vadd.xlane.f32.xlu1 %v1130_v26  ;;  %v8404_v26 = vadd.f32 %v8061_v14, %v8286_v18 }
 0x13f   : > { %1223 = vadd.xlane.f32.xlu0 %v1129_v11  ;;  %v8410_v11 = vadd.f32 %v8061_v14, %v8277_v2 }
 0x140   : > { %11722 = vst [vmem:[#allocation16_spill] sm:$0xff] %v8404_v26  ;;  %v1132_v18 = vmul.f32 %v8404_v26, %v8404_v26  ;;  %v6884_v26 = vpop.f32.mrf.mxu0 }
 0x141   : > { %v1131_v2 = vmul.f32 %v8410_v11, %v8410_v11 }
 0x142   : > { %1221 = vadd.xlane.f32.xlu1 %v1128_v33  ;;  %v8415_v33 = vadd.f32 %v6872_v8, %v8061_v14 }
 0x143   : > { %1219 = vadd.xlane.f32.xlu0 %v1127_v25  ;;  %v8421_v25 = vadd.f32 %v8297_v49, %v8061_v14 }
 0x144   : > { %11723 = vst [vmem:[#allocation17_spill] sm:$0xff] %v8415_v33  ;;  %v1138_v8 = vmul.f32 %v8415_v33, %v8415_v33  ;;  %v1039_v33 = vpop.f32.mrf.mxu0 }
 0x145   : > { %11724 = vst [vmem:[#allocation18_spill] sm:$0xff] %v8421_v25  ;;  %v1137_v49 = vmul.f32 %v8421_v25, %v8421_v25  ;;  %v8449_v25 = vadd.f32 %v8061_v14, %v1007_v62 }
 0x146   : > { %1233 = vadd.xlane.f32.xlu1 %v1134_v12  ;;  %v8427_v12 = vadd.f32 %v8061_v14, %v8312_v40 }
 0x147   : > { %1231 = vadd.xlane.f32.xlu0 %v1133_v48  ;;  %v8433_v48 = vadd.f32 %v8061_v14, %v8299_v52  ;;  %11728 = vst [vmem:[#allocation22_spill] sm:$0xff] %v8449_v25  ;;  %v1140_v62 = vmul.f32 %v8449_v25, %v8449_v25 }
 0x148   : > { %v1136_v40 = vmul.f32 %v8427_v12, %v8427_v12 }
 0x149   : > { %11725 = vst [vmem:[#allocation19_spill] sm:$0xff] %v8433_v48  ;;  %v1135_v52 = vmul.f32 %v8433_v48, %v8433_v48  ;;  %v8460_v48 = vadd.f32 %v6880_v0, %v8061_v14  ;;  %v8475_v0 = vadd.f32 %v8061_v14, %v1020_v53 }
 0x14a   : > { %1229 = vadd.xlane.f32.xlu1 %v1132_v18  ;;  %v8438_v18 = vadd.f32 %v6876_v10, %v8061_v14 }
 0x14b   : > { %1227 = vadd.xlane.f32.xlu0 %v1131_v2  ;;  %v8444_v2 = vadd.f32 %v8326_v7, %v8061_v14  ;;  %11730 = vst [vmem:[#allocation24_spill] sm:$0xff] %v8460_v48  ;;  %11733 = vst [vmem:[#allocation27_spill] sm:$0xff] %v8475_v0 }
 0x14c   : > { %11726 = vst [vmem:[#allocation20_spill] sm:$0xff] %v8438_v18  ;;  %v1142_v10 = vmul.f32 %v8438_v18, %v8438_v18 }
 0x14d   : > { %11727 = vst [vmem:[#allocation21_spill] sm:$0xff] %v8444_v2  ;;  %v1141_v7 = vmul.f32 %v8444_v2, %v8444_v2  ;;  %v8470_v2 = vadd.f32 %v8061_v14, %v1023_v39  ;;  %v8485_v39 = vadd.f32 %v6883_v59, %v8061_v14 }
 0x14e   : > { %1241 = vadd.xlane.f32.xlu1 %v1138_v8  ;;  %v8455_v8 = vadd.f32 %v8061_v14, %v8328_v38 }
 0x14f   : > { %1239 = vadd.xlane.f32.xlu0 %v1137_v49  ;;  %v6887_v49 = vpop.f32.mrf.mxu0  ;;  %11732 = vst [vmem:[#allocation26_spill] sm:$0xff] %v8470_v2  ;;  %11735 = vst [vmem:[#allocation29_spill] sm:$0xff] %v8485_v39 }
 0x150   : > { %11729 = vst [vmem:[#allocation23_spill] sm:$0xff] %v8455_v8 }
 0x151   : > { %v1052_v38 = vpop.f32.mrf.mxu0 }
 0x152   : > { %1237 = vadd.xlane.f32.xlu1 %v1136_v40  ;;  %v8465_v40 = vadd.f32 %v6879_v35, %v8061_v14 }
 0x153   : > { %1235 = vadd.xlane.f32.xlu0 %v1135_v52  ;;  %v1139_v52 = vmul.f32 %v8455_v8, %v8455_v8  ;;  %v6888_v35 = vpop.f32.mrf.mxu0  ;;  %v8480_v8 = vadd.f32 %v6884_v26, %v8061_v14  ;;  %v8495_v26 = vadd.f32 %v8061_v14, %v1036_v3 }
 0x154   : > { %11731 = vst [vmem:[#allocation25_spill] sm:$0xff] %v8465_v40 }
 0x155   : > { %11734 = vst [vmem:[#allocation28_spill] sm:$0xff] %v8480_v8  ;;  %v1055_v53 = vpop.f32.mrf.mxu0  ;;  %11737 = vst [vmem:[#allocation31_spill] sm:$0xff] %v8495_v26 }
 0x156   : > { %1249 = vadd.xlane.f32.xlu1 %v1142_v10  ;;  %v1146_v10 = vmul.f32 %v8460_v48, %v8460_v48  ;;  %v1147_v48 = vmul.f32 %v8495_v26, %v8495_v26 }
 0x157   : > { %1247 = vadd.xlane.f32.xlu0 %v1141_v7  ;;  %v1145_v7 = vmul.f32 %v8465_v40, %v8465_v40  ;;  %v8490_v40 = vadd.f32 %v8061_v14, %v1039_v33  ;;  %v6891_v59 = vpop.f32.mrf.mxu0 }
 0x159   : > { %11736 = vst [vmem:[#allocation30_spill] sm:$0xff] %v8490_v40  ;;  %v1148_v33 = vmul.f32 %v8490_v40, %v8490_v40  ;;  %v1068_v3 = vpop.f32.mrf.mxu0 }
 0x15a   : > { %1245 = vadd.xlane.f32.xlu1 %v1140_v62  ;;  %v1144_v62 = vmul.f32 %v8470_v2, %v8470_v2 }
 0x15b   : > { %1243 = vadd.xlane.f32.xlu0 %v1139_v52  ;;  %v1143_v52 = vmul.f32 %v8475_v0, %v8475_v0  ;;  %v8500_v0 = vadd.f32 %v6888_v35, %v8061_v14  ;;  %v6892_v25 = vpop.f32.mrf.mxu0 }
 0x15d   : > { %11738 = vst [vmem:[#allocation32_spill] sm:$0xff] %v8500_v0  ;;  %v1154_v40 = vmul.f32 %v8500_v0, %v8500_v0  ;;  %v1071_v0 = vpop.f32.mrf.mxu0 }
 0x15e   : > { %1257 = vadd.xlane.f32.xlu1 %v1146_v10  ;;  %v1150_v10 = vmul.f32 %v8480_v8, %v8480_v8  ;;  %v8505_v8 = vadd.f32 %v6887_v49, %v8061_v14  ;;  %v8515_v49 = vadd.f32 %v8061_v14, %v1052_v38  ;;  %v8525_v38 = vadd.f32 %v6891_v59, %v8061_v14 }
 0x15f   : > { %1255 = vadd.xlane.f32.xlu0 %v1145_v7  ;;  %v1149_v7 = vmul.f32 %v8485_v39, %v8485_v39 }
 0x160   : > { %v1153_v26 = vmul.f32 %v8505_v8, %v8505_v8  ;;  %11740 = vst [vmem:[#allocation34_spill] sm:$0xff] %v8525_v38 }
 0x162   : > { %1253 = vadd.xlane.f32.xlu1 %v1144_v62 }
 0x163   : > { %1251 = vadd.xlane.f32.xlu0 %v1143_v52 }
 0x166   : > { %1265 = vadd.xlane.f32.xlu1 %v1150_v10  ;;  %v8510_v10 = vadd.f32 %v8061_v14, %v1055_v53 }
 0x167   : > { %1263 = vadd.xlane.f32.xlu0 %v1149_v7  ;;  %v1168_v2 = vpop.xlane.xlu1 %1167 }
 0x168   : > { %v1288_v62 = vpop.xlane.xlu0 %1287  ;;  %v1293_v52 = vmax.f32 %v1168_v2, 1e-24 }
 0x169   : > { %v1353_v35 = vmax.f32 %v1288_v62, 1e-24 }
 0x16a   : > { %1261 = vadd.xlane.f32.xlu1 %v1148_v33  ;;  %7425 = vrsqrt.f32 %v1293_v52  ;;  %v1152_v33 = vmul.f32 %v8510_v10, %v8510_v10 }
 0x16b   : > { %1259 = vadd.xlane.f32.xlu0 %v1147_v48  ;;  %v1170_v7 = vpop.xlane.xlu1 %1169  ;;  %v8520_v48 = vadd.f32 %v6892_v25, %v8061_v14  ;;  %v8530_v25 = vadd.f32 %v8061_v14, %v1071_v0 }
 0x16c   : > { %v1294_v39 = vmax.f32 %v1170_v7, 1e-24  ;;  %v1164_v2 = vpop.xlane.xlu0 %1163 }
 0x16d   : > { %11739 = vst [vmem:[#allocation33_spill] sm:$0xff] %v8520_v48  ;;  %v1291_v7 = vmax.f32 %v1164_v2, 1e-24  ;;  %11741 = vst [vmem:[#allocation35_spill] sm:$0xff] %v8530_v25  ;;  %v1158_v59 = vmul.f32 %v8520_v48, %v8520_v48  ;;  %v8535_v2 = vadd.f32 %v8061_v14, %v1068_v3 }
 0x16e   : > { %7427 = vrsqrt.f32 %v1294_v39  ;;  %1273 = vadd.xlane.f32.xlu1 %v1154_v40  ;;  %v1151_v40 = vmul.f32 %v8515_v49, %v8515_v49 }
 0x16f   : > { %1271 = vadd.xlane.f32.xlu0 %v1153_v26  ;;  %v1290_v53 = vpop.xlane.xlu1 %1289  ;;  %7429 = vrsqrt.f32 %v1353_v35  ;;  %11742 = vst [vmem:[#allocation36_spill] sm:$0xff] %v8535_v2  ;;  %v1155_v14 = vmul.f32 %v8535_v2, %v8535_v2 }
 0x170   : > { %v1354_v62 = vmax.f32 %v1290_v53, 1e-24  ;;  %v1284_v52 = vpop.xlane.xlu0 %1283 }
 0x171   : > { %v1351_v18 = vmax.f32 %v1284_v52, 1e-24 }
 0x172   : > { %7431 = vrsqrt.f32 %v1354_v62  ;;  %1269 = vadd.xlane.f32.xlu1 %v1152_v33  ;;  %v1157_v62 = vmul.f32 %v8525_v38, %v8525_v38  ;;  %v1156_v33 = vmul.f32 %v8530_v25, %v8530_v25 }
 0x173   : > { %1267 = vadd.xlane.f32.xlu0 %v1151_v40  ;;  %v1286_v39 = vpop.xlane.xlu1 %1285  ;;  %7433 = vrsqrt.f32 %v1351_v18 }
 0x174   : > { %v1352_v26 = vmax.f32 %v1286_v39, 1e-24  ;;  %v1166_v35 = vpop.xlane.xlu0 %1165  ;;  %7435 = vrsqrt.f32 %v1291_v7 }
 0x175   : > { %v1292_v53 = vmax.f32 %v1166_v35, 1e-24 }
 0x176   : > { %7437 = vrsqrt.f32 %v1352_v26  ;;  %1281 = vadd.xlane.f32.xlu1 %v1158_v59 }
 0x177   : > { %7439 = vrsqrt.f32 %v1292_v53  ;;  %1279 = vadd.xlane.f32.xlu0 %v1157_v62  ;;  %v1980_v0 = vpop.xlane.xlu1 %1979  ;;  %v7426_v40 = vpop.eup %7425 }
 0x178   : > { %v2009_v52 = vmax.f32 %v1980_v0, 1e-24  ;;  %v1176_v18 = vpop.xlane.xlu0 %1175  ;;  %v1421_v26 = vmul.f32 %v7426_v40, %v8064_v24 }
 0x179   : > { %v1297_v7 = vmax.f32 %v1176_v18, 1e-24 }
 0x17a   : > { %7441 = vrsqrt.f32 %v2009_v52  ;;  %1277 = vadd.xlane.f32.xlu1 %v1156_v33 }
 0x17b   : > { %v7428_v3 = vpop.eup %7427  ;;  %1275 = vadd.xlane.f32.xlu0 %v1155_v14  ;;  %v1976_v39 = vpop.xlane.xlu1 %1975 }
 0x17c   : > { %v1422_v35 = vmul.f32 %v7428_v3, %v8077_v50  ;;  %v2007_v59 = vmax.f32 %v1976_v39, 1e-24  ;;  %v1172_v53 = vpop.xlane.xlu0 %1171  ;;  %v7430_v62 = vpop.eup %7429 }
 0x17d   : > { %v1481_v2 = vmul.f32 %v7430_v62, %v8067_v27  ;;  %v1295_v18 = vmax.f32 %v1172_v53, 1e-24 }
 0x17e   : > { %v6461_v0 = vpack.c.bf16 %v1422_v35, %v1421_v26  ;;  %7443 = vrsqrt.f32 %v2007_v59 }
 0x17f   : > { %v7432_v25 = vpop.eup %7431  ;;  %7445 = vrsqrt.f32 %v1297_v7  ;;  %v1178_v38 = vpop.xlane.xlu1 %1177 }
 0x180   : > { %6613 = vst [vmem:[#allocation2 + $0x8] sm:$0xff] %v6461_v0   ;;  %v1482_v52 = vmul.f32 %v7432_v25, %v8080_v61  ;;  %v1298_v33 = vmax.f32 %v1178_v38, 1e-24  ;;  %v1982_v14 = vpop.xlane.xlu0 %1981  ;;  %v7434_v48 = vpop.eup %7433 }
 0x181   : > { %v2010_v24 = vmax.f32 %v1982_v14, 1e-24  ;;  %v7436_v40 = vpop.eup %7435  ;;  %v1479_v7 = vmul.f32 %v7434_v48, %v8085_v13  ;;  %v8549_v38 = vpop.f32.mrf.mxu0 }
 0x182   : > { %v6611_v50 = vpack.c.bf16 %v1482_v52, %v1481_v2  ;;  %7447 = vrsqrt.f32 %v1298_v33  ;;  %v1419_v35 = vmul.f32 %v7436_v40, %v8072_v41  ;;  %v3013_v13 = vmax.f32 %v8549_v38, 1e-09 }
 0x183   : > { %v7438_v3 = vpop.eup %7437  ;;  %7449 = vrsqrt.f32 %v2010_v24  ;;  %v1174_v39 = vpop.xlane.xlu1 %1173 }
 0x184   : > { %v7440_v26 = vpop.eup %7439  ;;  %6643 = vst [vmem:[#allocation2 + $0xf8] sm:$0xff] %v6611_v50   ;;  %v1480_v27 = vmul.f32 %v7438_v3, %v8095_v21  ;;  %7451 = vrsqrt.f32 %v1295_v18  ;;  %v1296_v61 = vmax.f32 %v1174_v39, 1e-24  ;;  %v1978_v25 = vpop.xlane.xlu0 %1977 }
 0x185   : > { %v1420_v2 = vmul.f32 %v7440_v26, %v8100_v23  ;;  %v2008_v59 = vmax.f32 %v1978_v25, 1e-24  ;;  %v8554_v21 = vpop.f32.mrf.mxu0 }
 0x186   : > { %v6606_v53 = vpack.c.bf16 %v1480_v27, %v1479_v7  ;;  %7453 = vrsqrt.f32 %v1296_v61  ;;  %v3012_v18 = vmax.f32 %v8554_v21, 1e-09 }
 0x187   : > { %v7442_v62 = vpop.eup %7441  ;;  %v6456_v0 = vpack.c.bf16 %v1420_v2, %v1419_v35  ;;  %7455 = vrsqrt.f32 %v2008_v59  ;;  %v1988_v52 = vpop.xlane.xlu1 %1987 }
 0x188   : > { %6642 = vst [vmem:[#allocation2 + $0xf0] sm:$0xff] %v6606_v53   ;;  %v2013_v41 = vmax.f32 %v1988_v52, 1e-24  ;;  %v1184_v23 = vpop.xlane.xlu0 %1183  ;;  %v2041_v48 = vmul.f32 %v7442_v62, %v8105_v31  ;;  %v8567_v7 = vpop.f32.mrf.mxu0 }
 0x189   : > { %6457 = vst [vmem:[#allocation2] sm:$0xff] %v6456_v0   ;;  %v1301_v50 = vmax.f32 %v1184_v23, 1e-24  ;;  %v3015_v25 = vmax.f32 %v8567_v7, 1e-09 }
 0x18a   : > { %7457 = vrsqrt.f32 %v2013_v41  ;;  %2057 = vst [vmem:[%s8560_s24 + $0x10] sm:$0xff] %v2041_v48  ;;  %v8574_v62 = vpop.f32.mrf.mxu0 }
 0x18b   : > { %v7444_v33 = vpop.eup %7443  ;;  %v1984_v14 = vpop.xlane.xlu1 %1983  ;;  %v7377_v24 = vld [vmem:[#allocation2 + $0xf8] sm:$0xff]   ;;  %3175 = vrot.lane.b32.xlu1 %v3013_v13, %s7721_s25 }
 0x18c   : > { %v7446_v40 = vpop.eup %7445  ;;  %v2011_v3 = vmax.f32 %v1984_v14, 1e-24  ;;  %v1180_v39 = vpop.xlane.xlu0 %1179  ;;  %v2039_v26 = vmul.f32 %v7444_v33, %v8122_v46  ;;  %6783 = vmatprep.subr.bf16.mxu0 %v7377_v24  ;;  %v3014_v14 = vmax.f32 %v8574_v62, 1e-09 }
 0x18d   : > { %v1425_v27 = vmul.f32 %v7446_v40, %v8108_v32  ;;  %v1299_v59 = vmax.f32 %v1180_v39, 1e-24  ;;  %v8578_v23 = vpop.f32.mrf.mxu0 }
 0x18e   : > { %7459 = vrsqrt.f32 %v2011_v3  ;;  %2055 = vst [vmem:[%s8560_s24] sm:$0xff] %v2039_v26 }
 0x18f   : > { %v7448_v31 = vpop.eup %7447  ;;  %v1186_v61 = vpop.xlane.xlu1 %1185  ;;  %3173 = vrot.lane.b32.xlu1 %v3012_v18, %s7721_s25  ;;  %7461 = vrsqrt.f32 %v1301_v50 }
 0x190   : > { %v7450_v35 = vpop.eup %7449  ;;  %v1426_v2 = vmul.f32 %v7448_v31, %v8127_v55  ;;  %v1302_v53 = vmax.f32 %v1186_v61, 1e-24  ;;  %v1990_v46 = vpop.xlane.xlu0 %1989 }
 0x191   : > { %v7452_v0 = vpop.eup %7451  ;;  %v2014_v52 = vmax.f32 %v1990_v46, 1e-24  ;;  %3046 = vrot.lane.b32.xlu0 %v3013_v13, %s7722_s26  ;;  %v2042_v32 = vmul.f32 %v7450_v35, %v8132_v57  ;;  %v8587_v39 = vpop.f32.mrf.mxu0 }
 0x192   : > { %v6471_v41 = vpack.c.bf16 %v1426_v2, %v1425_v27  ;;  %7463 = vrsqrt.f32 %v1302_v53  ;;  %v1423_v13 = vmul.f32 %v7452_v0, %v8117_v43 }
 0x193   : > { %v7454_v33 = vpop.eup %7453  ;;  %7465 = vrsqrt.f32 %v2014_v52  ;;  %v1182_v55 = vpop.xlane.xlu1 %1181  ;;  %3179 = vrot.lane.b32.xlu1 %v3015_v25, %s7721_s25  ;;  %2058 = vst [vmem:[%s8560_s24 + $0x18] sm:$0xff] %v2042_v32  ;;  %v8583_v24 = vpack.c.bf16 %v2042_v32, %v2041_v48 }
 0x194   : > { %v7456_v40 = vpop.eup %7455  ;;  %6615 = vst [vmem:[#allocation2 + $0x18] sm:$0xff] %v6471_v41   ;;  %v1424_v57 = vmul.f32 %v7454_v33, %v8135_v63  ;;  %7467 = vrsqrt.f32 %v1299_v59  ;;  %v1300_v50 = vmax.f32 %v1182_v55, 1e-24  ;;  %v1986_v3 = vpop.xlane.xlu0 %1985  ;;  %v3017_v63 = vmax.f32 %v8578_v23, 1e-09 }
 0x195   : > { %v2012_v31 = vmax.f32 %v1986_v3, 1e-24  ;;  %3044 = vrot.lane.b32.xlu0 %v3012_v18, %s7722_s26  ;;  %v2040_v27 = vmul.f32 %v7456_v40, %v8140_v1  ;;  %v8596_v53 = vpop.f32.mrf.mxu0  ;;  %v3016_v18 = vmax.f32 %v8587_v39, 1e-09 }
 0x196   : > { %v6466_v61 = vpack.c.bf16 %v1424_v57, %v1423_v13  ;;  %7469 = vrsqrt.f32 %v1300_v50 }
 0x197   : > { %v7458_v48 = vpop.eup %7457  ;;  %7471 = vrsqrt.f32 %v2012_v31  ;;  %v1996_v35 = vpop.xlane.xlu1 %1995  ;;  %2056 = vst [vmem:[%s8560_s24 + $0x8] sm:$0xff] %v2040_v27  ;;  %v8592_v43 = vpack.c.bf16 %v2040_v27, %v2039_v26  ;;  %3177 = vrot.lane.b32.xlu1 %v3014_v14, %s7721_s25 }
 0x198   : > { %6614 = vst [vmem:[#allocation2 + $0x10] sm:$0xff] %v6466_v61   ;;  %v2017_v2 = vmax.f32 %v1996_v35, 1e-24  ;;  %v1192_v59 = vpop.xlane.xlu0 %1191  ;;  %v2045_v1 = vmul.f32 %v7458_v48, %v8145_v5  ;;  %v8604_v41 = vpop.f32.mrf.mxu0 }
 0x199   : > { %6923 = vmatprep.mubr.bf16.mxu1 %v8592_v43  ;;  %3050 = vrot.lane.b32.xlu0 %v3015_v25, %s7722_s26  ;;  %v1305_v46 = vmax.f32 %v1192_v59, 1e-24  ;;  %v3018_v40 = vmax.f32 %v8604_v41, 1e-09 }
 0x19a   : > { %7473 = vrsqrt.f32 %v2017_v2  ;;  %2061 = vst [vmem:[%s8560_s24 + $0x30] sm:$0xff] %v2045_v1 }
 0x19b   : > { %v7460_v26 = vpop.eup %7459  ;;  %v1992_v0 = vpop.xlane.xlu1 %1991  ;;  %3183 = vrot.lane.b32.xlu1 %v3017_v63, %s7721_s25 }
 0x19c   : > { %v2015_v52 = vmax.f32 %v1992_v0, 1e-24  ;;  %v1188_v32 = vpop.xlane.xlu0 %1187  ;;  %v8607_v5 = vmul.f32 %v7460_v26, %v8166_v34  ;;  %v7462_v33 = vpop.eup %7461 }
 0x19d   : > { %3048 = vrot.lane.b32.xlu0 %v3014_v14, %s7722_s26  ;;  %v1429_v57 = vmul.f32 %v7462_v33, %v8148_v6  ;;  %v1303_v34 = vmax.f32 %v1188_v32, 1e-24  ;;  %v8616_v14 = vpop.f32.mrf.mxu0  ;;  %v3019_v33 = vmax.f32 %v8596_v53, 1e-09 }
 0x19e   : > { %7475 = vrsqrt.f32 %v2015_v52  ;;  %2059 = vst [vmem:[%s8560_s24 + $0x20] sm:$0xff] %v8607_v5  ;;  %v3021_v6 = vmax.f32 %v8616_v14, 1e-09 }
 0x19f   : > { %v7464_v25 = vpop.eup %7463  ;;  %7477 = vrsqrt.f32 %v1305_v46  ;;  %v1194_v55 = vpop.xlane.xlu1 %1193  ;;  %3181 = vrot.lane.b32.xlu1 %v3016_v18, %s7721_s25 }
 0x1a0   : > { %v7466_v13 = vpop.eup %7465  ;;  %v1430_v50 = vmul.f32 %v7464_v25, %v8175_v54  ;;  %v1306_v3 = vmax.f32 %v1194_v55, 1e-24  ;;  %v1998_v31 = vpop.xlane.xlu0 %1997 }
 0x1a1   : > { %v7468_v27 = vpop.eup %7467  ;;  %v2018_v61 = vmax.f32 %v1998_v31, 1e-24  ;;  %3054 = vrot.lane.b32.xlu0 %v3017_v63, %s7722_s26  ;;  %v2046_v48 = vmul.f32 %v7466_v13, %v8180_v15  ;;  %v8629_v52 = vpop.f32.mrf.mxu0 }
 0x1a2   : > { %v6481_v35 = vpack.c.bf16 %v1430_v50, %v1429_v57  ;;  %7479 = vrsqrt.f32 %v1306_v3  ;;  %v1427_v46 = vmul.f32 %v7468_v27, %v8159_v17  ;;  %v3020_v55 = vmax.f32 %v8629_v52, 1e-09 }
 0x1a3   : > { %v7470_v2 = vpop.eup %7469  ;;  %7481 = vrsqrt.f32 %v2018_v61  ;;  %v1190_v59 = vpop.xlane.xlu1 %1189  ;;  %3185 = vrot.lane.b32.xlu1 %v3018_v40, %s7721_s25  ;;  %2062 = vst [vmem:[%s8560_s24 + $0x38] sm:$0xff] %v2046_v48  ;;  %v8625_v54 = vpack.c.bf16 %v2046_v48, %v2045_v1 }
 0x1a4   : > { %v7472_v26 = vpop.eup %7471  ;;  %6617 = vst [vmem:[#allocation2 + $0x28] sm:$0xff] %v6481_v35   ;;  %v1428_v15 = vmul.f32 %v7470_v2, %v8187_v22  ;;  %7483 = vrsqrt.f32 %v1303_v34  ;;  %v1304_v63 = vmax.f32 %v1190_v59, 1e-24  ;;  %v1994_v0 = vpop.xlane.xlu0 %1993 }
 0x1a5   : > { %v2016_v32 = vmax.f32 %v1994_v0, 1e-24  ;;  %3052 = vrot.lane.b32.xlu0 %v3016_v18, %s7722_s26  ;;  %v8634_v1 = vmul.f32 %v7472_v26, %v8192_v29  ;;  %v8642_v57 = vpop.f32.mrf.mxu0 }
 0x1a6   : > { %v6476_v25 = vpack.c.bf16 %v1428_v15, %v1427_v46  ;;  %7485 = vrsqrt.f32 %v1304_v63  ;;  %v3023_v3 = vmax.f32 %v8642_v57, 1e-09 }
 0x1a7   : > { %v7474_v17 = vpop.eup %7473  ;;  %7487 = vrsqrt.f32 %v2016_v32  ;;  %v2004_v22 = vpop.xlane.xlu1 %2003  ;;  %3191 = vrot.lane.b32.xlu1 %v3021_v6, %s7721_s25  ;;  %2060 = vst [vmem:[%s8560_s24 + $0x28] sm:$0xff] %v8634_v1 }
 0x1a8   : > { %6616 = vst [vmem:[#allocation2 + $0x20] sm:$0xff] %v6476_v25   ;;  %v2021_v13 = vmax.f32 %v2004_v22, 1e-24  ;;  %v1200_v18 = vpop.xlane.xlu0 %1199  ;;  %v8645_v29 = vmul.f32 %v7474_v17, %v8199_v36  ;;  %v8654_v36 = vpop.f32.mrf.mxu0 }
 0x1a9   : > { %3058 = vrot.lane.b32.xlu0 %v3019_v33, %s7722_s26  ;;  %v1309_v27 = vmax.f32 %v1200_v18, 1e-24  ;;  %v3022_v46 = vmax.f32 %v8654_v36, 1e-09 }
 0x1aa   : > { %7489 = vrsqrt.f32 %v2021_v13  ;;  %2065 = vst [vmem:[%s8560_s24 + $0x50] sm:$0xff] %v8645_v29 }
 0x1ab   : > { %v7476_v50 = vpop.eup %7475  ;;  %v2000_v34 = vpop.xlane.xlu1 %1999  ;;  %3060 = vrot.lane.b32.xlu1 %v3020_v55, %s7722_s26 }
 0x1ac   : > { %v7478_v31 = vpop.eup %7477  ;;  %v2019_v61 = vmax.f32 %v2000_v34, 1e-24  ;;  %v1196_v48 = vpop.xlane.xlu0 %1195  ;;  %v8657_v35 = vmul.f32 %v7476_v50, %v8222_v58 }
 0x1ad   : > { %3187 = vrot.lane.b32.xlu0 %v3019_v33, %s7721_s25  ;;  %v1433_v59 = vmul.f32 %v7478_v31, %v8202_v37  ;;  %v1307_v58 = vmax.f32 %v1196_v48, 1e-24  ;;  %v8668_v33 = vpop.f32.mrf.mxu0 }
 0x1ae   : > { %7491 = vrsqrt.f32 %v2019_v61  ;;  %2063 = vst [vmem:[%s8560_s24 + $0x40] sm:$0xff] %v8657_v35  ;;  %v3025_v18 = vmax.f32 %v8668_v33, 1e-09 }
 0x1af   : > { %v7480_v2 = vpop.eup %7479  ;;  %v1202_v26 = vpop.xlane.xlu1 %1201  ;;  %3066 = vrot.lane.b32.xlu1 %v3023_v3, %s7722_s26  ;;  %7493 = vrsqrt.f32 %v1309_v27 }
 0x1b0   : > { %v7482_v15 = vpop.eup %7481  ;;  %v1434_v63 = vmul.f32 %v7480_v2, %v8231_v60  ;;  %v1310_v0 = vmax.f32 %v1202_v26, 1e-24  ;;  %v2006_v32 = vpop.xlane.xlu0 %2005 }
 0x1b1   : > { %v7484_v25 = vpop.eup %7483  ;;  %v2022_v17 = vmax.f32 %v2006_v32, 1e-24  ;;  %3056 = vrot.lane.b32.xlu0 %v3018_v40, %s7722_s26  ;;  %v8674_v37 = vmul.f32 %v7482_v15, %v8236_v9  ;;  %v8684_v27 = vpop.f32.mrf.mxu0 }
 0x1b2   : > { %v6491_v22 = vpack.c.bf16 %v1434_v63, %v1433_v59  ;;  %7495 = vrsqrt.f32 %v1310_v0  ;;  %v1431_v34 = vmul.f32 %v7484_v25, %v8215_v51 }
 0x1b3   : > { %v7486_v13 = vpop.eup %7485  ;;  %7497 = vrsqrt.f32 %v2022_v17  ;;  %v1198_v60 = vpop.xlane.xlu1 %1197  ;;  %3064 = vrot.lane.b32.xlu1 %v3022_v46, %s7722_s26  ;;  %2066 = vst [vmem:[%s8560_s24 + $0x58] sm:$0xff] %v8674_v37  ;;  %v11743_v17 = vld [vmem:[#allocation5_spill] sm:$0xff] }
 0x1b4   : > { %v7488_v50 = vpop.eup %7487  ;;  %6619 = vst [vmem:[#allocation2 + $0x38] sm:$0xff] %v6491_v22   ;;  %v1432_v9 = vmul.f32 %v7486_v13, %v8243_v42  ;;  %7499 = vrsqrt.f32 %v1307_v58  ;;  %v1308_v40 = vmax.f32 %v1198_v60, 1e-24  ;;  %v2002_v31 = vpop.xlane.xlu0 %2001  ;;  %v3024_v42 = vmax.f32 %v8684_v27, 1e-09 }
 0x1b5   : > { %v2020_v61 = vmax.f32 %v2002_v31, 1e-24  ;;  %3062 = vrot.lane.b32.xlu0 %v3021_v6, %s7722_s26  ;;  %v8690_v48 = vmul.f32 %v7488_v50, %v8248_v47  ;;  %v8699_v15 = vpop.f32.mrf.mxu0  ;;  %v11744_v31 = vld [vmem:[#allocation3_spill] sm:$0xff] }
 0x1b6   : > { %v6486_v2 = vpack.c.bf16 %v1432_v9, %v1431_v34  ;;  %7501 = vrsqrt.f32 %v1308_v40  ;;  %v3027_v32 = vmax.f32 %v8699_v15, 1e-09 }
 0x1b7   : > { %v7490_v51 = vpop.eup %7489  ;;  %7503 = vrsqrt.f32 %v2020_v61  ;;  %v1210_v59 = vpop.xlane.xlu1 %1209  ;;  %3199 = vrot.lane.b32.xlu1 %v3025_v18, %s7721_s25  ;;  %2064 = vst [vmem:[%s8560_s24 + $0x48] sm:$0xff] %v8690_v48 }
 0x1b8   : > { %6618 = vst [vmem:[#allocation2 + $0x30] sm:$0xff] %v6486_v2   ;;  %v1314_v26 = vmax.f32 %v1210_v59, 1e-24  ;;  %v1208_v6 = vpop.xlane.xlu0 %1207  ;;  %v2053_v47 = vmul.f32 %v7490_v51, %v8255_v30  ;;  %v8710_v13 = vpop.f32.mrf.mxu0  ;;  %v11745_v2 = vld [vmem:[#allocation6_spill] sm:$0xff] }
 0x1b9   : > { %v1313_v63 = vmax.f32 %v1208_v6, 1e-24  ;;  %3189 = vrot.lane.b32.xlu0 %v3020_v55, %s7721_s25  ;;  %v3026_v9 = vmax.f32 %v8710_v13, 1e-09 }
 0x1ba   : > { %7505 = vrsqrt.f32 %v1314_v26  ;;  %2069 = vst [vmem:[%s8560_s24 + $0x70] sm:$0xff] %v2053_v47 }
 0x1bb   : > { %v7492_v58 = vpop.eup %7491  ;;  %7507 = vrsqrt.f32 %v1313_v63  ;;  %v1206_v0 = vpop.xlane.xlu1 %1205  ;;  %3068 = vrot.lane.b32.xlu1 %v3024_v42, %s7722_s26 }
 0x1bc   : > { %v1312_v30 = vmax.f32 %v1206_v0, 1e-24  ;;  %v1204_v25 = vpop.xlane.xlu0 %1203  ;;  %v2051_v22 = vmul.f32 %v7492_v58, %v11743_v17  ;;  %v7494_v60 = vpop.eup %7493 }
 0x1bd   : > { %v1311_v55 = vmax.f32 %v1204_v25, 1e-24  ;;  %3195 = vrot.lane.b32.xlu0 %v3023_v3, %s7721_s25  ;;  %v1437_v61 = vmul.f32 %v7494_v60, %v11744_v31  ;;  %v11746_v60 = vld [vmem:[#allocation4_spill] sm:$0xff] }
 0x1be   : > { %7509 = vrsqrt.f32 %v1312_v30  ;;  %2067 = vst [vmem:[%s8560_s24 + $0x60] sm:$0xff] %v2051_v22  ;;  %v11748_v31 = vld [vmem:[#allocation8_spill] sm:$0xff] }
 0x1bf   : > { %v7496_v50 = vpop.eup %7495  ;;  %7511 = vrsqrt.f32 %v1311_v55  ;;  %v1218_v34 = vpop.xlane.xlu1 %1217  ;;  %3203 = vrot.lane.b32.xlu1 %v3027_v32, %s7721_s25  ;;  %v11747_v55 = vld [vmem:[#allocation7_spill] sm:$0xff] }
 0x1c0   : > { %v7498_v40 = vpop.eup %7497  ;;  %v1438_v51 = vmul.f32 %v7496_v50, %v11745_v2  ;;  %v1318_v59 = vmax.f32 %v1218_v34, 1e-24  ;;  %v1216_v26 = vpop.xlane.xlu0 %1215 }
 0x1c1   : > { %v7500_v3 = vpop.eup %7499  ;;  %v1317_v6 = vmax.f32 %v1216_v26, 1e-24  ;;  %v2054_v63 = vmul.f32 %v7498_v40, %v8295_v44  ;;  %3193 = vrot.lane.b32.xlu0 %v3022_v46, %s7721_s25 }
 0x1c2   : > { %v6501_v58 = vpack.c.bf16 %v1438_v51, %v1437_v61  ;;  %7513 = vrsqrt.f32 %v1318_v59  ;;  %v1435_v44 = vmul.f32 %v7500_v3, %v11746_v60  ;;  %v11749_v3 = vld [vmem:[#allocation9_spill] sm:$0xff] }
 0x1c3   : > { %v7502_v0 = vpop.eup %7501  ;;  %7515 = vrsqrt.f32 %v1317_v6  ;;  %v1214_v30 = vpop.xlane.xlu1 %1213  ;;  %2070 = vst [vmem:[%s8560_s24 + $0x78] sm:$0xff] %v2054_v63  ;;  %v8727_v25 = vpack.c.bf16 %v2054_v63, %v2053_v47  ;;  %3201 = vrot.lane.b32.xlu1 %v3026_v9, %s7721_s25 }
 0x1c4   : > { %v7504_v17 = vpop.eup %7503  ;;  %6621 = vst [vmem:[#allocation2 + $0x48] sm:$0xff] %v6501_v58   ;;  %v1436_v50 = vmul.f32 %v7502_v0, %v11747_v55  ;;  %v1316_v46 = vmax.f32 %v1214_v30, 1e-24  ;;  %v1212_v34 = vpop.xlane.xlu0 %1211 }
 0x1c5   : > { %v1315_v40 = vmax.f32 %v1212_v34, 1e-24  ;;  %6915 = vmatprep.subr.bf16.mxu1 %v8727_v25  ;;  %v2052_v61 = vmul.f32 %v7504_v17, %v11748_v31  ;;  %3070 = vrot.lane.b32.xlu0 %v3025_v18, %s7722_s26 }
 0x1c6   : > { %v6496_v47 = vpack.c.bf16 %v1436_v50, %v1435_v44  ;;  %7517 = vrsqrt.f32 %v1316_v46  ;;  %6916 = vmatpush3.bf16.xpose.msra.mxu1 %v8727_v25  ;;  %v11750_v44 = vld [vmem:[#allocation10_spill] sm:$0xff] }
 0x1c7   : > { %v7506_v2 = vpop.eup %7505  ;;  %7519 = vrsqrt.f32 %v1315_v40  ;;  %v1226_v51 = vpop.xlane.xlu1 %1225  ;;  %2068 = vst [vmem:[%s8560_s24 + $0x68] sm:$0xff] %v2052_v61  ;;  %v8741_v59 = vpack.c.bf16 %v2052_v61, %v2051_v22  ;;  %v8753_v40 = vpack.c.bf16 %v8674_v37, %v8645_v29 }
 0x1c8   : > { %v7508_v26 = vpop.eup %7507  ;;  %6620 = vst [vmem:[#allocation2 + $0x40] sm:$0xff] %v6496_v47   ;;  %v1442_v6 = vmul.f32 %v7506_v2, %v11749_v3  ;;  %v1322_v63 = vmax.f32 %v1226_v51, 1e-24  ;;  %v1224_v58 = vpop.xlane.xlu0 %1223 }
 0x1c9   : > { %v1441_v0 = vmul.f32 %v7508_v26, %v8322_v28  ;;  %v1321_v30 = vmax.f32 %v1224_v58, 1e-24  ;;  %6917 = vmatprep.subr.bf16.mxu1 %v8741_v59  ;;  %3197 = vrot.lane.b32.xlu0 %v3024_v42, %s7721_s25  ;;  %v11752_v58 = vld [vmem:[#allocation12_spill] sm:$0xff] }
 0x1ca   : > { %7521 = vrsqrt.f32 %v1322_v63 }
 0x1cb   : > { %v7510_v18 = vpop.eup %7509  ;;  %v6511_v17 = vpack.c.bf16 %v1442_v6, %v1441_v0  ;;  %7523 = vrsqrt.f32 %v1321_v30  ;;  %v1222_v22 = vpop.xlane.xlu1 %1221 }
 0x1cc   : > { %v7512_v60 = vpop.eup %7511  ;;  %v1440_v55 = vmul.f32 %v7510_v18, %v11750_v44  ;;  %v1320_v50 = vmax.f32 %v1222_v22, 1e-24  ;;  %v1220_v46 = vpop.xlane.xlu0 %1219 }
 0x1cd   : > { %6623 = vst [vmem:[#allocation2 + $0x58] sm:$0xff] %v6511_v17   ;;  %v1439_v28 = vmul.f32 %v7512_v60, %v8338_v16  ;;  %v1319_v34 = vmax.f32 %v1220_v46, 1e-24  ;;  %3074 = vrot.lane.b32.xlu0 %v3027_v32, %s7722_s26  ;;  %v11751_v16 = vld [vmem:[#allocation11_spill] sm:$0xff] }
 0x1ce   : > { %7525 = vrsqrt.f32 %v1320_v50  ;;  %6918 = vmatpush3.bf16.xpose.msra.mxu1 %v8741_v59  ;;  %v11753_v50 = vld [vmem:[#allocation13_spill] sm:$0xff] }
 0x1cf   : > { %v7514_v42 = vpop.eup %7513  ;;  %v6506_v31 = vpack.c.bf16 %v1440_v55, %v1439_v28  ;;  %7527 = vrsqrt.f32 %v1319_v34  ;;  %6919 = vmatprep.subr.bf16.mxu1 %v8753_v40  ;;  %v1234_v61 = vpop.xlane.xlu1 %1233 }
 0x1d0   : > { %v7516_v47 = vpop.eup %7515  ;;  %v1446_v2 = vmul.f32 %v7514_v42, %v11751_v16  ;;  %v1326_v51 = vmax.f32 %v1234_v61, 1e-24  ;;  %v1232_v26 = vpop.xlane.xlu0 %1231  ;;  %v7378_v61 = vld [vmem:[%s11552_s7 + $0x38] sm:$0xff]  }
 0x1d1   : > { %6622 = vst [vmem:[#allocation2 + $0x50] sm:$0xff] %v6506_v31   ;;  %v1445_v29 = vmul.f32 %v7516_v47, %v8350_v19  ;;  %v1325_v37 = vmax.f32 %v1232_v26, 1e-24  ;;  %3072 = vrot.lane.b32.xlu0 %v3026_v9, %s7722_s26  ;;  %v8769_v19 = vpack.c.bf16 %v8690_v48, %v8657_v35  ;;  %v11754_v16 = vld [vmem:[#allocation14_spill] sm:$0xff]  ;;  %s7724_s26 = smov 1  }
 0x1d2   : > { %7529 = vrsqrt.f32 %v1326_v51 }
 0x1d3   : > { %v7518_v32 = vpop.eup %7517  ;;  %v6521_v3 = vpack.c.bf16 %v1446_v2, %v1445_v29  ;;  %7531 = vrsqrt.f32 %v1325_v37  ;;  %v1230_v6 = vpop.xlane.xlu1 %1229 }
 0x1d4   : > { %v7520_v63 = vpop.eup %7519  ;;  %v1444_v0 = vmul.f32 %v7518_v32, %v11752_v58  ;;  %v1324_v30 = vmax.f32 %v1230_v6, 1e-24  ;;  %v1228_v18 = vpop.xlane.xlu0 %1227 }
 0x1d5   : > { %6625 = vst [vmem:[#allocation2 + $0x68] sm:$0xff] %v6521_v3   ;;  %v1443_v17 = vmul.f32 %v7520_v63, %v8362_v4  ;;  %v1323_v22 = vmax.f32 %v1228_v18, 1e-24  ;;  %v11755_v63 = vld [vmem:[#allocation15_spill] sm:$0xff] }
 0x1d6   : > { %7533 = vrsqrt.f32 %v1324_v30  ;;  %6920 = vmatpush3.bf16.xpose.msra.mxu1 %v8753_v40 }
 0x1d7   : > { %v7522_v9 = vpop.eup %7521  ;;  %v6516_v60 = vpack.c.bf16 %v1444_v0, %v1443_v17  ;;  %7535 = vrsqrt.f32 %v1323_v22  ;;  %6921 = vmatprep.subr.bf16.mxu1 %v8769_v19  ;;  %v1242_v44 = vpop.xlane.xlu1 %1241 }
 0x1d8   : > { %v7524_v55 = vpop.eup %7523  ;;  %v1450_v46 = vmul.f32 %v7522_v9, %v11753_v50  ;;  %v1330_v28 = vmax.f32 %v1242_v44, 1e-24  ;;  %v1240_v34 = vpop.xlane.xlu0 %1239 }
 0x1d9   : > { %6624 = vst [vmem:[#allocation2 + $0x60] sm:$0xff] %v6516_v60   ;;  %v1449_v4 = vmul.f32 %v7524_v55, %v8374_v20  ;;  %v1329_v42 = vmax.f32 %v1240_v34, 1e-24  ;;  %v7379_v60 = vld [vmem:[%s11552_s7 + $0x30] sm:$0xff]   ;;  %v11756_v55 = vld [vmem:[#allocation16_spill] sm:$0xff]  ;;  %v8789_v34 = vpack.c.bf16 %v8634_v1, %v8607_v5 }
 0x1da   : > { %7537 = vrsqrt.f32 %v1330_v28  ;;  %v7380_v5 = vld [vmem:[%s11552_s7 + $0x28] sm:$0xff]  }
 0x1db   : > { %v7526_v35 = vpop.eup %7525  ;;  %v6531_v48 = vpack.c.bf16 %v1450_v46, %v1449_v4  ;;  %7539 = vrsqrt.f32 %v1329_v42  ;;  %v1238_v31 = vpop.xlane.xlu1 %1237 }
 0x1dc   : > { %v7528_v47 = vpop.eup %7527  ;;  %v1448_v2 = vmul.f32 %v7526_v35, %v11754_v16  ;;  %v1328_v51 = vmax.f32 %v1238_v31, 1e-24  ;;  %v1236_v26 = vpop.xlane.xlu0 %1235  ;;  %v11757_v31 = vld [vmem:[#allocation17_spill] sm:$0xff] }
 0x1dd   : > { %6627 = vst [vmem:[#allocation2 + $0x78] sm:$0xff] %v6531_v48   ;;  %v1447_v29 = vmul.f32 %v7528_v47, %v8386_v45  ;;  %v1327_v37 = vmax.f32 %v1236_v26, 1e-24 }
 0x1de   : > { %7541 = vrsqrt.f32 %v1328_v51  ;;  %6922 = vmatpush3.bf16.xpose.msra.mxu1 %v8769_v19 }
 0x1df   : > { %v7530_v20 = vpop.eup %7529  ;;  %v6526_v32 = vpack.c.bf16 %v1448_v2, %v1447_v29  ;;  %7543 = vrsqrt.f32 %v1327_v37  ;;  %v1250_v3 = vpop.xlane.xlu1 %1249  ;;  %6931 = vmatprep.subr.bf16.mxu1 %v7378_v61  ;;  %v11758_v2 = vld [vmem:[#allocation18_spill] sm:$0xff] }
 0x1e0   : > { %v7532_v6 = vpop.eup %7531  ;;  %v1454_v58 = vmul.f32 %v7530_v20, %v11755_v63  ;;  %v1334_v0 = vmax.f32 %v1250_v3, 1e-24  ;;  %v1248_v30 = vpop.xlane.xlu0 %1247  ;;  %v7381_v20 = vld [vmem:[%s11552_s7 + $0x20] sm:$0xff]  }
 0x1e1   : > { %6626 = vst [vmem:[#allocation2 + $0x70] sm:$0xff] %v6526_v32   ;;  %v1453_v18 = vmul.f32 %v7532_v6, %v8398_v56  ;;  %v1333_v17 = vmax.f32 %v1248_v30, 1e-24 }
 0x1e2   : > { %7545 = vrsqrt.f32 %v1334_v0 }
 0x1e3   : > { %v7534_v45 = vpop.eup %7533  ;;  %v6541_v22 = vpack.c.bf16 %v1454_v58, %v1453_v18  ;;  %7547 = vrsqrt.f32 %v1333_v17  ;;  %v1246_v9 = vpop.xlane.xlu1 %1245  ;;  %v11759_v58 = vld [vmem:[#allocation19_spill] sm:$0xff] }
 0x1e4   : > { %v7536_v44 = vpop.eup %7535  ;;  %v1452_v50 = vmul.f32 %v7534_v45, %v11756_v55  ;;  %v1332_v46 = vmax.f32 %v1246_v9, 1e-24  ;;  %v1244_v28 = vpop.xlane.xlu0 %1243  ;;  %v11760_v9 = vld [vmem:[#allocation20_spill] sm:$0xff] }
 0x1e5   : > { %6629 = vst [vmem:[#allocation2 + $0x88] sm:$0xff] %v6541_v22   ;;  %v1451_v56 = vmul.f32 %v7536_v44, %v8410_v11  ;;  %v1331_v4 = vmax.f32 %v1244_v28, 1e-24  ;;  %6924 = vmatmul.mubr.bf16.vlgmr.msra.gmra.mxu1 %v8583_v24 }
 0x1e6   : > { %7549 = vrsqrt.f32 %v1332_v46  ;;  %6927 = vmatprep.mubr.bf16.mxu1 %v8789_v34  ;;  %6932 = vmatpush3.bf16.msra.mxu1 %v7378_v61 }
 0x1e7   : > { %v7538_v42 = vpop.eup %7537  ;;  %v6536_v35 = vpack.c.bf16 %v1452_v50, %v1451_v56  ;;  %7551 = vrsqrt.f32 %v1331_v4  ;;  %v1258_v48 = vpop.xlane.xlu1 %1257  ;;  %6933 = vmatprep.subr.bf16.mxu1 %v7379_v60  ;;  %v11761_v50 = vld [vmem:[#allocation21_spill] sm:$0xff] }
 0x1e8   : > { %v7540_v1 = vpop.eup %7539  ;;  %v1458_v47 = vmul.f32 %v7538_v42, %v11757_v31  ;;  %v1338_v11 = vmax.f32 %v1258_v48, 1e-24  ;;  %v1256_v16 = vpop.xlane.xlu0 %1255  ;;  %v7383_v42 = vld [vmem:[%s11552_s7 + $0x10] sm:$0xff]   ;;  %v11762_v48 = vld [vmem:[#allocation22_spill] sm:$0xff] }
 0x1e9   : > { %6628 = vst [vmem:[#allocation2 + $0x80] sm:$0xff] %v6536_v35   ;;  %v1457_v51 = vmul.f32 %v7540_v1, %v11758_v2  ;;  %v1337_v26 = vmax.f32 %v1256_v16, 1e-24 }
 0x1ea   : > { %7553 = vrsqrt.f32 %v1338_v11  ;;  %6934 = vmatpush3.bf16.msra.mxu1 %v7379_v60 }
 0x1eb   : > { %v7542_v61 = vpop.eup %7541  ;;  %v6551_v29 = vpack.c.bf16 %v1458_v47, %v1457_v51  ;;  %7555 = vrsqrt.f32 %v1337_v26  ;;  %v1254_v37 = vpop.xlane.xlu1 %1253  ;;  %6935 = vmatprep.subr.bf16.mxu1 %v7380_v5  ;;  %v11763_v47 = vld [vmem:[#allocation23_spill] sm:$0xff] }
 0x1ec   : > { %v7544_v32 = vpop.eup %7543  ;;  %v1456_v3 = vmul.f32 %v7542_v61, %v8427_v12  ;;  %v1336_v6 = vmax.f32 %v1254_v37, 1e-24  ;;  %v1252_v63 = vpop.xlane.xlu0 %1251  ;;  %v7382_v12 = vld [vmem:[%s11552_s7 + $0x18] sm:$0xff]   ;;  %v7384_v61 = vld [vmem:[%s11552_s7 + $0x8] sm:$0xff]  }
 0x1ed   : > { %6631 = vst [vmem:[#allocation2 + $0x98] sm:$0xff] %v6551_v29   ;;  %v1455_v0 = vmul.f32 %v7544_v32, %v11759_v58  ;;  %v1335_v30 = vmax.f32 %v1252_v63, 1e-24  ;;  %6928 = vmatmul.mubr.bf16.gmra.mxu1 %v8625_v54  ;;  %v11764_v37 = vld [vmem:[#allocation24_spill] sm:$0xff] }
 0x1ee   : > { %7557 = vrsqrt.f32 %v1336_v6  ;;  %6936 = vmatpush3.bf16.msra.mxu1 %v7380_v5  ;;  %6947 = vmatprep.mubr.bf16.mxu1 %v8592_v43  ;;  %v11765_v6 = vld [vmem:[#allocation25_spill] sm:$0xff] }
 0x1ef   : > { %v7546_v18 = vpop.eup %7545  ;;  %v6546_v17 = vpack.c.bf16 %v1456_v3, %v1455_v0  ;;  %7559 = vrsqrt.f32 %v1335_v30  ;;  %v1266_v45 = vpop.xlane.xlu1 %1265  ;;  %6937 = vmatprep.subr.bf16.mxu1 %v7381_v20 }
 0x1f0   : > { %v7548_v22 = vpop.eup %7547  ;;  %v1462_v60 = vmul.f32 %v7546_v18, %v11760_v9  ;;  %v1342_v44 = vmax.f32 %v1266_v45, 1e-24  ;;  %v1264_v55 = vpop.xlane.xlu0 %1263 }
 0x1f1   : > { %6630 = vst [vmem:[#allocation2 + $0x90] sm:$0xff] %v6546_v17   ;;  %v1461_v46 = vmul.f32 %v7548_v22, %v11761_v50  ;;  %v1341_v28 = vmax.f32 %v1264_v55, 1e-24  ;;  %v7385_v17 = vld [vmem:[%s11552_s7] sm:$0xff]  }
 0x1f2   : > { %7561 = vrsqrt.f32 %v1342_v44  ;;  %6938 = vmatpush3.bf16.msra.mxu1 %v7381_v20  ;;  %v11767_v44 = vld [vmem:[#allocation27_spill] sm:$0xff] }
 0x1f3   : > { %v7550_v43 = vpop.eup %7549  ;;  %v6561_v56 = vpack.c.bf16 %v1462_v60, %v1461_v46  ;;  %7563 = vrsqrt.f32 %v1341_v28  ;;  %v1262_v4 = vpop.xlane.xlu1 %1261  ;;  %6939 = vmatprep.subr.bf16.mxu1 %v7382_v12 }
 0x1f4   : > { %v7552_v35 = vpop.eup %7551  ;;  %v1460_v5 = vmul.f32 %v7550_v43, %v11762_v48  ;;  %v1340_v1 = vmax.f32 %v1262_v4, 1e-24  ;;  %v1260_v31 = vpop.xlane.xlu0 %1259 }
 0x1f5   : > { %6633 = vst [vmem:[#allocation2 + $0xa8] sm:$0xff] %v6561_v56   ;;  %v1459_v11 = vmul.f32 %v7552_v35, %v11763_v47  ;;  %v1339_v16 = vmax.f32 %v1260_v31, 1e-24  ;;  %v7386_v56 = vld [vmem:[%s11556_s11 + $0x38] sm:$0xff]  }
 0x1f6   : > { %7565 = vrsqrt.f32 %v1340_v1  ;;  %6940 = vmatpush3.bf16.msra.mxu1 %v7382_v12  ;;  %v11766_v12 = vld [vmem:[#allocation26_spill] sm:$0xff]  ;;  %v11769_v1 = vld [vmem:[#allocation29_spill] sm:$0xff] }
 0x1f7   : > { %v7554_v2 = vpop.eup %7553  ;;  %v6556_v51 = vpack.c.bf16 %v1460_v5, %v1459_v11  ;;  %7567 = vrsqrt.f32 %v1339_v16  ;;  %v1274_v26 = vpop.xlane.xlu1 %1273  ;;  %6941 = vmatprep.subr.bf16.mxu1 %v7383_v42 }
 0x1f8   : > { %v7556_v29 = vpop.eup %7555  ;;  %v1466_v20 = vmul.f32 %v7554_v2, %v11764_v37  ;;  %v1346_v32 = vmax.f32 %v1274_v26, 1e-24  ;;  %v1272_v3 = vpop.xlane.xlu0 %1271 }
 0x1f9   : > { %6632 = vst [vmem:[#allocation2 + $0xa0] sm:$0xff] %v6556_v51   ;;  %v1465_v63 = vmul.f32 %v7556_v29, %v11765_v6  ;;  %v1345_v58 = vmax.f32 %v1272_v3, 1e-24  ;;  %v7389_v51 = vld [vmem:[%s11556_s11 + $0x30] sm:$0xff]  }
 0x1fa   : > { %7569 = vrsqrt.f32 %v1346_v32  ;;  %6942 = vmatpush3.bf16.msra.mxu1 %v7383_v42  ;;  %v11768_v42 = vld [vmem:[#allocation28_spill] sm:$0xff]  ;;  %v11771_v32 = vld [vmem:[#allocation31_spill] sm:$0xff] }
 0x1fb   : > { %v7558_v0 = vpop.eup %7557  ;;  %v6571_v30 = vpack.c.bf16 %v1466_v20, %v1465_v63  ;;  %7571 = vrsqrt.f32 %v1345_v58  ;;  %v1270_v18 = vpop.xlane.xlu1 %1269  ;;  %6943 = vmatprep.subr.bf16.mxu1 %v7384_v61  ;;  %v7388_v58 = vld [vmem:[#allocation2 + $0xf0] sm:$0xff]  }
 0x1fc   : > { %v7560_v45 = vpop.eup %7559  ;;  %v1464_v22 = vmul.f32 %v7558_v0, %v11766_v12  ;;  %v1344_v9 = vmax.f32 %v1270_v18, 1e-24  ;;  %v1268_v60 = vpop.xlane.xlu0 %1267  ;;  %v11772_v12 = vld [vmem:[#allocation32_spill] sm:$0xff] }
 0x1fd   : > { %6635 = vst [vmem:[#allocation2 + $0xb8] sm:$0xff] %v6571_v30   ;;  %v1463_v55 = vmul.f32 %v7560_v45, %v11767_v44  ;;  %v1343_v50 = vmax.f32 %v1268_v60, 1e-24 }
 0x1fe   : > { %7573 = vrsqrt.f32 %v1344_v9  ;;  %6944 = vmatpush3.bf16.msra.mxu1 %v7384_v61  ;;  %v11770_v61 = vld [vmem:[#allocation30_spill] sm:$0xff] }
 0x1ff   : > { %v7562_v46 = vpop.eup %7561  ;;  %v6566_v28 = vpack.c.bf16 %v1464_v22, %v1463_v55  ;;  %7575 = vrsqrt.f32 %v1343_v50  ;;  %v1282_v43 = vpop.xlane.xlu1 %1281  ;;  %6945 = vmatprep.subr.bf16.mxu1 %v7385_v17  ;;  %v7392_v50 = vld [vmem:[%s11556_s11 + $0x20] sm:$0xff]  }
 0x200   : > { %v7564_v4 = vpop.eup %7563  ;;  %v1470_v35 = vmul.f32 %v7562_v46, %v11768_v42  ;;  %v1350_v48 = vmax.f32 %v1282_v43, 1e-24  ;;  %v1280_v5 = vpop.xlane.xlu0 %1279 }
 0x201   : > { %6634 = vst [vmem:[#allocation2 + $0xb0] sm:$0xff] %v6566_v28   ;;  %v1469_v31 = vmul.f32 %v7564_v4, %v11769_v1  ;;  %v1349_v47 = vmax.f32 %v1280_v5, 1e-24  ;;  %v7393_v4 = vld [vmem:[%s11556_s11 + $0x18] sm:$0xff]  }
 0x202   : > { %7577 = vrsqrt.f32 %v1350_v48  ;;  %6946 = vmatpush3.bf16.msra.mxu1 %v7385_v17  ;;  %v7391_v17 = vld [vmem:[%s11556_s11 + $0x28] sm:$0xff]   ;;  %v11774_v5 = vld [vmem:[#allocation34_spill] sm:$0xff] }
 0x203   : > { %v7566_v11 = vpop.eup %7565  ;;  %v6581_v16 = vpack.c.bf16 %v1470_v35, %v1469_v31  ;;  %7579 = vrsqrt.f32 %v1349_v47  ;;  %v1278_v2 = vpop.xlane.xlu1 %1277  ;;  %6963 = vmatprep.subr.bf16.mxu1 %v7386_v56  ;;  %v11773_v35 = vld [vmem:[#allocation33_spill] sm:$0xff]  ;;  %v11775_v47 = vld [vmem:[#allocation35_spill] sm:$0xff] }
 0x204   : > { %v7568_v26 = vpop.eup %7567  ;;  %v1468_v29 = vmul.f32 %v7566_v11, %v11770_v61  ;;  %v1348_v37 = vmax.f32 %v1278_v2, 1e-24  ;;  %v1276_v20 = vpop.xlane.xlu0 %1275  ;;  %v7387_v63 = vld [vmem:[#allocation2 + $0xb8] sm:$0xff]   ;;  %v11776_v2 = vld [vmem:[#allocation36_spill] sm:$0xff] }
 0x205   : > { %6637 = vst [vmem:[#allocation2 + $0xc8] sm:$0xff] %v6581_v16   ;;  %v1467_v3 = vmul.f32 %v7568_v26, %v11771_v32  ;;  %v1347_v6 = vmax.f32 %v1276_v20, 1e-24  ;;  %6948 = vmatmul.mubr.bf16.vlgmr.msra.gmra.mxu1 %v8583_v24  ;;  %6784 = vmatpush3.bf16.msra.mxu0 %v7387_v63 }
 0x206   : > { %7581 = vrsqrt.f32 %v1348_v37  ;;  %6951 = vmatprep.mubr.bf16.mxu1 %v8789_v34  ;;  %6964 = vmatpush3.bf16.msra.mxu1 %v7386_v56 }
 0x207   : > { %v7570_v0 = vpop.eup %7569  ;;  %v6576_v30 = vpack.c.bf16 %v1468_v29, %v1467_v3  ;;  %7583 = vrsqrt.f32 %v1347_v6  ;;  %v3176_v18 = vpop.permute.xlu1 %3175  ;;  %6965 = vmatprep.subr.bf16.mxu1 %v7389_v51  ;;  %6785 = vmatprep.subr.bf16.mxu0 %v7388_v58  ;;  %v7395_v29 = vld [vmem:[%s11556_s11 + $0x8] sm:$0xff]  }
 0x208   : > { %v7572_v45 = vpop.eup %7571  ;;  %v1474_v22 = vmul.f32 %v7570_v0, %v11772_v12  ;;  %7585 = vrcp.f32 %v3176_v18  ;;  %v7390_v24 = vld [vmem:[#allocation2 + $0xb0] sm:$0xff]   ;;  %v3047_v9 = vpop.permute.xlu0 %3046  ;;  %v7397_v58 = vld [vmem:[#allocation2 + $0xa8] sm:$0xff]  }
 0x209   : > { %6636 = vst [vmem:[#allocation2 + $0xc0] sm:$0xff] %v6576_v30   ;;  %v1473_v34 = vmul.f32 %v7572_v45, %v8505_v8  ;;  %6786 = vmatpush3.bf16.msra.mxu0 %v7390_v24  ;;  %v7399_v24 = vld [vmem:[#allocation2 + $0x78] sm:$0xff]  }
 0x20a   : > { %6966 = vmatpush3.bf16.msra.mxu1 %v7389_v51 }
 0x20b   : > { %v7574_v60 = vpop.eup %7573  ;;  %v6591_v44 = vpack.c.bf16 %v1474_v22, %v1473_v34  ;;  %v3174_v55 = vpop.permute.xlu1 %3173  ;;  %6967 = vmatprep.subr.bf16.mxu1 %v7391_v17  ;;  %v7401_v34 = vld [vmem:[#allocation2 + $0xa0] sm:$0xff]  }
 0x20c   : > { %v7576_v46 = vpop.eup %7575  ;;  %v1472_v28 = vmul.f32 %v7574_v60, %v8510_v10  ;;  %7587 = vrcp.f32 %v3174_v55  ;;  %v3045_v10 = vpop.permute.xlu0 %3044 }
 0x20d   : > { %6639 = vst [vmem:[#allocation2 + $0xd8] sm:$0xff] %v6591_v44   ;;  %v1471_v43 = vmul.f32 %v7576_v46, %v8515_v49  ;;  %6952 = vmatmul.mubr.bf16.gmra.mxu1 %v8625_v54  ;;  %7589 = vrcp.f32 %v3047_v9 }
 0x20e   : > { %6955 = vmatprep.mubr.bf16.mxu1 %v8769_v19  ;;  %6968 = vmatpush3.bf16.msra.mxu1 %v7391_v17  ;;  %7591 = vrcp.f32 %v3045_v10  ;;  %v7394_v19 = vld [vmem:[%s11556_s11 + $0x10] sm:$0xff]  }
 0x20f   : > { %v7578_v8 = vpop.eup %7577  ;;  %v6586_v56 = vpack.c.bf16 %v1472_v28, %v1471_v43  ;;  %6969 = vmatprep.subr.bf16.mxu1 %v7392_v50  ;;  %v3180_v46 = vpop.permute.xlu1 %3179 }
 0x210   : > { %v7580_v42 = vpop.eup %7579  ;;  %v1478_v48 = vmul.f32 %v7578_v8, %v11773_v35  ;;  %v3051_v9 = vpop.permute.xlu0 %3050 }
 0x211   : > { %6638 = vst [vmem:[#allocation2 + $0xd0] sm:$0xff] %v6586_v56   ;;  %v1477_v49 = vmul.f32 %v7580_v42, %v11774_v5  ;;  %7593 = vrcp.f32 %v3051_v9 }
 0x212   : > { %6970 = vmatpush3.bf16.msra.mxu1 %v7392_v50  ;;  %7595 = vrcp.f32 %v3180_v46 }
 0x213   : > { %v7582_v54 = vpop.eup %7581  ;;  %v6601_v1 = vpack.c.bf16 %v1478_v48, %v1477_v49  ;;  %6971 = vmatprep.subr.bf16.mxu1 %v7393_v4  ;;  %v3178_v5 = vpop.permute.xlu1 %3177 }
 0x214   : > { %v7584_v31 = vpop.eup %7583  ;;  %v1476_v11 = vmul.f32 %v7582_v54, %v11775_v47  ;;  %v7402_v60 = vld [vmem:[#allocation2 + $0xd8] sm:$0xff]   ;;  %v3049_v35 = vpop.permute.xlu0 %3048  ;;  %v7406_v54 = vld [vmem:[#allocation2 + $0xc8] sm:$0xff]  }
 0x215   : > { %v7586_v16 = vpop.eup %7585  ;;  %6641 = vst [vmem:[#allocation2 + $0xe8] sm:$0xff] %v6601_v1   ;;  %v1475_v51 = vmul.f32 %v7584_v31, %v11776_v2  ;;  %6956 = vmatmul.mubr.bf16.gmra.mxu1 %v8753_v40  ;;  %v7407_v47 = vld [vmem:[#allocation2 + $0x88] sm:$0xff]   ;;  %v7408_v2 = vld [vmem:[#allocation2 + $0xc0] sm:$0xff]   ;;  %7597 = vrcp.f32 %v3049_v35 }
 0x216   : > { %6959 = vmatprep.mubr.bf16.mxu1 %v8741_v59  ;;  %6972 = vmatpush3.bf16.msra.mxu1 %v7393_v4  ;;  %v3224_v26 = vmul.f32 %v7586_v16, %v8549_v38  ;;  %v7398_v59 = vld [vmem:[%s11556_s11] sm:$0xff]  }
 0x217   : > { %v6596_v61 = vpack.c.bf16 %v1476_v11, %v1475_v51  ;;  %6973 = vmatprep.subr.bf16.mxu1 %v7394_v19 }
 0x218   : > { %v3254_v37 = vmul.f32 2.0, %v3224_v26  ;;  %v7404_v8 = vld [vmem:[#allocation2 + $0xd0] sm:$0xff]   ;;  %v3055_v11 = vpop.permute.xlu0 %3054 }
 0x219   : > { %v7588_v20 = vpop.eup %7587  ;;  %6640 = vst [vmem:[#allocation2 + $0xe0] sm:$0xff] %v6596_v61   ;;  %v3184_v61 = vpop.permute.xlu1 %3183 }
 0x21a   : > { %6974 = vmatpush3.bf16.msra.mxu1 %v7394_v19  ;;  %v3270_v32 = vmul.f32 0.0625, %v3254_v37  ;;  %v3222_v3 = vmul.f32 %v7588_v20, %v8554_v21  ;;  %v7590_v63 = vpop.eup %7589  ;;  %v7409_v37 = vld [vmem:[#allocation2 + $0x80] sm:$0xff]   ;;  %7599 = vrcp.f32 %v3184_v61 }
 0x21b   : > { %6975 = vmatprep.subr.bf16.mxu1 %v7395_v29  ;;  %v7592_v17 = vpop.eup %7591  ;;  %v3095_v45 = vmul.f32 %v7590_v63, %v8549_v38  ;;  %v7403_v38 = vld [vmem:[#allocation2 + $0x98] sm:$0xff]   ;;  %7601 = vrcp.f32 %v3178_v5 }
 0x21c   : > { %v7396_v40 = vld [vmem:[#allocation2 + $0xe8] sm:$0xff]   ;;  %v6292_v6 = vadd.f32 -1.0, %v3270_v32  ;;  %v3253_v0 = vmul.f32 2.0, %v3222_v3  ;;  %v3093_v55 = vmul.f32 %v7592_v17, %v8554_v21  ;;  %v7405_v21 = vld [vmem:[#allocation2 + $0x90] sm:$0xff]   ;;  %7603 = vrcp.f32 %v3055_v11 }
 0x21d   : > { %6960 = vmatmul.mubr.bf16.gmra.mxu1 %v8727_v25  ;;  %6787 = vmatprep.subr.bf16.mxu0 %v7396_v40  ;;  %v3125_v50 = vmul.f32 2.0, %v3095_v45 }
 0x21e   : > { %6976 = vmatpush3.bf16.msra.mxu1 %v7395_v29  ;;  %v3350_v30 = vadd.f32 1.0, %v6292_v6  ;;  %6788 = vmatpush3.bf16.msra.mxu0 %v7397_v58  ;;  %v3269_v18 = vmul.f32 0.0625, %v3253_v0  ;;  %v3124_v4 = vmul.f32 2.0, %v3093_v55  ;;  %v7594_v6 = vpop.eup %7593  ;;  %v11598_v58 = vmov 0  }
 0x21f   : > { %6977 = vmatprep.subr.bf16.mxu1 %v7398_v59  ;;  %v3142_v42 = vmul.f32 0.0625, %v3125_v50 }
 0x220   : > { %v7400_v12 = vld [vmem:[#allocation2 + $0xe0] sm:$0xff]   ;;  %v3366_v22 = vmul.f32 8.0, %v3350_v30  ;;  %v6291_v44 = vadd.f32 -1.0, %v3269_v18  ;;  %v3141_v1 = vmul.f32 0.0625, %v3124_v4  ;;  %v3099_v18 = vmul.f32 %v7594_v6, %v8567_v7 }
 0x221   : > { %6789 = vmatprep.subr.bf16.mxu0 %v7400_v12  ;;  %v6276_v19 = vadd.f32 -1.0, %v3142_v42 }
 0x222   : > { %6978 = vmatpush3.bf16.msra.mxu1 %v7398_v59  ;;  %v6324_v25 = vadd.f32 -0.5, %v3366_v22  ;;  %6790 = vmatpush3.bf16.msra.mxu0 %v7401_v34  ;;  %v3349_v43 = vadd.f32 1.0, %v6291_v44  ;;  %v6275_v51 = vadd.f32 -1.0, %v3141_v1  ;;  %v3053_v59 = vpop.permute.xlu0 %3052  ;;  %v7596_v22 = vpop.eup %7595 }
 0x223   : > { %6743 = vmatprep.subr.bf16.mxu1 %v7399_v24  ;;  %6791 = vmatprep.subr.bf16.mxu0 %v7402_v60  ;;  %v3302_v26 = vadd.f32 1.0, %v6276_v19  ;;  %v3127_v24 = vmul.f32 2.0, %v3099_v18  ;;  %v3182_v34 = vpop.permute.xlu1 %3181  ;;  %v7598_v9 = vpop.eup %7597  ;;  %v3228_v46 = vmul.f32 %v7596_v22, %v8567_v7 }
 0x224   : > { %v3430_v28 = vmax.f32 %v6324_v25, -2.0  ;;  %v3365_v10 = vmul.f32 8.0, %v3349_v43  ;;  %v3301_v32 = vadd.f32 1.0, %v6275_v51  ;;  %7605 = vrcp.f32 %v3182_v34 }
 0x225   : > { %v3318_v3 = vmul.f32 8.0, %v3302_v26  ;;  %v3097_v43 = vmul.f32 %v7598_v9, %v8574_v62  ;;  %v3256_v4 = vmul.f32 2.0, %v3228_v46 }
 0x226   : > { %v3446_v56 = vmin.f32 %v3430_v28, 17.0  ;;  %6792 = vmatpush3.bf16.msra.mxu0 %v7403_v38  ;;  %v6323_v31 = vadd.f32 -0.5, %v3365_v10  ;;  %v3317_v63 = vmul.f32 8.0, %v3301_v32  ;;  %v8892_v17 = vpop.permute.xlu0 %3058  ;;  %v3144_v28 = vmul.f32 0.0625, %v3127_v24 }
 0x227   : > { %6793 = vmatprep.subr.bf16.mxu0 %v7404_v8  ;;  %v6308_v30 = vadd.f32 -0.5, %v3318_v3  ;;  %v7600_v44 = vpop.eup %7599  ;;  %v3126_v35 = vmul.f32 2.0, %v3097_v43  ;;  %v3272_v1 = vmul.f32 0.0625, %v3256_v4 }
 0x228   : > { %v8873_v48 = vfloor.f32 %v3446_v56  ;;  %v3429_v16 = vmax.f32 %v6323_v31, -2.0  ;;  %v6307_v45 = vadd.f32 -0.5, %v3317_v63  ;;  %v3232_v8 = vmul.f32 %v7600_v44, %v8578_v23  ;;  %v7602_v10 = vpop.eup %7601  ;;  %v3186_v31 = vpop.permute.xlu1 %3185 }
 0x229   : > { %v3398_v12 = vmax.f32 %v6308_v30, -2.0  ;;  %v6278_v42 = vadd.f32 -1.0, %v3144_v28  ;;  %v7604_v11 = vpop.eup %7603  ;;  %v3226_v51 = vmul.f32 %v7602_v10, %v8574_v62 }
 0x22a   : > { %v8876_v49 = vsub.f32 %v3446_v56, %v8873_v48  ;;  %6794 = vmatpush3.bf16.msra.mxu0 %v7405_v21  ;;  %v3445_v29 = vmin.f32 %v3429_v16, 17.0  ;;  %vm3654_vm2 = vcmp.ge.f32.partialorder %v8873_v48, 0.0  ;;  %vm3670_vm3 = vcmp.le.f32.partialorder %v8873_v48, 15.0  ;;  %v3188_v50 = vpop.permute.xlu0 %3187 }
 0x22b   : > { %6795 = vmatprep.subr.bf16.mxu0 %v7406_v54  ;;  %vm3686_vm4 = vmand %vm3654_vm2, %vm3670_vm3  ;;  %v3397_v60 = vmax.f32 %v6307_v45, -2.0  ;;  %v8897_v55 = vmin.f32 %v3398_v12, 17.0  ;;  %vm3702_vm8 = vcmp.ge.f32.partialorder %v8873_v48, -1.0  ;;  %7607 = vrcp.f32 %v3188_v50 }
 0x22c   : > { %4071 = vrot.lane.b32.xlu0 %v8876_v49, %s7721_s25  ;;  %v8880_v20 = vfloor.f32 %v3445_v29  ;;  %v3750_v0 = vsel %vm3686_vm4, 1, %v11598_v58  ;;  %vm3718_vm9 = vcmp.le.f32.partialorder %v8873_v48, 14.0  ;;  %v3258_v5 = vmul.f32 2.0, %v3232_v8 }
 0x22d   : > { %11777 = vst [vmem:[#allocation5_spill] sm:$0xff] %v8897_v55  ;;  %v8903_v38 = vmin.f32 %v3397_v60, 17.0  ;;  %v8908_v56 = vfloor.f32 %v8897_v55  ;;  %vm3734_vm10 = vmand %vm3702_vm8, %vm3718_vm9  ;;  %v3304_v19 = vadd.f32 1.0, %v6278_v42  ;;  %7609 = vrcp.f32 %v3053_v59 }
 0x22e   : > { %6796 = vmatpush3.bf16.msra.mxu0 %v7407_v47  ;;  %v8884_v40 = vsub.f32 %v3445_v29, %v8880_v20  ;;  %vm3653_vm5 = vcmp.ge.f32.partialorder %v8880_v20, 0.0  ;;  %vm3669_vm6 = vcmp.le.f32.partialorder %v8880_v20, 15.0  ;;  %v3974_v7 = vsel %vm3734_vm10, 1, %v11598_v58  ;;  %v3057_v63 = vpop.permute.xlu0 %3056 }
 0x22f   : > { %6797 = vmatprep.subr.bf16.mxu0 %v7408_v2  ;;  %vm3685_vm7 = vmand %vm3653_vm5, %vm3669_vm6  ;;  %11778 = vst [vmem:[#allocation3_spill] sm:$0xff] %v8903_v38  ;;  %v8913_v21 = vfloor.f32 %v8903_v38  ;;  %vm3701_vm11 = vcmp.ge.f32.partialorder %v8880_v20, -1.0  ;;  %vm3717_vm12 = vcmp.le.f32.partialorder %v8880_v20, 14.0  ;;  %v7044_v54 = vtrunc.f32 %v8908_v56 }
 0x230   : > { %4069 = vrot.lane.b32.xlu1 %v8884_v40, %s7721_s25  ;;  %3767 = vrot.lane.b32.xlu0 %v3750_v0, %s7721_s25  ;;  %v3749_v25 = vsel %vm3685_vm7, 1, %v11598_v58  ;;  %11779 = vst [vmem:[#allocation6_spill] sm:$0xff] %v8908_v56  ;;  %vm3733_vm13 = vmand %vm3701_vm11, %vm3717_vm12  ;;  %v3143_v16 = vmul.f32 0.0625, %v3126_v35  ;;  %v3274_v26 = vmul.f32 0.0625, %v3258_v5  ;;  %7611 = vrcp.f32 %v3186_v31 }
 0x231   : > { %11780 = vst [vmem:[#allocation4_spill] sm:$0xff] %v8913_v21  ;;  %v3973_v47 = vsel %vm3733_vm13, 1, %v11598_v58  ;;  %v7045_v2 = vcvt.f32.s32 %v7044_v54  ;;  %v7042_v61 = vtrunc.f32 %v8913_v21  ;;  %v6294_v29 = vadd.f32 -1.0, %v3272_v1  ;;  %v7606_v59 = vpop.eup %7605 }
 0x232   : > { %6798 = vmatpush3.bf16.msra.mxu0 %v7409_v37  ;;  %v3320_v37 = vmul.f32 8.0, %v3304_v19  ;;  %v3103_v32 = vmul.f32 %v7604_v11, %v8578_v23  ;;  %v6277_v6 = vadd.f32 -1.0, %v3143_v16  ;;  %v3542_v0 = vsub.f32 1.0, %v8876_v49  ;;  %v3063_v28 = vpop.permute.xlu0 %3062  ;;  %v3192_v19 = vpop.permute.xlu1 %3191 }
 0x233   : > { %v7043_v3 = vcvt.f32.s32 %v7042_v61  ;;  %v3352_v30 = vadd.f32 1.0, %v6294_v29  ;;  %v3255_v18 = vmul.f32 2.0, %v3226_v51  ;;  %v6296_v62 = vadd.f32 -1.0, %v3274_v26 }
 0x234   : > { %3765 = vrot.lane.b32.xlu1 %v3749_v25, %s7721_s25  ;;  %3991 = vrot.lane.b32.xlu0 %v3974_v7, %s7721_s25  ;;  %v6310_v24 = vadd.f32 -0.5, %v3320_v37  ;;  %v3129_v34 = vmul.f32 2.0, %v3103_v32  ;;  %v3541_v23 = vsub.f32 1.0, %v8884_v40  ;;  %v3230_v9 = vmul.f32 %v7606_v59, %v8587_v39 }
 0x235   : > { %v3368_v12 = vmul.f32 8.0, %v3352_v30  ;;  %v3271_v22 = vmul.f32 0.0625, %v3255_v18  ;;  %v3303_v60 = vadd.f32 1.0, %v6277_v6  ;;  %v3354_v49 = vadd.f32 1.0, %v6296_v62 }
 0x236   : > { %7613 = vrcp.f32 %v8892_v17  ;;  %v3257_v46 = vmul.f32 2.0, %v3230_v9  ;;  %v3400_v4 = vmax.f32 %v6310_v24, -2.0  ;;  %v3146_v42 = vmul.f32 0.0625, %v3129_v34  ;;  %v3061_v62 = vpop.permute.xlu1 %3060 }
 0x237   : > { %v6326_v25 = vadd.f32 -0.5, %v3368_v12  ;;  %v6293_v44 = vadd.f32 -1.0, %v3271_v22  ;;  %v3319_v35 = vmul.f32 8.0, %v3303_v60  ;;  %v3370_v54 = vmul.f32 8.0, %v3354_v49 }
 0x238   : > { %3989 = vrot.lane.b32.xlu1 %v3973_v47, %s7721_s25  ;;  %4247 = vrot.lane.b32.xlu0 %v7045_v2, %s7724_s26  ;;  %v7608_v45 = vpop.eup %7607  ;;  %v3273_v7 = vmul.f32 0.0625, %v3257_v46  ;;  %7615 = vrcp.f32 %v3063_v28  ;;  %v8934_v16 = vmin.f32 %v3400_v4, 17.0  ;;  %v6280_v2 = vadd.f32 -1.0, %v3146_v42 }
 0x239   : > { %v3236_v50 = vmul.f32 %v7608_v45, %v8596_v53  ;;  %v3432_v43 = vmax.f32 %v6326_v25, -2.0  ;;  %v3351_v8 = vadd.f32 1.0, %v6293_v44  ;;  %v6309_v26 = vadd.f32 -0.5, %v3319_v35  ;;  %v3190_v44 = vpop.permute.xlu0 %3189 }
 0x23a   : > { %v7610_v40 = vpop.eup %7609  ;;  %v6295_v47 = vadd.f32 -1.0, %v3273_v7  ;;  %11781 = vst [vmem:[#allocation7_spill] sm:$0xff] %v8934_v16  ;;  %v6328_v29 = vadd.f32 -0.5, %v3370_v54  ;;  %7617 = vrcp.f32 %v3192_v19  ;;  %v3306_v18 = vadd.f32 1.0, %v6280_v2  ;;  %v3067_v7 = vpop.permute.xlu1 %3066 }
 0x23b   : > { %v3448_v10 = vmin.f32 %v3432_v43, 17.0  ;;  %v3367_v5 = vmul.f32 8.0, %v3351_v8  ;;  %v3260_v1 = vmul.f32 2.0, %v3236_v50  ;;  %v3101_v51 = vmul.f32 %v7610_v40, %v8587_v39 }
 0x23c   : > { %4245 = vrot.lane.b32.xlu1 %v7043_v3, %s7724_s26  ;;  %3847 = vrot.lane.b32.xlu0 %v3542_v0, %s7721_s25  ;;  %v3353_v3 = vadd.f32 1.0, %v6295_v47  ;;  %v8948_v0 = vfloor.f32 %v8934_v16  ;;  %v3399_v30 = vmax.f32 %v6309_v26, -2.0  ;;  %7619 = vrcp.f32 %v3057_v63 }
 0x23d   : > { %v8932_v17 = vfloor.f32 %v3448_v10  ;;  %v6325_v31 = vadd.f32 -0.5, %v3367_v5  ;;  %v7612_v11 = vpop.eup %7611  ;;  %v3276_v37 = vmul.f32 0.0625, %v3260_v1  ;;  %v3128_v39 = vmul.f32 2.0, %v3101_v51 }
 0x23e   : > { %v3234_v59 = vmul.f32 %v7612_v11, %v8604_v41  ;;  %11782 = vst [vmem:[#allocation8_spill] sm:$0xff] %v8948_v0  ;;  %v3434_v45 = vmax.f32 %v6328_v29, -2.0  ;;  %v3369_v9 = vmul.f32 8.0, %v3353_v3  ;;  %7621 = vrcp.f32 %v3061_v62  ;;  %v8979_v11 = vpop.permute.xlu0 %3195 }
 0x23f   : > { %v8938_v61 = vsub.f32 %v3448_v10, %v8932_v17  ;;  %vm3656_vm14 = vcmp.ge.f32.partialorder %v8932_v17, 0.0  ;;  %vm3672_vm15 = vcmp.le.f32.partialorder %v8932_v17, 15.0  ;;  %v3431_v32 = vmax.f32 %v6325_v31, -2.0 }
 0x240   : > { %3845 = vrot.lane.b32.xlu1 %v3541_v23, %s7721_s25  ;;  %vm3688_vm0 = vmand %vm3656_vm14, %vm3672_vm15  ;;  %vm3704_vm1 = vcmp.ge.f32.partialorder %v8932_v17, -1.0  ;;  %vm3720_vm2 = vcmp.le.f32.partialorder %v8932_v17, 14.0  ;;  %v6298_v12 = vadd.f32 -1.0, %v3276_v37  ;;  %v3259_v60 = vmul.f32 2.0, %v3234_v59 }
 0x241   : > { %4075 = vrot.lane.b32.xlu0 %v8938_v61, %s7721_s25  ;;  %v3447_v6 = vmin.f32 %v3431_v32, 17.0  ;;  %v3752_v22 = vsel %vm3688_vm0, 1, %v11598_v58  ;;  %vm8954_vm3 = vmand %vm3704_vm1, %vm3720_vm2  ;;  %v3145_v25 = vmul.f32 0.0625, %v3128_v39  ;;  %v8960_v49 = vmin.f32 %v3399_v30, 17.0 }
 0x242   : > { %v3322_v50 = vmul.f32 8.0, %v3306_v18  ;;  %v7048_v46 = vtrunc.f32 %v8948_v0  ;;  %v8964_v28 = vmin.f32 %v3434_v45, 17.0  ;;  %v3356_v8 = vadd.f32 1.0, %v6298_v12 }
 0x243   : > { %v8951_v24 = vfloor.f32 %v3447_v6  ;;  %v7614_v34 = vpop.eup %7613  ;;  %11785 = vst [vmem:[#allocation9_spill] sm:$0xff] %v8960_v49  ;;  %v3976_v4 = vsel %vm8954_vm3, 1, %v11598_v58  ;;  %v6327_v40 = vadd.f32 -0.5, %v3369_v9  ;;  %v3275_v35 = vmul.f32 0.0625, %v3259_v60 }
 0x244   : > { %v3107_v43 = vmul.f32 %v7614_v34, %v8596_v53  ;;  %v6279_v10 = vadd.f32 -1.0, %v3145_v25  ;;  %7623 = vrcp.f32 %v3190_v44  ;;  %v8975_v53 = vfloor.f32 %v8960_v49  ;;  %v3194_v34 = vpop.permute.xlu0 %3193 }
 0x245   : > { %3771 = vrot.lane.b32.xlu0 %v3752_v22, %s7721_s25  ;;  %v3511_v63 = vsub.f32 %v3447_v6, %v8951_v24  ;;  %vm3655_vm4 = vcmp.ge.f32.partialorder %v8951_v24, 0.0  ;;  %vm3671_vm5 = vcmp.le.f32.partialorder %v8951_v24, 15.0  ;;  %v7616_v42 = vpop.eup %7615  ;;  %vm3703_vm7 = vcmp.ge.f32.partialorder %v8951_v24, -1.0 }
 0x246   : > { %vm3687_vm6 = vmand %vm3655_vm4, %vm3671_vm5  ;;  %vm3719_vm8 = vcmp.le.f32.partialorder %v8951_v24, 14.0  ;;  %11786 = vst [vmem:[#allocation10_spill] sm:$0xff] %v8975_v53  ;;  %v6312_v5 = vadd.f32 -0.5, %v3322_v50  ;;  %v7049_v1 = vcvt.f32.s32 %v7048_v46  ;;  %v3131_v19 = vmul.f32 2.0, %v3107_v43 }
 0x247   : > { %4073 = vrot.lane.b32.xlu1 %v3511_v63, %s7721_s25  ;;  %v3751_v54 = vsel %vm3687_vm6, 1, %v11598_v58  ;;  %v3372_v31 = vmul.f32 8.0, %v3356_v8  ;;  %7625 = vrcp.f32 %v3067_v7  ;;  %v3111_v47 = vmul.f32 %v7616_v42, %v8616_v14  ;;  %vm3735_vm9 = vmand %vm3703_vm7, %vm3719_vm8  ;;  %v7618_v29 = vpop.eup %7617 }
 0x248   : > { %v8987_v2 = vfloor.f32 %v8964_v28  ;;  %v3433_v51 = vmax.f32 %v6327_v40, -2.0  ;;  %v6297_v26 = vadd.f32 -1.0, %v3275_v35  ;;  %v3305_v37 = vadd.f32 1.0, %v6279_v10 }
 0x249   : > { %3995 = vrot.lane.b32.xlu0 %v3976_v4, %s7721_s25  ;;  %v3402_v32 = vmax.f32 %v6312_v5, -2.0  ;;  %v3975_v3 = vsel %vm3735_vm9, 1, %v11598_v58  ;;  %v3544_v59 = vsub.f32 1.0, %v8938_v61  ;;  %v7046_v39 = vtrunc.f32 %v8975_v53  ;;  %v7620_v6 = vpop.eup %7619 }
 0x24a   : > { %v3148_v30 = vmul.f32 0.0625, %v3131_v19  ;;  %v6330_v18 = vadd.f32 -0.5, %v3372_v31  ;;  %v3133_v62 = vmul.f32 2.0, %v3111_v47  ;;  %vm3658_vm10 = vcmp.ge.f32.partialorder %v8987_v2, 0.0 }
 0x24b   : > { %3769 = vrot.lane.b32.xlu1 %v3751_v54, %s7721_s25  ;;  %vm3674_vm11 = vcmp.le.f32.partialorder %v8987_v2, 15.0  ;;  %v3449_v45 = vmin.f32 %v3433_v51, 17.0  ;;  %v3355_v12 = vadd.f32 1.0, %v6297_v26  ;;  %v3321_v22 = vmul.f32 8.0, %v3305_v37  ;;  %v7622_v9 = vpop.eup %7621 }
 0x24c   : > { %v3543_v23 = vsub.f32 1.0, %v3511_v63  ;;  %v3240_v61 = vmul.f32 %v7618_v29, %v8616_v14  ;;  %v8998_v60 = vmin.f32 %v3402_v32, 17.0  ;;  %v3105_v25 = vmul.f32 %v7620_v6, %v8604_v41  ;;  %vm3690_vm12 = vmand %vm3658_vm10, %vm3674_vm11 }
 0x24d   : > { %4251 = vrot.lane.b32.xlu0 %v7049_v1, %s7724_s26  ;;  %v7047_v44 = vcvt.f32.s32 %v7046_v39  ;;  %v6282_v50 = vadd.f32 -1.0, %v3148_v30  ;;  %v3150_v46 = vmul.f32 0.0625, %v3133_v62  ;;  %v3436_v43 = vmax.f32 %v6330_v18, -2.0  ;;  %v3071_v30 = vpop.permute.xlu0 %3070 }
 0x24e   : > { %11787 = vst [vmem:[#allocation11_spill] sm:$0xff] %v8998_v60  ;;  %7627 = vrcp.f32 %v3194_v34  ;;  %v9005_v63 = vfloor.f32 %v3449_v45  ;;  %v3371_v14 = vmul.f32 8.0, %v3355_v12  ;;  %v6311_v8 = vadd.f32 -0.5, %v3321_v22 }
 0x24f   : > { %3993 = vrot.lane.b32.xlu1 %v3975_v3, %s7721_s25  ;;  %vm3706_vm13 = vcmp.ge.f32.partialorder %v8987_v2, -1.0  ;;  %vm3722_vm14 = vcmp.le.f32.partialorder %v8987_v2, 14.0  ;;  %v3262_v41 = vmul.f32 2.0, %v3240_v61  ;;  %v9010_v42 = vfloor.f32 %v8998_v60 }
 0x250   : > { %v3130_v7 = vmul.f32 2.0, %v3105_v25  ;;  %v3754_v40 = vsel %vm3690_vm12, 1, %v11598_v58  ;;  %v3514_v35 = vsub.f32 %v8964_v28, %v8987_v2  ;;  %v3109_v10 = vmul.f32 %v7622_v9, %v8629_v52  ;;  %vm3738_vm1 = vmand %vm3706_vm13, %vm3722_vm14 }
 0x251   : > { %3851 = vrot.lane.b32.xlu0 %v3544_v59, %s7721_s25  ;;  %v7624_v4 = vpop.eup %7623  ;;  %11788 = vst [vmem:[#allocation12_spill] sm:$0xff] %v9010_v42  ;;  %v6284_v5 = vadd.f32 -1.0, %v3150_v46  ;;  %v9017_v1 = vmin.f32 %v3436_v43, 17.0  ;;  %vm3705_vm15 = vcmp.ge.f32.partialorder %v9005_v63, -1.0  ;;  %vm3721_vm0 = vcmp.le.f32.partialorder %v9005_v63, 14.0 }
 0x252   : > { %v6329_v28 = vadd.f32 -0.5, %v3371_v14  ;;  %v3308_v19 = vadd.f32 1.0, %v6282_v50  ;;  %v3513_v31 = vsub.f32 %v3449_v45, %v9005_v63  ;;  %v3278_v47 = vmul.f32 0.0625, %v3262_v41  ;;  %vm3737_vm2 = vmand %vm3705_vm15, %vm3721_vm0 }
 0x253   : > { %3849 = vrot.lane.b32.xlu1 %v3543_v23, %s7721_s25  ;;  %v3238_v51 = vmul.f32 %v7624_v4, %v8629_v52  ;;  %v3401_v26 = vmax.f32 %v6311_v8, -2.0  ;;  %v3147_v29 = vmul.f32 0.0625, %v3130_v7  ;;  %v7052_v37 = vtrunc.f32 %v9010_v42 }
 0x254   : > { %v7626_v54 = vpop.eup %7625  ;;  %v3132_v32 = vmul.f32 2.0, %v3109_v10  ;;  %v3310_v59 = vadd.f32 1.0, %v6284_v5  ;;  %v3978_v39 = vsel %vm3738_vm1, 1, %v11598_v58  ;;  %v9035_v6 = vfloor.f32 %v9017_v1 }
 0x255   : > { %4249 = vrot.lane.b32.xlu0 %v7047_v44, %s7724_s26  ;;  %v3115_v3 = vmul.f32 %v7626_v54, %v8642_v57  ;;  %v3435_v52 = vmax.f32 %v6329_v28, -2.0  ;;  %v3324_v18 = vmul.f32 8.0, %v3308_v19  ;;  %7629 = vrcp.f32 %v8979_v11  ;;  %v3065_v44 = vpop.permute.xlu1 %3064 }
 0x256   : > { %v6300_v62 = vadd.f32 -1.0, %v3278_v47  ;;  %v3261_v45 = vmul.f32 2.0, %v3238_v51  ;;  %v9039_v12 = vmin.f32 %v3401_v26, 17.0  ;;  %v6281_v22 = vadd.f32 -1.0, %v3147_v29 }
 0x257   : > { %3775 = vrot.lane.b32.xlu1 %v3754_v40, %s7721_s25  ;;  %v3977_v34 = vsel %vm3737_vm2, 1, %v11598_v58  ;;  %v7053_v23 = vcvt.f32.s32 %v7052_v37  ;;  %v3149_v61 = vmul.f32 0.0625, %v3132_v32  ;;  %v3135_v9 = vmul.f32 2.0, %v3115_v3 }
 0x258   : > { %11789 = vst [vmem:[#allocation13_spill] sm:$0xff] %v9039_v12  ;;  %v3326_v25 = vmul.f32 8.0, %v3310_v59  ;;  %7631 = vrcp.f32 %v3071_v30  ;;  %vm3660_vm3 = vcmp.ge.f32.partialorder %v9035_v6, 0.0  ;;  %vm3676_vm4 = vcmp.le.f32.partialorder %v9035_v6, 15.0 }
 0x259   : > { %4079 = vrot.lane.b32.xlu0 %v3514_v35, %s7721_s25  ;;  %vm3657_vm5 = vcmp.ge.f32.partialorder %v9005_v63, 0.0  ;;  %v3451_v11 = vmin.f32 %v3435_v52, 17.0  ;;  %v3545_v46 = vsub.f32 1.0, %v3513_v31  ;;  %vm3673_vm6 = vcmp.le.f32.partialorder %v9005_v63, 15.0  ;;  %vm3692_vm7 = vmand %vm3660_vm3, %vm3676_vm4  ;;  %v3200_v26 = vpop.permute.xlu1 %3199 }
 0x25a   : > { %v3358_v43 = vadd.f32 1.0, %v6300_v62  ;;  %v3277_v14 = vmul.f32 0.0625, %v3261_v45  ;;  %v9049_v8 = vfloor.f32 %v9039_v12  ;;  %v6314_v41 = vadd.f32 -0.5, %v3324_v18  ;;  %vm3689_vm8 = vmand %vm3657_vm5, %vm3673_vm6 }
 0x25b   : > { %4077 = vrot.lane.b32.xlu1 %v3513_v31, %s7721_s25  ;;  %v7628_v50 = vpop.eup %7627  ;;  %v3307_v4 = vadd.f32 1.0, %v6281_v22  ;;  %v3546_v7 = vsub.f32 1.0, %v3514_v35  ;;  %v6283_v40 = vadd.f32 -1.0, %v3149_v61  ;;  %v3152_v10 = vmul.f32 0.0625, %v3135_v9  ;;  %v3198_v35 = vpop.permute.xlu0 %3197 }
 0x25c   : > { %11790 = vst [vmem:[#allocation14_spill] sm:$0xff] %v9049_v8  ;;  %v6316_v5 = vadd.f32 -0.5, %v3326_v25  ;;  %v9059_v54 = vfloor.f32 %v3451_v11  ;;  %v3242_v28 = vmul.f32 %v7628_v50, %v8654_v36  ;;  %v3374_v19 = vmul.f32 8.0, %v3358_v43 }
 0x25d   : > { %3999 = vrot.lane.b32.xlu0 %v3978_v39, %s7721_s25  ;;  %v6299_v31 = vadd.f32 -1.0, %v3277_v14  ;;  %v3404_v47 = vmax.f32 %v6314_v41, -2.0  ;;  %v3323_v51 = vmul.f32 8.0, %v3307_v4  ;;  %v3756_v29 = vsel %vm3692_vm7, 1, %v11598_v58 }
 0x25e   : > { %v7050_v37 = vtrunc.f32 %v9049_v8  ;;  %v3309_v32 = vadd.f32 1.0, %v6283_v40  ;;  %v6286_v3 = vadd.f32 -1.0, %v3152_v10  ;;  %v3406_v59 = vmax.f32 %v6316_v5, -2.0 }
 0x25f   : > { %3997 = vrot.lane.b32.xlu1 %v3977_v34, %s7721_s25  ;;  %v3753_v39 = vsel %vm3689_vm8, 1, %v11598_v58  ;;  %7633 = vrcp.f32 %v3198_v35  ;;  %vm3659_vm9 = vcmp.ge.f32.partialorder %v9059_v54, 0.0  ;;  %vm3675_vm10 = vcmp.le.f32.partialorder %v9059_v54, 15.0 }
 0x260   : > { %v3263_v30 = vmul.f32 2.0, %v3242_v28  ;;  %v3515_v52 = vsub.f32 %v3451_v11, %v9059_v54  ;;  %v6332_v18 = vadd.f32 -0.5, %v3374_v19  ;;  %v3357_v62 = vadd.f32 1.0, %v6299_v31  ;;  %vm3691_vm11 = vmand %vm3659_vm9, %vm3675_vm10 }
 0x261   : > { %4255 = vrot.lane.b32.xlu0 %v7053_v23, %s7724_s26  ;;  %v9070_v22 = vmin.f32 %v3404_v47, 17.0  ;;  %v6313_v34 = vadd.f32 -0.5, %v3323_v51  ;;  %v7051_v23 = vcvt.f32.s32 %v7050_v37  ;;  %v3325_v61 = vmul.f32 8.0, %v3309_v32 }
 0x262   : > { %v7630_v45 = vpop.eup %7629  ;;  %v3312_v9 = vadd.f32 1.0, %v6286_v3  ;;  %7635 = vrcp.f32 %v3065_v44  ;;  %v9073_v50 = vmin.f32 %v3406_v59, 17.0  ;;  %vm3707_vm12 = vcmp.ge.f32.partialorder %v9059_v54, -1.0 }
 0x263   : > { %3853 = vrot.lane.b32.xlu1 %v3545_v46, %s7721_s25  ;;  %11791 = vst [vmem:[#allocation15_spill] sm:$0xff] %v9070_v22  ;;  %v3069_v46 = vpop.permute.xlu1 %3068  ;;  %vm3723_vm13 = vcmp.le.f32.partialorder %v9059_v54, 14.0  ;;  %v3279_v11 = vmul.f32 0.0625, %v3263_v30  ;;  %vm3708_vm14 = vcmp.ge.f32.partialorder %v9035_v6, -1.0  ;;  %vm3724_vm15 = vcmp.le.f32.partialorder %v9035_v6, 14.0 }
 0x264   : > { %v3438_v43 = vmax.f32 %v6332_v18, -2.0  ;;  %v3373_v44 = vmul.f32 8.0, %v3357_v62  ;;  %v9081_v14 = vfloor.f32 %v9070_v22  ;;  %v3403_v41 = vmax.f32 %v6313_v34, -2.0  ;;  %vm3739_vm0 = vmand %vm3707_vm12, %vm3723_vm13 }
 0x265   : > { %3855 = vrot.lane.b32.xlu0 %v3546_v7, %s7721_s25  ;;  %v7632_v25 = vpop.eup %7631  ;;  %v3755_v4 = vsel %vm3691_vm11, 1, %v11598_v58  ;;  %v3516_v7 = vsub.f32 %v9017_v1, %v9035_v6  ;;  %7637 = vrcp.f32 %v3069_v46  ;;  %v3244_v10 = vmul.f32 %v7630_v45, %v8642_v57  ;;  %vm3740_vm1 = vmand %vm3708_vm14, %vm3724_vm15 }
 0x266   : > { %11792 = vst [vmem:[#allocation16_spill] sm:$0xff] %v9081_v14  ;;  %v3119_v40 = vmul.f32 %v7632_v25, %v8668_v33  ;;  %v6315_v5 = vadd.f32 -0.5, %v3325_v61  ;;  %v3328_v28 = vmul.f32 8.0, %v3312_v9  ;;  %v6301_v35 = vadd.f32 -1.0, %v3279_v11 }
 0x267   : > { %3779 = vrot.lane.b32.xlu1 %v3756_v29, %s7721_s25  ;;  %v9095_v1 = vfloor.f32 %v9073_v50  ;;  %v3454_v19 = vmin.f32 %v3438_v43, 17.0  ;;  %v6331_v31 = vadd.f32 -0.5, %v3373_v44  ;;  %v9097_v47 = vmin.f32 %v3403_v41, 17.0  ;;  %v9101_v29 = vpop.permute.xlu1 %3203 }
 0x268   : > { %v3979_v51 = vsel %vm3739_vm0, 1, %v11598_v58  ;;  %v7056_v57 = vtrunc.f32 %v9081_v14  ;;  %v3137_v37 = vmul.f32 2.0, %v3119_v40  ;;  %v3980_v32 = vsel %vm3740_vm1, 1, %v11598_v58 }
 0x269   : > { %3773 = vrot.lane.b32.xlu0 %v3753_v39, %s7721_s25  ;;  %11793 = vst [vmem:[#allocation17_spill] sm:$0xff] %v9097_v47  ;;  %v3264_v3 = vmul.f32 2.0, %v3244_v10  ;;  %v3405_v59 = vmax.f32 %v6315_v5, -2.0  ;;  %v6318_v39 = vadd.f32 -0.5, %v3328_v28  ;;  %7639 = vrcp.f32 %v3200_v26  ;;  %v9118_v5 = vpop.permute.xlu0 %3074 }
 0x26a   : > { %v3359_v30 = vadd.f32 1.0, %v6301_v35  ;;  %v3547_v62 = vsub.f32 1.0, %v3515_v52  ;;  %v7060_v45 = vtrunc.f32 %v9095_v1  ;;  %v9107_v34 = vfloor.f32 %v3454_v19 }
 0x26b   : > { %4081 = vrot.lane.b32.xlu1 %v3515_v52, %s7721_s25  ;;  %v9110_v61 = vfloor.f32 %v9097_v47  ;;  %v7057_v9 = vcvt.f32.s32 %v7056_v57  ;;  %v3154_v25 = vmul.f32 0.0625, %v3137_v37  ;;  %v3280_v46 = vmul.f32 0.0625, %v3264_v3  ;;  %v3202_v41 = vpop.permute.xlu1 %3201 }
 0x26c   : > { %v7634_v18 = vpop.eup %7633  ;;  %v3408_v26 = vmax.f32 %v6318_v39, -2.0  ;;  %v3375_v43 = vmul.f32 8.0, %v3359_v30  ;;  %v9115_v44 = vmin.f32 %v3405_v59, 17.0  ;;  %v3518_v40 = vsub.f32 %v3454_v19, %v9107_v34 }
 0x26d   : > { %4253 = vrot.lane.b32.xlu0 %v7051_v23, %s7724_s26  ;;  %v3437_v23 = vmax.f32 %v6331_v31, -2.0  ;;  %11794 = vst [vmem:[#allocation18_spill] sm:$0xff] %v9110_v61  ;;  %v3246_v52 = vmul.f32 %v7634_v18, %v8684_v27  ;;  %v3548_v28 = vsub.f32 1.0, %v3516_v7  ;;  %v7054_v35 = vtrunc.f32 %v9110_v61 }
 0x26e   : > { %v6288_v31 = vadd.f32 -1.0, %v3154_v25  ;;  %v9122_v37 = vmin.f32 %v3408_v26, 17.0  ;;  %7641 = vrcp.f32 %v3202_v41  ;;  %v11596_v59 = vmov 1   ;;  %v3073_v25 = vpop.permute.xlu0 %3072 }
 0x26f   : > { %3777 = vrot.lane.b32.xlu1 %v3755_v4, %s7721_s25  ;;  %v7636_v11 = vpop.eup %7635  ;;  %v7061_v4 = vcvt.f32.s32 %v7060_v45  ;;  %v3453_v10 = vmin.f32 %v3437_v23, 17.0  ;;  %v3265_v3 = vmul.f32 2.0, %v3246_v52  ;;  %v9127_v19 = vfloor.f32 %v9115_v44  ;;  %7123 = vset.pattern.permute.xlu0 %v11596_v59 }
 0x270   : > { %7124 = vset.pattern.permute.xlu1 %v11596_v59  ;;  %v3113_v30 = vmul.f32 %v7636_v11, %v8654_v36  ;;  %v7055_v18 = vcvt.f32.s32 %v7054_v35  ;;  %v3314_v45 = vadd.f32 1.0, %v6288_v31  ;;  %vm3662_vm2 = vcmp.ge.f32.partialorder %v9107_v34, 0.0 }
 0x271   : > { %4083 = vrot.lane.b32.xlu0 %v3516_v7, %s7721_s25  ;;  %v3550_v7 = vsub.f32 1.0, %v3518_v40  ;;  %v9129_v39 = vfloor.f32 %v3453_v10  ;;  %v3281_v26 = vmul.f32 0.0625, %v3265_v3  ;;  %v7058_v36 = vtrunc.f32 %v9127_v19 }
 0x272   : > { %v7638_v57 = vpop.eup %7637  ;;  %vm3678_vm3 = vcmp.le.f32.partialorder %v9107_v34, 15.0  ;;  %v3330_v41 = vmul.f32 8.0, %v3314_v45  ;;  %7643 = vrcp.f32 %v3073_v25  ;;  %vm3710_vm5 = vcmp.ge.f32.partialorder %v9107_v34, -1.0 }
 0x273   : > { %4001 = vrot.lane.b32.xlu1 %v3979_v51, %s7721_s25  ;;  %v6302_v51 = vadd.f32 -1.0, %v3280_v46  ;;  %v9140_v52 = vsub.f32 %v3453_v10, %v9129_v39  ;;  %7645 = vrcp.f32 %v9101_v29  ;;  %vm3694_vm4 = vmand %vm3662_vm2, %vm3678_vm3  ;;  %v6303_v35 = vadd.f32 -1.0, %v3281_v26 }
 0x274   : > { %v7059_v31 = vcvt.f32.s32 %v7058_v36  ;;  %vm3726_vm6 = vcmp.le.f32.partialorder %v9107_v34, 14.0  ;;  %v6320_v3 = vadd.f32 -0.5, %v3330_v41  ;;  %v3758_v29 = vsel %vm3694_vm4, 1, %v11598_v58 }
 0x275   : > { %4003 = vrot.lane.b32.xlu0 %v3980_v32, %s7721_s25  ;;  %v6333_v32 = vadd.f32 -0.5, %v3375_v43  ;;  %v3360_v23 = vadd.f32 1.0, %v6302_v51  ;;  %vm3742_vm7 = vmand %vm3710_vm5, %vm3726_vm6  ;;  %vm3661_vm8 = vcmp.ge.f32.partialorder %v9129_v39, 0.0  ;;  %vm3677_vm9 = vcmp.le.f32.partialorder %v9129_v39, 15.0 }
 0x276   : > { %v7640_v43 = vpop.eup %7639  ;;  %7647 = vrcp.f32 %v9118_v5  ;;  %v3410_v25 = vmax.f32 %v6320_v3, -2.0  ;;  %vm3693_vm10 = vmand %vm3661_vm8, %vm3677_vm9  ;;  %vm3709_vm13 = vcmp.ge.f32.partialorder %v9129_v39, -1.0  ;;  %vm3725_vm14 = vcmp.le.f32.partialorder %v9129_v39, 14.0 }
 0x277   : > { %3857 = vrot.lane.b32.xlu1 %v3547_v62, %s7721_s25  ;;  %v3117_v62 = vmul.f32 %v7638_v57, %v8684_v27  ;;  %v3439_v46 = vmax.f32 %v6333_v32, -2.0  ;;  %v3134_v27 = vmul.f32 2.0, %v3113_v30  ;;  %v3248_v51 = vmul.f32 %v7640_v43, %v8668_v33  ;;  %vm3741_vm0 = vmand %vm3709_vm13, %vm3725_vm14 }
 0x278   : > { %v3361_v30 = vadd.f32 1.0, %v6303_v35  ;;  %v11669_v56 = vmov 0.0  }
 0x279   : > { %4259 = vrot.lane.b32.xlu0 %v7057_v9, %s7724_s26  ;;  %v9136_v9 = vfloor.f32 %v9122_v37  ;;  %v3136_v11 = vmul.f32 2.0, %v3117_v62  ;;  %v3151_v57 = vmul.f32 0.0625, %v3134_v27  ;;  %v3266_v33 = vmul.f32 2.0, %v3248_v51 }
 0x27a   : > { %v3377_v43 = vmul.f32 8.0, %v3361_v30 }
 0x27b   : > { %4263 = vrot.lane.b32.xlu1 %v7061_v4, %s7724_s26  ;;  %v3376_v4 = vmul.f32 8.0, %v3360_v23  ;;  %v7064_v10 = vtrunc.f32 %v9136_v9  ;;  %v3153_v32 = vmul.f32 0.0625, %v3136_v11  ;;  %v6285_v45 = vadd.f32 -1.0, %v3151_v57 }
 0x27c   : > { %v3282_v5 = vmul.f32 0.0625, %v3266_v33 }
 0x27d   : > { %3859 = vrot.lane.b32.xlu0 %v3548_v28, %s7721_s25  ;;  %v3455_v28 = vmin.f32 %v3439_v46, 17.0  ;;  %v7065_v62 = vcvt.f32.s32 %v7064_v10  ;;  %v6287_v23 = vadd.f32 -1.0, %v3153_v32  ;;  %v3982_v46 = vsel %vm3742_vm7, 1, %v11598_v58 }
 0x27e   : > { %v3311_v11 = vadd.f32 1.0, %v6285_v45  ;;  %v3757_v10 = vsel %vm3693_vm10, 1, %v11598_v58  ;;  %v6304_v32 = vadd.f32 -1.0, %v3282_v5 }
 0x27f   : > { %3863 = vrot.lane.b32.xlu1 %v3550_v7, %s7721_s25  ;;  %v9156_v7 = vfloor.f32 %v3455_v28  ;;  %v3313_v41 = vadd.f32 1.0, %v6287_v23 }
 0x280   : > { %v3327_v3 = vmul.f32 8.0, %v3311_v11 }
 0x281   : > { %4257 = vrot.lane.b32.xlu0 %v7055_v18, %s7724_s26  ;;  %v7642_v18 = vpop.eup %7641  ;;  %vm3663_vm11 = vcmp.ge.f32.partialorder %v9156_v7, 0.0  ;;  %vm3679_vm12 = vcmp.le.f32.partialorder %v9156_v7, 15.0  ;;  %v3519_v27 = vsub.f32 %v3455_v28, %v9156_v7  ;;  %vm3711_vm1 = vcmp.ge.f32.partialorder %v9156_v7, -1.0 }
 0x282   : > { %v3250_v36 = vmul.f32 %v7642_v18, %v8710_v13  ;;  %vm3695_vm15 = vmand %vm3663_vm11, %vm3679_vm12  ;;  %v7644_v35 = vpop.eup %7643  ;;  %vm3727_vm2 = vcmp.le.f32.partialorder %v9156_v7, 14.0  ;;  %v6335_v28 = vadd.f32 -0.5, %v3377_v43  ;;  %v3981_v18 = vsel %vm3741_vm0, 1, %v11598_v58 }
 0x283   : > { %4085 = vrot.lane.b32.xlu1 %v9140_v52, %s7721_s25  ;;  %v7646_v51 = vpop.eup %7645  ;;  %v3121_v30 = vmul.f32 %v7644_v35, %v8710_v13  ;;  %vm3743_vm3 = vmand %vm3711_vm1, %vm3727_vm2  ;;  %v6317_v13 = vadd.f32 -0.5, %v3327_v3 }
 0x284   : > { %v3441_v45 = vmax.f32 %v6335_v28, -2.0  ;;  %v3983_v43 = vsel %vm3743_vm3, 1, %v11598_v58  ;;  %v7648_v5 = vpop.eup %7647 }
 0x285   : > { %4087 = vrot.lane.b32.xlu0 %v3518_v40, %s7721_s25  ;;  %v6334_v40 = vadd.f32 -0.5, %v3376_v4  ;;  %v9170_v4 = vmin.f32 %v3410_v25, 17.0  ;;  %v3407_v3 = vmax.f32 %v6317_v13, -2.0 }
 0x286   : > { %v3457_v28 = vmin.f32 %v3441_v45, 17.0 }
 0x287   : > { %4261 = vrot.lane.b32.xlu1 %v7059_v31, %s7724_s26  ;;  %v3440_v26 = vmax.f32 %v6334_v40, -2.0  ;;  %v3267_v31 = vmul.f32 2.0, %v3250_v36  ;;  %v3329_v40 = vmul.f32 8.0, %v3313_v41  ;;  %v3549_v36 = vsub.f32 1.0, %v9140_v52 }
 0x288   : > { %v3138_v41 = vmul.f32 2.0, %v3121_v30  ;;  %v3123_v30 = vmul.f32 %v7648_v5, %v8699_v15  ;;  %v9209_v13 = vmin.f32 %v3407_v3, 17.0 }
 0x289   : > { %3783 = vrot.lane.b32.xlu0 %v3758_v29, %s7721_s25  ;;  %v3456_v57 = vmin.f32 %v3440_v26, 17.0  ;;  %v3759_v29 = vsel %vm3695_vm15, 1, %v11598_v58  ;;  %v3283_v23 = vmul.f32 0.0625, %v3267_v31  ;;  %v3252_v26 = vmul.f32 %v7646_v51, %v8699_v15 }
 0x28a   : > { %v6319_v11 = vadd.f32 -0.5, %v3329_v40  ;;  %v3139_v15 = vmul.f32 2.0, %v3123_v30 }
 0x28b   : > { %4267 = vrot.lane.b32.xlu1 %v7065_v62, %s7724_s26  ;;  %v9182_v62 = vfloor.f32 %v9170_v4  ;;  %v9187_v25 = vfloor.f32 %v3456_v57  ;;  %v6305_v31 = vadd.f32 -1.0, %v3283_v23  ;;  %v9205_v23 = vfloor.f32 %v3457_v28 }
 0x28c   : > { %v3409_v40 = vmax.f32 %v6319_v11, -2.0  ;;  %v3156_v3 = vmul.f32 0.0625, %v3139_v15 }
 0x28d   : > { %4007 = vrot.lane.b32.xlu0 %v3982_v46, %s7721_s25  ;;  %v3362_v46 = vadd.f32 1.0, %v6304_v32  ;;  %v7068_v35 = vtrunc.f32 %v9182_v62  ;;  %vm3664_vm4 = vcmp.ge.f32.partialorder %v9187_v25, 0.0  ;;  %vm3680_vm5 = vcmp.le.f32.partialorder %v9187_v25, 15.0 }
 0x28e   : > { %v3268_v32 = vmul.f32 2.0, %v3252_v26  ;;  %v3520_v52 = vsub.f32 %v3456_v57, %v9187_v25  ;;  %vm3696_vm6 = vmand %vm3664_vm4, %vm3680_vm5  ;;  %vm3712_vm7 = vcmp.ge.f32.partialorder %v9187_v25, -1.0  ;;  %vm3728_vm8 = vcmp.le.f32.partialorder %v9187_v25, 14.0 }
 0x28f   : > { %4089 = vrot.lane.b32.xlu1 %v3519_v27, %s7721_s25  ;;  %v3378_v51 = vmul.f32 8.0, %v3362_v46  ;;  %v7069_v45 = vcvt.f32.s32 %v7068_v35  ;;  %v3363_v46 = vadd.f32 1.0, %v6305_v31  ;;  %vm3744_vm9 = vmand %vm3712_vm7, %vm3728_vm8  ;;  %vm3665_vm10 = vcmp.ge.f32.partialorder %v9205_v23, 0.0 }
 0x290   : > { %v3284_v26 = vmul.f32 0.0625, %v3268_v32  ;;  %vm3681_vm11 = vcmp.le.f32.partialorder %v9205_v23, 15.0  ;;  %v9224_v32 = vfloor.f32 %v9209_v13  ;;  %v3984_v30 = vsel %vm3744_vm9, 1, %v11598_v58 }
 0x291   : > { %3781 = vrot.lane.b32.xlu0 %v3757_v10, %s7721_s25  ;;  %v3551_v10 = vsub.f32 1.0, %v3519_v27  ;;  %v6336_v57 = vadd.f32 -0.5, %v3378_v51  ;;  %v3379_v11 = vmul.f32 8.0, %v3363_v46  ;;  %vm3697_vm12 = vmand %vm3665_vm10, %vm3681_vm11  ;;  %vm3713_vm13 = vcmp.ge.f32.partialorder %v9205_v23, -1.0 }
 0x292   : > { %v6306_v51 = vadd.f32 -1.0, %v3284_v26  ;;  %vm3729_vm14 = vcmp.le.f32.partialorder %v9205_v23, 14.0  ;;  %v3552_v26 = vsub.f32 1.0, %v3520_v52 }
 0x293   : > { %3785 = vrot.lane.b32.xlu1 %v3759_v29, %s7721_s25  ;;  %v3442_v31 = vmax.f32 %v6336_v57, -2.0  ;;  %v3761_v57 = vsel %vm3697_vm12, 1, %v11598_v58  ;;  %vm3745_vm15 = vmand %vm3713_vm13, %vm3729_vm14 }
 0x294   : > { %v3364_v46 = vadd.f32 1.0, %v6306_v51 }
 0x295   : > { %4005 = vrot.lane.b32.xlu0 %v3981_v18, %s7721_s25  ;;  %v3155_v18 = vmul.f32 0.0625, %v3138_v41  ;;  %v9218_v41 = vmin.f32 %v3409_v40, 17.0 }
 0x297   : > { %4009 = vrot.lane.b32.xlu1 %v3983_v43, %s7721_s25  ;;  %v3760_v43 = vsel %vm3696_vm6, 1, %v11598_v58  ;;  %v9232_v40 = vfloor.f32 %v9218_v41  ;;  %v3380_v58 = vmul.f32 8.0, %v3364_v46 }
 0x299   : > { %3861 = vrot.lane.b32.xlu0 %v3549_v36, %s7721_s25  ;;  %v6289_v36 = vadd.f32 -1.0, %v3155_v18 }
 0x29b   : > { %3865 = vrot.lane.b32.xlu1 %v3551_v10, %s7721_s25  ;;  %v3521_v10 = vsub.f32 %v3457_v28, %v9205_v23  ;;  %v3315_v18 = vadd.f32 1.0, %v6289_v36  ;;  %v6337_v28 = vadd.f32 -0.5, %v3379_v11 }
 0x29d   : > { %4091 = vrot.lane.b32.xlu0 %v3520_v52, %s7721_s25  ;;  %v3331_v59 = vmul.f32 8.0, %v3315_v18  ;;  %v3443_v11 = vmax.f32 %v6337_v28, -2.0  ;;  %v11801_v52 = vmov 0   ;;  %v6338_v28 = vadd.f32 -0.5, %v3380_v58 }
 0x29e   : > { %v9185_v33 = vpop.permute.xlu0 %4071  ;;  %v3985_v22 = vsel %vm3745_vm15, 1, %v11801_v52 }
 0x29f   : > { %11795 = vst [vmem:[#allocation19_spill] sm:$0xff] %v9185_v33  ;;  %4271 = vrot.lane.b32.xlu1 %v7069_v45, %s7724_s26  ;;  %v3458_v45 = vmin.f32 %v3442_v31, 17.0  ;;  %v7066_v31 = vtrunc.f32 %v9232_v40 }
 0x2a1   : > { %3787 = vrot.lane.b32.xlu0 %v3760_v43, %s7721_s25  ;;  %v7062_v43 = vtrunc.f32 %v9224_v32  ;;  %v9243_v51 = vfloor.f32 %v3458_v45  ;;  %v7067_v18 = vcvt.f32.s32 %v7066_v31 }
 0x2a2   : > { %v9198_v29 = vpop.permute.xlu0 %3767  ;;  %v9202_v27 = vpop.permute.xlu1 %4069 }
 0x2a3   : > { %11796 = vst [vmem:[#allocation20_spill] sm:$0xff] %v9198_v29  ;;  %11797 = vst [vmem:[#allocation21_spill] sm:$0xff] %v9202_v27  ;;  %4093 = vrot.lane.b32.xlu1 %v3521_v10, %s7721_s25  ;;  %v7063_v14 = vcvt.f32.s32 %v7062_v43  ;;  %vm3666_vm0 = vcmp.ge.f32.partialorder %v9243_v51, 0.0  ;;  %vm3682_vm1 = vcmp.le.f32.partialorder %v9243_v51, 15.0  ;;  %v3522_v46 = vsub.f32 %v3458_v45, %v9243_v51 }
 0x2a4   : > { %vm3698_vm2 = vmand %vm3666_vm0, %vm3682_vm1  ;;  %vm3714_vm3 = vcmp.ge.f32.partialorder %v9243_v51, -1.0  ;;  %vm3730_vm4 = vcmp.le.f32.partialorder %v9243_v51, 14.0 }
 0x2a5   : > { %4011 = vrot.lane.b32.xlu0 %v3984_v30, %s7721_s25  ;;  %v6290_v30 = vadd.f32 -1.0, %v3156_v3  ;;  %v3459_v3 = vmin.f32 %v3443_v11, 17.0  ;;  %v3444_v11 = vmax.f32 %v6338_v28, -2.0  ;;  %vm3746_vm5 = vmand %vm3714_vm3, %vm3730_vm4 }
 0x2a6   : > { %v9216_v5 = vpop.permute.xlu0 %3991  ;;  %v9221_v35 = vpop.permute.xlu1 %3765 }
 0x2a7   : > { %11798 = vst [vmem:[#allocation22_spill] sm:$0xff] %v9216_v5  ;;  %11799 = vst [vmem:[#allocation23_spill] sm:$0xff] %v9221_v35  ;;  %3789 = vrot.lane.b32.xlu1 %v3761_v57, %s7721_s25  ;;  %v3316_v47 = vadd.f32 1.0, %v6290_v30  ;;  %v6321_v57 = vadd.f32 -0.5, %v3331_v59  ;;  %v7074_v59 = vtrunc.f32 %v8880_v20  ;;  %v3553_v30 = vsub.f32 1.0, %v3521_v10 }
 0x2a9   : > { %3867 = vrot.lane.b32.xlu0 %v3552_v26, %s7721_s25  ;;  %v3332_v43 = vmul.f32 8.0, %v3316_v47  ;;  %v3762_v47 = vsel %vm3698_vm2, 1, %v11801_v52  ;;  %v7075_v31 = vcvt.f32.s32 %v7074_v59 }
 0x2aa   : > { %v9235_v15 = vpop.permute.xlu0 %4247  ;;  %v9239_v36 = vpop.permute.xlu1 %3989 }
 0x2ab   : > { %11800 = vst [vmem:[#allocation24_spill] sm:$0xff] %v9239_v36  ;;  %4013 = vrot.lane.b32.xlu1 %v3985_v22, %s7721_s25  ;;  %v3411_v22 = vmax.f32 %v6321_v57, -2.0  ;;  %v6322_v20 = vadd.f32 -0.5, %v3332_v43  ;;  %v4229_v59 = vmul.u32 16, %v7075_v31 }
 0x2ad   : > { %4265 = vrot.lane.b32.xlu0 %v7063_v14, %s7724_s26  ;;  %v9256_v14 = vfloor.f32 %v3459_v3  ;;  %v9269_v10 = vmin.f32 %v3411_v22, 17.0  ;;  %v3412_v43 = vmax.f32 %v6322_v20, -2.0  ;;  %v3554_v20 = vsub.f32 1.0, %v3522_v46 }
 0x2ae   : > { %v9248_v61 = vpop.permute.xlu0 %3847  ;;  %v4246_v26 = vpop.permute.xlu1 %4245 }
 0x2af   : > { %11802 = vst [vmem:[#allocation25_spill] sm:$0xff] %v9248_v61  ;;  %4269 = vrot.lane.b32.xlu1 %v7067_v18, %s7724_s26  ;;  %vm3667_vm6 = vcmp.ge.f32.partialorder %v9256_v14, 0.0  ;;  %vm3683_vm7 = vcmp.le.f32.partialorder %v9256_v14, 15.0  ;;  %v3523_v57 = vsub.f32 %v3459_v3, %v9256_v14  ;;  %v3460_v18 = vmin.f32 %v3444_v11, 17.0 }
 0x2b0   : > { %vm3699_vm8 = vmand %vm3667_vm6, %vm3683_vm7  ;;  %vm3715_vm9 = vcmp.ge.f32.partialorder %v9256_v14, -1.0  ;;  %vm3731_vm10 = vcmp.le.f32.partialorder %v9256_v14, 14.0  ;;  %v9280_v22 = vfloor.f32 %v9269_v10  ;;  %v9291_v8 = vmin.f32 %v3412_v43, 17.0 }
 0x2b1   : > { %4095 = vrot.lane.b32.xlu0 %v3522_v46, %s7721_s25  ;;  %v9284_v11 = vfloor.f32 %v3460_v18  ;;  %v3763_v60 = vsel %vm3699_vm8, 1, %v11801_v52  ;;  %vm3747_vm11 = vmand %vm3715_vm9, %vm3731_vm10 }
 0x2b2   : > { %v9263_v45 = vpop.permute.xlu1 %3845  ;;  %v7070_v42 = vtrunc.f32 %v9280_v22 }
 0x2b3   : > { %v9260_v58 = vpop.permute.xlu0 %4075  ;;  %3869 = vrot.lane.b32.xlu1 %v3553_v30, %s7721_s25  ;;  %11804 = vst [vmem:[#allocation27_spill] sm:$0xff] %v9263_v45  ;;  %v3986_v30 = vsel %vm3746_vm5, 1, %v11801_v52  ;;  %vm3668_vm12 = vcmp.ge.f32.partialorder %v9284_v11, 0.0  ;;  %vm3684_vm13 = vcmp.le.f32.partialorder %v9284_v11, 15.0  ;;  %v3524_v43 = vsub.f32 %v3460_v18, %v9284_v11 }
 0x2b4   : > { %11803 = vst [vmem:[#allocation26_spill] sm:$0xff] %v9260_v58  ;;  %vm3700_vm15 = vmand %vm3668_vm12, %vm3684_vm13  ;;  %vm3716_vm0 = vcmp.ge.f32.partialorder %v9284_v11, -1.0  ;;  %vm3732_vm1 = vcmp.le.f32.partialorder %v9284_v11, 14.0 }
 0x2b5   : > { %3791 = vrot.lane.b32.xlu0 %v3762_v47, %s7721_s25  ;;  %v7076_v47 = vtrunc.f32 %v8873_v48  ;;  %v7078_v48 = vtrunc.f32 %v8951_v24  ;;  %vm3748_vm2 = vmand %vm3716_vm0, %vm3732_vm1  ;;  %vm3566_vm0 = vcmp.ge.f32.partialorder %v9095_v1, 0.0  ;;  %vm3582_vm1 = vcmp.le.f32.partialorder %v9095_v1, 15.0 }
 0x2b7   : > { %v9272_v28 = vpop.permute.xlu0 %3771  ;;  %4097 = vrot.lane.b32.xlu1 %v3523_v57, %s7721_s25  ;;  %v7077_v58 = vcvt.f32.s32 %v7076_v47 }
 0x2b8   : > { %11805 = vst [vmem:[#allocation28_spill] sm:$0xff] %v9272_v28 }
 0x2b9   : > { %4015 = vrot.lane.b32.xlu0 %v3986_v30, %s7721_s25  ;;  %v9282_v3 = vpop.permute.xlu1 %4073  ;;  %v4277_v30 = vadd.s32 %v4246_v26, %v4229_v59  ;;  %v3987_v26 = vsel %vm3747_vm11, 1, %v11801_v52  ;;  %v4230_v24 = vmul.u32 16, %v7077_v58 }
 0x2ba   : > { %11806 = vst [vmem:[#allocation29_spill] sm:$0xff] %v9282_v3  ;;  %v7071_v3 = vcvt.f32.s32 %v7070_v42 }
 0x2bb   : > { %v9288_v12 = vpop.permute.xlu0 %3995  ;;  %3793 = vrot.lane.b32.xlu1 %v3763_v60, %s7721_s25  ;;  %v7080_v60 = vtrunc.f32 %v8932_v17  ;;  %v4309_v59 = vadd.s32 256, %v4277_v30  ;;  %vm4293_vm14 = vcmp.lt.s32.totalorder %v4277_v30, 0  ;;  %v9310_v17 = vfloor.f32 %v9291_v8 }
 0x2bc   : > { %11807 = vst [vmem:[#allocation30_spill] sm:$0xff] %v9288_v12  ;;  %v7079_v12 = vcvt.f32.s32 %v7078_v48  ;;  %v3555_v48 = vsub.f32 1.0, %v3523_v57  ;;  %v7084_v57 = vtrunc.f32 %v8987_v2  ;;  %v3556_v2 = vsub.f32 1.0, %v3524_v43 }
 0x2bd   : > { %3871 = vrot.lane.b32.xlu0 %v3554_v20, %s7721_s25  ;;  %v9294_v31 = vpop.permute.xlu1 %3769  ;;  %v7081_v18 = vcvt.f32.s32 %v7080_v60  ;;  %v4325_v28 = vsel %vm4293_vm14, %v4309_v59, %v4277_v30  ;;  %v7072_v60 = vtrunc.f32 %v9310_v17 }
 0x2be   : > { %11808 = vst [vmem:[#allocation31_spill] sm:$0xff] %v9294_v31  ;;  %v4231_v31 = vmul.u32 16, %v7079_v12  ;;  %v6339_v58 = vadd.s32 4294967040, %v4325_v28  ;;  %vm4341_vm3 = vcmp.ge.s32.totalorder %v4325_v28, 256 }
 0x2bf   : > { %v4252_v46 = vpop.permute.xlu0 %4251  ;;  %4017 = vrot.lane.b32.xlu1 %v3987_v26, %s7721_s25  ;;  %v3764_v26 = vsel %vm3700_vm15, 1, %v11801_v52  ;;  %v4232_v16 = vmul.u32 16, %v7081_v18 }
 0x2c1   : > { %4099 = vrot.lane.b32.xlu0 %v3524_v43, %s7721_s25  ;;  %v9305_v20 = vpop.permute.xlu1 %3993  ;;  %v7082_v43 = vtrunc.f32 %v9005_v63 }
 0x2c2   : > { %11809 = vst [vmem:[#allocation32_spill] sm:$0xff] %v9305_v20  ;;  %v4278_v20 = vadd.s32 %v9235_v15, %v4230_v24  ;;  %v4280_v15 = vadd.s32 %v4252_v46, %v4232_v16  ;;  %v4373_v24 = vsel %vm4341_vm3, %v6339_v58, %v4325_v28  ;;  %vm3630_vm3 = vcmp.le.f32.partialorder %v9095_v1, 14.0 }
 0x2c3   : > { %v9312_v47 = vpop.permute.xlu0 %3851  ;;  %4273 = vrot.lane.b32.xlu1 %v7071_v3, %s7724_s26 }
 0x2c4   : > { %11810 = vst [vmem:[#allocation33_spill] sm:$0xff] %v9312_v47  ;;  %v3988_v47 = vsel %vm3748_vm2, 1, %v11801_v52  ;;  %v4310_v30 = vadd.s32 256, %v4278_v20  ;;  %vm4294_vm4 = vcmp.lt.s32.totalorder %v4278_v20, 0  ;;  %vm4296_vm7 = vcmp.lt.s32.totalorder %v4280_v15, 0 }
 0x2c5   : > { %3795 = vrot.lane.b32.xlu0 %v3764_v26, %s7721_s25  ;;  %v9318_v42 = vpop.permute.xlu1 %3849  ;;  %v7073_v26 = vcvt.f32.s32 %v7072_v60  ;;  %vm3614_vm2 = vcmp.ge.f32.partialorder %v9095_v1, -1.0 }
 0x2c6   : > { %11811 = vst [vmem:[#allocation34_spill] sm:$0xff] %v9318_v42  ;;  %v4326_v46 = vsel %vm4294_vm4, %v4310_v30, %v4278_v20  ;;  %vm9377_vm4 = vmand %vm3566_vm0, %vm3582_vm1 }
 0x2c7   : > { %v4250_v0 = vpop.permute.xlu0 %4249  ;;  %3873 = vrot.lane.b32.xlu1 %v3555_v48, %s7721_s25  ;;  %v7085_v48 = vcvt.f32.s32 %v7084_v57  ;;  %v6340_v28 = vadd.s32 4294967040, %v4326_v46  ;;  %vm4342_vm8 = vcmp.ge.s32.totalorder %v4326_v46, 256 }
 0x2c8   : > { %v4279_v3 = vadd.s32 %v4250_v0, %v4231_v31  ;;  %v4312_v31 = vadd.s32 256, %v4280_v15 }
 0x2c9   : > { %4019 = vrot.lane.b32.xlu0 %v3988_v47, %s7721_s25  ;;  %v9324_v59 = vpop.permute.xlu1 %3775  ;;  %v4374_v20 = vsel %vm4342_vm8, %v6340_v28, %v4326_v46 }
 0x2ca   : > { %11812 = vst [vmem:[#allocation35_spill] sm:$0xff] %v9324_v59  ;;  %vm4295_vm5 = vcmp.lt.s32.totalorder %v4279_v3, 0  ;;  %v4311_v12 = vadd.s32 256, %v4279_v3  ;;  %v4328_v58 = vsel %vm4296_vm7, %v4312_v31, %v4280_v15  ;;  %vm9384_vm7 = vmand %vm3614_vm2, %vm3630_vm3 }
 0x2cb   : > { %v9327_v18 = vpop.permute.xlu0 %4079  ;;  %4391 = vperm.xlu1 %7124, %v4373_v24   ;;  %v6342_v30 = vadd.s32 4294967040, %v4328_v58  ;;  %vm4344_vm9 = vcmp.ge.s32.totalorder %v4328_v58, 256 }
 0x2cc   : > { %11813 = vst [vmem:[#allocation36_spill] sm:$0xff] %v9327_v18  ;;  %v4327_v0 = vsel %vm4295_vm5, %v4311_v12, %v4279_v3  ;;  %v4234_v3 = vmul.u32 16, %v7085_v48  ;;  %v7083_v48 = vcvt.f32.s32 %v7082_v43 }
 0x2cd   : > { %4275 = vrot.lane.b32.xlu0 %v7073_v26, %s7724_s26  ;;  %vm4343_vm6 = vcmp.ge.s32.totalorder %v4327_v0, 256  ;;  %v6341_v16 = vadd.s32 4294967040, %v4327_v0  ;;  %v9330_v47 = vpop.permute.xlu1 %4077 }
 0x2ce   : > { %11814 = vst [vmem:[#allocation37_spill] sm:$0xff] %v9330_v47 }
 0x2cf   : > { %v9332_v59 = vpop.permute.xlu0 %3999  ;;  %v4375_v42 = vsel %vm4343_vm6, %v6341_v16, %v4327_v0  ;;  %v4376_v0 = vsel %vm4344_vm9, %v6342_v30, %v4328_v58 }
 0x2d0   : > { %11815 = vst [vmem:[#allocation38_spill] sm:$0xff] %v9332_v59  ;;  %4397 = vperm.xlu1 %7124, %v4375_v42  }
 0x2d1   : > { %3875 = vrot.lane.b32.xlu0 %v3556_v2, %s7721_s25  ;;  %v9335_v60 = vpop.permute.xlu1 %3997  ;;  %s7726_s25 = smov 64  }
 0x2d2   : > { %11816 = vst [vmem:[#allocation39_spill] sm:$0xff] %v9335_v60 }
 0x2d3   : > { %v4256_v12 = vpop.permute.xlu0 %4255 }
 0x2d4   : > { %v4282_v24 = vadd.s32 %v4256_v12, %v4234_v3  ;;  %v4233_v3 = vmul.u32 16, %v7083_v48 }
 0x2d5   : > { %4394 = vperm.xlu0 %7123, %v4374_v20   ;;  %v9337_v57 = vpop.permute.xlu1 %3853 }
 0x2d6   : > { %11817 = vst [vmem:[#allocation40_spill] sm:$0xff] %v9337_v57  ;;  %vm4298_vm10 = vcmp.lt.s32.totalorder %v4282_v24, 0  ;;  %v4314_v26 = vadd.s32 256, %v4282_v24 }
 0x2d7   : > { %v9340_v42 = vpop.permute.xlu0 %3855 }
 0x2d8   : > { %11818 = vst [vmem:[#allocation41_spill] sm:$0xff] %v9340_v42  ;;  %v4330_v16 = vsel %vm4298_vm10, %v4314_v26, %v4282_v24  ;;  %v7088_v24 = vtrunc.f32 %v9035_v6  ;;  %vm3613_vm10 = vcmp.ge.f32.partialorder %v9127_v19, -1.0  ;;  %v7092_v42 = vtrunc.f32 %v9107_v34 }
 0x2d9   : > { %4400 = vperm.xlu0 %7123, %v4376_v0   ;;  %vm4346_vm11 = vcmp.ge.s32.totalorder %v4330_v16, 256  ;;  %v6344_v15 = vadd.s32 4294967040, %v4330_v16  ;;  %v9342_v31 = vpop.permute.xlu1 %3779  ;;  %v3504_v34 = vsub.f32 %v9122_v37, %v9136_v9  ;;  %v7090_v37 = vtrunc.f32 %v9129_v39 }
 0x2da   : > { %11819 = vst [vmem:[#allocation42_spill] sm:$0xff] %v9342_v31  ;;  %v9459_v39 = vsub.f32 %v9218_v41, %v9232_v40 }
 0x2db   : > { %v9344_v46 = vpop.permute.xlu0 %3773  ;;  %v4378_v2 = vsel %vm4346_vm11, %v6344_v15, %v4330_v16  ;;  %v7089_v16 = vcvt.f32.s32 %v7088_v24  ;;  %vm3629_vm11 = vcmp.le.f32.partialorder %v9127_v19, 14.0 }
 0x2dc   : > { %11820 = vst [vmem:[#allocation43_spill] sm:$0xff] %v9344_v46  ;;  %vm9407_vm0 = vmand %vm3613_vm10, %vm3629_vm11  ;;  %vm3584_vm10 = vcmp.le.f32.partialorder %v9136_v9, 15.0  ;;  %vm3616_vm11 = vcmp.ge.f32.partialorder %v9136_v9, -1.0 }
 0x2dd   : > { %4406 = vperm.xlu0 %7123, %v4378_v2   ;;  %v9346_v28 = vpop.permute.xlu1 %4081 }
 0x2de   : > { %11821 = vst [vmem:[#allocation44_spill] sm:$0xff] %v9346_v28 }
 0x2df   : > { %v4254_v12 = vpop.permute.xlu0 %4253 }
 0x2e0   : > { %v4281_v20 = vadd.s32 %v4254_v12, %v4233_v3  ;;  %v4236_v3 = vmul.u32 16, %v7089_v16 }
 0x2e1   : > { %v9348_v63 = vpop.permute.xlu1 %3777 }
 0x2e2   : > { %11822 = vst [vmem:[#allocation45_spill] sm:$0xff] %v9348_v63  ;;  %vm4297_vm12 = vcmp.lt.s32.totalorder %v4281_v20, 0  ;;  %v4313_v58 = vadd.s32 256, %v4281_v20 }
 0x2e3   : > { %v9351_v30 = vpop.permute.xlu0 %4083 }
 0x2e4   : > { %11823 = vst [vmem:[#allocation46_spill] sm:$0xff] %v9351_v30  ;;  %v4329_v26 = vsel %vm4297_vm12, %v4313_v58, %v4281_v20 }
 0x2e5   : > { %vm4345_vm13 = vcmp.ge.s32.totalorder %v4329_v26, 256  ;;  %v6343_v43 = vadd.s32 4294967040, %v4329_v26  ;;  %v9353_v0 = vpop.permute.xlu1 %4001 }
 0x2e6   : > { %11824 = vst [vmem:[#allocation47_spill] sm:$0xff] %v9353_v0 }
 0x2e7   : > { %v9355_v15 = vpop.permute.xlu0 %4003  ;;  %v4377_v2 = vsel %vm4345_vm13, %v6343_v43, %v4329_v26 }
 0x2e8   : > { %11825 = vst [vmem:[#allocation48_spill] sm:$0xff] %v9355_v15  ;;  %4403 = vperm.xlu1 %7124, %v4377_v2   ;;  %v3502_v2 = vsub.f32 %v9073_v50, %v9095_v1  ;;  %v7086_v50 = vtrunc.f32 %v9059_v54 }
 0x2e9   : > { %v9357_v48 = vpop.permute.xlu1 %3857 }
 0x2ea   : > { %11826 = vst [vmem:[#allocation49_spill] sm:$0xff] %v9357_v48  ;;  %v7087_v18 = vcvt.f32.s32 %v7086_v50 }
 0x2eb   : > { %v4260_v12 = vpop.permute.xlu0 %4259 }
 0x2ec   : > { %v4284_v31 = vadd.s32 %v4260_v12, %v4236_v3  ;;  %7125 = vset.pattern.permute.xlu1 %v11801_v52 }
 0x2ed   : > { %v9360_v6 = vpop.permute.xlu1 %4263 }
 0x2ee   : > { %vm4300_vm14 = vcmp.lt.s32.totalorder %v4284_v31, 0  ;;  %v4316_v20 = vadd.s32 256, %v4284_v31 }
 0x2ef   : > { %v9362_v58 = vpop.permute.xlu0 %3859 }
 0x2f0   : > { %11827 = vst [vmem:[#allocation50_spill] sm:$0xff] %v9362_v58  ;;  %v4332_v63 = vsel %vm4300_vm14, %v4316_v20, %v4284_v31  ;;  %v3534_v31 = vsub.f32 1.0, %v3502_v2  ;;  %vm3565_vm14 = vcmp.ge.f32.partialorder %v9127_v19, 0.0 }
 0x2f1   : > { %vm4348_vm15 = vcmp.ge.s32.totalorder %v4332_v63, 256  ;;  %v6346_v24 = vadd.s32 4294967040, %v4332_v63  ;;  %v3864_v30 = vpop.permute.xlu1 %3863 }
 0x2f3   : > { %v4258_v15 = vpop.permute.xlu0 %4257  ;;  %v4380_v26 = vsel %vm4348_vm15, %v6346_v24, %v4332_v63  ;;  %vm3581_vm15 = vcmp.le.f32.partialorder %v9127_v19, 15.0 }
 0x2f4   : > { %4412 = vperm.xlu0 %7123, %v4380_v26   ;;  %v4235_v26 = vmul.u32 16, %v7087_v18  ;;  %v3950_v18 = vmul.f32 %v3864_v30, %v3502_v2 }
 0x2f5   : > { %v9364_v43 = vpop.permute.xlu1 %4085 }
 0x2f7   : > { %v4088_v16 = vpop.permute.xlu0 %4087 }
 0x2f8   : > { %7126 = vset.pattern.permute.xlu0 %v11801_v52  ;;  %v4126_v24 = vmul.f32 %v4088_v16, %v3534_v31  ;;  %v4174_v28 = vmul.f32 %v4088_v16, %v3502_v2  ;;  %v3902_v16 = vmul.f32 %v3864_v30, %v3534_v31  ;;  %v7093_v2 = vcvt.f32.s32 %v7092_v42 }
 0x2f9   : > { %v9369_v3 = vpop.permute.xlu1 %4261 }
 0x2fa   : > { %v4238_v42 = vmul.u32 16, %v7093_v2 }
 0x2fb   : > { %v3784_v12 = vpop.permute.xlu0 %3783 }
 0x2fc   : > { %vm3806_vm9 = vcmp.ne.s32.totalorder %v3784_v12, 0  ;;  %v4283_v12 = vadd.s32 %v4258_v15, %v4235_v26 }
 0x2fd   : > { %v9373_v20 = vpop.permute.xlu1 %4267  ;;  %vm9401_vm12 = vmand %vm9377_vm4, %vm3806_vm9 }
 0x2fe   : > { %vm9415_vm1 = vmand %vm9384_vm7, %vm3806_vm9  ;;  %v4315_v15 = vadd.s32 256, %v4283_v12  ;;  %vm3568_vm9 = vcmp.ge.f32.partialorder %v9136_v9, 0.0 }
 0x2ff   : > { %v4008_v63 = vpop.permute.xlu0 %4007 }
 0x300   : > { %vm4030_vm5 = vcmp.ne.s32.totalorder %v4008_v63, 0  ;;  %v3501_v63 = vsub.f32 %v9115_v44, %v9127_v19  ;;  %v3918_v19 = vsel %vm9401_vm12, %v3902_v16, 0.0  ;;  %vm3632_vm12 = vcmp.le.f32.partialorder %v9136_v9, 14.0 }
 0x301   : > { %vm4046_vm6 = vmand %vm9377_vm4, %vm4030_vm5  ;;  %v9388_v48 = vpop.permute.xlu1 %4089 }
 0x302   : > { %v4142_v0 = vsel %vm4046_vm6, %v4126_v24, 0.0  ;;  %vm4158_vm8 = vmand %vm9384_vm7, %vm4030_vm5  ;;  %v3533_v44 = vsub.f32 1.0, %v3501_v63  ;;  %v3966_v24 = vsel %vm9415_vm1, %v3950_v18, 0.0  ;;  %vm4299_vm7 = vcmp.lt.s32.totalorder %v4283_v12, 0 }
 0x303   : > { %5413 = vperm.xlu1 %7125, %v4142_v0   ;;  %v3782_v1 = vpop.permute.xlu0 %3781  ;;  %v4190_v54 = vsel %vm4158_vm8, %v4174_v28, 0.0  ;;  %v4173_v28 = vmul.f32 %v9364_v43, %v3501_v63  ;;  %vm3597_vm4 = vmand %vm3565_vm14, %vm3581_vm15  ;;  %vm3583_vm1 = vcmp.le.f32.partialorder %v9224_v32, 15.0 }
 0x304   : > { %vm3805_vm2 = vcmp.ne.s32.totalorder %v3782_v1, 0  ;;  %v4125_v30 = vmul.f32 %v9364_v43, %v3533_v44 }
 0x305   : > { %v9394_v47 = vpop.permute.xlu1 %3785  ;;  %vm3821_vm5 = vmand %vm3597_vm4, %vm3805_vm2 }
 0x306   : > { %vm3933_vm8 = vmand %vm9407_vm0, %vm3805_vm2 }
 0x307   : > { %5533 = vperm.xlu1 %7125, %v4190_v54   ;;  %v4006_v0 = vpop.permute.xlu0 %4005 }
 0x308   : > { %vm4029_vm13 = vcmp.ne.s32.totalorder %v4006_v0, 0 }
 0x309   : > { %v9419_v31 = vpop.permute.xlu1 %4009  ;;  %vm4157_vm3 = vmand %vm9407_vm0, %vm4029_vm13  ;;  %vm3567_vm0 = vcmp.ge.f32.partialorder %v9224_v32, 0.0 }
 0x30a   : > { %v4189_v58 = vsel %vm4157_vm3, %v4173_v28, 0.0  ;;  %vm4045_vm6 = vmand %vm3597_vm4, %vm4029_vm13  ;;  %vm3569_vm4 = vcmp.ge.f32.partialorder %v9232_v40, 0.0 }
 0x30b   : > { %5189 = vperm.xlu1 %7125, %v3918_v19   ;;  %v3862_v60 = vpop.permute.xlu0 %3861  ;;  %5528 = vperm.xlu0 %7126, %v4189_v58   ;;  %v4141_v58 = vsel %vm4045_vm6, %v4125_v30, 0.0  ;;  %vm9451_vm13 = vmand %vm3568_vm9, %vm3584_vm10  ;;  %vm4031_vm6 = vcmp.ne.s32.totalorder %v9419_v31, 0  ;;  %v11844_v30 = vmov 1  }
 0x30c   : > { %v3901_v57 = vmul.f32 %v3862_v60, %v3533_v44  ;;  %v3949_v28 = vmul.f32 %v3862_v60, %v3501_v63  ;;  %v3536_v60 = vsub.f32 1.0, %v3504_v34  ;;  %v4286_v44 = vadd.s32 %v9360_v6, %v4238_v42  ;;  %vm9463_vm3 = vmand %vm3616_vm11, %vm3632_vm12 }
 0x30d   : > { %v9428_v59 = vpop.permute.xlu1 %3865 }
 0x30e   : > { %v3917_v16 = vsel %vm3821_vm5, %v3901_v57, 0.0  ;;  %v4331_v57 = vsel %vm4299_vm7, %v4315_v15, %v4283_v12  ;;  %v3965_v63 = vsel %vm3933_vm8, %v3949_v28, 0.0  ;;  %vm3585_vm5 = vcmp.le.f32.partialorder %v9232_v40, 15.0  ;;  %vm9486_vm8 = vmand %vm3567_vm0, %vm3583_vm1 }
 0x30f   : > { %5293 = vperm.xlu1 %7125, %v3966_v24   ;;  %v4092_v19 = vpop.permute.xlu0 %4091  ;;  %5184 = vperm.xlu0 %7126, %v3917_v16   ;;  %v6345_v0 = vadd.s32 4294967040, %v4331_v57  ;;  %vm4347_vm15 = vcmp.ge.s32.totalorder %v4331_v57, 256  ;;  %v7091_v24 = vcvt.f32.s32 %v7090_v37  ;;  %v3503_v16 = vsub.f32 %v9209_v13, %v9224_v32  ;;  %vm9496_vm11 = vmand %vm3569_vm4, %vm3585_vm5 }
 0x310   : > { %v4128_v50 = vmul.f32 %v4092_v19, %v3536_v60  ;;  %v4318_v28 = vadd.s32 256, %v4286_v44  ;;  %vm4302_vm10 = vcmp.lt.s32.totalorder %v4286_v44, 0  ;;  %vm9504_vm12 = vmand %vm9486_vm8, %vm4031_vm6  ;;  %vm3631_vm1 = vcmp.le.f32.partialorder %v9224_v32, 14.0 }
 0x311   : > { %v9434_v26 = vpop.permute.xlu1 %4271  ;;  %v4379_v2 = vsel %vm4347_vm15, %v6345_v0, %v4331_v57  ;;  %v4237_v0 = vmul.u32 16, %v7091_v24  ;;  %v7094_v24 = vtrunc.f32 %v9156_v7 }
 0x312   : > { %v4334_v18 = vsel %vm4302_vm10, %v4318_v28, %v4286_v44  ;;  %vm3570_vm10 = vcmp.ge.f32.partialorder %v9182_v62, 0.0 }
 0x313   : > { %5408 = vperm.xlu1 %7125, %v4141_v58   ;;  %v9438_v54 = vpop.permute.xlu0 %3787  ;;  %v4176_v58 = vmul.f32 %v4092_v19, %v3504_v34  ;;  %v4285_v7 = vadd.s32 %v9369_v3, %v4237_v0  ;;  %v7095_v9 = vcvt.f32.s32 %v7094_v24  ;;  %v7096_v3 = vtrunc.f32 %v9187_v25 }
 0x314   : > { %vm3808_vm9 = vcmp.ne.s32.totalorder %v9438_v54, 0  ;;  %v7098_v0 = vtrunc.f32 %v9205_v23  ;;  %v4175_v24 = vmul.f32 %v9388_v48, %v3503_v16  ;;  %v9568_v25 = vsub.f32 %v9170_v4, %v9182_v62 }
 0x315   : > { %v9445_v43 = vpop.permute.xlu1 %4093 }
 0x316   : > { %v10085_v57 = vmul.f32 %v9445_v43, %v9459_v39 }
 0x317   : > { %5288 = vperm.xlu1 %7125, %v3965_v63   ;;  %v4012_v1 = vpop.permute.xlu0 %4011  ;;  %v3537_v63 = vsub.f32 1.0, %v9459_v39 }
 0x318   : > { %vm4032_vm14 = vcmp.ne.s32.totalorder %v4012_v1, 0 }
 0x319   : > { %vm4048_vm2 = vmand %vm9451_vm13, %vm4032_vm14  ;;  %v9469_v6 = vpop.permute.xlu1 %3789 }
 0x31a   : > { %v4144_v12 = vsel %vm4048_vm2, %v4128_v50, 0.0  ;;  %vm9476_vm7 = vmand %vm9463_vm3, %vm4032_vm14  ;;  %v9515_v50 = vmul.f32 %v9445_v43, %v3537_v63 }
 0x31b   : > { %7127 = vset.pattern.permute.xlu1 %v11844_v30  ;;  %5423 = vperm.xlu0 %7126, %v4144_v12   ;;  %v3868_v15 = vpop.permute.xlu0 %3867  ;;  %v4192_v1 = vsel %vm9476_vm7, %v4176_v58, 0.0  ;;  %vm3824_vm14 = vmand %vm9451_vm13, %vm3808_vm9  ;;  %vm3615_vm13 = vcmp.ge.f32.partialorder %v9224_v32, -1.0  ;;  %v6348_v32 = vadd.s32 4294967040, %v4334_v18  ;;  %vm3807_vm7 = vcmp.ne.s32.totalorder %v9394_v47, 0 }
 0x31c   : > { %v3904_v42 = vmul.f32 %v3868_v15, %v3536_v60  ;;  %4409 = vperm.xlu1 %7127, %v4379_v2   ;;  %v3952_v37 = vmul.f32 %v3868_v15, %v3504_v34  ;;  %11851 = vst [vmem:[#allocation51_spill] sm:$0xff] %v9515_v50  ;;  %v3535_v2 = vsub.f32 1.0, %v3503_v16  ;;  %v11852_v34 = vmov 0  ;;  %vm3936_vm2 = vmand %vm9463_vm3, %vm3808_vm9 }
 0x31d   : > { %v9508_v60 = vpop.permute.xlu1 %4013  ;;  %vm9548_vm4 = vmand %vm3615_vm13, %vm3631_vm1  ;;  %vm4350_vm3 = vcmp.ge.s32.totalorder %v4334_v18, 256  ;;  %vm4301_vm9 = vcmp.lt.s32.totalorder %v4285_v7, 0 }
 0x31e   : > { %vm4033_vm15 = vcmp.ne.s32.totalorder %v9508_v60, 0  ;;  %v3920_v41 = vsel %vm3824_vm14, %v3904_v42, 0.0  ;;  %v4127_v58 = vmul.f32 %v9388_v48, %v3535_v2  ;;  %v3968_v44 = vsel %vm3936_vm2, %v3952_v37, 0.0  ;;  %vm9559_vm5 = vmand %vm9548_vm4, %vm4031_vm6 }
 0x31f   : > { %5543 = vperm.xlu0 %7126, %v4192_v1   ;;  %v4266_v12 = vpop.permute.xlu0 %4265  ;;  %vm9526_vm0 = vmand %vm9496_vm11, %vm4033_vm15  ;;  %v3903_v31 = vmul.f32 %v9428_v59, %v3535_v2  ;;  %v4382_v23 = vsel %vm4350_vm3, %v6348_v32, %v4334_v18  ;;  %v4191_v48 = vsel %vm9559_vm5, %v4175_v24, 0.0  ;;  %v3538_v18 = vsub.f32 1.0, %v9568_v25  ;;  %v9630_v24 = vpop.f32.mrf.mxu1 }
 0x320   : > { %v11853_v34 = vsel %vm9526_vm0, 4294967295, %v11852_v34  ;;  %7128 = vset.pattern.permute.xlu1 %v11801_v52  ;;  %v4143_v1 = vsel %vm9504_vm12, %v4127_v58, 0.0  ;;  %v3951_v58 = vmul.f32 %v9428_v59, %v3503_v16  ;;  %vm9581_vm6 = vmand %vm9486_vm8, %vm3807_vm7  ;;  %v7100_v59 = vtrunc.f32 %v9243_v51 }
 0x321   : > { %11854 = vst [vmem:[#allocation52_spill] sm:$0xff] %v11853_v34  ;;  %5199 = vperm.xlu1 %7128, %v3920_v41   ;;  %v9544_v42 = vpop.permute.xlu1 %4269  ;;  %v4317_v41 = vadd.s32 256, %v4285_v7  ;;  %vm3586_vm12 = vcmp.le.f32.partialorder %v9182_v62, 15.0  ;;  %v7097_v16 = vcvt.f32.s32 %v7096_v3  ;;  %vm9592_vm14 = vmand %vm9548_vm4, %vm3807_vm7  ;;  %v3919_v3 = vsel %vm9581_vm6, %v3903_v31, 0.0  ;;  %v9647_v15 = vpop.f32.mrf.mxu1 }
 0x322   : > { %v3967_v47 = vsel %vm9592_vm14, %v3951_v58, 0.0  ;;  %vm3809_vm8 = vcmp.ne.s32.totalorder %v9469_v6, 0  ;;  %vm9616_vm13 = vmand %vm3570_vm10, %vm3586_vm12  ;;  %vm3617_vm3 = vcmp.ge.f32.partialorder %v9232_v40, -1.0  ;;  %vm3633_vm5 = vcmp.le.f32.partialorder %v9232_v40, 14.0 }
 0x323   : > { %5303 = vperm.xlu0 %7126, %v3968_v44   ;;  %v9546_v28 = vpop.permute.xlu0 %4095  ;;  %v4333_v51 = vsel %vm4301_vm9, %v4317_v41, %v4285_v7  ;;  %v4240_v31 = vmul.u32 16, %v7097_v16  ;;  %vm3825_vm7 = vmand %vm9496_vm11, %vm3809_vm8  ;;  %vm3618_vm12 = vcmp.ge.f32.partialorder %v9182_v62, -1.0 }
 0x324   : > { %v9610_v54 = vmul.f32 %v9546_v28, %v3538_v18  ;;  %v6347_v41 = vadd.s32 4294967040, %v4333_v51  ;;  %vm4349_vm4 = vcmp.ge.s32.totalorder %v4333_v51, 256  ;;  %vm9651_vm11 = vmand %vm3617_vm3, %vm3633_vm5 }
 0x325   : > { %5418 = vperm.xlu1 %7128, %v4143_v1   ;;  %v3870_v19 = vpop.permute.xlu1 %3869  ;;  %v4239_v1 = vmul.u32 16, %v7095_v9  ;;  %v7099_v9 = vcvt.f32.s32 %v7098_v0  ;;  %v7101_v0 = vcvt.f32.s32 %v7100_v59  ;;  %v4288_v59 = vadd.s32 %v9373_v20, %v4240_v31  ;;  %vm3937_vm10 = vmand %vm9651_vm11, %vm3809_vm8 }
 0x326   : > { %11864 = vst [vmem:[#allocation54_spill] sm:$0xff] %v9610_v54  ;;  %v3953_v16 = vmul.f32 %v3870_v19, %v9459_v39 }
 0x327   : > { %7129 = vset.pattern.permute.xlu0 %v11844_v30  ;;  %v9573_v44 = vpop.permute.xlu0 %3791  ;;  %v4287_v13 = vadd.s32 %v4266_v12, %v4239_v1  ;;  %v3905_v12 = vmul.f32 %v3870_v19, %v3537_v63  ;;  %v11867_v63 = vmov 0  ;;  %v4381_v1 = vsel %vm4349_vm4, %v6347_v41, %v4333_v51 }
 0x328   : > { %5130 = vperm.xlu0 %7129, %v4382_v23   ;;  %vm3810_vm6 = vcmp.ne.s32.totalorder %v9573_v44, 0  ;;  %v4320_v51 = vadd.s32 256, %v4288_v59  ;;  %vm4304_vm14 = vcmp.lt.s32.totalorder %v4288_v59, 0  ;;  %vm3634_vm4 = vcmp.le.f32.partialorder %v9182_v62, 14.0 }
 0x329   : > { %5538 = vperm.xlu1 %7128, %v4191_v48   ;;  %v9597_v32 = vpop.permute.xlu1 %4097  ;;  %v4319_v58 = vadd.s32 256, %v4287_v13  ;;  %v4241_v48 = vmul.u32 16, %v7099_v9  ;;  %vm4303_vm9 = vcmp.lt.s32.totalorder %v4287_v13, 0  ;;  %v3921_v2 = vsel %vm3825_vm7, %v3905_v12, 0.0  ;;  %vm3826_vm3 = vmand %vm9616_vm13, %vm3810_vm6 }
 0x32a   : > { %11863 = vst [vmem:[#allocation53_spill] sm:$0xff] %v9597_v32 }
 0x32b   : > { %v9600_v37 = vpop.permute.xlu0 %4015  ;;  %v4289_v20 = vadd.s32 %v9544_v42, %v4241_v48  ;;  %v4335_v9 = vsel %vm4303_vm9, %v4319_v58, %v4287_v13  ;;  %v7104_v13 = vtrunc.f32 %v9284_v11 }
 0x32c   : > { %vm4034_vm1 = vcmp.ne.s32.totalorder %v9600_v37, 0  ;;  %7130 = vset.pattern.permute.xlu0 %v11801_v52  ;;  %v6349_v6 = vadd.s32 4294967040, %v4335_v9  ;;  %vm4351_vm8 = vcmp.ge.s32.totalorder %v4335_v9, 256 }
 0x32d   : > { %vm9626_vm2 = vmand %vm9616_vm13, %vm4034_vm1  ;;  %5194 = vperm.xlu0 %7130, %v3919_v3   ;;  %5298 = vperm.xlu1 %7128, %v3967_v47   ;;  %v9632_v23 = vpop.permute.xlu1 %3793  ;;  %v7102_v3 = vtrunc.f32 %v9256_v14  ;;  %v4242_v47 = vmul.u32 16, %v7101_v0  ;;  %v3969_v0 = vsel %vm3937_vm10, %v3953_v16, 0.0  ;;  %v4321_v41 = vadd.s32 256, %v4289_v20 }
 0x32e   : > { %v11868_v63 = vsel %vm9626_vm2, 4294967295, %v11867_v63  ;;  %11870 = vst [vmem:[#allocation56_spill] sm:$0xff] %v9632_v23  ;;  %vm4305_vm5 = vcmp.lt.s32.totalorder %v4289_v20, 0  ;;  %vm9682_vm13 = vmand %vm3618_vm12, %vm3634_vm4  ;;  %v4383_v16 = vsel %vm4351_vm8, %v6349_v6, %v4335_v9  ;;  %v7105_v62 = vcvt.f32.s32 %v7104_v13 }
 0x32f   : > { %11869 = vst [vmem:[#allocation55_spill] sm:$0xff] %v11868_v63  ;;  %v3872_v4 = vpop.permute.xlu0 %3871  ;;  %v4290_v42 = vadd.s32 %v9434_v26, %v4242_v47  ;;  %v7103_v12 = vcvt.f32.s32 %v7102_v3  ;;  %vm3938_vm9 = vmand %vm9682_vm13, %vm3810_vm6  ;;  %v4337_v47 = vsel %vm4305_vm5, %v4321_v41, %v4289_v20 }
 0x330   : > { %v3906_v14 = vmul.f32 %v3872_v4, %v3538_v18  ;;  %v6926_v18 = vpop.f32.mrf.mxu1  ;;  %v3954_v31 = vmul.f32 %v3872_v4, %v9568_v25  ;;  %v4336_v4 = vsel %vm4304_vm14, %v4320_v51, %v4288_v59  ;;  %v6351_v44 = vadd.s32 4294967040, %v4337_v47 }
 0x331   : > { %7131 = vset.pattern.permute.xlu0 %v11844_v30  ;;  %5204 = vperm.xlu1 %7128, %v3921_v2   ;;  %v9657_v19 = vpop.permute.xlu1 %4017  ;;  %v4322_v48 = vadd.s32 256, %v4290_v42  ;;  %v4243_v7 = vmul.u32 16, %v7103_v12  ;;  %vm4306_vm7 = vcmp.lt.s32.totalorder %v4290_v42, 0  ;;  %v6350_v59 = vadd.s32 4294967040, %v4336_v4 }
 0x332   : > { %11873 = vst [vmem:[#allocation57_spill] sm:$0xff] %v9657_v19  ;;  %5127 = vperm.xlu0 %7131, %v4381_v1   ;;  %v3922_v26 = vsel %vm3826_vm3, %v3906_v14, 0.0  ;;  %v3970_v3 = vsel %vm3938_vm9, %v3954_v31, 0.0  ;;  %v2116_v14 = vpop.f32.mrf.mxu1  ;;  %vm4352_vm10 = vcmp.ge.s32.totalorder %v4336_v4, 256  ;;  %v4244_v9 = vmul.u32 16, %v7105_v62 }
 0x333   : > { %v9665_v40 = vpop.permute.xlu0 %4099  ;;  %v4338_v51 = vsel %vm4306_vm7, %v4322_v48, %v4290_v42  ;;  %vm4353_vm6 = vcmp.ge.s32.totalorder %v4337_v47, 256  ;;  %v4384_v13 = vsel %vm4352_vm10, %v6350_v59, %v4336_v4 }
 0x334   : > { %11874 = vst [vmem:[#allocation58_spill] sm:$0xff] %v9665_v40  ;;  %v6929_v6 = vpop.f32.mrf.mxu1  ;;  %v6352_v41 = vadd.s32 4294967040, %v4338_v51  ;;  %vm4354_vm14 = vcmp.ge.s32.totalorder %v4338_v51, 256 }
 0x335   : > { %5308 = vperm.xlu1 %7128, %v3969_v0   ;;  %v4274_v58 = vpop.permute.xlu1 %4273 }
 0x336   : > { %7132 = vset.pattern.permute.xlu0 %v11801_v52  ;;  %v4291_v2 = vadd.s32 %v4274_v58, %v4243_v7  ;;  %v2129_v48 = vpop.f32.mrf.mxu1  ;;  %v4386_v7 = vsel %vm4354_vm14, %v6352_v41, %v4338_v51 }
 0x337   : > { %5209 = vperm.xlu0 %7132, %v3922_v26   ;;  %v9676_v1 = vpop.permute.xlu0 %3795  ;;  %v4385_v26 = vsel %vm4353_vm6, %v6351_v44, %v4337_v47 }
 0x338   : > { %11875 = vst [vmem:[#allocation59_spill] sm:$0xff] %v9676_v1  ;;  %v4323_v0 = vadd.s32 256, %v4291_v2  ;;  %vm4307_vm12 = vcmp.lt.s32.totalorder %v4291_v2, 0 }
 0x339   : > { %7134 = vset.pattern.permute.xlu1 %v11844_v30  ;;  %v9718_v41 = vpop.permute.xlu1 %3873 }
 0x33a   : > { %5133 = vperm.xlu1 %7134, %v4383_v16   ;;  %v4339_v58 = vsel %vm4307_vm12, %v4323_v0, %v4291_v2  ;;  %11879 = vst [vmem:[#allocation61_spill] sm:$0xff] %v9718_v41  ;;  %vm2176_vm12 = vcmask 1048064  }
 0x33b   : > { %5313 = vperm.xlu0 %7132, %v3970_v3   ;;  %v9693_v12 = vpop.permute.xlu0 %4019  ;;  %v6353_v16 = vadd.s32 4294967040, %v4339_v58  ;;  %vm4355_vm3 = vcmp.ge.s32.totalorder %v4339_v58, 256 }
 0x33c   : > { %11878 = vst [vmem:[#allocation60_spill] sm:$0xff] %v9693_v12 }
 0x33d   : > { %v4387_v4 = vsel %vm4355_vm3, %v6353_v16, %v4339_v58 }
 0x33e   : > { %2156 = vrot.lane.b32.xlu1 %v9630_v24, %s7726_s25 }
 0x33f   : > { %7133 = vset.pattern.permute.xlu0 %v11844_v30  ;;  %v4276_v20 = vpop.permute.xlu0 %4275  ;;  %v6930_v30 = vpop.f32.mrf.mxu1 }
 0x340   : > { %v4292_v31 = vadd.s32 %v4276_v20, %v4244_v9  ;;  %5136 = vperm.xlu0 %7133, %v4384_v13   ;;  %v2185_v9 = vlaneseq }
 0x341   : > { %v2132_v62 = vpop.f32.mrf.mxu1 }
 0x342   : > { %vm4308_vm4 = vcmp.lt.s32.totalorder %v4292_v31, 0  ;;  %v4324_v42 = vadd.s32 256, %v4292_v31  ;;  %5139 = vperm.xlu1 %7134, %v4385_v26   ;;  %v9713_v20 = vand.u32 127, %v2185_v9 }
 0x343   : > { %v6949_v2 = vpop.f32.mrf.mxu1 }
 0x344   : > { %5142 = vperm.xlu0 %7133, %v4386_v7   ;;  %v4340_v24 = vsel %vm4308_vm4, %v4324_v42, %v4292_v31  ;;  %vm2187_vm5 = vcmp.lt.s32.totalorder %v9713_v20, 32 }
 0x345   : > { %v6354_v3 = vadd.s32 4294967040, %v4340_v24  ;;  %vm4356_vm8 = vcmp.ge.s32.totalorder %v4340_v24, 256 }
 0x346   : > { %2158 = vrot.lane.b32.xlu1 %v6926_v18, %s7726_s25  ;;  %v2293_v18 = vpop.f32.mrf.mxu1  ;;  %v9724_v42 = vpop.permute.xlu1 %4391 }
 0x347   : > { %v4388_v47 = vsel %vm4356_vm8, %v6354_v3, %v4340_v24  ;;  %11880 = vst [vmem:[#allocation62_spill] sm:$0xff] %v9724_v42 }
 0x348   : > { %2152 = vrot.lane.b32.xlu0 %v9647_v15, %s7726_s25  ;;  %v6950_v15 = vpop.f32.mrf.mxu1 }
 0x34a   : > { %5145 = vperm.xlu1 %7134, %v4387_v4   ;;  %v2296_v59 = vpop.f32.mrf.mxu1 }
 0x34c   : > { %5148 = vperm.xlu0 %7133, %v4388_v47   ;;  %v6953_v51 = vpop.f32.mrf.mxu1 }
 0x34e   : > { %2154 = vrot.lane.b32.xlu1 %v2116_v14, %s7726_s25  ;;  %v2309_v44 = vpop.f32.mrf.mxu1 }
 0x34f   : > { %7195 = vset.pattern.permute.xlu1 %v11801_v52 }
 0x350   : > { %2164 = vrot.lane.b32.xlu0 %v6929_v6, %s7726_s25  ;;  %v6954_v0 = vpop.f32.mrf.mxu1  ;;  %v9711_v6 = vld [vmem:[%s11553_s8] ss:$0 sm:$0xff] }
 0x351   : > { %7196 = vset.pattern.permute.xlu0 %v11801_v52  ;;  %v9716_v13 = vadd.f32 %v6949_v2, %v9711_v6  ;;  %v9722_v26 = vadd.f32 %v9711_v6, %v2293_v18  ;;  %v9732_v7 = vadd.f32 %v9711_v6, %v2296_v59  ;;  %v9735_v16 = vadd.f32 %v6950_v15, %v9711_v6 }
 0x352   : > { %2166 = vrot.lane.b32.xlu1 %v6930_v30, %s7726_s25  ;;  %v2312_v14 = vpop.f32.mrf.mxu1  ;;  %v9737_v30 = vpop.permute.xlu1 %4397  ;;  %v9751_v18 = vadd.f32 %v6953_v51, %v9711_v6 }
 0x353   : > { %v2358_v58 = vsel %vm2187_vm5, %v9716_v13, 0.0  ;;  %11882 = vst [vmem:[#allocation64_spill] sm:$0xff] %v9737_v30  ;;  %v2356_v3 = vsel %vm2187_vm5, %v9722_v26, 0.0  ;;  %v2357_v2 = vsel %vm2187_vm5, %v9732_v7, 0.0  ;;  %v2359_v59 = vsel %vm2187_vm5, %v9735_v16, 0.0 }
 0x354   : > { %2160 = vrot.lane.b32.xlu0 %v2129_v48, %s7726_s25  ;;  %v6957_v52 = vpop.f32.mrf.mxu1  ;;  %v9729_v48 = vpop.permute.xlu0 %3875  ;;  %v9759_v9 = vadd.f32 %v9711_v6, %v2312_v14 }
 0x355   : > { %11881 = vst [vmem:[#allocation63_spill] sm:$0xff] %v9729_v48 }
 0x356   : > { %2162 = vrot.lane.b32.xlu1 %v2132_v62, %s7726_s25  ;;  %v2325_v31 = vpop.f32.mrf.mxu1  ;;  %v9745_v62 = vadd.f32 %v6954_v0, %v9711_v6 }
 0x358   : > { %v6958_v24 = vpop.f32.mrf.mxu1  ;;  %v9742_v4 = vpop.permute.xlu0 %4394 }
 0x359   : > { %11883 = vst [vmem:[#allocation65_spill] sm:$0xff] %v9742_v4  ;;  %v9775_v14 = vadd.f32 %v6958_v24, %v9711_v6 }
 0x35a   : > { %v2328_v47 = vpop.f32.mrf.mxu1 }
 0x35b   : > { %v9791_v24 = vadd.f32 %v9711_v6, %v2328_v47 }
 0x35c   : > { %v6961_v0 = vpop.f32.mrf.mxu1  ;;  %v9767_v51 = vpop.permute.xlu0 %4400 }
 0x35d   : > { %11885 = vst [vmem:[#allocation67_spill] sm:$0xff] %v9767_v51  ;;  %v2367_v51 = vsel %vm2187_vm5, %v9775_v14, 0.0 }
 0x35e   : > { %v2341_v46 = vpop.f32.mrf.mxu1 }
 0x360   : > { %v6962_v49 = vpop.f32.mrf.mxu1 }
 0x361   : > { %v9807_v47 = vadd.f32 %v6962_v49, %v9711_v6 }
 0x362   : > { %v2344_v42 = vpop.f32.mrf.mxu1 }
 0x363   : > { %v9753_v15 = vpop.permute.xlu1 %4403  ;;  %v9823_v49 = vadd.f32 %v9711_v6, %v2344_v42 }
 0x364   : > { %11884 = vst [vmem:[#allocation66_spill] sm:$0xff] %v9753_v15 }
 0x365   : > { %v2369_v42 = vsel %vm2187_vm5, %v9823_v49, 0.0 }
 0x373   : > { %2376 = vadd.xlane.f32.xlu0 %v2358_v58  ;;  %v2363_v58 = vsel %vm2187_vm5, %v9745_v62, 0.0 }
 0x377   : > { %2372 = vadd.xlane.f32.xlu0 %v2356_v3  ;;  %v9765_v3 = vadd.f32 %v9711_v6, %v2309_v44  ;;  %v9781_v44 = vadd.f32 %v6957_v52, %v9711_v6  ;;  %v9797_v52 = vadd.f32 %v9711_v6, %v2325_v31  ;;  %v9813_v31 = vadd.f32 %v6961_v0, %v9711_v6 }
 0x378   : > { %v9829_v0 = vadd.f32 %v9711_v6, %v2341_v46 }
 0x37a   : > { %2374 = vadd.xlane.f32.xlu1 %v2357_v2  ;;  %v2362_v2 = vsel %vm2187_vm5, %v9751_v18, 0.0  ;;  %v2368_v46 = vsel %vm2187_vm5, %v9829_v0, 0.0 }
 0x37b   : > { %2378 = vadd.xlane.f32.xlu0 %v2359_v59  ;;  %v2361_v59 = vsel %vm2187_vm5, %v9759_v9, 0.0 }
 0x37e   : > { %v9769_v15 = vpop.permute.xlu1 %5413  ;;  %2386 = vadd.xlane.f32.xlu1 %v2363_v58  ;;  %v2360_v58 = vsel %vm2187_vm5, %v9765_v3, 0.0 }
 0x37f   : > { %2384 = vadd.xlane.f32.xlu0 %v2362_v2  ;;  %v9788_v2 = vpop.permute.xlu0 %4406 }
 0x380   : > { %11886 = vst [vmem:[#allocation68_spill] sm:$0xff] %v9788_v2  ;;  %v2365_v2 = vsel %vm2187_vm5, %v9791_v24, 0.0 }
 0x382   : > { %v9783_v30 = vpop.permute.xlu1 %5533  ;;  %2382 = vadd.xlane.f32.xlu1 %v2361_v59  ;;  %v2366_v59 = vsel %vm2187_vm5, %v9781_v44, 0.0 }
 0x383   : > { %2380 = vadd.xlane.f32.xlu0 %v2360_v58  ;;  %v9804_v58 = vpop.permute.xlu0 %4412 }
 0x384   : > { %11887 = vst [vmem:[#allocation69_spill] sm:$0xff] %v9804_v58  ;;  %v2371_v58 = vsel %vm2187_vm5, %v9807_v47, 0.0 }
 0x386   : > { %v9799_v53 = vpop.permute.xlu1 %5189  ;;  %2394 = vadd.xlane.f32.xlu1 %v2367_v51  ;;  %v2364_v51 = vsel %vm2187_vm5, %v9797_v52, 0.0 }
 0x387   : > { %2392 = vadd.xlane.f32.xlu0 %v2366_v59  ;;  %v9820_v59 = vpop.permute.xlu0 %5528 }
 0x38a   : > { %v9815_v33 = vpop.permute.xlu1 %5293  ;;  %2390 = vadd.xlane.f32.xlu1 %v2365_v2  ;;  %v2370_v2 = vsel %vm2187_vm5, %v9813_v31, 0.0 }
 0x38b   : > { %2388 = vadd.xlane.f32.xlu0 %v2364_v51  ;;  %v9839_v51 = vpop.permute.xlu0 %5184 }
 0x38e   : > { %v9831_v27 = vpop.permute.xlu1 %5408  ;;  %2402 = vadd.xlane.f32.xlu1 %v2371_v58 }
 0x38f   : > { %2400 = vadd.xlane.f32.xlu0 %v2370_v2 }
 0x392   : > { %v9841_v4 = vpop.permute.xlu1 %5288  ;;  %2398 = vadd.xlane.f32.xlu1 %v2369_v42 }
 0x393   : > { %2396 = vadd.xlane.f32.xlu0 %v2368_v46  ;;  %v9866_v46 = vadd.s32 128, %v9713_v20 }
 0x396   : > { %v9846_v6 = vpop.permute.xlu0 %5423 }
 0x397   : > { %11888 = vst [vmem:[#allocation70_spill] sm:$0xff] %v9846_v6  ;;  %v9848_v58 = vpop.permute.xlu1 %4409 }
 0x398   : > { %11889 = vst [vmem:[#allocation71_spill] sm:$0xff] %v9848_v58 }
 0x39a   : > { %v9850_v2 = vpop.permute.xlu0 %5543 }
 0x39b   : > { %11890 = vst [vmem:[#allocation72_spill] sm:$0xff] %v9850_v2 }
 0x39c   : > { %v9852_v5 = vpop.permute.xlu1 %5199 }
 0x39e   : > { %v9854_v36 = vpop.permute.xlu0 %5303 }
 0x39f   : > { %11891 = vst [vmem:[#allocation73_spill] sm:$0xff] %v9854_v36 }
 0x3a0   : > { %v9856_v61 = vpop.permute.xlu1 %5418 }
 0x3a1   : > { %11892 = vst [vmem:[#allocation74_spill] sm:$0xff] %v9856_v61 }
 0x3a3   : > { %v5131_v29 = vpop.permute.xlu0 %5130 }
 0x3a4   : > { %v9858_v45 = vpop.permute.xlu1 %5538  ;;  %vm5152_vm7 = vcmp.eq.s32.totalorder %v9713_v20, %v5131_v29  ;;  %vm5153_vm9 = vcmp.eq.s32.totalorder %v9866_v46, %v5131_v29 }
 0x3a5   : > { %11893 = vst [vmem:[#allocation75_spill] sm:$0xff] %v9858_v45  ;;  %v9875_v38 = vsel %vm5152_vm7, 1.0, %v11669_v56  ;;  %v9878_v21 = vsel %vm5153_vm9, 1.0, %v11669_v56  ;;  %vm10063_vm7 = vmand %vm9651_vm11, %vm4033_vm15  ;;  %vm4534_vm15 = vcmp.lt.s32.totalorder %v9713_v20, 1 }
 0x3a6   : > { %vm10077_vm9 = vmand %vm9682_vm13, %vm4034_vm1  ;;  %vm11697_vm1 = vcmp.lt.s32.totalorder %v9713_v20, 16 }
 0x3a8   : > { %v9860_v42 = vpop.permute.xlu1 %5298  ;;  %v9862_v35 = vpop.permute.xlu0 %5194 }
 0x3ac   : > { %v9870_v58 = vpop.permute.xlu1 %5204 }
 0x3ad   : > { %11894 = vst [vmem:[#allocation76_spill] sm:$0xff] %v9870_v58  ;;  %v5128_v55 = vpop.permute.xlu0 %5127 }
 0x3ae   : > { %vm5150_vm10 = vcmp.eq.s32.totalorder %v9713_v20, %v5128_v55  ;;  %vm5151_vm6 = vcmp.eq.s32.totalorder %v9866_v46, %v5128_v55 }
 0x3af   : > { %v9881_v40 = vsel %vm5150_vm10, 1.0, %v11669_v56  ;;  %v9884_v29 = vsel %vm5151_vm6, 1.0, %v11669_v56  ;;  %vm11696_vm6 = vcmp.lt.s32.totalorder %v9713_v20, 17 }
 0x3b0   : > { %v9886_v58 = vpop.permute.xlu1 %5308  ;;  %v7150_v32 = vpack.i.bf16 %v9878_v21, %v9884_v29  ;;  %v7135_v55 = vpack.i.bf16 %v9875_v38, %v9881_v40 }
 0x3b1   : > { %11895 = vst [vmem:[#allocation77_spill] sm:$0xff] %v9886_v58 }
 0x3b2   : > { %7151 = vrot.lane.b32.xlu0 %v7150_v32, %s7728_s22  ;;  %7136 = vrot.lane.b32.xlu1 %v7135_v55, %s7724_s26  ;;  %v9894_v12 = vpop.permute.xlu0 %5209 }
 0x3b3   : > { %11896 = vst [vmem:[#allocation78_spill] sm:$0xff] %v9894_v12 }
 0x3b5   : > { %v5134_v19 = vpop.permute.xlu1 %5133 }
 0x3b6   : > { %7161 = vrot.lane.b32.xlu0 %v7150_v32, %s7729_s0  ;;  %7141 = vrot.lane.b32.xlu1 %v7150_v32, %s7724_s26  ;;  %v9898_v56 = vpop.permute.xlu0 %5313  ;;  %vm5155_vm14 = vcmp.eq.s32.totalorder %v9866_v46, %v5134_v19  ;;  %vm5154_vm4 = vcmp.eq.s32.totalorder %v9713_v20, %v5134_v19  ;;  %v11898_v32 = vmov 0.0  }
 0x3b7   : > { %11897 = vst [vmem:[#allocation79_spill] sm:$0xff] %v9898_v56  ;;  %v9921_v1 = vsel %vm5155_vm14, 1.0, %v11898_v32  ;;  %v9925_v19 = vsel %vm5154_vm4, 1.0, %v11898_v32  ;;  %vm3587_vm14 = vcmp.le.f32.partialorder %v9280_v22, 15.0  ;;  %vm3572_vm4 = vcmp.ge.f32.partialorder %v9310_v17, 0.0 }
 0x3b9   : > { %v2157_v58 = vpop.permute.xlu1 %2156 }
 0x3ba   : > { %2179 = vst.msk [vmem:[%s9903_s20 + $0x10] sm:$0xff] %vm2176_vm12, %v2157_v58  ;;  %7146 = vrot.lane.b32.xlu1 %v7135_v55, %s7728_s22 }
 0x3bb   : > { %v5137_v12 = vpop.permute.xlu0 %5136 }
 0x3bc   : > { %vm5156_vm3 = vcmp.eq.s32.totalorder %v9713_v20, %v5137_v12  ;;  %vm5157_vm8 = vcmp.eq.s32.totalorder %v9866_v46, %v5137_v12 }
 0x3bd   : > { %v9913_v56 = vsel %vm5156_vm3, 1.0, %v11898_v32  ;;  %v9916_v48 = vsel %vm5157_vm8, 1.0, %v11898_v32  ;;  %v9918_v58 = vpop.permute.xlu1 %5139 }
 0x3be   : > { %7156 = vrot.lane.b32.xlu1 %v7135_v55, %s7729_s0  ;;  %v7170_v12 = vpack.i.bf16 %v9916_v48, %v9921_v1  ;;  %v7165_v23 = vpack.i.bf16 %v9913_v56, %v9925_v19  ;;  %vm5158_vm11 = vcmp.eq.s32.totalorder %v9713_v20, %v9918_v58 }
 0x3bf   : > { %v9927_v41 = vpop.permute.xlu0 %5142 }
 0x3c0   : > { %7171 = vrot.lane.b32.xlu0 %v7170_v12, %s7724_s26  ;;  %vm5160_vm13 = vcmp.eq.s32.totalorder %v9713_v20, %v9927_v41  ;;  %vm5161_vm10 = vcmp.eq.s32.totalorder %v9866_v46, %v9927_v41 }
 0x3c1   : > { %v2159_v45 = vpop.permute.xlu1 %2158 }
 0x3c2   : > { %2180 = vst.msk [vmem:[%s9903_s20 + $0x18] sm:$0xff] %vm2176_vm12, %v2159_v45  ;;  %7166 = vrot.lane.b32.xlu1 %v7165_v23, %s7724_s26 }
 0x3c3   : > { %v2153_v55 = vpop.permute.xlu0 %2152 }
 0x3c4   : > { %2177 = vst.msk [vmem:[%s9903_s20] sm:$0xff] %vm2176_vm12, %v2153_v55  ;;  %7181 = vrot.lane.b32.xlu0 %v7170_v12, %s7728_s22 }
 0x3c5   : > { %v9940_v2 = vpop.permute.xlu1 %5145 }
 0x3c6   : > { %11899 = vst [vmem:[#allocation80_spill] sm:$0xff] %v9940_v2  ;;  %7176 = vrot.lane.b32.xlu1 %v7165_v23, %s7728_s22 }
 0x3c7   : > { %v9943_v6 = vpop.permute.xlu0 %5148 }
 0x3c8   : > { %11900 = vst [vmem:[#allocation81_spill] sm:$0xff] %v9943_v6  ;;  %7191 = vrot.lane.b32.xlu0 %v7170_v12, %s7729_s0 }
 0x3c9   : > { %v2155_v61 = vpop.permute.xlu1 %2154 }
 0x3ca   : > { %2178 = vst.msk [vmem:[%s9903_s20 + $0x8] sm:$0xff] %vm2176_vm12, %v2155_v61  ;;  %7186 = vrot.lane.b32.xlu1 %v7165_v23, %s7729_s0 }
 0x3cb   : > { %v2165_v45 = vpop.permute.xlu0 %2164 }
 0x3cc   : > { %2183 = vst.msk [vmem:[%s9903_s20 + $0x30] sm:$0xff] %vm2176_vm12, %v2165_v45 }
 0x3cd   : > { %v2167_v55 = vpop.permute.xlu1 %2166 }
 0x3ce   : > { %2184 = vst.msk [vmem:[%s9903_s20 + $0x38] sm:$0xff] %vm2176_vm12, %v2167_v55 }
 0x3cf   : > { %v2161_v54 = vpop.permute.xlu0 %2160 }
 0x3d0   : > { %2181 = vst.msk [vmem:[%s9903_s20 + $0x20] sm:$0xff] %vm2176_vm12, %v2161_v54 }
 0x3d1   : > { %v2163_v2 = vpop.permute.xlu1 %2162 }
 0x3d2   : > { %2182 = vst.msk [vmem:[%s9903_s20 + $0x28] sm:$0xff] %vm2176_vm12, %v2163_v2  ;;  %vm3571_vm12 = vcmp.ge.f32.partialorder %v9280_v22, 0.0 }
 0x3d3   : > { %vm10278_vm3 = vmand %vm3571_vm12, %vm3587_vm14 }
 0x3fc   : > { %v2377_v6 = vpop.xlane.xlu0 %2376 }
 0x3fd   : > { %v2406_v63 = vmul.f32 0.03125, %v2377_v6 }
 0x3ff   : > { %v2422_v12 = vsub.f32 %v9716_v13, %v2406_v63 }
 0x400   : > { %v2373_v50 = vpop.xlane.xlu0 %2372 }
 0x401   : > { %v2404_v61 = vmul.f32 0.03125, %v2373_v50  ;;  %v9960_v23 = vsel %vm2187_vm5, %v2422_v12, 0.0 }
 0x402   : > { %11901 = vst [vmem:[#allocation82_spill] sm:$0xff] %v9960_v23  ;;  %v2454_v45 = vmul.f32 %v9960_v23, %v9960_v23 }
 0x403   : > { %v2420_v55 = vsub.f32 %v9722_v26, %v2404_v61  ;;  %v2375_v34 = vpop.xlane.xlu1 %2374 }
 0x404   : > { %v2405_v54 = vmul.f32 0.03125, %v2375_v34  ;;  %2472 = vadd.xlane.f32.xlu0 %v2454_v45  ;;  %v2379_v36 = vpop.xlane.xlu0 %2378 }
 0x405   : > { %v2407_v2 = vmul.f32 0.03125, %v2379_v36  ;;  %v9967_v6 = vsel %vm2187_vm5, %v2420_v55, 0.0 }
 0x406   : > { %v2452_v50 = vmul.f32 %v9967_v6, %v9967_v6  ;;  %v2421_v63 = vsub.f32 %v9732_v7, %v2405_v54 }
 0x407   : > { %v2423_v13 = vsub.f32 %v9735_v16, %v2407_v2  ;;  %v2387_v12 = vpop.xlane.xlu1 %2386 }
 0x408   : > { %2468 = vadd.xlane.f32.xlu0 %v2452_v50  ;;  %v2385_v23 = vpop.xlane.xlu0 %2384  ;;  %v2411_v61 = vmul.f32 0.03125, %v2387_v12  ;;  %v9982_v7 = vsel %vm2187_vm5, %v2421_v63, 0.0 }
 0x409   : > { %v2410_v26 = vmul.f32 0.03125, %v2385_v23  ;;  %v9975_v34 = vsel %vm2187_vm5, %v2423_v13, 0.0  ;;  %v2453_v13 = vmul.f32 %v9982_v7, %v9982_v7 }
 0x40a   : > { %v2455_v36 = vmul.f32 %v9975_v34, %v9975_v34  ;;  %v2427_v12 = vsub.f32 %v9745_v62, %v2411_v61 }
 0x40b   : > { %v2426_v45 = vsub.f32 %v9751_v18, %v2410_v26  ;;  %v2383_v55 = vpop.xlane.xlu1 %2382 }
 0x40c   : > { %v2409_v16 = vmul.f32 0.03125, %v2383_v55  ;;  %2474 = vadd.xlane.f32.xlu1 %v2455_v36  ;;  %v2381_v54 = vpop.xlane.xlu0 %2380 }
 0x40d   : > { %v2408_v2 = vmul.f32 0.03125, %v2381_v54  ;;  %v9986_v23 = vsel %vm2187_vm5, %v2426_v45, 0.0 }
 0x40e   : > { %v2425_v50 = vsub.f32 %v9759_v9, %v2409_v16  ;;  %v2458_v18 = vmul.f32 %v9986_v23, %v9986_v23 }
 0x40f   : > { %v2424_v63 = vsub.f32 %v9765_v3, %v2408_v2  ;;  %v2395_v26 = vpop.xlane.xlu1 %2394  ;;  %v10010_v2 = vsel %vm2187_vm5, %v2427_v12, 0.0 }
 0x410   : > { %2470 = vadd.xlane.f32.xlu1 %v2453_v13  ;;  %2480 = vadd.xlane.f32.xlu0 %v2458_v18  ;;  %v2393_v36 = vpop.xlane.xlu0 %2392  ;;  %v9997_v45 = vsel %vm2187_vm5, %v2425_v50, 0.0  ;;  %v2415_v3 = vmul.f32 0.03125, %v2395_v26  ;;  %v2459_v26 = vmul.f32 %v10010_v2, %v10010_v2 }
 0x411   : > { %v2414_v55 = vmul.f32 0.03125, %v2393_v36  ;;  %v2457_v9 = vmul.f32 %v9997_v45, %v9997_v45  ;;  %v10003_v16 = vsel %vm2187_vm5, %v2424_v63, 0.0 }
 0x412   : > { %v2456_v62 = vmul.f32 %v10003_v16, %v10003_v16  ;;  %v2431_v12 = vsub.f32 %v9775_v14, %v2415_v3 }
 0x413   : > { %v2430_v61 = vsub.f32 %v9781_v44, %v2414_v55  ;;  %v2391_v54 = vpop.xlane.xlu1 %2390 }
 0x414   : > { %v2413_v50 = vmul.f32 0.03125, %v2391_v54  ;;  %2478 = vadd.xlane.f32.xlu0 %v2457_v9  ;;  %2476 = vadd.xlane.f32.xlu1 %v2456_v62  ;;  %v2389_v13 = vpop.xlane.xlu0 %2388 }
 0x415   : > { %v2412_v18 = vmul.f32 0.03125, %v2389_v13  ;;  %v10014_v63 = vsel %vm2187_vm5, %v2430_v61, 0.0 }
 0x416   : > { %v2429_v36 = vsub.f32 %v9791_v24, %v2413_v50  ;;  %v2462_v44 = vmul.f32 %v10014_v63, %v10014_v63 }
 0x417   : > { %v2428_v55 = vsub.f32 %v9797_v52, %v2412_v18  ;;  %v2403_v9 = vpop.xlane.xlu1 %2402  ;;  %v10038_v18 = vsel %vm2187_vm5, %v2431_v12, 0.0 }
 0x418   : > { %2482 = vadd.xlane.f32.xlu1 %v2459_v26  ;;  %2488 = vadd.xlane.f32.xlu0 %v2462_v44  ;;  %v2401_v62 = vpop.xlane.xlu0 %2400  ;;  %v10025_v61 = vsel %vm2187_vm5, %v2429_v36, 0.0  ;;  %v2419_v52 = vmul.f32 0.03125, %v2403_v9  ;;  %v2463_v9 = vmul.f32 %v10038_v18, %v10038_v18 }
 0x419   : > { %v2418_v54 = vmul.f32 0.03125, %v2401_v62  ;;  %v2461_v24 = vmul.f32 %v10025_v61, %v10025_v61  ;;  %v10031_v50 = vsel %vm2187_vm5, %v2428_v55, 0.0 }
 0x41a   : > { %v2460_v14 = vmul.f32 %v10031_v50, %v10031_v50  ;;  %v2435_v12 = vsub.f32 %v9807_v47, %v2419_v52  ;;  %v10089_v52 = vmul.f32 %v9546_v28, %v9568_v25  ;;  %v5224_v28 = vmul.f32 %v9799_v53, %v9875_v38 }
 0x41b   : > { %v2434_v3 = vsub.f32 %v9813_v31, %v2418_v54  ;;  %v2399_v13 = vpop.xlane.xlu1 %2398  ;;  %v5225_v25 = vmul.f32 %v9799_v53, %v9878_v21  ;;  %v10124_v38 = vmul.f32 %v9862_v35, %v9925_v19  ;;  %v10128_v21 = vmul.f32 %v9862_v35, %v9921_v1 }
 0x41c   : > { %v2417_v36 = vmul.f32 0.03125, %v2399_v13  ;;  %2486 = vadd.xlane.f32.xlu0 %v2461_v24  ;;  %2484 = vadd.xlane.f32.xlu1 %v2460_v14  ;;  %v2397_v26 = vpop.xlane.xlu0 %2396  ;;  %v10053_v24 = vsub.f32 %v9269_v10, %v9280_v22  ;;  %v10093_v37 = vsel %vm2187_vm5, %v2435_v12, 0.0  ;;  %v10098_v13 = vsub.f32 %v9291_v8, %v9310_v17 }
 0x41d   : > { %v2416_v44 = vmul.f32 0.03125, %v2397_v26  ;;  %v10042_v55 = vsel %vm2187_vm5, %v2434_v3, 0.0  ;;  %11909 = vst [vmem:[#allocation86_spill] sm:$0xff] %v10093_v37  ;;  %v2467_v8 = vmul.f32 %v10093_v37, %v10093_v37  ;;  %v5222_v26 = vmul.f32 %v9839_v51, %v9881_v40 }
 0x41e   : > { %11902 = vst [vmem:[#allocation83_spill] sm:$0xff] %v10042_v55  ;;  %v2433_v62 = vsub.f32 %v9823_v49, %v2417_v36  ;;  %v2466_v31 = vmul.f32 %v10042_v55, %v10042_v55  ;;  %v10137_v19 = vmul.f32 %v9852_v5, %v9913_v56  ;;  %v10141_v35 = vmul.f32 %v9852_v5, %v9916_v48 }
 0x41f   : > { %v2432_v54 = vsub.f32 %v9829_v0, %v2416_v44  ;;  %v5223_v44 = vmul.f32 %v9839_v51, %v9884_v29  ;;  %v10144_v1 = vsel %vm5158_vm11, 1.0, %v11898_v32  ;;  %v11953_v0 = vld [vmem:[#allocation20_spill] sm:$0xff] }
 0x420   : > { %2490 = vadd.xlane.f32.xlu1 %v2463_v9  ;;  %2496 = vadd.xlane.f32.xlu0 %v2466_v31  ;;  %v10057_v14 = vsel %vm2187_vm5, %v2433_v62, 0.0  ;;  %11910 = vst [vmem:[#allocation87_spill] sm:$0xff] %v10144_v1  ;;  %v10147_v9 = vsel %vm5160_vm13, 1.0, %v11898_v32 }
 0x421   : > { %11903 = vst [vmem:[#allocation84_spill] sm:$0xff] %v10057_v14  ;;  %v2465_v47 = vmul.f32 %v10057_v14, %v10057_v14  ;;  %v10071_v10 = vsel %vm2187_vm5, %v2432_v54, 0.0  ;;  %vm5159_vm5 = vcmp.eq.s32.totalorder %v9866_v46, %v9918_v58  ;;  %11911 = vst [vmem:[#allocation88_spill] sm:$0xff] %v10147_v9  ;;  %v10175_v39 = vpack.i.bf16 %v10147_v9, %v10144_v1 }
 0x422   : > { %11906 = vst [vmem:[#allocation85_spill] sm:$0xff] %v10071_v10  ;;  %v2464_v60 = vmul.f32 %v10071_v10, %v10071_v10  ;;  %v10161_v48 = vsel %vm5159_vm5, 1.0, %v11898_v32  ;;  %vm3620_vm5 = vcmp.ge.f32.partialorder %v9310_v17, -1.0 }
 0x424   : > { %v7137_v3 = vpop.permute.xlu1 %7136  ;;  %2494 = vadd.xlane.f32.xlu0 %v2465_v47  ;;  %2492 = vadd.xlane.f32.xlu1 %v2464_v60  ;;  %v7152_v36 = vpop.permute.xlu0 %7151  ;;  %v10167_v47 = vsel %vm5161_vm10, 1.0, %v11898_v32  ;;  %vm3636_vm10 = vcmp.le.f32.partialorder %v9310_v17, 14.0 }
 0x425   : > { %v7139_v40 = vunpack.i.h.bf16 %v7137_v3  ;;  %v7138_v51 = vunpack.i.l.bf16 %v7137_v3  ;;  %v7154_v60 = vunpack.i.h.bf16 %v7152_v36 }
 0x428   : > { %v7142_v53 = vpop.permute.xlu1 %7141  ;;  %2498 = vadd.xlane.f32.xlu1 %v2467_v8  ;;  %v7162_v5 = vpop.permute.xlu0 %7161 }
 0x429   : > { %v7144_v29 = vunpack.i.h.bf16 %v7142_v53  ;;  %v7143_v62 = vunpack.i.l.bf16 %v7142_v53  ;;  %v7153_v53 = vunpack.i.l.bf16 %v7152_v36  ;;  %v7164_v11 = vunpack.i.h.bf16 %v7162_v5 }
 0x42a   : > { %v7163_v37 = vunpack.i.l.bf16 %v7162_v5 }
 0x42b   : > { %v5270_v31 = vsel %vm4534_vm15, %v7138_v51, %v7143_v62  ;;  %v5271_v12 = vsel %vm4534_vm15, %v7139_v40, %v7144_v29  ;;  %v5278_v56 = vsel %vm4534_vm15, %v7143_v62, %v7138_v51  ;;  %v5279_v54 = vsel %vm4534_vm15, %v7144_v29, %v7139_v40 }
 0x42c   : > { %v5326_v3 = vmul.f32 %v9841_v4, %v5278_v56  ;;  %v7147_v8 = vpop.permute.xlu1 %7146  ;;  %v5328_v40 = vmul.f32 %v9815_v33, %v5279_v54  ;;  %v5327_v62 = vmul.f32 %v9841_v4, %v5270_v31  ;;  %v5329_v58 = vmul.f32 %v9815_v33, %v5271_v12 }
 0x42d   : > { %v7149_v51 = vunpack.i.h.bf16 %v7147_v8  ;;  %v7148_v29 = vunpack.i.l.bf16 %v7147_v8 }
 0x42e   : > { %v5342_v4 = vadd.f32 %v5326_v3, %v5222_v26  ;;  %v5344_v43 = vadd.f32 %v5328_v40, %v5224_v28  ;;  %v5343_v10 = vadd.f32 %v5327_v62, %v5223_v44 }
 0x42f   : > { %v5390_v41 = vsel %vm11697_vm1, %v7148_v29, %v7153_v53  ;;  %v5391_v56 = vsel %vm11697_vm1, %v7149_v51, %v7154_v60  ;;  %v5398_v36 = vsel %vm11697_vm1, %v7153_v53, %v7148_v29  ;;  %v5399_v54 = vsel %vm11697_vm1, %v7154_v60, %v7149_v51 }
 0x430   : > { %v5446_v33 = vmul.f32 %v9831_v27, %v5398_v36  ;;  %v5447_v31 = vmul.f32 %v9831_v27, %v5390_v41  ;;  %v5448_v12 = vmul.f32 %v9769_v15, %v5399_v54  ;;  %v7157_v8 = vpop.permute.xlu1 %7156  ;;  %v5449_v1 = vmul.f32 %v9769_v15, %v5391_v56 }
 0x431   : > { %v7159_v9 = vunpack.i.h.bf16 %v7157_v8  ;;  %v7158_v55 = vunpack.i.l.bf16 %v7157_v8  ;;  %v5345_v53 = vadd.f32 %v5329_v58, %v5225_v25 }
 0x432   : > { %v5462_v14 = vadd.f32 %v5446_v33, %v5342_v4  ;;  %v7172_v5 = vpop.permute.xlu0 %7171  ;;  %v5464_v3 = vadd.f32 %v5448_v12, %v5344_v43  ;;  %v5463_v25 = vadd.f32 %v5447_v31, %v5343_v10 }
 0x433   : > { %v5510_v60 = vsel %vm11696_vm6, %v7158_v55, %v7163_v37  ;;  %v5511_v26 = vsel %vm11696_vm6, %v7159_v9, %v7164_v11  ;;  %v5518_v27 = vsel %vm11696_vm6, %v7163_v37, %v7158_v55  ;;  %v5519_v28 = vsel %vm11696_vm6, %v7164_v11, %v7159_v9 }
 0x434   : > { %v5566_v40 = vmul.f32 %v9820_v59, %v5518_v27  ;;  %v5568_v15 = vmul.f32 %v9783_v30, %v5519_v28  ;;  %v7167_v44 = vpop.permute.xlu1 %7166  ;;  %v7174_v51 = vunpack.i.h.bf16 %v7172_v5  ;;  %v7173_v29 = vunpack.i.l.bf16 %v7172_v5  ;;  %v11914_v27 = vld [vmem:[#allocation51_spill] sm:$0xff] }
 0x435   : > { %v7169_v62 = vunpack.i.h.bf16 %v7167_v44  ;;  %v7168_v58 = vunpack.i.l.bf16 %v7167_v44  ;;  %v5567_v36 = vmul.f32 %v9820_v59, %v5510_v60  ;;  %v5569_v55 = vmul.f32 %v9783_v30, %v5511_v26  ;;  %v11912_v59 = vld [vmem:[#allocation73_spill] sm:$0xff] }
 0x436   : > { %v5582_v41 = vadd.f32 %v5566_v40, %v5462_v14  ;;  %v5584_v56 = vadd.f32 %v5568_v15, %v5464_v3  ;;  %v7182_v9 = vpop.permute.xlu0 %7181  ;;  %v5465_v33 = vadd.f32 %v5449_v1, %v5345_v53  ;;  %v11915_v28 = vsel %vm9526_vm0, %v11914_v27, 0.0  ;;  %v11917_v3 = vld [vmem:[#allocation54_spill] sm:$0xff] }
 0x437   : > { %v5272_v37 = vsel %vm4534_vm15, %v7168_v58, %v7173_v29  ;;  %v5273_v11 = vsel %vm4534_vm15, %v7169_v62, %v7174_v51  ;;  %v5280_v43 = vsel %vm4534_vm15, %v7173_v29, %v7168_v58  ;;  %v5281_v10 = vsel %vm4534_vm15, %v7174_v51, %v7169_v62 }
 0x438   : > { %v5330_v14 = vmul.f32 %v9860_v42, %v5280_v43  ;;  %v5331_v54 = vmul.f32 %v9860_v42, %v5272_v37  ;;  %v5332_v4 = vmul.f32 %v11912_v59, %v5281_v10  ;;  %v7177_v30 = vpop.permute.xlu1 %7176  ;;  %v7184_v31 = vunpack.i.h.bf16 %v7182_v9  ;;  %v11919_v37 = vld [vmem:[#allocation74_spill] sm:$0xff] }
 0x439   : > { %v7183_v12 = vunpack.i.l.bf16 %v7182_v9  ;;  %v7179_v8 = vunpack.i.h.bf16 %v7177_v30  ;;  %v7178_v60 = vunpack.i.l.bf16 %v7177_v30  ;;  %5428 = vperm.xlu1 %7195, %v11915_v28   ;;  %v5333_v5 = vmul.f32 %v11912_v59, %v5273_v11 }
 0x43a   : > { %v11918_v40 = vsel %vm9626_vm2, %v11917_v3, 0.0  ;;  %v5583_v1 = vadd.f32 %v5567_v36, %v5463_v25  ;;  %v5585_v53 = vadd.f32 %v5569_v55, %v5465_v33  ;;  %v5598_v15 = vpack.c.bf16 %v5584_v56, %v5582_v41  ;;  %v7192_v58 = vpop.permute.xlu0 %7191  ;;  %v11920_v25 = vld [vmem:[#allocation70_spill] sm:$0xff] }
 0x43b   : > { %5433 = vperm.xlu0 %7196, %v11918_v40   ;;  %v5392_v44 = vsel %vm11697_vm1, %v7178_v60, %v7183_v12  ;;  %v5393_v51 = vsel %vm11697_vm1, %v7179_v8, %v7184_v31  ;;  %v5400_v29 = vsel %vm11697_vm1, %v7183_v12, %v7178_v60  ;;  %v5401_v62 = vsel %vm11697_vm1, %v7184_v31, %v7179_v8  ;;  %v11923_v40 = vld [vmem:[#allocation75_spill] sm:$0xff] }
 0x43c   : > { %v5450_v11 = vmul.f32 %v11919_v37, %v5400_v29  ;;  %v5453_v36 = vmul.f32 %v11920_v25, %v5393_v51  ;;  %v7187_v41 = vpop.permute.xlu1 %7186  ;;  %v10236_v56 = vpack.i.bf16 %v10167_v47, %v10161_v48  ;;  %v5347_v55 = vadd.f32 %v5331_v54, %v10128_v21  ;;  %v11925_v51 = vld [vmem:[#allocation56_spill] sm:$0xff] }
 0x43d   : > { %v5451_v43 = vmul.f32 %v11919_v37, %v5392_v44  ;;  %v7194_v10 = vunpack.i.h.bf16 %v7192_v58  ;;  %v5599_v9 = vpack.c.bf16 %v5585_v53, %v5583_v1  ;;  %v7189_v59 = vunpack.i.h.bf16 %v7187_v41  ;;  %7198 = vrot.lane.b32.xlu1 %v10175_v39, %s7724_s26 }
 0x43e   : > { %v5452_v30 = vmul.f32 %v11920_v25, %v5401_v62  ;;  %v7193_v33 = vunpack.i.l.bf16 %v7192_v58  ;;  %v7188_v31 = vunpack.i.l.bf16 %v7187_v41  ;;  %v5349_v12 = vadd.f32 %v5333_v5, %v10141_v35  ;;  %v11921_v35 = vld [vmem:[#allocation72_spill] sm:$0xff]  ;;  %v11927_v62 = vld [vmem:[#allocation61_spill] sm:$0xff] }
 0x43f   : > { %7203 = vrot.lane.b32.xlu0 %v10236_v56, %s7724_s26  ;;  %5766 = vmatprep.mubr.bf16.mxu0 %v5599_v9  ;;  %v5513_v21 = vsel %vm11696_vm6, %v7189_v59, %v7194_v10  ;;  %v5521_v54 = vsel %vm11696_vm6, %v7194_v10, %v7189_v59  ;;  %v5346_v8 = vadd.f32 %v5330_v14, %v10124_v38  ;;  %v11922_v42 = vsel %vm10063_vm7, %v10085_v57, 0.0 }
 0x440   : > { %v5348_v60 = vadd.f32 %v5332_v4, %v10137_v19  ;;  %5767 = vmatmul.mubr.bf16.vlgmr.msra.gmra.mxu0 %v5598_v15  ;;  %v5512_v26 = vsel %vm11696_vm6, %v7188_v31, %v7193_v33  ;;  %v5520_v27 = vsel %vm11696_vm6, %v7193_v33, %v7188_v31  ;;  %v5469_v28 = vadd.f32 %v5453_v36, %v5349_v12  ;;  %v11938_v31 = vld [vmem:[#allocation57_spill] sm:$0xff]  ;;  %v11939_v12 = vld [vmem:[#allocation60_spill] sm:$0xff] }
 0x441   : > { %v5573_v5 = vmul.f32 %v11921_v35, %v5513_v21  ;;  %5548 = vperm.xlu1 %7195, %v11922_v42   ;;  %v5467_v3 = vadd.f32 %v5451_v43, %v5347_v55  ;;  %v5571_v38 = vmul.f32 %v11923_v40, %v5512_v26  ;;  %v5466_v14 = vadd.f32 %v5450_v11, %v5346_v8  ;;  %v11931_v11 = vld [vmem:[#allocation63_spill] sm:$0xff]  ;;  %v11940_v21 = vld [vmem:[#allocation81_spill] sm:$0xff]  ;;  %v11943_v26 = vld [vmem:[#allocation58_spill] sm:$0xff] }
 0x442   : > { %v5570_v19 = vmul.f32 %v11923_v40, %v5520_v27  ;;  %vm3588_vm0 = vcmp.le.f32.partialorder %v9310_v17, 15.0  ;;  %v11924_v4 = vsel %vm10077_vm9, %v10089_v52, 0.0  ;;  %v5468_v53 = vadd.f32 %v5452_v30, %v5348_v60  ;;  %v11930_v52 = vld [vmem:[#allocation59_spill] sm:$0xff]  ;;  %v11942_v8 = vld [vmem:[#allocation53_spill] sm:$0xff] }
 0x443   : > { %5553 = vperm.xlu0 %7196, %v11924_v4   ;;  %v5589_v1 = vadd.f32 %v5573_v5, %v5469_v28  ;;  %v5572_v49 = vmul.f32 %v11921_v35, %v5521_v54  ;;  %v3540_v57 = vsub.f32 1.0, %v10098_v13  ;;  %v5587_v15 = vadd.f32 %v5571_v38, %v5467_v3  ;;  %vm10292_vm11 = vmand %vm3572_vm4, %vm3588_vm0  ;;  %v11944_v28 = vld [vmem:[#allocation80_spill] sm:$0xff] }
 0x444   : > { %v5586_v44 = vadd.f32 %v5570_v19, %v5466_v14  ;;  %vm3811_vm2 = vcmp.ne.s32.totalorder %v11925_v51, 0  ;;  %v11926_v29 = vsub.f32 1.0, %v10053_v24  ;;  %vm3812_vm8 = vcmp.ne.s32.totalorder %v11930_v52, 0  ;;  %vm10316_vm4 = vmand %vm3620_vm5, %vm3636_vm10  ;;  %v11954_v52 = vld [vmem:[#allocation25_spill] sm:$0xff] }
 0x445   : > { %v5588_v37 = vadd.f32 %v5572_v49, %v5468_v53  ;;  %v3908_v25 = vmul.f32 %v11931_v11, %v3540_v57  ;;  %7208 = vrot.lane.b32.xlu1 %v10175_v39, %s7728_s22  ;;  %v5601_v36 = vpack.c.bf16 %v5589_v1, %v5587_v15  ;;  %vm3619_vm7 = vcmp.ge.f32.partialorder %v9280_v22, -1.0  ;;  %vm3827_vm13 = vmand %vm10278_vm3, %vm3811_vm2  ;;  %v11945_v53 = vld [vmem:[#allocation4_spill] sm:$0xff]  ;;  %v11946_v49 = vld [vmem:[#allocation3_spill] sm:$0xff] }
 0x446   : > { %v3907_v58 = vmul.f32 %v11927_v62, %v11926_v29  ;;  %vm3635_vm9 = vcmp.le.f32.partialorder %v9280_v22, 14.0  ;;  %v3955_v22 = vmul.f32 %v11927_v62, %v10053_v24  ;;  %vm3828_vm12 = vmand %vm10292_vm11, %vm3812_vm8  ;;  %v3956_v9 = vmul.f32 %v11931_v11, %v10098_v13  ;;  %v11947_v15 = vld [vmem:[#allocation6_spill] sm:$0xff]  ;;  %v11950_v62 = vld [vmem:[#allocation27_spill] sm:$0xff] }
 0x447   : > { %7213 = vrot.lane.b32.xlu0 %v10236_v56, %s7728_s22  ;;  %v5600_v55 = vpack.c.bf16 %v5588_v37, %v5586_v44  ;;  %5774 = vmatprep.mubr.bf16.mxu0 %v5601_v36  ;;  %vm10310_vm14 = vmand %vm3619_vm7, %vm3635_vm9  ;;  %v3924_v17 = vsel %vm3828_vm12, %v3908_v25, 0.0  ;;  %vm4035_vm9 = vcmp.ne.s32.totalorder %v11938_v31, 0  ;;  %v11941_v54 = vmov %v11926_v29  ;;  %v11948_v44 = vld [vmem:[#allocation5_spill] sm:$0xff]  ;;  %v11949_v29 = vld [vmem:[#allocation23_spill] sm:$0xff] }
 0x448   : > { %v3923_v43 = vsel %vm3827_vm13, %v3907_v58, 0.0  ;;  %vm3939_vm0 = vmand %vm10310_vm14, %vm3811_vm2  ;;  %vm4036_vm13 = vcmp.ne.s32.totalorder %v11939_v12, 0  ;;  %vm5164_vm2 = vcmp.eq.s32.totalorder %v9713_v20, %v11940_v21  ;;  %v4131_v60 = vmul.f32 %v11942_v8, %v11941_v54  ;;  %v11964_v31 = vld [vmem:[#allocation21_spill] sm:$0xff] }
 0x449   : > { %5775 = vmatmul.mubr.bf16.gmra.mxu0 %v5600_v55  ;;  %5214 = vperm.xlu1 %7195, %v3923_v43   ;;  %vm3940_vm7 = vmand %vm10316_vm4, %vm3812_vm8  ;;  %v3971_v30 = vsel %vm3939_vm0, %v3955_v22, 0.0  ;;  %vm5165_vm10 = vcmp.eq.s32.totalorder %v9866_v46, %v11940_v21  ;;  %v4132_v27 = vmul.f32 %v11943_v26, %v3540_v57  ;;  %vm5163_vm12 = vcmp.eq.s32.totalorder %v9866_v46, %v11944_v28  ;;  %v11965_v21 = vld [vmem:[#allocation19_spill] sm:$0xff] }
 0x44a   : > { %v3972_v33 = vsel %vm3940_vm7, %v3956_v9, 0.0  ;;  %vm4051_vm5 = vmand %vm10278_vm3, %vm4035_vm9  ;;  %vm5162_vm3 = vcmp.eq.s32.totalorder %v9713_v20, %v11944_v28  ;;  %v10358_v5 = vsel %vm5165_vm10, 1.0, %v11898_v32  ;;  %v4179_v14 = vmul.f32 %v11942_v8, %v10053_v24  ;;  %v11961_v9 = vld [vmem:[#allocation24_spill] sm:$0xff]  ;;  %v11966_v8 = vld [vmem:[#allocation62_spill] sm:$0xff] }
 0x44b   : > { %5219 = vperm.xlu0 %7196, %v3924_v17   ;;  %vm4052_vm8 = vmand %vm10292_vm11, %vm4036_vm13  ;;  %v4147_v35 = vsel %vm4051_vm5, %v4131_v60, 0.0  ;;  %v10361_v3 = vsel %vm5162_vm3, 1.0, %v11898_v32  ;;  %v4180_v19 = vmul.f32 %v11943_v26, %v10098_v13  ;;  %v3493_v57 = vsub.f32 %v11946_v49, %v11945_v53  ;;  %v11962_v17 = vld [vmem:[#allocation22_spill] sm:$0xff]  ;;  %v11969_v49 = vld [vmem:[#allocation8_spill] sm:$0xff] }
 0x44c   : > { %v4148_v42 = vsel %vm4052_vm8, %v4132_v27, 0.0  ;;  %vm4163_vm11 = vmand %vm10310_vm14, %vm4035_vm9  ;;  %v10388_v24 = vsub.f32 %v11948_v44, %v11947_v15  ;;  %vm3558_vm14 = vcmp.ge.f32.partialorder %v11947_v15, 0.0  ;;  %vm3557_vm7 = vcmp.ge.f32.partialorder %v11945_v53, 0.0 }
 0x44d   : > { %5318 = vperm.xlu1 %7195, %v3971_v30   ;;  %vm4164_vm0 = vmand %vm10316_vm4, %vm4036_vm13  ;;  %v4195_v4 = vsel %vm4163_vm11, %v4179_v14, 0.0  ;;  %v3525_v51 = vsub.f32 1.0, %v3493_v57  ;;  %vm3574_vm4 = vcmp.le.f32.partialorder %v11947_v15, 15.0  ;;  %vm3573_vm9 = vcmp.le.f32.partialorder %v11945_v53, 15.0  ;;  %v11963_v30 = vld [vmem:[#allocation65_spill] sm:$0xff] }
 0x44e   : > { %v4196_v1 = vsel %vm4164_vm0, %v4180_v19, 0.0  ;;  %v3526_v13 = vsub.f32 1.0, %v10388_v24  ;;  %vm3797_vm13 = vcmp.ne.s32.totalorder %v11949_v29, 0  ;;  %vm10399_vm5 = vmand %vm3558_vm14, %vm3574_vm4  ;;  %vm3606_vm8 = vcmp.ge.f32.partialorder %v11947_v15, -1.0  ;;  %v11967_v19 = vld [vmem:[#allocation10_spill] sm:$0xff] }
 0x44f   : > { %5323 = vperm.xlu0 %7196, %v3972_v33   ;;  %v3893_v58 = vmul.f32 %v11950_v62, %v3525_v51  ;;  %vm3622_vm10 = vcmp.le.f32.partialorder %v11947_v15, 14.0  ;;  %vm10408_vm3 = vmand %vm3557_vm7, %vm3573_vm9  ;;  %vm3621_vm11 = vcmp.le.f32.partialorder %v11945_v53, 14.0  ;;  %v3941_v36 = vmul.f32 %v11950_v62, %v3493_v57  ;;  %v11970_v15 = vld [vmem:[#allocation7_spill] sm:$0xff]  ;;  %v11972_v62 = vld [vmem:[#allocation34_spill] sm:$0xff] }
 0x450   : > { %v3894_v11 = vmul.f32 %v11954_v52, %v3526_v13  ;;  %vm3813_vm0 = vmand %vm10408_vm3, %vm3797_vm13  ;;  %v3942_v22 = vmul.f32 %v11954_v52, %v10388_v24  ;;  %vm4021_vm9 = vcmp.ne.s32.totalorder %v11961_v9, 0  ;;  %v4117_v12 = vmul.f32 %v11964_v31, %v3525_v51  ;;  %v11976_v52 = vld [vmem:[#allocation33_spill] sm:$0xff] }
 0x451   : > { %7218 = vrot.lane.b32.xlu1 %v10175_v39, %s7729_s0  ;;  %v10355_v39 = vsel %vm5164_vm2, 1.0, %v11898_v32  ;;  %vm3798_vm2 = vcmp.ne.s32.totalorder %v11953_v0, 0  ;;  %v3909_v41 = vsel %vm3813_vm0, %v3893_v58, 0.0  ;;  %vm10424_vm4 = vmand %vm3606_vm8, %vm3622_vm10  ;;  %vm4022_vm10 = vcmp.ne.s32.totalorder %v11962_v17, 0  ;;  %v11975_v0 = vld [vmem:[#allocation28_spill] sm:$0xff] }
 0x452   : > { %v7227_v40 = vpack.i.bf16 %v10355_v39, %v10361_v3  ;;  %vm3814_vm14 = vmand %vm10399_vm5, %vm3798_vm2  ;;  %v4118_v54 = vmul.f32 %v11965_v21, %v3526_v13  ;;  %v4165_v14 = vmul.f32 %v11964_v31, %v3493_v57  ;;  %v10497_v44 = vsub.f32 %v11970_v15, %v11969_v49  ;;  %v11986_v31 = vld [vmem:[#allocation29_spill] sm:$0xff] }
 0x453   : > { %7223 = vrot.lane.b32.xlu0 %v10236_v56, %s7729_s0  ;;  %v10364_v56 = vsel %vm5163_vm12, 1.0, %v11898_v32  ;;  %vm3605_vm12 = vcmp.ge.f32.partialorder %v11945_v53, -1.0  ;;  %v3910_v43 = vsel %vm3814_vm14, %v3894_v11, 0.0  ;;  %vm3926_vm0 = vmand %vm10424_vm4, %vm3798_vm2  ;;  %vm4417_vm2 = vcmp.eq.s32.totalorder %v9866_v46, %v11963_v30 }
 0x454   : > { %v7232_v38 = vpack.i.bf16 %v10358_v5, %v10364_v56  ;;  %vm10430_vm7 = vmand %vm3605_vm12, %vm3621_vm11  ;;  %vm4416_vm11 = vcmp.eq.s32.totalorder %v9713_v20, %v11963_v30  ;;  %v3958_v33 = vsel %vm3926_vm0, %v3942_v22, 0.0  ;;  %vm4415_vm14 = vcmp.eq.s32.totalorder %v9866_v46, %v11966_v8  ;;  %v11984_v30 = vld [vmem:[#allocation30_spill] sm:$0xff] }
 0x455   : > { %5438 = vperm.xlu1 %7195, %v4147_v35   ;;  %vm3925_vm8 = vmand %vm10430_vm7, %vm3797_vm13  ;;  %v10463_v60 = vsel %vm4416_vm11, 1.0, %v11898_v32  ;;  %v10466_v27 = vsel %vm4417_vm2, 1.0, %v11898_v32  ;;  %v4166_v53 = vmul.f32 %v11965_v21, %v10388_v24  ;;  %v3528_v29 = vsub.f32 1.0, %v10497_v44  ;;  %v11971_v24 = vld [vmem:[#allocation31_spill] sm:$0xff]  ;;  %v11987_v21 = vld [vmem:[#allocation26_spill] sm:$0xff] }
 0x456   : > { %v3957_v59 = vsel %vm3925_vm8, %v3941_v36, 0.0  ;;  %vm4037_vm12 = vmand %vm10408_vm3, %vm4021_vm9  ;;  %vm4414_vm3 = vcmp.eq.s32.totalorder %v9713_v20, %v11966_v8  ;;  %vm3799_vm0 = vcmp.ne.s32.totalorder %v11971_v24, 0  ;;  %vm3800_vm11 = vcmp.ne.s32.totalorder %v11975_v0, 0  ;;  %v11988_v8 = vld [vmem:[#allocation64_spill] sm:$0xff] }
 0x457   : > { %5443 = vperm.xlu0 %7196, %v4148_v42   ;;  %vm4038_vm13 = vmand %vm10399_vm5, %vm4022_vm10  ;;  %v4133_v26 = vsel %vm4037_vm12, %v4117_v12, 0.0  ;;  %v10469_v35 = vsel %vm4414_vm3, 1.0, %v11898_v32  ;;  %v10472_v42 = vsel %vm4415_vm14, 1.0, %v11898_v32  ;;  %v3896_v11 = vmul.f32 %v11976_v52, %v3528_v29 }
 0x458   : > { %v4134_v28 = vsel %vm4038_vm13, %v4118_v54, 0.0  ;;  %vm4149_vm5 = vmand %vm10430_vm7, %vm4021_vm9  ;;  %vm3576_vm7 = vcmp.le.f32.partialorder %v11969_v49, 15.0  ;;  %vm3559_vm9 = vcmp.ge.f32.partialorder %v11967_v19, 0.0  ;;  %vm3608_vm13 = vcmp.ge.f32.partialorder %v11969_v49, -1.0 }
 0x459   : > { %7228 = vrot.lane.b32.xlu1 %v7227_v40, %s7724_s26  ;;  %vm4150_vm8 = vmand %vm10424_vm4, %vm4022_vm10  ;;  %v4181_v51 = vsel %vm4149_vm5, %v4165_v14, 0.0  ;;  %vm3560_vm4 = vcmp.ge.f32.partialorder %v11969_v49, 0.0  ;;  %vm3575_vm10 = vcmp.le.f32.partialorder %v11967_v19, 15.0  ;;  %vm3624_vm2 = vcmp.le.f32.partialorder %v11969_v49, 14.0 }
 0x45a   : > { %v4182_v57 = vsel %vm4150_vm8, %v4166_v53, 0.0  ;;  %vm10507_vm12 = vmand %vm3560_vm4, %vm3576_vm7  ;;  %vm3607_vm14 = vcmp.ge.f32.partialorder %v11967_v19, -1.0  ;;  %vm3623_vm5 = vcmp.le.f32.partialorder %v11967_v19, 14.0  ;;  %v3944_v22 = vmul.f32 %v11976_v52, %v10497_v44  ;;  %v12000_v52 = vld [vmem:[#allocation11_spill] sm:$0xff] }
 0x45b   : > { %7233 = vrot.lane.b32.xlu0 %v7232_v38, %s7724_s26  ;;  %vm10516_vm3 = vmand %vm3559_vm9, %vm3575_vm10  ;;  %v4120_v54 = vmul.f32 %v11987_v21, %v3528_v29 }
 0x45c   : > { %vm3815_vm8 = vmand %vm10516_vm3, %vm3799_vm0 }
 0x45d   : > { %5558 = vperm.xlu1 %7195, %v4195_v4   ;;  %v11968_v4 = vld [vmem:[#allocation9_spill] sm:$0xff]  ;;  %vm3816_vm4 = vmand %vm10507_vm12, %vm3800_vm11 }
 0x45e   : > { %vm10533_vm7 = vmand %vm3608_vm13, %vm3624_vm2 }
 0x45f   : > { %5563 = vperm.xlu0 %7196, %v4196_v1   ;;  %v10490_v1 = vsub.f32 %v11968_v4, %v11967_v19  ;;  %vm10539_vm9 = vmand %vm3607_vm14, %vm3623_vm5  ;;  %vm4024_vm14 = vcmp.ne.s32.totalorder %v11984_v30, 0 }
 0x460   : > { %vm3927_vm10 = vmand %vm10539_vm9, %vm3799_vm0 }
 0x461   : > { %7238 = vrot.lane.b32.xlu1 %v7227_v40, %s7728_s22  ;;  %v3527_v13 = vsub.f32 1.0, %v10490_v1  ;;  %v3943_v36 = vmul.f32 %v11972_v62, %v10490_v1  ;;  %vm3928_vm13 = vmand %vm10533_vm7, %vm3800_vm11  ;;  %v4167_v29 = vmul.f32 %v11986_v31, %v10490_v1  ;;  %v4168_v1 = vmul.f32 %v11987_v21, %v10497_v44  ;;  %v12012_v21 = vld [vmem:[#allocation18_spill] sm:$0xff] }
 0x462   : > { %v3960_v17 = vsel %vm3928_vm13, %v3944_v22, 0.0  ;;  %vm4040_vm11 = vmand %vm10507_vm12, %vm4024_vm14  ;;  %vm3627_vm1 = vcmp.le.f32.partialorder %v12012_v21, 14.0 }
 0x463   : > { %7243 = vrot.lane.b32.xlu0 %v7232_v38, %s7728_s22  ;;  %v3895_v58 = vmul.f32 %v11972_v62, %v3527_v13  ;;  %v3959_v9 = vsel %vm3927_vm10, %v3943_v36, 0.0  ;;  %v4119_v12 = vmul.f32 %v11986_v31, %v3527_v13  ;;  %v4136_v19 = vsel %vm4040_vm11, %v4120_v54, 0.0  ;;  %v11998_v62 = vld [vmem:[#allocation14_spill] sm:$0xff]  ;;  %v12013_v54 = vld [vmem:[#allocation17_spill] sm:$0xff] }
 0x464   : > { %vm3609_vm11 = vcmp.ge.f32.partialorder %v11998_v62, -1.0 }
 0x465   : > { %7248 = vrot.lane.b32.xlu1 %v7227_v40, %s7729_s0  ;;  %v7257_v40 = vpack.i.bf16 %v10463_v60, %v10469_v35 }
 0x467   : > { %7253 = vrot.lane.b32.xlu0 %v7232_v38, %s7729_s0  ;;  %v7262_v38 = vpack.i.bf16 %v10466_v27, %v10472_v42 }
 0x469   : > { %4448 = vperm.xlu1 %7195, %v3909_v41   ;;  %v3911_v41 = vsel %vm3815_vm8, %v3895_v58, 0.0  ;;  %v11999_v58 = vld [vmem:[#allocation13_spill] sm:$0xff] }
 0x46a   : > { %v10618_v37 = vsub.f32 %v11999_v58, %v11998_v62  ;;  %v12021_v58 = vld [vmem:[#allocation40_spill] sm:$0xff] }
 0x46b   : > { %4453 = vperm.xlu0 %7196, %v3910_v43   ;;  %v3912_v43 = vsel %vm3816_vm4, %v3896_v11, 0.0  ;;  %vm4419_vm4 = vcmp.eq.s32.totalorder %v9866_v46, %v11988_v8 }
 0x46c   : > { %v10583_v4 = vsel %vm4419_vm4, 1.0, %v11898_v32  ;;  %v3529_v10 = vsub.f32 1.0, %v10618_v37 }
 0x46d   : > { %4553 = vperm.xlu1 %7195, %v3957_v59   ;;  %v11983_v59 = vld [vmem:[#allocation32_spill] sm:$0xff]  ;;  %11992 = vst [vmem:[#allocation55_spill] sm:$0xff] %v10583_v4 }
 0x46e   : > { %vm4023_vm2 = vcmp.ne.s32.totalorder %v11983_v59, 0  ;;  %v12006_v59 = vld [vmem:[#allocation35_spill] sm:$0xff] }
 0x46f   : > { %4558 = vperm.xlu0 %7196, %v3958_v33   ;;  %vm4039_vm5 = vmand %vm10516_vm3, %vm4023_vm2  ;;  %v11985_v33 = vld [vmem:[#allocation67_spill] sm:$0xff]  ;;  %vm4418_vm3 = vcmp.eq.s32.totalorder %v9713_v20, %v11988_v8  ;;  %v10672_v8 = vsub.f32 %v12013_v54, %v12012_v21 }
 0x470   : > { %vm4420_vm0 = vcmp.eq.s32.totalorder %v9713_v20, %v11985_v33  ;;  %vm4421_vm8 = vcmp.eq.s32.totalorder %v9866_v46, %v11985_v33  ;;  %vm10597_vm12 = vmand %vm10539_vm9, %vm4023_vm2 }
 0x471   : > { %4674 = vperm.xlu1 %7195, %v4133_v26   ;;  %v10574_v26 = vsel %vm4420_vm0, 1.0, %v11898_v32 }
 0x472   : > { %11989 = vst [vmem:[#allocation73_spill] sm:$0xff] %v10574_v26 }
 0x473   : > { %4679 = vperm.xlu0 %7196, %v4134_v28   ;;  %v4135_v28 = vsel %vm4039_vm5, %v4119_v12, 0.0  ;;  %vm10611_vm5 = vmand %vm10533_vm7, %vm4024_vm14  ;;  %vm3561_vm7 = vcmp.ge.f32.partialorder %v11998_v62, 0.0  ;;  %vm3577_vm14 = vcmp.le.f32.partialorder %v11998_v62, 15.0  ;;  %v12011_v12 = vld [vmem:[#allocation38_spill] sm:$0xff] }
 0x474   : > { %v4184_v22 = vsel %vm10611_vm5, %v4168_v1, 0.0  ;;  %vm4026_vm5 = vcmp.ne.s32.totalorder %v12011_v12, 0  ;;  %v12054_v12 = vld [vmem:[#allocation42_spill] sm:$0xff] }
 0x475   : > { %7258 = vrot.lane.b32.xlu1 %v7257_v40, %s7724_s26 }
 0x477   : > { %7263 = vrot.lane.b32.xlu0 %v7262_v38, %s7724_s26 }
 0x479   : > { %4795 = vperm.xlu1 %7195, %v4181_v51   ;;  %v12017_v51 = vld [vmem:[#allocation16_spill] sm:$0xff] }
 0x47b   : > { %4800 = vperm.xlu0 %7196, %v4182_v57   ;;  %v11995_v57 = vld [vmem:[#allocation12_spill] sm:$0xff] }
 0x47c   : > { %vm3562_vm10 = vcmp.ge.f32.partialorder %v11995_v57, 0.0  ;;  %vm3578_vm13 = vcmp.le.f32.partialorder %v11995_v57, 15.0  ;;  %vm3610_vm9 = vcmp.ge.f32.partialorder %v11995_v57, -1.0  ;;  %vm3626_vm2 = vcmp.le.f32.partialorder %v11995_v57, 14.0 }
 0x47d   : > { %7268 = vrot.lane.b32.xlu1 %v7257_v40, %s7728_s22  ;;  %v10627_v11 = vsub.f32 %v12000_v52, %v11995_v57  ;;  %vm10637_vm0 = vmand %vm3562_vm10, %vm3578_vm13  ;;  %v12018_v57 = vld [vmem:[#allocation15_spill] sm:$0xff] }
 0x47e   : > { %vm10659_vm10 = vmand %vm3561_vm7, %vm3577_vm14 }
 0x47f   : > { %7273 = vrot.lane.b32.xlu0 %v7262_v38, %s7728_s22  ;;  %v3530_v30 = vsub.f32 1.0, %v10627_v11  ;;  %vm10705_vm14 = vmand %vm10637_vm0, %vm4026_vm5 }
 0x481   : > { %4458 = vperm.xlu1 %7195, %v3911_v41   ;;  %v4183_v41 = vsel %vm10597_vm12, %v4167_v29, 0.0  ;;  %vm3802_vm12 = vcmp.ne.s32.totalorder %v12006_v59, 0 }
 0x483   : > { %4463 = vperm.xlu0 %7196, %v3912_v43  }
 0x485   : > { %4563 = vperm.xlu1 %7195, %v3959_v9   ;;  %v12005_v9 = vld [vmem:[#allocation43_spill] sm:$0xff] }
 0x486   : > { %vm3801_vm4 = vcmp.ne.s32.totalorder %v12005_v9, 0 }
 0x487   : > { %4568 = vperm.xlu0 %7196, %v3960_v17  }
 0x489   : > { %7278 = vrot.lane.b32.xlu1 %v7257_v40, %s7729_s0  ;;  %v10577_v40 = vsel %vm4421_vm8, 1.0, %v11898_v32  ;;  %vm3625_vm8 = vcmp.le.f32.partialorder %v11998_v62, 14.0 }
 0x48a   : > { %11990 = vst [vmem:[#allocation52_spill] sm:$0xff] %v10577_v40  ;;  %v10591_v15 = vpack.i.bf16 %v10577_v40, %v10583_v4  ;;  %vm10665_vm13 = vmand %vm3609_vm11, %vm3625_vm8  ;;  %vm3563_vm11 = vcmp.ge.f32.partialorder %v12012_v21, 0.0  ;;  %vm3579_vm8 = vcmp.le.f32.partialorder %v12012_v21, 15.0 }
 0x48b   : > { %7283 = vrot.lane.b32.xlu0 %v7262_v38, %s7729_s0  ;;  %v10580_v38 = vsel %vm4418_vm3, 1.0, %v11898_v32  ;;  %vm10647_vm3 = vmand %vm3610_vm9, %vm3626_vm2 }
 0x48c   : > { %11991 = vst [vmem:[#allocation51_spill] sm:$0xff] %v10580_v38  ;;  %v10587_v49 = vpack.i.bf16 %v10574_v26, %v10580_v38  ;;  %vm10679_vm9 = vmand %vm10659_vm10, %vm3801_vm4 }
 0x48d   : > { %4684 = vperm.xlu1 %7195, %v4135_v28   ;;  %v2473_v14 = vpop.xlane.xlu0 %2472  ;;  %vm10693_vm2 = vmand %vm10637_vm0, %vm3802_vm12 }
 0x48e   : > { %v2502_v53 = vmul.f32 0.03125, %v2473_v14  ;;  %v12014_v14 = vld [vmem:[#allocation41_spill] sm:$0xff]  ;;  %vm10715_vm6 = vmand %vm10647_vm3, %vm4026_vm5  ;;  %vm3611_vm5 = vcmp.ge.f32.partialorder %v12012_v21, -1.0  ;;  %v7422_v21 = vld [vmem:[#allocation2 + $0x8] sm:$0xff]  }
 0x48f   : > { %4689 = vperm.xlu0 %7196, %v4136_v19   ;;  %v3898_v19 = vmul.f32 %v12014_v14, %v3530_v30  ;;  %v3946_v54 = vmul.f32 %v12014_v14, %v10627_v11  ;;  %vm10728_vm0 = vmand %vm10665_vm13, %vm3801_vm4 }
 0x490   : > { %v2518_v25 = vadd.f32 1e-05, %v2502_v53 }
 0x491   : > { %7288 = vrot.lane.b32.xlu1 %v10587_v49, %s7724_s26  ;;  %v2469_v13 = vpop.xlane.xlu0 %2468  ;;  %v3914_v14 = vsel %vm10693_vm2, %v3898_v19, 0.0 }
 0x492   : > { %v2500_v0 = vmul.f32 0.03125, %v2469_v13  ;;  %v10685_v13 = vsub.f32 %v12018_v57, %v12017_v51 }
 0x493   : > { %7293 = vrot.lane.b32.xlu0 %v10591_v15, %s7724_s26 }
 0x494   : > { %v2516_v36 = vadd.f32 1e-05, %v2500_v0  ;;  %v3897_v0 = vmul.f32 %v12021_v58, %v3529_v10 }
 0x495   : > { %v2475_v55 = vpop.xlane.xlu1 %2474  ;;  %4805 = vperm.xlu1 %7195, %v4183_v41  }
 0x496   : > { %7649 = vrsqrt.f32 %v2516_v36  ;;  %v2503_v17 = vmul.f32 0.03125, %v2475_v55  ;;  %v3531_v55 = vsub.f32 1.0, %v10672_v8  ;;  %v12036_v36 = vld [vmem:[#allocation47_spill] sm:$0xff] }
 0x497   : > { %4810 = vperm.xlu0 %7196, %v4184_v22   ;;  %7651 = vrsqrt.f32 %v2518_v25  ;;  %v12022_v25 = vld [vmem:[#allocation39_spill] sm:$0xff] }
 0x498   : > { %v2519_v28 = vadd.f32 1e-05, %v2503_v17  ;;  %vm4025_vm7 = vcmp.ne.s32.totalorder %v12022_v25, 0  ;;  %v3913_v17 = vsel %vm10679_vm9, %v3897_v0, 0.0  ;;  %vm3930_vm9 = vmand %vm10647_vm3, %vm3802_vm12  ;;  %vm4027_vm3 = vcmp.ne.s32.totalorder %v12036_v36, 0 }
 0x499   : > { %v2471_v29 = vpop.xlane.xlu1 %2470  ;;  %7298 = vrot.lane.b32.xlu1 %v10587_v49, %s7728_s22  ;;  %v2481_v24 = vpop.xlane.xlu0 %2480  ;;  %vm10741_vm4 = vmand %vm10659_vm10, %vm4025_vm7 }
 0x49a   : > { %7653 = vrsqrt.f32 %v2519_v28  ;;  %v2501_v1 = vmul.f32 0.03125, %v2471_v29  ;;  %v2506_v52 = vmul.f32 0.03125, %v2481_v24  ;;  %v11698_v28 = vsub.f32 1.0, %v10685_v13  ;;  %vm10759_vm10 = vmand %vm10665_vm13, %vm4025_vm7 }
 0x49b   : > { %7303 = vrot.lane.b32.xlu0 %v10591_v15, %s7728_s22  ;;  %v3945_v29 = vmul.f32 %v12021_v58, %v10618_v37  ;;  %vm10800_vm13 = vmand %vm3563_vm11, %vm3579_vm8 }
 0x49c   : > { %v2517_v22 = vadd.f32 1e-05, %v2501_v1  ;;  %v2522_v44 = vadd.f32 1e-05, %v2506_v52  ;;  %v12031_v1 = vld [vmem:[#allocation37_spill] sm:$0xff]  ;;  %vm10818_vm7 = vmand %vm10800_vm13, %vm4027_vm3 }
 0x49d   : > { %v2477_v57 = vpop.xlane.xlu1 %2476  ;;  %4468 = vperm.xlu1 %7195, %v3913_v17   ;;  %v2479_v53 = vpop.xlane.xlu0 %2478  ;;  %v4121_v52 = vmul.f32 %v12031_v1, %v3529_v10  ;;  %v12032_v17 = vld [vmem:[#allocation36_spill] sm:$0xff]  ;;  %v10769_v10 = vmul.f32 %v12031_v1, %v10618_v37  ;;  %v3961_v58 = vsel %vm10728_vm0, %v3945_v29, 0.0  ;;  %v12037_v29 = vld [vmem:[#allocation66_spill] sm:$0xff]  ;;  %vm10839_vm8 = vmand %vm3611_vm5, %vm3627_vm1  ;;  %vm3564_vm0 = vcmp.ge.f32.partialorder %v12017_v51, 0.0 }
 0x49e   : > { %7655 = vrsqrt.f32 %v2517_v22  ;;  %v2504_v24 = vmul.f32 0.03125, %v2477_v57  ;;  %v2505_v0 = vmul.f32 0.03125, %v2479_v53  ;;  %v10749_v62 = vmul.f32 %v12032_v17, %v3530_v30  ;;  %v12035_v53 = vld [vmem:[#allocation44_spill] sm:$0xff]  ;;  %vm10859_vm5 = vmand %vm10839_vm8, %vm4027_vm3 }
 0x49f   : > { %4473 = vperm.xlu0 %7196, %v3914_v14   ;;  %v10753_v19 = vmul.f32 %v12032_v17, %v10627_v11  ;;  %7657 = vrsqrt.f32 %v2522_v44  ;;  %v3962_v22 = vsel %vm3930_vm9, %v3946_v54, 0.0  ;;  %v4137_v44 = vsel %vm10741_vm4, %v4121_v52, 0.0  ;;  %v12040_v17 = vld [vmem:[#allocation46_spill] sm:$0xff] }
 0x4a0   : > { %v2520_v11 = vadd.f32 1e-05, %v2504_v24  ;;  %v2521_v30 = vadd.f32 1e-05, %v2505_v0  ;;  %v4138_v43 = vsel %vm10705_vm14, %v10749_v62, 0.0  ;;  %v10787_v14 = vmul.f32 %v12035_v53, %v3531_v55 }
 0x4a1   : > { %v2483_v31 = vpop.xlane.xlu1 %2482  ;;  %4573 = vperm.xlu1 %7195, %v3961_v58   ;;  %v2489_v25 = vpop.xlane.xlu0 %2488  ;;  %vm4422_vm12 = vcmp.eq.s32.totalorder %v9713_v20, %v12037_v29  ;;  %v10794_v1 = vmul.f32 %v12035_v53, %v10672_v8  ;;  %v10807_v62 = vmul.f32 %v12040_v17, %v11698_v28  ;;  %vm4423_vm14 = vcmp.eq.s32.totalorder %v9866_v46, %v12037_v29  ;;  %v7412_v53 = vld [vmem:[#allocation2 + $0x30] sm:$0xff]  }
 0x4a2   : > { %7659 = vrsqrt.f32 %v2520_v11  ;;  %v2507_v59 = vmul.f32 0.03125, %v2483_v31  ;;  %v2510_v57 = vmul.f32 0.03125, %v2489_v25  ;;  %v12041_v11 = vld [vmem:[#allocation68_spill] sm:$0xff]  ;;  %vm3580_vm1 = vcmp.le.f32.partialorder %v12017_v51, 15.0  ;;  %v7418_v25 = vld [vmem:[#allocation2 + $0x18] sm:$0xff]  }
 0x4a3   : > { %4578 = vperm.xlu0 %7196, %v3962_v22   ;;  %v7650_v54 = vpop.eup %7649  ;;  %7661 = vrsqrt.f32 %v2521_v30  ;;  %vm4424_vm2 = vcmp.eq.s32.totalorder %v9713_v20, %v12041_v11  ;;  %vm4425_vm11 = vcmp.eq.s32.totalorder %v9866_v46, %v12041_v11  ;;  %vm3612_vm9 = vcmp.ge.f32.partialorder %v12017_v51, -1.0 }
 0x4a4   : > { %v7652_v9 = vpop.eup %7651  ;;  %v2523_v24 = vadd.f32 1e-05, %v2507_v59  ;;  %v2526_v0 = vadd.f32 1e-05, %v2510_v57  ;;  %v2548_v31 = vmul.f32 %v7650_v54, %v9967_v6  ;;  %v10832_v6 = vsel %vm4422_vm12, 1.0, %v11898_v32  ;;  %v12045_v57 = vld [vmem:[#allocation82_spill] sm:$0xff] }
 0x4a5   : > { %v2485_v30 = vpop.xlane.xlu1 %2484  ;;  %7308 = vrot.lane.b32.xlu1 %v10587_v49, %s7729_s0  ;;  %v2487_v58 = vpop.xlane.xlu0 %2486  ;;  %12044 = vst [vmem:[#allocation54_spill] sm:$0xff] %v10832_v6  ;;  %v2550_v54 = vmul.f32 %v7652_v9, %v12045_v57  ;;  %v10851_v9 = vld [vmem:[%s11554_s9] ss:$0 sm:$0xff]  ;;  %v10884_v57 = vsel %vm4425_vm11, 1.0, %v11898_v32  ;;  %vm3628_vm3 = vcmp.le.f32.partialorder %v12017_v51, 14.0  ;;  %vm3804_vm12 = vcmp.ne.s32.totalorder %v12054_v12, 0 }
 0x4a6   : > { %7663 = vrsqrt.f32 %v2523_v24  ;;  %v2508_v22 = vmul.f32 0.03125, %v2485_v30  ;;  %v2509_v59 = vmul.f32 0.03125, %v2487_v58  ;;  %12053 = vst [vmem:[#allocation72_spill] sm:$0xff] %v10884_v57 }
 0x4a7   : > { %7313 = vrot.lane.b32.xlu0 %v10591_v15, %s7729_s0  ;;  %v7654_v49 = vpop.eup %7653  ;;  %7665 = vrsqrt.f32 %v2526_v0  ;;  %v10845_v15 = vmul.f32 %v12040_v17, %v10685_v13  ;;  %v10873_v0 = vsel %vm4423_vm14, 1.0, %v11898_v32 }
 0x4a8   : > { %v2551_v24 = vmul.f32 %v7654_v49, %v9975_v34  ;;  %v2524_v30 = vadd.f32 1e-05, %v2508_v22  ;;  %v2525_v58 = vadd.f32 1e-05, %v2509_v59  ;;  %v10867_v34 = vsel %vm4424_vm2, 1.0, %v11898_v32  ;;  %12051 = vst [vmem:[#allocation70_spill] sm:$0xff] %v10873_v0 }
 0x4a9   : > { %12050 = vst [vmem:[#allocation74_spill] sm:$0xff] %v10867_v34  ;;  %v2491_v17 = vpop.xlane.xlu1 %2490  ;;  %4694 = vperm.xlu1 %7195, %v4137_v44   ;;  %v2497_v36 = vpop.xlane.xlu0 %2496  ;;  %v2571_v22 = vmul.f32 %v10851_v9, %v2548_v31  ;;  %v12052_v49 = vld [vmem:[#allocation45_spill] sm:$0xff]  ;;  %v10890_v31 = vpack.i.bf16 %v10867_v34, %v10832_v6  ;;  %v2573_v59 = vmul.f32 %v10851_v9, %v2550_v54 }
 0x4aa   : > { %vm3803_vm4 = vcmp.ne.s32.totalorder %v12052_v49, 0  ;;  %7667 = vrsqrt.f32 %v2524_v30  ;;  %v2511_v29 = vmul.f32 0.03125, %v2491_v17  ;;  %v2514_v28 = vmul.f32 0.03125, %v2497_v36 }
 0x4ab   : > { %4699 = vperm.xlu0 %7196, %v4138_v43   ;;  %v7656_v44 = vpop.eup %7655  ;;  %7669 = vrsqrt.f32 %v2525_v58  ;;  %v2574_v11 = vmul.f32 %v10851_v9, %v2551_v24  ;;  %v10897_v43 = vpack.i.bf16 %v10884_v57, %v10873_v0  ;;  %v10903_v58 = vld [vmem:[%s11555_s10] ss:$0 sm:$0xff]  ;;  %v12055_v24 = vld [vmem:[#allocation49_spill] sm:$0xff] }
 0x4ac   : > { %v7658_v37 = vpop.eup %7657  ;;  %v2527_v30 = vadd.f32 1e-05, %v2511_v29  ;;  %v2549_v17 = vmul.f32 %v7656_v44, %v9982_v7  ;;  %v10911_v36 = vmul.f32 %v12055_v24, %v3531_v55  ;;  %v2530_v29 = vadd.f32 1e-05, %v2514_v28 }
 0x4ad   : > { %7318 = vrot.lane.b32.xlu1 %v10890_v31, %s7724_s26  ;;  %v2493_v57 = vpop.xlane.xlu1 %2492  ;;  %v2495_v7 = vpop.xlane.xlu0 %2494  ;;  %v2594_v44 = vadd.f32 %v10903_v58, %v2571_v22  ;;  %v2597_v34 = vadd.f32 %v10903_v58, %v2574_v11  ;;  %v2596_v55 = vadd.f32 %v10903_v58, %v2573_v59  ;;  %v2554_v28 = vmul.f32 %v7658_v37, %v9986_v23 }
 0x4ae   : > { %v2512_v0 = vmul.f32 0.03125, %v2493_v57  ;;  %v2513_v6 = vmul.f32 0.03125, %v2495_v7  ;;  %v2572_v54 = vmul.f32 %v10851_v9, %v2549_v17  ;;  %7671 = vrsqrt.f32 %v2527_v30 }
 0x4af   : > { %7323 = vrot.lane.b32.xlu0 %v10897_v43, %s7724_s26  ;;  %v7660_v40 = vpop.eup %7659  ;;  %7673 = vrsqrt.f32 %v2530_v29  ;;  %v12056_v57 = vsel %vm10759_vm10, %v10769_v10, 0.0  ;;  %v2610_v7 = vmax.f32 %v2594_v44, 0.0  ;;  %v2613_v30 = vmax.f32 %v2597_v34, 0.0  ;;  %vm10940_vm10 = vmand %vm3564_vm0, %vm3580_vm1  ;;  %v12063_v44 = vld [vmem:[#allocation50_spill] sm:$0xff] }
 0x4b0   : > { %v7662_v26 = vpop.eup %7661  ;;  %v2528_v4 = vadd.f32 1e-05, %v2512_v0  ;;  %v2529_v38 = vadd.f32 1e-05, %v2513_v6  ;;  %v2595_v22 = vadd.f32 %v10903_v58, %v2572_v54  ;;  %v2552_v11 = vmul.f32 %v7660_v40, %v10003_v16  ;;  %vm10988_vm2 = vmand %vm10940_vm10, %vm3804_vm12 }
 0x4b1   : > { %4815 = vperm.xlu1 %7195, %v12056_v57   ;;  %v2499_v17 = vpop.xlane.xlu1 %2498  ;;  %v2553_v59 = vmul.f32 %v7662_v26, %v9997_v45  ;;  %v12057_v37 = vsel %vm10715_vm6, %v10753_v19, 0.0  ;;  %v2612_v33 = vmax.f32 %v2596_v55, 0.0  ;;  %v2577_v0 = vmul.f32 %v10851_v9, %v2554_v28  ;;  %vm10950_vm6 = vmand %vm10800_vm13, %vm3803_vm4  ;;  %v7416_v45 = vld [vmem:[#allocation2 + $0x20] sm:$0xff]  }
 0x4b2   : > { %7675 = vrsqrt.f32 %v2528_v4  ;;  %v2515_v23 = vmul.f32 0.03125, %v2499_v17  ;;  %v2611_v6 = vmax.f32 %v2595_v22, 0.0  ;;  %v2575_v16 = vmul.f32 %v10851_v9, %v2552_v11  ;;  %vm10972_vm13 = vmand %vm3612_vm9, %vm3628_vm3  ;;  %v7410_v11 = vld [vmem:[#allocation2 + $0x38] sm:$0xff]  }
 0x4b3   : > { %4820 = vperm.xlu0 %7196, %v12057_v37   ;;  %v7664_v40 = vpop.eup %7663  ;;  %7677 = vrsqrt.f32 %v2529_v38  ;;  %v2576_v10 = vmul.f32 %v10851_v9, %v2553_v59  ;;  %v10956_v54 = vmul.f32 %v12055_v24, %v10672_v8  ;;  %v12062_v29 = vsub.f32 1.0, %v10685_v13  ;;  %v12069_v59 = vld [vmem:[#allocation71_spill] sm:$0xff]  ;;  %vm11001_vm0 = vmand %vm10972_vm13, %vm3804_vm12 }
 0x4b4   : > { %v7666_v34 = vpop.eup %7665  ;;  %v2531_v26 = vadd.f32 1e-05, %v2515_v23  ;;  %v2626_v4 = vpack.c.bf16 %v2611_v6, %v2610_v7  ;;  %v2598_v41 = vadd.f32 %v10903_v58, %v2575_v16  ;;  %v2555_v38 = vmul.f32 %v7664_v40, %v10010_v2  ;;  %v12072_v40 = vld [vmem:[#allocation48_spill] sm:$0xff]  ;;  %vm11013_vm9 = vmand %vm10839_vm8, %vm3803_vm4 }
 0x4b5   : > { %v3900_v55 = vmul.f32 %v12063_v44, %v12062_v29  ;;  %7328 = vrot.lane.b32.xlu1 %v10890_v31, %s7728_s22  ;;  %v10963_v2 = vpop.permute.xlu1 %5428  ;;  %v2627_v52 = vpack.c.bf16 %v2613_v30, %v2612_v33  ;;  %v2599_v22 = vadd.f32 %v10903_v58, %v2576_v10  ;;  %v3948_v24 = vmul.f32 %v12063_v44, %v10685_v13  ;;  %v12068_v13 = vld [vmem:[#allocation69_spill] sm:$0xff] }
 0x4b6   : > { %v10965_v28 = vpop.permute.xlu0 %5433  ;;  %6979 = vmatprep.mubr.bf16.mxu1 %v2626_v4  ;;  %v3915_v57 = vsel %vm10950_vm6, %v10911_v36, 0.0  ;;  %v2614_v17 = vmax.f32 %v2598_v41, 0.0  ;;  %v2578_v7 = vmul.f32 %v10851_v9, %v2555_v38  ;;  %vm4428_vm14 = vcmp.eq.s32.totalorder %v9713_v20, %v12068_v13  ;;  %v7411_v36 = vld [vmem:[#allocation2 + $0x70] sm:$0xff]   ;;  %v7413_v38 = vld [vmem:[#allocation2 + $0x68] sm:$0xff]  }
 0x4b7   : > { %7333 = vrot.lane.b32.xlu0 %v10897_v43, %s7728_s22  ;;  %v7668_v51 = vpop.eup %7667  ;;  %vm4426_vm11 = vcmp.eq.s32.totalorder %v9713_v20, %v12069_v59  ;;  %6980 = vmatmul.mubr.bf16.vlgmr.msra.gmra.mxu1 %v2627_v52  ;;  %v2615_v23 = vmax.f32 %v2599_v22, 0.0  ;;  %v2558_v37 = vmul.f32 %v7666_v34, %v10014_v63  ;;  %vm4028_vm1 = vcmp.ne.s32.totalorder %v12072_v40, 0 }
 0x4b8   : > { %v7670_v6 = vpop.eup %7669  ;;  %7679 = vrsqrt.f32 %v2531_v26  ;;  %6744 = vmatpush3.bf16.msra.mxu1 %v7410_v11  ;;  %v2600_v33 = vadd.f32 %v10903_v58, %v2577_v0  ;;  %v2601_v10 = vadd.f32 %v10903_v58, %v2578_v7  ;;  %v2556_v4 = vmul.f32 %v7668_v51, %v10031_v50  ;;  %vm11090_vm8 = vmand %vm10940_vm10, %vm4028_vm1 }
 0x4b9   : > { %vm4427_vm3 = vcmp.eq.s32.totalorder %v9866_v46, %v12069_v59  ;;  %6745 = vmatprep.subr.bf16.mxu1 %v7411_v36  ;;  %4478 = vperm.xlu1 %7195, %v3915_v57   ;;  %v7199_v12 = vpop.permute.xlu1 %7198  ;;  %v3916_v0 = vsel %vm10988_vm2, %v3900_v55, 0.0  ;;  %v2628_v26 = vpack.c.bf16 %v2615_v23, %v2614_v17  ;;  %v2557_v50 = vmul.f32 %v7670_v6, %v10025_v61 }
 0x4ba   : > { %v7204_v34 = vpop.permute.xlu0 %7203  ;;  %vm4429_vm12 = vcmp.eq.s32.totalorder %v9866_v46, %v12068_v13  ;;  %v3963_v49 = vsel %vm11013_vm9, %v10956_v54, 0.0  ;;  %v3964_v41 = vsel %vm11001_vm0, %v3948_v24, 0.0  ;;  %v2617_v19 = vmax.f32 %v2601_v10, 0.0  ;;  %v7415_v13 = vld [vmem:[#allocation2 + $0x60] sm:$0xff]  }
 0x4bb   : > { %4483 = vperm.xlu0 %7196, %v3916_v0   ;;  %6983 = vmatprep.mubr.bf16.mxu1 %v2628_v26  ;;  %v2579_v29 = vmul.f32 %v10851_v9, %v2556_v4  ;;  %v2580_v44 = vmul.f32 %v10851_v9, %v2557_v50  ;;  %v2581_v61 = vmul.f32 %v10851_v9, %v2558_v37  ;;  %v7672_v55 = vpop.eup %7671  ;;  %v11036_v52 = vsel %vm4428_vm14, 1.0, %v11898_v32  ;;  %v12075_v0 = vld [vmem:[#allocation85_spill] sm:$0xff] }
 0x4bc   : > { %v11042_v54 = vsel %vm4426_vm11, 1.0, %v11898_v32  ;;  %v11048_v22 = vsel %vm4427_vm3, 1.0, %v11898_v32  ;;  %6746 = vmatpush3.bf16.msra.mxu1 %v7412_v53  ;;  %v2616_v24 = vmax.f32 %v2600_v33, 0.0  ;;  %v7201_v11 = vunpack.i.h.bf16 %v7199_v12  ;;  %v7674_v36 = vpop.eup %7673  ;;  %v7414_v33 = vld [vmem:[#allocation2 + $0x28] sm:$0xff]  }
 0x4bd   : > { %v7200_v57 = vunpack.i.l.bf16 %v7199_v12  ;;  %v7206_v17 = vunpack.i.h.bf16 %v7204_v34  ;;  %v7205_v7 = vunpack.i.l.bf16 %v7204_v34  ;;  %6747 = vmatprep.subr.bf16.mxu1 %v7413_v38  ;;  %v11050_v51 = vpop.permute.xlu1 %5548  ;;  %v11058_v23 = vsel %vm4429_vm12, 1.0, %v11898_v32  ;;  %4583 = vperm.xlu1 %7195, %v3963_v49  }
 0x4be   : > { %v11052_v30 = vpop.permute.xlu0 %5553  ;;  %v2629_v59 = vpack.c.bf16 %v2617_v19, %v2616_v24  ;;  %v2602_v37 = vadd.f32 %v10903_v58, %v2579_v29  ;;  %v2603_v6 = vadd.f32 %v10903_v58, %v2580_v44  ;;  %v11063_v10 = vadd.f32 %v10903_v58, %v2581_v61  ;;  %v12076_v19 = vld [vmem:[#allocation84_spill] sm:$0xff] }
 0x4bf   : > { %4588 = vperm.xlu0 %7196, %v3964_v41   ;;  %v7676_v16 = vpop.eup %7675  ;;  %v11067_v4 = vpack.i.bf16 %v11036_v52, %v11042_v54  ;;  %v11071_v46 = vpack.i.bf16 %v11058_v23, %v11048_v22  ;;  %v2559_v34 = vmul.f32 %v7672_v55, %v10038_v18  ;;  %v5275_v50 = vsel %vm4534_vm15, %v7201_v11, %v7206_v17 }
 0x4c0   : > { %v7678_v32 = vpop.eup %7677  ;;  %6984 = vmatmul.mubr.bf16.gmra.mxu1 %v2629_v59  ;;  %v2618_v63 = vmax.f32 %v2602_v37, 0.0  ;;  %v2619_v12 = vmax.f32 %v2603_v6, 0.0  ;;  %v2560_v26 = vmul.f32 %v7676_v16, %v12075_v0  ;;  %v5283_v53 = vsel %vm4534_vm15, %v7206_v17, %v7201_v11  ;;  %v12080_v59 = vld [vmem:[#allocation76_spill] sm:$0xff] }
 0x4c1   : > { %v5274_v49 = vsel %vm4534_vm15, %v7200_v57, %v7205_v7  ;;  %6748 = vmatpush3.bf16.msra.mxu1 %v7414_v33  ;;  %v7209_v41 = vpop.permute.xlu1 %7208  ;;  %v2561_v29 = vmul.f32 %v7678_v32, %v12076_v19  ;;  %v5282_v44 = vsel %vm4534_vm15, %v7205_v7, %v7200_v57  ;;  %7338 = vrot.lane.b32.xlu1 %v10890_v31, %s7729_s0  ;;  %v12079_v7 = vld [vmem:[#allocation87_spill] sm:$0xff]  ;;  %v12082_v0 = vld [vmem:[#allocation88_spill] sm:$0xff]  ;;  %v7417_v19 = vld [vmem:[#allocation2 + $0x58] sm:$0xff]   ;;  %vm12086_vm4 = vcmp.lt.s32.totalorder %v9713_v20, 16 }
 0x4c2   : > { %v7214_v38 = vpop.permute.xlu0 %7213  ;;  %6749 = vmatprep.subr.bf16.mxu1 %v7415_v13  ;;  %v7211_v18 = vunpack.i.h.bf16 %v7209_v41  ;;  %v7210_v61 = vunpack.i.l.bf16 %v7209_v41  ;;  %v2630_v57 = vpack.c.bf16 %v2619_v12, %v2618_v63  ;;  %v2582_v17 = vmul.f32 %v10851_v9, %v2559_v34  ;;  %v12081_v33 = vld [vmem:[#allocation83_spill] sm:$0xff]  ;;  %v12083_v41 = vld [vmem:[#allocation78_spill] sm:$0xff]  ;;  %vm12088_vm10 = vmmov %vm12086_vm4 }
 0x4c3   : > { %v7215_v55 = vunpack.i.l.bf16 %v7214_v38  ;;  %v7216_v11 = vunpack.i.h.bf16 %v7214_v38  ;;  %7343 = vrot.lane.b32.xlu0 %v10897_v43, %s7729_s0  ;;  %v2583_v31 = vmul.f32 %v10851_v9, %v2560_v26  ;;  %v5230_v37 = vmul.f32 %v12080_v59, %v12079_v7  ;;  %v12084_v12 = vld [vmem:[#allocation79_spill] sm:$0xff]  ;;  %v12085_v26 = vld [vmem:[#allocation77_spill] sm:$0xff]  ;;  %vm12091_vm6 = vmmov %vm12086_vm4 }
 0x4c4   : > { %v5231_v6 = vmul.f32 %v12080_v59, %v10161_v48  ;;  %v2584_v16 = vmul.f32 %v10851_v9, %v2561_v29  ;;  %v2562_v32 = vmul.f32 %v7674_v36, %v12081_v33  ;;  %v5232_v43 = vmul.f32 %v12083_v41, %v12082_v0  ;;  %6987 = vmatprep.mubr.bf16.mxu1 %v2630_v57  ;;  %v7419_v0 = vld [vmem:[#allocation2 + $0x50] sm:$0xff]  }
 0x4c5   : > { %v7680_v13 = vpop.eup %7679  ;;  %v5233_v63 = vmul.f32 %v12083_v41, %v10167_v47  ;;  %v5336_v34 = vmul.f32 %v12084_v12, %v5283_v53  ;;  %v5335_v38 = vmul.f32 %v12085_v26, %v5274_v49  ;;  %v11110_v7 = vpop.permute.xlu1 %5214  ;;  %v5337_v29 = vmul.f32 %v12084_v12, %v5275_v50  ;;  %6750 = vmatpush3.bf16.msra.mxu1 %v7416_v45  ;;  %v12092_v45 = vld [vmem:[#allocation86_spill] sm:$0xff] }
 0x4c6   : > { %v11112_v48 = vpop.permute.xlu0 %5219  ;;  %v5334_v36 = vmul.f32 %v12085_v26, %v5282_v44  ;;  %v5394_v59 = vsel %vm12086_vm4, %v7210_v61, %v7215_v55  ;;  %v12087_v47 = vsel %vm10818_vm7, %v10787_v14, 0.0  ;;  %v4140_v53 = vsel %vm11090_vm8, %v10807_v62, 0.0  ;;  %6751 = vmatprep.subr.bf16.mxu1 %v7417_v19  ;;  %vm11134_vm7 = vmand %vm10972_vm13, %vm4028_vm1  ;;  %v7420_v19 = vld [vmem:[#allocation2 + $0x10] sm:$0xff]  }
 0x4c7   : > { %4704 = vperm.xlu1 %7195, %v12087_v47   ;;  %v5395_v49 = vsel %vm12088_vm10, %v7211_v18, %v7216_v11  ;;  %4709 = vperm.xlu0 %7196, %v4140_v53   ;;  %v2605_v50 = vadd.f32 %v10903_v58, %v2582_v17  ;;  %v2620_v44 = vmax.f32 %v11063_v10, 0.0  ;;  %v2606_v57 = vadd.f32 %v10903_v58, %v2583_v31  ;;  %vm12093_vm13 = vmmov %vm12086_vm4  ;;  %v7421_v53 = vld [vmem:[#allocation2 + $0x48] sm:$0xff]  }
 0x4c8   : > { %v5402_v62 = vsel %vm12091_vm6, %v7215_v55, %v7210_v61  ;;  %v2607_v24 = vadd.f32 %v10903_v58, %v2584_v16  ;;  %v2563_v17 = vmul.f32 %v7680_v13, %v12092_v45  ;;  %v2585_v10 = vmul.f32 %v10851_v9, %v2562_v32  ;;  %vm12100_vm1 = vmmov %vm12086_vm4 }
 0x4c9   : > { %v5351_v33 = vadd.f32 %v5335_v38, %v5231_v6  ;;  %v5455_v31 = vmul.f32 %v10963_v2, %v5394_v59  ;;  %v2621_v40 = vmax.f32 %v2605_v50, 0.0  ;;  %v11144_v8 = vpop.permute.xlu1 %5318  ;;  %v2622_v12 = vmax.f32 %v2606_v57, 0.0  ;;  %6752 = vmatpush3.bf16.msra.mxu1 %v7418_v25  ;;  %vm12101_vm9 = vmmov %vm12100_vm1 }
 0x4ca   : > { %v11146_v41 = vpop.permute.xlu0 %5323  ;;  %v5403_v61 = vsel %vm12093_vm13, %v7216_v11, %v7211_v18  ;;  %v5457_v55 = vmul.f32 %v10965_v28, %v5395_v49  ;;  %v2623_v16 = vmax.f32 %v2607_v24, 0.0  ;;  %v2586_v6 = vmul.f32 %v10851_v9, %v2563_v17  ;;  %6753 = vmatprep.subr.bf16.mxu1 %v7419_v0  ;;  %vm12102_vm3 = vmmov %vm12100_vm1 }
 0x4cb   : > { %7348 = vrot.lane.b32.xlu1 %v11067_v4, %s7724_s26  ;;  %v5454_v32 = vmul.f32 %v10963_v2, %v5402_v62  ;;  %v2631_v13 = vpack.c.bf16 %v2621_v40, %v2620_v44  ;;  %7353 = vrot.lane.b32.xlu0 %v11071_v46, %s7724_s26  ;;  %v4188_v18 = vsel %vm11134_vm7, %v10845_v15, 0.0  ;;  %v2608_v11 = vadd.f32 %v10903_v58, %v2585_v10  ;;  %v7423_v10 = vld [vmem:[#allocation2 + $0x40] sm:$0xff]   ;;  %vm12107_vm7 = vmmov %vm12100_vm1 }
 0x4cc   : > { %v5352_v26 = vadd.f32 %v5336_v34, %v5232_v43  ;;  %v2632_v38 = vpack.c.bf16 %v2623_v16, %v2622_v12  ;;  %v2609_v59 = vadd.f32 %v10903_v58, %v2586_v6  ;;  %v5353_v47 = vadd.f32 %v5337_v29, %v5233_v63  ;;  %vm12108_vm6 = vmmov %vm12100_vm1 }
 0x4cd   : > { %v5350_v9 = vadd.f32 %v5334_v36, %v5230_v37  ;;  %v5456_v2 = vmul.f32 %v10965_v28, %v5403_v61  ;;  %6988 = vmatmul.mubr.bf16.gmra.mxu1 %v2631_v13  ;;  %v7219_v49 = vpop.permute.xlu1 %7218  ;;  %v5471_v44 = vadd.f32 %v5455_v31, %v5351_v33  ;;  %v12094_v58 = vsel %vm10859_vm5, %v10794_v1, 0.0  ;;  %vm12099_vm5 = vmmov %vm12086_vm4 }
 0x4ce   : > { %v7224_v50 = vpop.permute.xlu0 %7223  ;;  %6991 = vmatprep.mubr.bf16.mxu1 %v2632_v38  ;;  %6754 = vmatpush3.bf16.msra.mxu1 %v7420_v19  ;;  %v7221_v57 = vunpack.i.h.bf16 %v7219_v49  ;;  %v7220_v15 = vunpack.i.l.bf16 %v7219_v49  ;;  %v2624_v37 = vmax.f32 %v2608_v11, 0.0  ;;  %v2625_v43 = vmax.f32 %v2609_v59, 0.0  ;;  %vm12109_vm13 = vmmov %vm12100_vm1 }
 0x4cf   : > { %v7226_v14 = vunpack.i.h.bf16 %v7224_v50  ;;  %v7225_v62 = vunpack.i.l.bf16 %v7224_v50  ;;  %6755 = vmatprep.subr.bf16.mxu1 %v7421_v53  ;;  %4825 = vperm.xlu1 %7195, %v12094_v58   ;;  %v5473_v28 = vadd.f32 %v5457_v55, %v5353_v47  ;;  %v5470_v63 = vadd.f32 %v5454_v32, %v5350_v9 }
 0x4d0   : > { %vm12095_vm2 = vcmp.lt.s32.totalorder %v9713_v20, 17  ;;  %4830 = vperm.xlu0 %7196, %v4188_v18   ;;  %v2633_v40 = vpack.c.bf16 %v2625_v43, %v2624_v37  ;;  %v5472_v0 = vadd.f32 %v5456_v2, %v5352_v26 }
 0x4d1   : > { %v5515_v34 = vsel %vm12095_vm2, %v7221_v57, %v7226_v14  ;;  %vm12096_vm14 = vmmov %vm12095_vm2  ;;  %v5439_v33 = vpop.permute.xlu1 %5438 }
 0x4d2   : > { %v5523_v29 = vsel %vm12096_vm14, %v7226_v14, %v7221_v57  ;;  %vm12097_vm11 = vmmov %vm12095_vm2  ;;  %v5577_v24 = vmul.f32 %v11052_v30, %v5515_v34  ;;  %v5444_v31 = vpop.permute.xlu0 %5443  ;;  %6756 = vmatpush3.bf16.msra.mxu1 %v7422_v21  ;;  %v5234_v57 = vmul.f32 %v11110_v7, %v10361_v3  ;;  %v5237_v14 = vmul.f32 %v11112_v48, %v10358_v5 }
 0x4d3   : > { %v5514_v36 = vsel %vm12097_vm11, %v7220_v15, %v7225_v62  ;;  %vm12098_vm0 = vmmov %vm12095_vm2  ;;  %v5576_v1 = vmul.f32 %v11052_v30, %v5523_v29  ;;  %6757 = vmatprep.subr.bf16.mxu1 %v7423_v10  ;;  %7358 = vrot.lane.b32.xlu1 %v11067_v4, %s7728_s22  ;;  %v7424_v30 = vld [vmem:[#allocation2] sm:$0xff]  }
 0x4d4   : > { %v5522_v25 = vsel %vm12098_vm0, %v7225_v62, %v7220_v15  ;;  %v5575_v17 = vmul.f32 %v11050_v51, %v5514_v36  ;;  %v5593_v61 = vadd.f32 %v5577_v24, %v5473_v28  ;;  %7363 = vrot.lane.b32.xlu0 %v11071_v46, %s7728_s22  ;;  %v5235_v15 = vmul.f32 %v11110_v7, %v10364_v56  ;;  %vm12103_vm12 = vmmov %vm12098_vm0 }
 0x4d5   : > { %v5574_v45 = vmul.f32 %v11050_v51, %v5522_v25  ;;  %v5592_v16 = vadd.f32 %v5576_v1, %v5472_v0  ;;  %6992 = vmatmul.mubr.bf16.gmra.mxu1 %v2633_v40  ;;  %v7229_v51 = vpop.permute.xlu1 %7228  ;;  %vm12104_vm8 = vmmov %vm12098_vm0 }
 0x4d6   : > { %v5591_v12 = vadd.f32 %v5575_v17, %v5471_v44  ;;  %v7234_v6 = vpop.permute.xlu0 %7233  ;;  %6758 = vmatpush3.bf16.msra.mxu1 %v7424_v30  ;;  %v7231_v13 = vunpack.i.h.bf16 %v7229_v51  ;;  %v7230_v18 = vunpack.i.l.bf16 %v7229_v51  ;;  %vm12105_vm4 = vmmov %vm12098_vm0 }
 0x4d7   : > { %v5590_v55 = vadd.f32 %v5574_v45, %v5470_v63  ;;  %v7236_v11 = vunpack.i.h.bf16 %v7234_v6  ;;  %v7235_v26 = vunpack.i.l.bf16 %v7234_v6  ;;  %7368 = vrot.lane.b32.xlu1 %v11067_v4, %s7729_s0  ;;  %vm12106_vm10 = vmmov %vm12098_vm0 }
 0x4d8   : > { %v5603_v32 = vpack.c.bf16 %v5593_v61, %v5591_v12  ;;  %7373 = vrot.lane.b32.xlu0 %v11071_v46, %s7729_s0  ;;  %v5236_v46 = vmul.f32 %v11112_v48, %v10355_v39  ;;  %vm12110_vm2 = vmmov %vm12100_vm1 }
 0x4d9   : > { %v5602_v38 = vpack.c.bf16 %v5592_v16, %v5590_v55  ;;  %v5277_v19 = vsel %vm4534_vm15, %v7231_v13, %v7236_v11  ;;  %v5285_v59 = vsel %vm4534_vm15, %v7236_v11, %v7231_v13  ;;  %v5276_v47 = vsel %vm4534_vm15, %v7230_v18, %v7235_v26  ;;  %v5559_v2 = vpop.permute.xlu1 %5558  ;;  %vm12111_vm14 = vmmov %vm12098_vm0 }
 0x4da   : > { %5782 = vmatprep.mubr.bf16.mxu0 %v5603_v32  ;;  %v5284_v9 = vsel %vm4534_vm15, %v7235_v26, %v7230_v18  ;;  %v5564_v4 = vpop.permute.xlu0 %5563  ;;  %v5340_v53 = vmul.f32 %v11146_v41, %v5285_v59  ;;  %v5341_v49 = vmul.f32 %v11146_v41, %v5277_v19  ;;  %v5339_v44 = vmul.f32 %v11144_v8, %v5276_v47  ;;  %vm12112_vm11 = vmmov %vm12098_vm0 }
 0x4db   : > { %5783 = vmatmul.mubr.bf16.gmra.mxu0 %v5602_v38  ;;  %v5338_v50 = vmul.f32 %v11144_v8, %v5284_v9 }
 0x4dc   : > { %v5356_v63 = vadd.f32 %v5340_v53, %v5236_v46  ;;  %v5357_v8 = vadd.f32 %v5341_v49, %v5237_v14  ;;  %v5355_v29 = vadd.f32 %v5339_v44, %v5235_v15 }
 0x4dd   : > { %v7239_v62 = vpop.permute.xlu1 %7238  ;;  %v5354_v34 = vadd.f32 %v5338_v50, %v5234_v57 }
 0x4de   : > { %v7244_v58 = vpop.permute.xlu0 %7243  ;;  %v7241_v37 = vunpack.i.h.bf16 %v7239_v62  ;;  %v7240_v41 = vunpack.i.l.bf16 %v7239_v62 }
 0x4df   : > { %v7246_v43 = vunpack.i.h.bf16 %v7244_v58  ;;  %v7245_v28 = vunpack.i.l.bf16 %v7244_v58 }
 0x4e1   : > { %v5397_v3 = vsel %vm12099_vm5, %v7241_v37, %v7246_v43  ;;  %v5405_v56 = vsel %vm12100_vm1, %v7246_v43, %v7241_v37  ;;  %v5396_v39 = vsel %vm12101_vm9, %v7240_v41, %v7245_v28  ;;  %v5404_v5 = vsel %vm12102_vm3, %v7245_v28, %v7240_v41  ;;  %v7249_v21 = vpop.permute.xlu1 %7248  ;;  %vm12113_vm5 = vmmov %vm12098_vm0 }
 0x4e2   : > { %v5460_v7 = vmul.f32 %v5444_v31, %v5405_v56  ;;  %v5461_v48 = vmul.f32 %v5444_v31, %v5397_v3  ;;  %v5458_v36 = vmul.f32 %v5439_v33, %v5404_v5  ;;  %v5459_v25 = vmul.f32 %v5439_v33, %v5396_v39  ;;  %v7254_v1 = vpop.permute.xlu0 %7253  ;;  %vm12114_vm9 = vmmov %vm12100_vm1 }
 0x4e3   : > { %v7251_v24 = vunpack.i.h.bf16 %v7249_v21  ;;  %v7250_v45 = vunpack.i.l.bf16 %v7249_v21  ;;  %v7256_v17 = vunpack.i.h.bf16 %v7254_v1  ;;  %v7255_v10 = vunpack.i.l.bf16 %v7254_v1  ;;  %vm12115_vm3 = vmmov %vm12100_vm1 }
 0x4e4   : > { %v5475_v40 = vadd.f32 %v5459_v25, %v5355_v29  ;;  %v5477_v0 = vadd.f32 %v5461_v48, %v5357_v8  ;;  %v5474_v12 = vadd.f32 %v5458_v36, %v5354_v34  ;;  %v5476_v61 = vadd.f32 %v5460_v7, %v5356_v63 }
 0x4e5   : > { %v5517_v55 = vsel %vm12103_vm12, %v7251_v24, %v7256_v17  ;;  %v5525_v30 = vsel %vm12104_vm8, %v7256_v17, %v7251_v24  ;;  %v5516_v31 = vsel %vm12105_vm4, %v7250_v45, %v7255_v10  ;;  %v5524_v33 = vsel %vm12106_vm10, %v7255_v10, %v7250_v45  ;;  %v4449_v13 = vpop.permute.xlu1 %4448  ;;  %vm12116_vm12 = vmmov %vm12100_vm1 }
 0x4e6   : > { %v5580_v16 = vmul.f32 %v5564_v4, %v5525_v30  ;;  %v5581_v51 = vmul.f32 %v5564_v4, %v5517_v55  ;;  %v5578_v6 = vmul.f32 %v5559_v2, %v5524_v33  ;;  %v5579_v32 = vmul.f32 %v5559_v2, %v5516_v31  ;;  %v4454_v18 = vpop.permute.xlu0 %4453  ;;  %vm12121_vm8 = vmmov %vm12098_vm0 }
 0x4e7   : > { %v4486_v21 = vmul.f32 %v4449_v13, %v10469_v35  ;;  %vm12122_vm4 = vmmov %vm12098_vm0 }
 0x4e8   : > { %v5595_v11 = vadd.f32 %v5579_v32, %v5475_v40  ;;  %v5597_v26 = vadd.f32 %v5581_v51, %v5477_v0  ;;  %v5594_v38 = vadd.f32 %v5578_v6, %v5474_v12  ;;  %v5596_v19 = vadd.f32 %v5580_v16, %v5476_v61  ;;  %vm12123_vm10 = vmmov %vm12098_vm0 }
 0x4e9   : > { %v4554_v59 = vpop.permute.xlu1 %4553  ;;  %v4487_v40 = vmul.f32 %v4449_v13, %v10472_v42  ;;  %v4488_v0 = vmul.f32 %v4454_v18, %v10463_v60  ;;  %v4489_v12 = vmul.f32 %v4454_v18, %v10466_v27 }
 0x4ea   : > { %v4559_v47 = vpop.permute.xlu0 %4558  ;;  %v5605_v9 = vpack.c.bf16 %v5597_v26, %v5595_v11  ;;  %v5604_v53 = vpack.c.bf16 %v5596_v19, %v5594_v38 }
 0x4ec   : > { %5790 = vmatprep.mubr.bf16.mxu0 %v5605_v9 }
 0x4ed   : > { %5791 = vmatmul.mubr.bf16.gmra.mxu0 %v5604_v53  ;;  %v4675_v49 = vpop.permute.xlu1 %4674 }
 0x4ee   : > { %v4680_v50 = vpop.permute.xlu0 %4679 }
 0x4f1   : > { %v7259_v44 = vpop.permute.xlu1 %7258 }
 0x4f2   : > { %v7264_v57 = vpop.permute.xlu0 %7263  ;;  %v7261_v2 = vunpack.i.h.bf16 %v7259_v44  ;;  %v7260_v58 = vunpack.i.l.bf16 %v7259_v44 }
 0x4f3   : > { %v7266_v46 = vunpack.i.h.bf16 %v7264_v57  ;;  %v7265_v37 = vunpack.i.l.bf16 %v7264_v57 }
 0x4f5   : > { %v11223_v15 = vpop.permute.xlu1 %4795  ;;  %v4544_v8 = vsel %vm4534_vm15, %v7266_v46, %v7261_v2  ;;  %v4536_v3 = vsel %vm4534_vm15, %v7261_v2, %v7266_v46  ;;  %v4535_v56 = vsel %vm4534_vm15, %v7260_v58, %v7265_v37  ;;  %v4543_v39 = vsel %vm4534_vm15, %v7265_v37, %v7260_v58 }
 0x4f6   : > { %v11225_v4 = vpop.permute.xlu0 %4800  ;;  %v4593_v5 = vmul.f32 %v4559_v47, %v4544_v8  ;;  %v4594_v1 = vmul.f32 %v4559_v47, %v4536_v3  ;;  %v4591_v24 = vmul.f32 %v4554_v59, %v4543_v39  ;;  %v4592_v45 = vmul.f32 %v4554_v59, %v4535_v56 }
 0x4f8   : > { %v4609_v42 = vadd.f32 %v4593_v5, %v4488_v0  ;;  %v4610_v60 = vadd.f32 %v4594_v1, %v4489_v12  ;;  %v4607_v51 = vadd.f32 %v4591_v24, %v4486_v21  ;;  %v4608_v27 = vadd.f32 %v4592_v45, %v4487_v40 }
 0x4f9   : > { %v7269_v14 = vpop.permute.xlu1 %7268 }
 0x4fa   : > { %v7274_v62 = vpop.permute.xlu0 %7273  ;;  %v7271_v41 = vunpack.i.h.bf16 %v7269_v14  ;;  %v7270_v43 = vunpack.i.l.bf16 %v7269_v14 }
 0x4fb   : > { %v7276_v28 = vunpack.i.h.bf16 %v7274_v62  ;;  %v7275_v63 = vunpack.i.l.bf16 %v7274_v62 }
 0x4fd   : > { %v11229_v34 = vpop.permute.xlu1 %4458  ;;  %v4665_v7 = vsel %vm12107_vm7, %v7276_v28, %v7271_v41  ;;  %v4656_v48 = vsel %vm12108_vm6, %v7270_v43, %v7275_v63  ;;  %v4664_v36 = vsel %vm12109_vm13, %v7275_v63, %v7270_v43  ;;  %v4657_v61 = vsel %vm12110_vm2, %v7271_v41, %v7276_v28  ;;  %vm12124_vm7 = vmmov %vm12098_vm0 }
 0x4fe   : > { %v11231_v29 = vpop.permute.xlu0 %4463  ;;  %v4714_v55 = vmul.f32 %v4680_v50, %v4665_v7  ;;  %v4712_v30 = vmul.f32 %v4675_v49, %v4664_v36  ;;  %v4713_v31 = vmul.f32 %v4675_v49, %v4656_v48  ;;  %v4715_v6 = vmul.f32 %v4680_v50, %v4657_v61  ;;  %vm12125_vm6 = vmmov %vm12100_vm1 }
 0x4ff   : > { %vm12126_vm13 = vmmov %vm12100_vm1 }
 0x500   : > { %v6799_v25 = vpop.f32.mrf.mxu0  ;;  %v4728_v59 = vadd.f32 %v4712_v30, %v4607_v51  ;;  %v4730_v47 = vadd.f32 %v4714_v55, %v4609_v42  ;;  %v4729_v53 = vadd.f32 %v4713_v31, %v4608_v27  ;;  %v4731_v28 = vadd.f32 %v4715_v6, %v4610_v60  ;;  %vm12127_vm2 = vmmov %vm12100_vm1 }
 0x501   : > { %v11246_v17 = vpop.permute.xlu1 %4563 }
 0x502   : > { %v11248_v10 = vpop.permute.xlu0 %4568  ;;  %v6800_v35 = vpop.f32.mrf.mxu0 }
 0x503   : > { %v11261_v33 = vadd.f32 %v6800_v35, %v6799_v25 }
 0x504   : > { %v6802_v16 = vpop.f32.mrf.mxu0 }
 0x505   : > { %5799 = vst [vmem:[%s11259_s29 + $0x40] sm:$0xff] %v11261_v33  ;;  %v7279_v32 = vpop.permute.xlu1 %7278 }
 0x506   : > { %v7284_v13 = vpop.permute.xlu0 %7283  ;;  %v6803_v18 = vpop.f32.mrf.mxu0  ;;  %v7281_v11 = vunpack.i.h.bf16 %v7279_v32  ;;  %v7280_v26 = vunpack.i.l.bf16 %v7279_v32 }
 0x507   : > { %v7286_v38 = vunpack.i.h.bf16 %v7284_v13  ;;  %v7285_v19 = vunpack.i.l.bf16 %v7284_v13  ;;  %v11265_v9 = vadd.f32 %v6803_v18, %v6802_v16 }
 0x509   : > { %v4778_v49 = vsel %vm12111_vm14, %v7281_v11, %v7286_v38  ;;  %v4786_v50 = vsel %vm12112_vm11, %v7286_v38, %v7281_v11  ;;  %v4777_v44 = vsel %vm12098_vm0, %v7280_v26, %v7285_v19  ;;  %v4785_v57 = vsel %vm12113_vm5, %v7285_v19, %v7280_v26  ;;  %v6805_v2 = vpop.f32.mrf.mxu0  ;;  %5800 = vst [vmem:[%s11259_s29 + $0x48] sm:$0xff] %v11265_v9  ;;  %v4685_v37 = vpop.permute.xlu1 %4684  ;;  %vm12128_vm14 = vmmov %vm12100_vm1 }
 0x50a   : > { %v4835_v46 = vmul.f32 %v11225_v4, %v4786_v50  ;;  %v4836_v14 = vmul.f32 %v11225_v4, %v4778_v49  ;;  %v4833_v62 = vmul.f32 %v11223_v15, %v4785_v57  ;;  %v4834_v58 = vmul.f32 %v11223_v15, %v4777_v44  ;;  %v4690_v41 = vpop.permute.xlu0 %4689  ;;  %v12117_v49 = vld [vmem:[#allocation51_spill] sm:$0xff]  ;;  %vm12133_vm11 = vmmov %vm12098_vm0 }
 0x50b   : > { %v6806_v43 = vpop.f32.mrf.mxu0  ;;  %v4490_v50 = vmul.f32 %v11229_v34, %v12117_v49  ;;  %v12118_v44 = vld [vmem:[#allocation55_spill] sm:$0xff]  ;;  %vm12134_vm5 = vmmov %vm12098_vm0 }
 0x50c   : > { %v4849_v63 = vadd.f32 %v4833_v62, %v4728_v59  ;;  %v4851_v8 = vadd.f32 %v4835_v46, %v4730_v47  ;;  %v11281_v3 = vadd.f32 %v6806_v43, %v6805_v2  ;;  %v4850_v56 = vadd.f32 %v4834_v58, %v4729_v53  ;;  %v12119_v2 = vld [vmem:[#allocation73_spill] sm:$0xff] }
 0x50d   : > { %v6808_v39 = vpop.f32.mrf.mxu0  ;;  %v4852_v5 = vadd.f32 %v4836_v14, %v4731_v28  ;;  %v7289_v7 = vpop.permute.xlu1 %7288  ;;  %v4491_v57 = vmul.f32 %v11229_v34, %v12118_v44  ;;  %v4492_v46 = vmul.f32 %v11231_v29, %v12119_v2  ;;  %v12120_v14 = vld [vmem:[#allocation52_spill] sm:$0xff] }
 0x50e   : > { %5801 = vst [vmem:[%s11259_s29 + $0x50] sm:$0xff] %v11281_v3  ;;  %v7294_v4 = vpop.permute.xlu0 %7293  ;;  %v4865_v48 = vpack.c.bf16 %v4851_v8, %v4849_v63  ;;  %v7291_v40 = vunpack.i.h.bf16 %v7289_v7  ;;  %v7290_v0 = vunpack.i.l.bf16 %v7289_v7 }
 0x50f   : > { %v6809_v36 = vpop.f32.mrf.mxu0  ;;  %v4866_v15 = vpack.c.bf16 %v4852_v5, %v4850_v56  ;;  %v7296_v12 = vunpack.i.h.bf16 %v7294_v4  ;;  %v7295_v61 = vunpack.i.l.bf16 %v7294_v4 }
 0x510   : > { %v11285_v25 = vadd.f32 %v6809_v36, %v6808_v39 }
 0x511   : > { %5033 = vmatprep.mubr.bf16.mxu1 %v4866_v15  ;;  %v4806_v21 = vpop.permute.xlu1 %4805  ;;  %v4538_v60 = vsel %vm4534_vm15, %v7291_v40, %v7296_v12  ;;  %v4546_v51 = vsel %vm4534_vm15, %v7296_v12, %v7291_v40  ;;  %v4537_v27 = vsel %vm4534_vm15, %v7290_v0, %v7295_v61  ;;  %v4545_v6 = vsel %vm4534_vm15, %v7295_v61, %v7290_v0 }
 0x512   : > { %5802 = vst [vmem:[%s11259_s29 + $0x58] sm:$0xff] %v11285_v25  ;;  %v4811_v1 = vpop.permute.xlu0 %4810  ;;  %5034 = vmatmul.mubr.bf16.vlgmr.msra.gmra.mxu1 %v4865_v48  ;;  %v4597_v26 = vmul.f32 %v11248_v10, %v4546_v51  ;;  %v4598_v38 = vmul.f32 %v11248_v10, %v4538_v60  ;;  %v4595_v19 = vmul.f32 %v11246_v17, %v4545_v6 }
 0x513   : > { %v4596_v59 = vmul.f32 %v11246_v17, %v4537_v27  ;;  %v4493_v10 = vmul.f32 %v11231_v29, %v12120_v14 }
 0x514   : > { %v4613_v28 = vadd.f32 %v4597_v26, %v4492_v46  ;;  %v4611_v8 = vadd.f32 %v4595_v19, %v4490_v50 }
 0x515   : > { %v7299_v24 = vpop.permute.xlu1 %7298  ;;  %v4614_v63 = vadd.f32 %v4598_v38, %v4493_v10  ;;  %v4612_v56 = vadd.f32 %v4596_v59, %v4491_v57 }
 0x516   : > { %v7304_v45 = vpop.permute.xlu0 %7303  ;;  %v7301_v35 = vunpack.i.h.bf16 %v7299_v24  ;;  %v7300_v55 = vunpack.i.l.bf16 %v7299_v24 }
 0x517   : > { %v7306_v30 = vunpack.i.h.bf16 %v7304_v45  ;;  %v7305_v31 = vunpack.i.l.bf16 %v7304_v45 }
 0x519   : > { %v11289_v42 = vpop.permute.xlu1 %4468  ;;  %v4659_v32 = vsel %vm12100_vm1, %v7301_v35, %v7306_v30  ;;  %v4667_v13 = vsel %vm12114_vm9, %v7306_v30, %v7301_v35  ;;  %v4658_v18 = vsel %vm12115_vm3, %v7300_v55, %v7305_v31  ;;  %v4666_v11 = vsel %vm12116_vm12, %v7305_v31, %v7300_v55  ;;  %vm12135_vm1 = vmmov %vm12098_vm0 }
 0x51a   : > { %v11291_v16 = vpop.permute.xlu0 %4473  ;;  %v4718_v62 = vmul.f32 %v4690_v41, %v4667_v13  ;;  %v4719_v58 = vmul.f32 %v4690_v41, %v4659_v32  ;;  %v4716_v43 = vmul.f32 %v4685_v37, %v4666_v11  ;;  %v4717_v17 = vmul.f32 %v4685_v37, %v4658_v18  ;;  %vm12137_vm9 = vmmov %vm12127_vm2 }
 0x51b   : > { %vm12138_vm3 = vmmov %vm12127_vm2 }
 0x51c   : > { %v4733_v36 = vadd.f32 %v4717_v17, %v4612_v56  ;;  %v4735_v15 = vadd.f32 %v4719_v58, %v4614_v63  ;;  %v4732_v24 = vadd.f32 %v4716_v43, %v4611_v8  ;;  %v4734_v45 = vadd.f32 %v4718_v62, %v4613_v28  ;;  %vm12139_vm12 = vmmov %vm12127_vm2 }
 0x51d   : > { %v11313_v47 = vpop.permute.xlu1 %4573 }
 0x51e   : > { %v11315_v53 = vpop.permute.xlu0 %4578 }
 0x521   : > { %v7309_v39 = vpop.permute.xlu1 %7308 }
 0x522   : > { %v7314_v5 = vpop.permute.xlu0 %7313  ;;  %v7311_v7 = vunpack.i.h.bf16 %v7309_v39  ;;  %v7310_v4 = vunpack.i.l.bf16 %v7309_v39 }
 0x523   : > { %v7316_v48 = vunpack.i.h.bf16 %v7314_v5  ;;  %v7315_v34 = vunpack.i.l.bf16 %v7314_v5 }
 0x525   : > { %v4780_v29 = vsel %vm12121_vm8, %v7311_v7, %v7316_v48  ;;  %v4788_v37 = vsel %vm12122_vm4, %v7316_v48, %v7311_v7  ;;  %v4779_v41 = vsel %vm12123_vm10, %v7310_v4, %v7315_v34  ;;  %v4787_v40 = vsel %vm12124_vm7, %v7315_v34, %v7310_v4  ;;  %v4695_v55 = vpop.permute.xlu1 %4694  ;;  %v12129_v34 = vld [vmem:[#allocation54_spill] sm:$0xff]  ;;  %vm12140_vm8 = vmmov %vm12098_vm0 }
 0x526   : > { %v4839_v0 = vmul.f32 %v4811_v1, %v4788_v37  ;;  %v4840_v12 = vmul.f32 %v4811_v1, %v4780_v29  ;;  %v4837_v61 = vmul.f32 %v4806_v21, %v4787_v40  ;;  %v4838_v35 = vmul.f32 %v4806_v21, %v4779_v41  ;;  %v4700_v30 = vpop.permute.xlu0 %4699  ;;  %v12132_v37 = vld [vmem:[#allocation72_spill] sm:$0xff]  ;;  %vm12141_vm4 = vmmov %vm12098_vm0 }
 0x527   : > { %v4497_v41 = vmul.f32 %v11291_v16, %v12132_v37  ;;  %vm12142_vm10 = vmmov %vm12098_vm0 }
 0x528   : > { %v4854_v31 = vadd.f32 %v4838_v35, %v4733_v36  ;;  %v4856_v60 = vadd.f32 %v4840_v12, %v4735_v15  ;;  %v4853_v51 = vadd.f32 %v4837_v61, %v4732_v24  ;;  %v4855_v27 = vadd.f32 %v4839_v0, %v4734_v45  ;;  %v12130_v15 = vld [vmem:[#allocation70_spill] sm:$0xff]  ;;  %vm12143_vm7 = vmmov %vm12098_vm0 }
 0x529   : > { %v7319_v6 = vpop.permute.xlu1 %7318  ;;  %v4494_v36 = vmul.f32 %v11289_v42, %v12129_v34  ;;  %v4495_v24 = vmul.f32 %v11289_v42, %v12130_v15  ;;  %v12131_v45 = vld [vmem:[#allocation74_spill] sm:$0xff] }
 0x52a   : > { %v7324_v32 = vpop.permute.xlu0 %7323  ;;  %v4868_v13 = vpack.c.bf16 %v4856_v60, %v4854_v31  ;;  %v4867_v18 = vpack.c.bf16 %v4855_v27, %v4853_v51  ;;  %v7321_v59 = vunpack.i.h.bf16 %v7319_v6  ;;  %v7320_v1 = vunpack.i.l.bf16 %v7319_v6 }
 0x52b   : > { %v7326_v49 = vunpack.i.h.bf16 %v7324_v32  ;;  %v7325_v21 = vunpack.i.l.bf16 %v7324_v32  ;;  %v4496_v29 = vmul.f32 %v11291_v16, %v12131_v45 }
 0x52c   : > { %5041 = vmatprep.mubr.bf16.mxu1 %v4868_v13 }
 0x52d   : > { %5042 = vmatmul.mubr.bf16.gmra.mxu1 %v4867_v18  ;;  %v4816_v11 = vpop.permute.xlu1 %4815  ;;  %v4540_v10 = vsel %vm4534_vm15, %v7321_v59, %v7326_v49  ;;  %v4548_v62 = vsel %vm4534_vm15, %v7326_v49, %v7321_v59  ;;  %v4539_v58 = vsel %vm4534_vm15, %v7320_v1, %v7325_v21  ;;  %v4547_v43 = vsel %vm4534_vm15, %v7325_v21, %v7320_v1 }
 0x52e   : > { %v4821_v26 = vpop.permute.xlu0 %4820  ;;  %v4601_v56 = vmul.f32 %v11315_v53, %v4548_v62  ;;  %v4602_v39 = vmul.f32 %v11315_v53, %v4540_v10  ;;  %v4599_v5 = vmul.f32 %v11313_v47, %v4547_v43  ;;  %v4600_v7 = vmul.f32 %v11313_v47, %v4539_v58 }
 0x530   : > { %v4617_v61 = vadd.f32 %v4601_v56, %v4496_v29  ;;  %v4618_v47 = vadd.f32 %v4602_v39, %v4497_v41  ;;  %v4615_v35 = vadd.f32 %v4599_v5, %v4494_v36  ;;  %v4616_v31 = vadd.f32 %v4600_v7, %v4495_v24 }
 0x531   : > { %v7329_v38 = vpop.permute.xlu1 %7328 }
 0x532   : > { %v7334_v19 = vpop.permute.xlu0 %7333  ;;  %v7331_v50 = vunpack.i.h.bf16 %v7329_v38  ;;  %v7330_v44 = vunpack.i.l.bf16 %v7329_v38 }
 0x533   : > { %v7336_v57 = vunpack.i.h.bf16 %v7334_v19  ;;  %v7335_v2 = vunpack.i.l.bf16 %v7334_v19 }
 0x535   : > { %v11333_v46 = vpop.permute.xlu1 %4478  ;;  %v4661_v17 = vsel %vm12125_vm6, %v7331_v50, %v7336_v57  ;;  %v4669_v28 = vsel %vm12126_vm13, %v7336_v57, %v7331_v50  ;;  %v4660_v63 = vsel %vm12127_vm2, %v7330_v44, %v7335_v2  ;;  %v4668_v8 = vsel %vm12128_vm14, %v7335_v2, %v7330_v44 }
 0x536   : > { %v11335_v14 = vpop.permute.xlu0 %4483  ;;  %v4722_v40 = vmul.f32 %v4700_v30, %v4669_v28  ;;  %v4723_v53 = vmul.f32 %v4700_v30, %v4661_v17  ;;  %v4720_v0 = vmul.f32 %v4695_v55, %v4668_v8  ;;  %v4721_v12 = vmul.f32 %v4695_v55, %v4660_v63 }
 0x537   : > { %v4498_v41 = vmul.f32 %v11333_v46, %v11042_v54  ;;  %vm5924_vm6 = vcmask 523264  }
 0x538   : > { %v4737_v13 = vadd.f32 %v4721_v12, %v4616_v31  ;;  %v4739_v18 = vadd.f32 %v4723_v53, %v4618_v47  ;;  %v4736_v38 = vadd.f32 %v4720_v0, %v4615_v35  ;;  %v4738_v19 = vadd.f32 %v4722_v40, %v4617_v61 }
 0x539   : > { %v4584_v4 = vpop.permute.xlu1 %4583  ;;  %v4499_v40 = vmul.f32 %v11333_v46, %v11048_v22  ;;  %v4500_v0 = vmul.f32 %v11335_v14, %v11036_v52  ;;  %v4501_v12 = vmul.f32 %v11335_v14, %v11058_v23 }
 0x53a   : > { %v4589_v48 = vpop.permute.xlu0 %4588 }
 0x53d   : > { %v7339_v60 = vpop.permute.xlu1 %7338 }
 0x53e   : > { %v7344_v51 = vpop.permute.xlu0 %7343  ;;  %v7341_v27 = vunpack.i.h.bf16 %v7339_v60  ;;  %v7340_v6 = vunpack.i.l.bf16 %v7339_v60 }
 0x53f   : > { %v7346_v32 = vunpack.i.h.bf16 %v7344_v51  ;;  %v7345_v42 = vunpack.i.l.bf16 %v7344_v51 }
 0x541   : > { %v4782_v16 = vsel %vm12133_vm11, %v7341_v27, %v7346_v32  ;;  %v4790_v55 = vsel %vm12098_vm0, %v7346_v32, %v7341_v27  ;;  %v4781_v30 = vsel %vm12134_vm5, %v7340_v6, %v7345_v42  ;;  %v4789_v59 = vsel %vm12135_vm1, %v7345_v42, %v7340_v6 }
 0x542   : > { %v4843_v1 = vmul.f32 %v4821_v26, %v4790_v55  ;;  %v4844_v49 = vmul.f32 %v4821_v26, %v4782_v16  ;;  %v4841_v21 = vmul.f32 %v4816_v11, %v4789_v59  ;;  %v4842_v50 = vmul.f32 %v4816_v11, %v4781_v30  ;;  %v4705_v44 = vpop.permute.xlu1 %4704  ;;  %v4710_v57 = vpop.permute.xlu0 %4709 }
 0x544   : > { %v4858_v2 = vadd.f32 %v4842_v50, %v4737_v13  ;;  %v4860_v10 = vadd.f32 %v4844_v49, %v4739_v18  ;;  %v4857_v62 = vadd.f32 %v4841_v21, %v4736_v38  ;;  %v4859_v58 = vadd.f32 %v4843_v1, %v4738_v19 }
 0x546   : > { %v7349_v43 = vpop.permute.xlu1 %7348  ;;  %v4870_v17 = vpack.c.bf16 %v4860_v10, %v4858_v2  ;;  %v4869_v28 = vpack.c.bf16 %v4859_v58, %v4857_v62  ;;  %v7354_v56 = vpop.permute.xlu0 %7353 }
 0x547   : > { %v7351_v63 = vunpack.i.h.bf16 %v7349_v43  ;;  %v7350_v8 = vunpack.i.l.bf16 %v7349_v43  ;;  %v7356_v39 = vunpack.i.h.bf16 %v7354_v56  ;;  %v7355_v5 = vunpack.i.l.bf16 %v7354_v56  ;;  %v6250_v56 = vld [vmem:[%s11557_s12] ss:$0 sm:$0xff] }
 0x548   : > { %5049 = vmatprep.mubr.bf16.mxu1 %v4870_v17 }
 0x549   : > { %5050 = vmatmul.mubr.bf16.gmra.mxu1 %v4869_v28  ;;  %v4542_v26 = vsel %vm4534_vm15, %v7351_v63, %v7356_v39  ;;  %v4550_v11 = vsel %vm4534_vm15, %v7356_v39, %v7351_v63  ;;  %v4541_v7 = vsel %vm4534_vm15, %v7350_v8, %v7355_v5  ;;  %v4549_v34 = vsel %vm4534_vm15, %v7355_v5, %v7350_v8  ;;  %vm12136_vm15 = vmmov %vm12127_vm2 }
 0x54a   : > { %v4826_v36 = vpop.permute.xlu1 %4825  ;;  %v4605_v24 = vmul.f32 %v4589_v48, %v4550_v11  ;;  %v4606_v45 = vmul.f32 %v4589_v48, %v4542_v26  ;;  %v4603_v29 = vmul.f32 %v4584_v4, %v4549_v34  ;;  %v4604_v37 = vmul.f32 %v4584_v4, %v4541_v7 }
 0x54b   : > { %v4831_v15 = vpop.permute.xlu0 %4830 }
 0x54c   : > { %v4621_v60 = vadd.f32 %v4605_v24, %v4500_v0  ;;  %v4622_v4 = vadd.f32 %v4606_v45, %v4501_v12  ;;  %v4619_v51 = vadd.f32 %v4603_v29, %v4498_v41  ;;  %v4620_v27 = vadd.f32 %v4604_v37, %v4499_v40 }
 0x54e   : > { %v7359_v53 = vpop.permute.xlu1 %7358 }
 0x54f   : > { %v7361_v61 = vunpack.i.h.bf16 %v7359_v53  ;;  %v7360_v47 = vunpack.i.l.bf16 %v7359_v53  ;;  %v7364_v35 = vpop.permute.xlu0 %7363 }
 0x550   : > { %v7366_v31 = vunpack.i.h.bf16 %v7364_v35  ;;  %v7365_v48 = vunpack.i.l.bf16 %v7364_v35 }
 0x552   : > { %v4663_v54 = vsel %vm12136_vm15, %v7361_v61, %v7366_v31  ;;  %v4671_v22 = vsel %vm12137_vm9, %v7366_v31, %v7361_v61  ;;  %v4662_v52 = vsel %vm12138_vm3, %v7360_v47, %v7365_v48  ;;  %v4670_v23 = vsel %vm12139_vm12, %v7365_v48, %v7360_v47  ;;  %v7369_v46 = vpop.permute.xlu1 %7368 }
 0x553   : > { %v4726_v14 = vmul.f32 %v4710_v57, %v4671_v22  ;;  %v4727_v6 = vmul.f32 %v4710_v57, %v4663_v54  ;;  %v4724_v32 = vmul.f32 %v4705_v44, %v4670_v23  ;;  %v4725_v42 = vmul.f32 %v4705_v44, %v4662_v52  ;;  %v7374_v13 = vpop.permute.xlu0 %7373 }
 0x554   : > { %v7371_v18 = vunpack.i.h.bf16 %v7369_v46  ;;  %v7370_v38 = vunpack.i.l.bf16 %v7369_v46  ;;  %v7376_v19 = vunpack.i.h.bf16 %v7374_v13  ;;  %v7375_v16 = vunpack.i.l.bf16 %v7374_v13 }
 0x555   : > { %v4741_v55 = vadd.f32 %v4725_v42, %v4620_v27  ;;  %v4743_v30 = vadd.f32 %v4727_v6, %v4622_v4  ;;  %v4740_v59 = vadd.f32 %v4724_v32, %v4619_v51  ;;  %v4742_v1 = vadd.f32 %v4726_v14, %v4621_v60 }
 0x556   : > { %v4784_v49 = vsel %vm12140_vm8, %v7371_v18, %v7376_v19  ;;  %v4792_v21 = vsel %vm12141_vm4, %v7376_v19, %v7371_v18  ;;  %v4783_v50 = vsel %vm12142_vm10, %v7370_v38, %v7375_v16  ;;  %v4791_v44 = vsel %vm12143_vm7, %v7375_v16, %v7370_v38 }
 0x557   : > { %v4847_v57 = vmul.f32 %v4831_v15, %v4792_v21  ;;  %v4848_v2 = vmul.f32 %v4831_v15, %v4784_v49  ;;  %v4845_v10 = vmul.f32 %v4826_v36, %v4791_v44  ;;  %v4846_v62 = vmul.f32 %v4826_v36, %v4783_v50 }
 0x558   : > { %v5810_v44 = vmul.f32 %v11285_v25, %v11285_v25 }
 0x559   : > { %v4862_v58 = vadd.f32 %v4846_v62, %v4741_v55  ;;  %v4864_v43 = vadd.f32 %v4848_v2, %v4743_v30  ;;  %v4861_v17 = vadd.f32 %v4845_v10, %v4740_v59  ;;  %v4863_v28 = vadd.f32 %v4847_v57, %v4742_v1 }
 0x55a   : > { %v5809_v57 = vmul.f32 %v11281_v3, %v11281_v3  ;;  %v5808_v2 = vmul.f32 %v11265_v9, %v11265_v9  ;;  %v5807_v10 = vmul.f32 %v11261_v33, %v11261_v33 }
 0x55b   : > { %v4872_v63 = vpack.c.bf16 %v4864_v43, %v4862_v58  ;;  %v4871_v8 = vpack.c.bf16 %v4863_v28, %v4861_v17 }
 0x55d   : > { %5057 = vmatprep.mubr.bf16.mxu1 %v4872_v63 }
 0x55e   : > { %5058 = vmatmul.mubr.bf16.gmra.mxu1 %v4871_v8 }
 0x577   : > { %v6981_v20 = vpop.f32.mrf.mxu1 }
 0x578   : > { %v2748_v39 = vadd.f32 %v6981_v20, %v6250_v56 }
 0x579   : > { %v2739_v5 = vpop.f32.mrf.mxu1 }
 0x57a   : > { %2804 = vst [vmem:[%s11412_s18 + $0x10] sm:$0xff] %v2748_v39  ;;  %v2740_v26 = vadd.f32 %v6250_v56, %v2739_v5 }
 0x57b   : > { %v6982_v11 = vpop.f32.mrf.mxu1 }
 0x57c   : > { %2802 = vst [vmem:[%s11412_s18] sm:$0xff] %v2740_v26  ;;  %v2751_v7 = vadd.f32 %v6982_v11, %v6250_v56 }
 0x57d   : > { %v2742_v34 = vpop.f32.mrf.mxu1 }
 0x57e   : > { %2805 = vst [vmem:[%s11412_s18 + $0x18] sm:$0xff] %v2751_v7  ;;  %v2743_v36 = vadd.f32 %v6250_v56, %v2742_v34 }
 0x580   : > { %2803 = vst [vmem:[%s11412_s18 + $0x8] sm:$0xff] %v2743_v36  ;;  %v6985_v15 = vpop.f32.mrf.mxu1 }
 0x581   : > { %v2764_v24 = vadd.f32 %v6985_v15, %v6250_v56 }
 0x582   : > { %v2755_v45 = vpop.f32.mrf.mxu1 }
 0x583   : > { %2808 = vst [vmem:[%s11412_s18 + $0x30] sm:$0xff] %v2764_v24  ;;  %v2756_v29 = vadd.f32 %v6250_v56, %v2755_v45 }
 0x584   : > { %v6986_v37 = vpop.f32.mrf.mxu1 }
 0x585   : > { %2806 = vst [vmem:[%s11412_s18 + $0x20] sm:$0xff] %v2756_v29  ;;  %v2767_v41 = vadd.f32 %v6986_v37, %v6250_v56 }
 0x586   : > { %v2758_v40 = vpop.f32.mrf.mxu1 }
 0x587   : > { %2809 = vst [vmem:[%s11412_s18 + $0x38] sm:$0xff] %v2767_v41  ;;  %v2759_v53 = vadd.f32 %v6250_v56, %v2758_v40 }
 0x589   : > { %2807 = vst [vmem:[%s11412_s18 + $0x28] sm:$0xff] %v2759_v53 }
 0x58d   : > { %v6989_v0 = vpop.f32.mrf.mxu1 }
 0x58e   : > { %v2780_v12 = vadd.f32 %v6989_v0, %v6250_v56 }
 0x58f   : > { %v2771_v61 = vpop.f32.mrf.mxu1 }
 0x590   : > { %2812 = vst [vmem:[%s11412_s18 + $0x50] sm:$0xff] %v2780_v12  ;;  %v2772_v47 = vadd.f32 %v6250_v56, %v2771_v61 }
 0x591   : > { %v6990_v35 = vpop.f32.mrf.mxu1 }
 0x592   : > { %2810 = vst [vmem:[%s11412_s18 + $0x40] sm:$0xff] %v2772_v47  ;;  %v2783_v31 = vadd.f32 %v6990_v35, %v6250_v56 }
 0x593   : > { %v2774_v48 = vpop.f32.mrf.mxu1 }
 0x594   : > { %2813 = vst [vmem:[%s11412_s18 + $0x58] sm:$0xff] %v2783_v31  ;;  %v2775_v60 = vadd.f32 %v6250_v56, %v2774_v48 }
 0x595   : > { %v6993_v4 = vpop.f32.mrf.mxu1 }
 0x596   : > { %2811 = vst [vmem:[%s11412_s18 + $0x48] sm:$0xff] %v2775_v60  ;;  %v2796_v51 = vadd.f32 %v6993_v4, %v6250_v56 }
 0x597   : > { %v2787_v27 = vpop.f32.mrf.mxu1 }
 0x598   : > { %2816 = vst [vmem:[%s11412_s18 + $0x70] sm:$0xff] %v2796_v51  ;;  %v2788_v54 = vadd.f32 %v6250_v56, %v2787_v27 }
 0x599   : > { %v6994_v22 = vpop.f32.mrf.mxu1 }
 0x59a   : > { %2814 = vst [vmem:[%s11412_s18 + $0x60] sm:$0xff] %v2788_v54  ;;  %v2799_v23 = vadd.f32 %v6994_v22, %v6250_v56 }
 0x59b   : > { %v6811_v52 = vpop.f32.mrf.mxu0  ;;  %v2790_v46 = vpop.f32.mrf.mxu1 }
 0x59c   : > { %2817 = vst [vmem:[%s11412_s18 + $0x78] sm:$0xff] %v2799_v23  ;;  %v2791_v6 = vadd.f32 %v6250_v56, %v2790_v46 }
 0x59d   : > { %v6812_v14 = vpop.f32.mrf.mxu0 }
 0x59e   : > { %v11429_v32 = vadd.f32 %v6812_v14, %v6811_v52  ;;  %2815 = vst [vmem:[%s11412_s18 + $0x68] sm:$0xff] %v2791_v6 }
 0x59f   : > { %v6814_v42 = vpop.f32.mrf.mxu0 }
 0x5a0   : > { %5803 = vst [vmem:[%s11259_s29 + $0x60] sm:$0xff] %v11429_v32  ;;  %v5811_v50 = vmul.f32 %v11429_v32, %v11429_v32 }
 0x5a1   : > { %v6815_v13 = vpop.f32.mrf.mxu0 }
 0x5a2   : > { %v11434_v18 = vadd.f32 %v6815_v13, %v6814_v42 }
 0x5a4   : > { %5804 = vst [vmem:[%s11259_s29 + $0x68] sm:$0xff] %v11434_v18  ;;  %v5812_v21 = vmul.f32 %v11434_v18, %v11434_v18 }
 0x5ad   : > { %v6817_v38 = vpop.f32.mrf.mxu0 }
 0x5af   : > { %v6818_v19 = vpop.f32.mrf.mxu0 }
 0x5b0   : > { %v11438_v16 = vadd.f32 %v6818_v19, %v6817_v38 }
 0x5b1   : > { %v6820_v55 = vpop.f32.mrf.mxu0 }
 0x5b2   : > { %5805 = vst [vmem:[%s11259_s29 + $0x70] sm:$0xff] %v11438_v16  ;;  %v5813_v30 = vmul.f32 %v11438_v16, %v11438_v16 }
 0x5b3   : > { %v6821_v59 = vpop.f32.mrf.mxu0 }
 0x5b4   : > { %v11444_v1 = vadd.f32 %v6821_v59, %v6820_v55  ;;  %5827 = vadd.xlane.f32.xlu1 %v5813_v30 }
 0x5b6   : > { %5806 = vst [vmem:[%s11259_s29 + $0x78] sm:$0xff] %v11444_v1  ;;  %v5814_v49 = vmul.f32 %v11444_v1, %v11444_v1 }
 0x5b8   : > { %5829 = vadd.xlane.f32.xlu0 %v5814_v49  ;;  %5825 = vadd.xlane.f32.xlu1 %v5812_v21 }
 0x5bc   : > { %5823 = vadd.xlane.f32.xlu0 %v5811_v50  ;;  %5821 = vadd.xlane.f32.xlu1 %v5810_v44 }
 0x5c0   : > { %5819 = vadd.xlane.f32.xlu0 %v5809_v57  ;;  %5817 = vadd.xlane.f32.xlu1 %v5808_v2 }
 0x5c4   : > { %5815 = vadd.xlane.f32.xlu0 %v5807_v10 }
 0x5d2   : > { %v6759_v62 = vpop.f32.mrf.mxu1 }
 0x5d4   : > { %v6760_v58 = vpop.f32.mrf.mxu1 }
 0x5d5   : > { %v11462_v43 = vadd.f32 %v6760_v58, %v6759_v62 }
 0x5d6   : > { %v6762_v17 = vpop.f32.mrf.mxu1 }
 0x5d7   : > { %5066 = vst [vmem:[%s11259_s29] sm:$0xff] %v11462_v43  ;;  %v5074_v28 = vmul.f32 %v11462_v43, %v11462_v43 }
 0x5d8   : > { %v6763_v63 = vpop.f32.mrf.mxu1 }
 0x5d9   : > { %v11468_v8 = vadd.f32 %v6763_v63, %v6762_v17  ;;  %5082 = vadd.xlane.f32.xlu0 %v5074_v28 }
 0x5db   : > { %5067 = vst [vmem:[%s11259_s29 + $0x8] sm:$0xff] %v11468_v8  ;;  %v5075_v56 = vmul.f32 %v11468_v8, %v11468_v8 }
 0x5dd   : > { %5084 = vadd.xlane.f32.xlu1 %v5075_v56 }
 0x5ed   : > { %v6765_v20 = vpop.f32.mrf.mxu1 }
 0x5ef   : > { %v6766_v39 = vpop.f32.mrf.mxu1 }
 0x5f0   : > { %v11474_v5 = vadd.f32 %v6766_v39, %v6765_v20 }
 0x5f1   : > { %v6768_v26 = vpop.f32.mrf.mxu1 }
 0x5f2   : > { %5068 = vst [vmem:[%s11259_s29 + $0x10] sm:$0xff] %v11474_v5  ;;  %v5076_v11 = vmul.f32 %v11474_v5, %v11474_v5 }
 0x5f3   : > { %v6769_v7 = vpop.f32.mrf.mxu1 }
 0x5f4   : > { %v11480_v34 = vadd.f32 %v6769_v7, %v6768_v26  ;;  %5086 = vadd.xlane.f32.xlu0 %v5076_v11 }
 0x5f6   : > { %5069 = vst [vmem:[%s11259_s29 + $0x18] sm:$0xff] %v11480_v34  ;;  %v5077_v36 = vmul.f32 %v11480_v34, %v11480_v34 }
 0x5f8   : > { %5088 = vadd.xlane.f32.xlu1 %v5077_v36 }
 0x609   : > { %v6771_v15 = vpop.f32.mrf.mxu1 }
 0x60b   : > { %v6772_v24 = vpop.f32.mrf.mxu1 }
 0x60c   : > { %v11486_v45 = vadd.f32 %v6772_v24, %v6771_v15 }
 0x60d   : > { %v6774_v29 = vpop.f32.mrf.mxu1 }
 0x60e   : > { %5070 = vst [vmem:[%s11259_s29 + $0x20] sm:$0xff] %v11486_v45  ;;  %v5078_v37 = vmul.f32 %v11486_v45, %v11486_v45 }
 0x60f   : > { %v6775_v41 = vpop.f32.mrf.mxu1 }
 0x610   : > { %v11492_v40 = vadd.f32 %v6775_v41, %v6774_v29  ;;  %5090 = vadd.xlane.f32.xlu0 %v5078_v37 }
 0x612   : > { %5071 = vst [vmem:[%s11259_s29 + $0x28] sm:$0xff] %v11492_v40  ;;  %v5079_v53 = vmul.f32 %v11492_v40, %v11492_v40 }
 0x614   : > { %5092 = vadd.xlane.f32.xlu1 %v5079_v53 }
 0x61e   : > { %v6777_v0 = vpop.f32.mrf.mxu1 }
 0x620   : > { %v6778_v12 = vpop.f32.mrf.mxu1 }
 0x621   : > { %v11498_v61 = vadd.f32 %v6778_v12, %v6777_v0 }
 0x622   : > { %v6780_v47 = vpop.f32.mrf.mxu1 }
 0x623   : > { %5072 = vst [vmem:[%s11259_s29 + $0x30] sm:$0xff] %v11498_v61  ;;  %v5080_v35 = vmul.f32 %v11498_v61, %v11498_v61 }
 0x624   : > { %v6781_v31 = vpop.f32.mrf.mxu1 }
 0x625   : > { %v11504_v48 = vadd.f32 %v6781_v31, %v6780_v47  ;;  %5094 = vadd.xlane.f32.xlu0 %v5080_v35 }
 0x627   : > { %5073 = vst [vmem:[%s11259_s29 + $0x38] sm:$0xff] %v11504_v48  ;;  %v5081_v60 = vmul.f32 %v11504_v48, %v11504_v48 }
 0x629   : > { %5096 = vadd.xlane.f32.xlu1 %v5081_v60 }
 0x63d   : > { %v5828_v4 = vpop.xlane.xlu1 %5827 }
 0x63e   : > { %v5837_v51 = vmax.f32 %v5828_v4, 1e-24 }
 0x640   : > { %7681 = vrsqrt.f32 %v5837_v51 }
 0x641   : > { %v5830_v27 = vpop.xlane.xlu0 %5829  ;;  %v5826_v54 = vpop.xlane.xlu1 %5825 }
 0x642   : > { %v5838_v22 = vmax.f32 %v5830_v27, 1e-24  ;;  %v5836_v52 = vmax.f32 %v5826_v54, 1e-24 }
 0x644   : > { %7683 = vrsqrt.f32 %v5838_v22 }
 0x645   : > { %v5824_v23 = vpop.xlane.xlu0 %5823  ;;  %v5822_v46 = vpop.xlane.xlu1 %5821  ;;  %7685 = vrsqrt.f32 %v5836_v52 }
 0x646   : > { %v5835_v14 = vmax.f32 %v5824_v23, 1e-24  ;;  %v5834_v6 = vmax.f32 %v5822_v46, 1e-24 }
 0x648   : > { %7687 = vrsqrt.f32 %v5835_v14 }
 0x649   : > { %v5820_v42 = vpop.xlane.xlu0 %5819  ;;  %7689 = vrsqrt.f32 %v5834_v6  ;;  %v5818_v38 = vpop.xlane.xlu1 %5817 }
 0x64a   : > { %v5833_v13 = vmax.f32 %v5820_v42, 1e-24  ;;  %v5832_v59 = vmax.f32 %v5818_v38, 1e-24 }
 0x64c   : > { %7691 = vrsqrt.f32 %v5833_v13 }
 0x64d   : > { %v5816_v19 = vpop.xlane.xlu0 %5815  ;;  %v7682_v30 = vpop.eup %7681 }
 0x64e   : > { %v5831_v55 = vmax.f32 %v5816_v19, 1e-24  ;;  %v5853_v21 = vmul.f32 %v7682_v30, %v11438_v16 }
 0x650   : > { %7693 = vrsqrt.f32 %v5831_v55 }
 0x651   : > { %v7684_v49 = vpop.eup %7683  ;;  %7695 = vrsqrt.f32 %v5832_v59 }
 0x652   : > { %v5854_v50 = vmul.f32 %v7684_v49, %v11444_v1  ;;  %v7686_v44 = vpop.eup %7685 }
 0x653   : > { %v5852_v62 = vmul.f32 %v7686_v44, %v11434_v18 }
 0x654   : > { %v5858_v57 = vpack.c.bf16 %v5854_v50, %v5853_v21 }
 0x655   : > { %v7688_v2 = vpop.eup %7687 }
 0x656   : > { %7021 = vmatprep.subr.bf16.mxu1 %v5858_v57  ;;  %v5851_v10 = vmul.f32 %v7688_v2, %v11429_v32  ;;  %v7690_v58 = vpop.eup %7689 }
 0x657   : > { %7022 = vmatpush3.bf16.xpose.msra.mxu1 %v5858_v57  ;;  %v5850_v16 = vmul.f32 %v7690_v58, %v11285_v25 }
 0x658   : > { %v5857_v17 = vpack.c.bf16 %v5852_v62, %v5851_v10 }
 0x659   : > { %v7692_v28 = vpop.eup %7691 }
 0x65a   : > { %7023 = vmatprep.subr.bf16.mxu1 %v5857_v17  ;;  %v5849_v63 = vmul.f32 %v7692_v28, %v11281_v3 }
 0x65c   : > { %v5856_v56 = vpack.c.bf16 %v5850_v16, %v5849_v63 }
 0x65d   : > { %v7694_v1 = vpop.eup %7693 }
 0x65e   : > { %v7696_v20 = vpop.eup %7695  ;;  %v5847_v39 = vmul.f32 %v7694_v1, %v11261_v33 }
 0x65f   : > { %7024 = vmatpush3.bf16.xpose.msra.mxu1 %v5857_v17  ;;  %v5848_v18 = vmul.f32 %v7696_v20, %v11265_v9 }
 0x660   : > { %7025 = vmatprep.subr.bf16.mxu1 %v5856_v56 }
 0x661   : > { %v5855_v11 = vpack.c.bf16 %v5848_v18, %v5847_v39 }
 0x662   : > { %v5083_v26 = vpop.xlane.xlu0 %5082 }
 0x663   : > { %v5098_v32 = vmax.f32 %v5083_v26, 1e-24 }
 0x665   : > { %7697 = vrsqrt.f32 %v5098_v32 }
 0x666   : > { %v5085_v7 = vpop.xlane.xlu1 %5084 }
 0x667   : > { %7026 = vmatpush3.bf16.xpose.msra.mxu1 %v5856_v56  ;;  %v5099_v36 = vmax.f32 %v5085_v7, 1e-24 }
 0x668   : > { %7027 = vmatprep.subr.bf16.mxu1 %v5855_v11 }
 0x669   : > { %7699 = vrsqrt.f32 %v5099_v36 }
 0x66f   : > { %7028 = vmatpush3.bf16.xpose.msra.mxu1 %v5855_v11 }
 0x672   : > { %v7698_v3 = vpop.eup %7697 }
 0x673   : > { %v5114_v15 = vmul.f32 %v7698_v3, %v11462_v43 }
 0x676   : > { %v7700_v25 = vpop.eup %7699 }
 0x677   : > { %v5115_v24 = vmul.f32 %v7700_v25, %v11468_v8 }
 0x679   : > { %v5122_v29 = vpack.c.bf16 %v5115_v24, %v5114_v15 }
 0x67b   : > { %7029 = vmatprep.mubr.bf16.mxu1 %v5122_v29 }
 0x67d   : > { %v5087_v33 = vpop.xlane.xlu0 %5086 }
 0x67e   : > { %v5100_v37 = vmax.f32 %v5087_v33, 1e-24 }
 0x680   : > { %7701 = vrsqrt.f32 %v5100_v37 }
 0x681   : > { %v5089_v41 = vpop.xlane.xlu1 %5088 }
 0x682   : > { %v5101_v9 = vmax.f32 %v5089_v41, 1e-24 }
 0x684   : > { %7703 = vrsqrt.f32 %v5101_v9 }
 0x68d   : > { %v7702_v53 = vpop.eup %7701 }
 0x68e   : > { %v5116_v12 = vmul.f32 %v7702_v53, %v11474_v5 }
 0x691   : > { %v7704_v0 = vpop.eup %7703 }
 0x692   : > { %v5117_v47 = vmul.f32 %v7704_v0, %v11480_v34 }
 0x694   : > { %v5123_v35 = vpack.c.bf16 %v5117_v47, %v5116_v12 }
 0x696   : > { %7030 = vmatmul.mubr.bf16.vlgmr.msra.gmra.mxu1 %v5123_v35 }
 0x699   : > { %v5091_v31 = vpop.xlane.xlu0 %5090 }
 0x69a   : > { %v5102_v43 = vmax.f32 %v5091_v31, 1e-24 }
 0x69c   : > { %7705 = vrsqrt.f32 %v5102_v43 }
 0x69d   : > { %v5093_v60 = vpop.xlane.xlu1 %5092 }
 0x69e   : > { %v5103_v8 = vmax.f32 %v5093_v60, 1e-24 }
 0x6a0   : > { %7707 = vrsqrt.f32 %v5103_v8 }
 0x6a9   : > { %v7706_v4 = vpop.eup %7705 }
 0x6aa   : > { %v5118_v27 = vmul.f32 %v7706_v4, %v11486_v45 }
 0x6ad   : > { %v7708_v51 = vpop.eup %7707 }
 0x6ae   : > { %v5119_v54 = vmul.f32 %v7708_v51, %v11492_v40  ;;  %v5095_v22 = vpop.xlane.xlu0 %5094 }
 0x6af   : > { %v5104_v52 = vmax.f32 %v5095_v22, 1e-24 }
 0x6b0   : > { %v5124_v5 = vpack.c.bf16 %v5119_v54, %v5118_v27 }
 0x6b1   : > { %7709 = vrsqrt.f32 %v5104_v52 }
 0x6b2   : > { %7033 = vmatprep.mubr.bf16.mxu1 %v5124_v5  ;;  %v5097_v34 = vpop.xlane.xlu1 %5096 }
 0x6b3   : > { %v5105_v23 = vmax.f32 %v5097_v34, 1e-24 }
 0x6b5   : > { %7711 = vrsqrt.f32 %v5105_v23 }
 0x6be   : > { %v7710_v46 = vpop.eup %7709 }
 0x6bf   : > { %v5120_v6 = vmul.f32 %v7710_v46, %v11498_v61 }
 0x6c2   : > { %v7712_v14 = vpop.eup %7711 }
 0x6c3   : > { %v5121_v45 = vmul.f32 %v7712_v14, %v11504_v48 }
 0x6c5   : > { %v5125_v40 = vpack.c.bf16 %v5121_v45, %v5120_v6 }
 0x6c7   : > { %7034 = vmatmul.mubr.bf16.gmra.mxu1 %v5125_v40 }
 0x756   : > { %v7031_v42 = vpop.f32.mrf.mxu1 }
 0x757   : > { %5927 = vst.msk [vmem:[%s9903_s20 + $0x10] sm:$0xff] %vm5924_vm6, %v7031_v42 }
 0x758   : > { %v5893_v13 = vpop.f32.mrf.mxu1 }
 0x759   : > { %5925 = vst.msk [vmem:[%s9903_s20] sm:$0xff] %vm5924_vm6, %v5893_v13 }
 0x75a   : > { %v7032_v38 = vpop.f32.mrf.mxu1 }
 0x75b   : > { %5928 = vst.msk [vmem:[%s9903_s20 + $0x18] sm:$0xff] %vm5924_vm6, %v7032_v38 }
 0x75c   : > { %v5896_v19 = vpop.f32.mrf.mxu1 }
 0x75d   : > { %5926 = vst.msk [vmem:[%s9903_s20 + $0x8] sm:$0xff] %vm5924_vm6, %v5896_v19 }
 0x787   : > { %v7035_v61 = vpop.f32.mrf.mxu1 }
 0x788   : > { %5931 = vst.msk [vmem:[%s9903_s20 + $0x30] sm:$0xff] %vm5924_vm6, %v7035_v61 }
 0x789   : > { %v5909_v48 = vpop.f32.mrf.mxu1 }
 0x78a   : > { %5929 = vst.msk [vmem:[%s9903_s20 + $0x20] sm:$0xff] %vm5924_vm6, %v5909_v48 }
 0x78b   : > { %v7036_v55 = vpop.f32.mrf.mxu1 }
 0x78c   : > { %5932 = vst.msk [vmem:[%s9903_s20 + $0x38] sm:$0xff] %vm5924_vm6, %v7036_v55 }
 0x78d   : > { %v5912_v30 = vpop.f32.mrf.mxu1 }
 0x78e   : > { %5930 = vst.msk [vmem:[%s9903_s20 + $0x28] sm:$0xff] %vm5924_vm6, %v5912_v30 }
 0x78f PF: > { %s27_s21 = sadd.s32 1, %s7719_s21  }
 0x790   : > { %p24_p7 = scmp.ge.s32.totalorder %s27_s21, 4  }
 0x792   :  { %26 = sbr.rel (!%p24_p7) target bundleno = 2 (0x2), region = 144 }

// kernel: custom-call.16
= control target key start
LH: loop header
LB: loop body
LE: loop exit
PB: predicated region body
PF: predicated region fallthrough
CT: control target
= control target key end

     0   :  { %s664_s9 = smov 0   ;;  %s666_s10 = smov 0   ;;  %s810_s0 = inlined_call_operand.vmem [shape: f32[2,3,3], index: 0, kind: input, shape index: {}]   ;;  %s811_s1 = inlined_call_operand.vmem [shape: f32[2,3,3], index: 1, kind: output, shape index: {0}]   ;;  %s812_s2 = inlined_call_operand.vmem [shape: f32[2,3], index: 2, kind: output, shape index: {1}]  }
   0x1   :  { %s668_s11 = smov 0   ;;  %s670_s12 = smov 0  }
   0x2   :  { %s672_s13 = smov 0  }
   0x3 LB: > { %s28_s14 = sadd.s32 1, %s637_s12  ;;  %s519_s15 = sadd.s32 4294967295, %s641_s13   ;;  %s641_s13 = sphi %s672_s13, %s9_s13   ;;  %s637_s12 = sphi %s670_s12, %s819_s12   ;;  %s633_s11 = sphi %s668_s11, %s818_s11   ;;  %s629_s10 = sphi %s666_s10, %s817_s10   ;;  %s625_s9 = sphi %s664_s9, %s816_s9  }
   0x4   : > { %p30_p0 = scmp.ge.s32.totalorder %s28_s14, 2  ;;  %s33_s16 = ssub.s32 0, %s637_s12 }
   0x5   : > { %s521_s17 = smin.u32 %s637_s12, %s33_s16  ;;  %p57_p1 = scmp.ne.s32.totalorder %s629_s10, %s625_s9 }
   0x6   : > { %s821_s14 = smov (%p30_p0, %s28_s14), 0  ;;  %s35_s18 = sshrl.u32 %s521_s17, 3 }
   0x7   : > { %s39_s19 = ssub.s32 0, %s821_s14  ;;  %p58_p2 = scmp.eq.s32.totalorder %s519_s15, 1 }
   0x8   : > { %s522_s20 = smin.u32 %s39_s19, %s821_s14  ;;  %s47_s24 = sadd.s32 1, %s629_s10 }
   0x9   : > { %s41_s21 = sshrl.u32 %s522_s20, 3  ;;  %p699_p3 = por %p58_p2, %p57_p1 }
   0xa   : > { %s44_s23 = ssub.s32 %s35_s18, %s41_s21  ;;  %p524_p5 = scmp.ge.s32.totalorder %s641_s13, 2 }
   0xb   : > { %p45_p4 = scmp.eq.s32.totalorder %s44_s23, 0  ;;  %s82_s26 = sand.u32 (!%p524_p5), 1, %s641_s13  }
   0xc   : > { %80 = sbr.rel (%p524_p5) target bundleno = 19 (0x13), region = 16  ;;  %s526_s27 = sshll.u32 (!%p524_p5), %s637_s12, 2 }
   0xd   : > { %s705_s25 = scalar_select %p45_p4, %s629_s10, %s47_s24  }
   0xe   : > { %s525_s28 = sshll.u32 (!%p524_p5), %s82_s26, 2  ;;  %s88_s3 = scalar_lea.vmem (!%p524_p5), %s810_s0, %s526_s27 }
   0xf   : > { %s84_s4 = scalar_lea.vmem (!%p524_p5), [#allocation1], %s525_s28 }
  0x11   : > { %v105_v0 = vld [vmem:[%s88_s3] sm:$0xf] }
  0x12   : > { %106 = vst [vmem:[%s84_s4] sm:$0xf] %v105_v0 }
  0x13 PF: > { %p527_p6 = scmp.ge.s32.totalorder %s641_s13, 1  ;;  %p123_p7 = scmp.lt.s32.totalorder %s641_s13, 3 }
  0x15   : > { %p124_p8 = pnand %p527_p6, %p123_p7 }
  0x17   : > { %127 = sbr.rel (%p124_p8) target bundleno = 352 (0x160), region = 50 }
  0x1c   : > { %s134_s5 = sand.u32 1, %s519_s15   ;;  %s144_s6 = sand.u32 1, %s625_s9   ;;  %v647_v2 = vmov 0.0  }
  0x1d   : > { %s528_s7 = sshll.u32 %s134_s5, 2  ;;  %s716_s8 = sshll.u32 %s144_s6, 1 }
  0x1e   : > { %s136_s16 = scalar_lea.vmem [#allocation1], %s528_s7  ;;  %s158_s17 = sand.u32 7, %s633_s11  }
  0x1f   : > { %v150_v1 = vld [vmem:[%s136_s16] sm:$0xf]  ;;  %s719_s18 = scalar_lea.vmem [#allocation4], %s158_s17  ;;  %s722_s19 = scalar_lea.vmem [#allocation3], %s528_s7 }
  0x20   : > { %151 = vst [vmem:[#allocation0] sm:$0xf] %v150_v1  ;;  %162 = vst [vmem:[%s719_s18] sm:$0x1] %v647_v2  ;;  %s146_s15 = scalar_lea.vmem [#allocation5], %s716_s8  ;;  %s725_s20 = smov 0  }
  0x27   : > { %v160_v3 = vld [vmem:[#allocation0] sm:$0xff] }
  0x28   : > { %161 = vst [vmem:[#allocation2] sm:$0xff] %v160_v3 }
  0x29 LB: >> { %v170_v4 = vlaneseq  ;;  %v734_v6 = vstv %s645_s20  ;;  %s197_s9 = scalar_lea.vmem [#allocation2], %s645_s20  ;;  %s233_s21 = smov [#allocation2]  ;;  %v648_v60 = vmov 1.0   ;;  %v268_v61 = vld [vmem:[%s719_s18] ss:$0 sm:$0xff]  ;;  %s645_s20 = sphi %s725_s20, %s168_s20  }
  0x2a   : >> { %s255_s23 = scalar_lea.vmem [#allocation6], %s645_s20  ;;  %s271_s24 = smov [#allocation2] }
  0x2b   : >> { %v731_v5 = vshrl.u32 %v170_v4, 7  ;;  %v249_v49 = vand.u32 127, %v170_v4  ;;  %s272_s26 = smov [#allocation6] }
  0x2d   : >> { %vm174_vm0 = vcmp.gt.s32.totalorder %v731_v5, %v734_v6  ;;  %vm175_vm1 = vcmp.lt.s32.totalorder %v731_v5, 3  ;;  %v236_v5 = vmov %v731_v5  ;;  %vm749_vm12 = vcmp.eq.s32.totalorder %v249_v49, %v734_v6 }
  0x2e   : >> { %vm176_vm2 = vmand %vm174_vm0, %vm175_vm1  ;;  %vm240_vm9 = vcmp.gt.s32.totalorder %v236_v5, %v734_v6  ;;  %vm241_vm10 = vcmp.lt.s32.totalorder %v236_v5, 3  ;;  %v275_v5 = vmov %v731_v5  ;;  %vm301_vm15 = vcmp.gt.s32.totalorder %v249_v49, %v734_v6 }
  0x2f   : >> { %v169_v7 = vld [vmem:[#allocation2] sm:$0xff]  ;;  %v198_v16 = vld [vmem:[%s197_s9] ss:$0 sm:$0xff]  ;;  %vm242_vm11 = vmand %vm240_vm9, %vm241_vm10  ;;  %vm280_vm13 = vcmp.lt.s32.totalorder %v275_v5, 3  ;;  %v292_v5 = vmov %v731_v5 }
  0x30   : >> { %v177_v8 = vsel %vm176_vm2, %v169_v7, 0.0  ;;  %v199_v17 = vand.u32 2147483647, %v198_v16  ;;  %vm224_vm8 = vcmp.lt.f32.partialorder %v198_v16, 0.0  ;;  %v237_v46 = vld [vmem:[%s233_s21] sm:$0xff]  ;;  %vm309_vm14 = vcmp.ge.s32.totalorder %v292_v5, %v734_v6 }
  0x31   : >> { %v178_v9 = vmul.f32 %v177_v8, %v177_v8  ;;  %v243_v50 = vsel %vm242_vm11, %v237_v46, 0.0  ;;  %v278_v0 = vld [vmem:[%s271_s24] sm:$0xff]  ;;  %s288_s24 = smov %s271_s24  ;;  %vm310_vm0 = vmand %vm749_vm12, %vm309_vm14 }
  0x32   : >> { %v200_v22 = vmax.f32 %v199_v17, 0.0  ;;  %s313_s27 = scalar_lea.vmem %s288_s24, %s645_s20  ;;  %s168_s20 = sadd.s32 1, %s645_s20  }
  0x33   : >> { %v179_v10 = vrot.slane %v178_v9, 4  ;;  %p165_p9 = scmp.ge.s32.totalorder %s168_s20, 3  }
  0x34   : > { %s534_s28 = sshll.u32 (%p165_p9), %s633_s11, 2 }
  0x35   : >> { %v180_v11 = vadd.f32 %v179_v10, %v178_v9  ;;  %s348_s3 = scalar_lea.vmem (%p165_p9), %s811_s1, %s534_s28 }
  0x37   : >> { %v181_v12 = vrot.slane %v180_v11, 2 }
  0x39   : >> { %v182_v13 = vadd.f32 %v181_v12, %v180_v11 }
  0x3b   : >> { %v183_v14 = vrot.slane %v182_v13, 1 }
  0x3d   : >> { %v184_v15 = vadd.f32 %v183_v14, %v182_v13  ;;  %v299_v14 = vld [vmem:[%s288_s24] sm:$0xff] }
  0x3f   : >> { %589 = vrsqrt.f32 %v184_v15  ;;  %vm187_vm3 = vcmp.eq.f32.partialorder %v184_v15, inf  ;;  %v190_v19 = vand.u32 2147483648, %v184_v15  ;;  %vm189_vm4 = vcmp.eq.f32.partialorder %v184_v15, 0.0 }
  0x4c   : >> { %v590_v18 = vpop.eup %589 }
  0x4d   : >> { %v186_v20 = vmul.f32 %v590_v18, %v184_v15 }
  0x4f   : >> { %v188_v21 = vsel %vm187_vm3, %v184_v15, %v186_v20 }
  0x50   : >> { %v191_v23 = vsel %vm189_vm4, %v190_v19, %v188_v21 }
  0x51   : >> { %v201_v24 = vand.u32 2147483647, %v191_v23 }
  0x53   : >> { %v202_v25 = vmax.f32 %v200_v22, %v201_v24 }
  0x55   : >> { %591 = vrcp.f32 %v202_v25  ;;  %vm214_vm7 = vcmp.eq.f32.partialorder %v202_v25, 0.0 }
  0x62   : >> { %v592_v26 = vpop.eup %591 }
  0x63   : >> { %v204_v27 = vmul.f32 %v592_v26, %v199_v17  ;;  %v207_v28 = vmul.f32 0.0, %v592_v26  ;;  %v211_v29 = vmul.f32 %v592_v26, %v201_v24 }
  0x65   : >> { %v205_v30 = vmul.f32 %v204_v27, %v204_v27  ;;  %v208_v31 = vmul.f32 %v207_v28, %v207_v28  ;;  %v212_v32 = vmul.f32 %v211_v29, %v211_v29 }
  0x67   : >> { %v209_v33 = vadd.f32 %v208_v31, %v205_v30 }
  0x69   : >> { %v213_v34 = vadd.f32 %v212_v32, %v209_v33 }
  0x6b   : >> { %593 = vrsqrt.f32 %v213_v34  ;;  %vm217_vm5 = vcmp.eq.f32.partialorder %v213_v34, inf  ;;  %v220_v36 = vand.u32 2147483648, %v213_v34  ;;  %vm219_vm6 = vcmp.eq.f32.partialorder %v213_v34, 0.0 }
  0x78   : >> { %v594_v35 = vpop.eup %593 }
  0x79   : >> { %v216_v37 = vmul.f32 %v594_v35, %v213_v34 }
  0x7b   : >> { %v218_v38 = vsel %vm217_vm5, %v213_v34, %v216_v37 }
  0x7c   : >> { %v221_v39 = vsel %vm219_vm6, %v220_v36, %v218_v38 }
  0x7d   : >> { %v222_v40 = vmul.f32 %v221_v39, %v202_v25 }
  0x7f   : >> { %v223_v41 = vsel %vm214_vm7, 0.0, %v222_v40 }
  0x80   : >> { %v225_v42 = vxor.u32 2147483648, %v223_v41 }
  0x82   : >> { %v226_v43 = vsel %vm224_vm8, %v223_v41, %v225_v42 }
  0x83   : >> { %v742_v44 = vsel %vm189_vm4, %v198_v16, %v226_v43  ;;  %595 = vrcp.f32 %v226_v43  ;;  %v227_v47 = vsub.f32 %v226_v43, %v198_v16 }
  0x84   : >> { %v232_v45 = vsub.f32 %v198_v16, %v742_v44 }
  0x86   : >> { %597 = vrcp.f32 %v232_v45 }
  0x90   : >> { %v596_v48 = vpop.eup %595 }
  0x91   : >> { %v229_v51 = vmul.f32 %v596_v48, %v227_v47 }
  0x93   : >> { %v598_v52 = vpop.eup %597  ;;  %v231_v56 = vsel %vm189_vm4, 0.0, %v229_v51 }
  0x94   : >> { %v245_v53 = vmul.f32 %v598_v52, %v243_v50  ;;  %v261_v58 = vsel %vm749_vm12, %v231_v56, 0.0 }
  0x96   : >> { %v246_v55 = vsel %vm189_vm4, 0.0, %v245_v53 }
  0x97   : >> { %v251_v57 = vsel %vm749_vm12, %v246_v55, 0.0 }
  0x98   : >> { %252 = vadd.xlane.f32.xlu0 %v251_v57 }
  0x9c   : >> { %262 = vadd.xlane.f32.xlu0 %v261_v58 }
 0x121   : >> { %v253_v59 = vpop.xlane.xlu0 %252 }
 0x122   : >> { %254 = vst [vmem:[#allocation6] sm:$0xff] %v253_v59 }
 0x123   : >> { %256 = vst [vmem:[%s255_s23] sm:$0x1] %v648_v60 }
 0x125   : >> { %v263_v62 = vpop.xlane.xlu0 %262 }
 0x126   : >> { %v269_v63 = vsel %vm749_vm12, %v263_v62, %v268_v61 }
 0x127   : >> { %270 = vst [vmem:[%s719_s18] sm:$0x1] %v269_v63 }
 0x12a   : >> { %v277_v1 = vld [vmem:[%s272_s26] sm:$0xff]  ;;  %s289_s26 = smov %s272_s26 }
 0x12b   : >> { %v279_v2 = vmul.f32 %v278_v0, %v277_v1  ;;  %v297_v13 = vld [vmem:[%s289_s26] sm:$0xff] }
 0x12d   : >> { %v281_v3 = vsel %vm280_vm13, %v279_v2, 0.0 }
 0x12e   : >> { %v282_v4 = vrot.slane %v281_v3, 4  ;;  %v333_v6 = vld [vmem:[#allocation4] sm:$0x3] (%p165_p9) }
 0x12f   : > { %336 = vst [vmem:[%s146_s15] sm:$0x3] (%p165_p9), %v333_v6 }
 0x130   : >> { %v283_v7 = vadd.f32 %v282_v4, %v281_v3 }
 0x132   : >> { %v284_v8 = vrot.slane %v283_v7, 2 }
 0x134   : >> { %v285_v9 = vadd.f32 %v284_v8, %v283_v7 }
 0x136   : >> { %v286_v10 = vrot.slane %v285_v9, 1 }
 0x138   : >> { %v287_v11 = vadd.f32 %v286_v10, %v285_v9 }
 0x13a   : >> { %v293_v12 = vmul.f32 %v287_v11, %v263_v62 }
 0x13c   : >> { %v298_v15 = vmul.f32 %v297_v13, %v293_v12 }
 0x13e   : >> { %v302_v16 = vsub.f32 %v299_v14, %v298_v15 }
 0x140   : >> { %v303_v17 = vsel %vm301_vm15, %v302_v16, %v299_v14 }
 0x141   : >> { %v311_v18 = vsel %vm310_vm0, %v297_v13, %v303_v17 }
 0x142   : >> { %312 = vst [vmem:[%s288_s24] sm:$0xff] %v311_v18 }
 0x147   : > { %167 = sbr.rel (!%p165_p9) target bundleno = 41 (0x29), region = 167 }
 0x149   : >> { %v314_v19 = vld [vmem:[%s313_s27] ss:$0 sm:$0xff] }
 0x14a   : >> { %v319_v20 = vsel %vm749_vm12, %v742_v44, %v314_v19 }
 0x14b   : >> { %320 = vst [vmem:[%s313_s27] sm:$0x1] %v319_v20 }
 0x14c   : > { %p385_p10 = scmp.lt.s32.totalorder (%p699_p3), %s633_s11, 0  ;;  %s386_s4 = ssub.s32 (%p699_p3), 0, %s633_s11  ;;  %v409_v22 = vld [vmem:[%s146_s15] sm:$0x3] (%p699_p3) }
 0x14d   : > { %s535_s5 = smin.u32 (%p699_p3), %s633_s11, %s386_s4 }
 0x14e   : > { %s388_s6 = sshrl.u32 (%p699_p3), %s535_s5, 3 }
 0x14f   : > { %s389_s7 = ssub.s32 (%p699_p3), 0, %s388_s6 }
 0x152   : > { %v325_v5 = vld [vmem:[#allocation2] sm:$0xf] }
 0x153   : > { %328 = vst [vmem:[%s722_s19] sm:$0xf] %v325_v5 }
 0x157   : > { %384 = sbr.rel (!%p699_p3) target bundleno = 352 (0x160), region = 91 }
 0x15a   : > { %v365_v21 = vld [vmem:[%s722_s19] sm:$0xf] }
 0x15b   : > { %366 = vst [vmem:[%s348_s3] sm:$0xf] %v365_v21 }
 0x15c   : > { %s823_s7 = smov (!%p385_p10, %s389_s7), %s388_s6 }
 0x15d   : > { %s536_s16 = sshll.u32 %s823_s7, 1 }
 0x15e   : > { %s392_s19 = scalar_lea.vmem %s812_s2, %s536_s16 }
 0x15f   : > { %410 = vst [vmem:[%s392_s19] sm:$0x3] %v409_v22 }
 0x160 PF: > { %s9_s13 = sadd.s32 1, %s641_s13   ;;  %s816_s9 = smov %s629_s10 }
 0x161   : > { %p6_p11 = scmp.ge.s32.totalorder %s9_s13, 4   ;;  %s817_s10 = smov %s705_s25 }
 0x162   : > { %s818_s11 = smov %s637_s12  ;;  %s819_s12 = smov %s821_s14 }
 0x163   :  { %8 = sbr.rel (!%p6_p11) target bundleno = 3 (0x3), region = 178 }

// kernel: sub.72
= control target key start
LH: loop header
LB: loop body
LE: loop exit
PB: predicated region body
PF: predicated region fallthrough
CT: control target
= control target key end

     0   :  { %s34_s0 = inlined_call_operand.vmem [shape: f32[2,3], index: 0, kind: input, shape index: {}]   ;;  %s35_s1 = inlined_call_operand.vmem [shape: f32[2,3], index: 1, kind: input, shape index: {}]   ;;  %s36_s2 = inlined_call_operand.vmem [shape: f32[2,3], index: 2, kind: output, shape index: {}]  }
   0x1   :  { %v3_v0 = vld [vmem:[%s34_s0] sm:$0x7] }
   0x2   :  { %v4_v1 = vld [vmem:[%s35_s1] sm:$0x7] }
   0x3   :  { %v7_v2 = vsub.f32 %v3_v0, %v4_v1 }
   0x5   :  { %9 = vst [vmem:[%s36_s2] sm:$0xf] %v7_v2 }

</bundles_post_ra>
